<compile_context>
chip_gen: v7x
topology: tpu7x:2x2x1
jax: 0.10.0
libtpu: 0.0.40
codegen_flags: <defaults>
</compile_context>

<pallas_src>
import math
import numpy as np
import jax
import jax.numpy as jnp
from jax.experimental import pallas as pl
from jax.experimental.pallas import tpu as pltpu

# ----------------------------- model config ---------------------------------
BPE_SIZE = 64
H = 4
D_MODEL = 32
DK = D_MODEL // H
D_FF = 64
P_DROP = 0.1          # unused (eval mode)
N_LAYERS = 6
MAX_LEN = 512
LN_EPS = 1e-5
NEG_INF = -1e9


# --------------------------- in-kernel helpers -------------------------------
def _ln(x, g, b):
    """LayerNorm over last dim; x: (S, D), g/b: (1, D)."""
    mean = jnp.mean(x, axis=-1, keepdims=True)
    var = jnp.mean(jnp.square(x - mean), axis=-1, keepdims=True)
    return (x - mean) * jax.lax.rsqrt(var + LN_EPS) * g + b


def _mha_block(q, k, v, wo, bo, bias, compute_cov=False):
    """Multi-head attention, unrolled over heads (all VMEM-resident).

    q: (Sq, D), k/v: (Sk, D), wo: (D, D), bo: (1, D),
    bias: additive mask broadcastable to (Sq, Sk).
    Output projection is accumulated per head (no concat needed):
        out = sum_h (softmax(q_h k_h^T * s + bias) v_h) @ Wo[h*dk:(h+1)*dk, :]
    """
    Sq = q.shape[0]
    Sk = k.shape[0]
    scale = 1.0 / math.sqrt(DK)
    acc = jnp.zeros((Sq, D_MODEL), jnp.float32)
    cov = jnp.zeros((Sq, Sk), jnp.float32) if compute_cov else None
    for h in range(H):
        sl = slice(h * DK, (h + 1) * DK)
        qh = q[:, sl]
        kh = k[:, sl]
        vh = v[:, sl]
        s = jax.lax.dot_general(qh, kh, (((1,), (1,)), ((), ())),
                                preferred_element_type=jnp.float32) * scale + bias
        m = jnp.max(s, axis=-1, keepdims=True)
        e = jnp.exp(s - m)
        p = e * pl.reciprocal(jnp.sum(e, axis=-1, keepdims=True), approx=True)
        ctx_h = jnp.dot(p, vh, preferred_element_type=jnp.float32)        # (Sq, dk)
        acc = acc + jnp.dot(ctx_h, wo[sl, :], preferred_element_type=jnp.float32)
        if compute_cov:
            cov = cov + p
    out = acc + bo
    if compute_cov:
        return out, cov * (1.0 / H)
    return out, None


def _ffn(x, w1, b1, w2, b2):
    h = jnp.maximum(
        jnp.dot(x, w1, preferred_element_type=jnp.float32) + b1, 0.0)
    return jnp.dot(h, w2, preferred_element_type=jnp.float32) + b2


# ----------------------------- fused layer kernels ---------------------------
def encoder_layer_kernel(x_ref, sbias_ref,
                         wqkv_ref, bqkv_ref, wo_ref, bo_ref,
                         g1_ref, be1_ref,
                         w1_ref, b1_ref, w2_ref, b2_ref,
                         g2_ref, be2_ref,
                         o_ref):
    x = x_ref[0]                               # (S, D)
    sbias = sbias_ref[0]                       # (1, S) additive pad mask

    qkv = jnp.dot(x, wqkv_ref[...],
                  preferred_element_type=jnp.float32) + bqkv_ref[...]
    q = qkv[:, :D_MODEL]
    k = qkv[:, D_MODEL:2 * D_MODEL]
    v = qkv[:, 2 * D_MODEL:]

    a, _ = _mha_block(q, k, v, wo_ref[...], bo_ref[...], sbias)
    x = _ln(x + a, g1_ref[...], be1_ref[...])

    f = _ffn(x, w1_ref[...], b1_ref[...], w2_ref[...], b2_ref[...])
    x = _ln(x + f, g2_ref[...], be2_ref[...])

    o_ref[0] = x


def make_decoder_layer_kernel(emit_cov):
    def kernel(y_ref, ctx_ref, tbias_ref, sbias_ref,
               s_wqkv_ref, s_bqkv_ref, s_wo_ref, s_bo_ref, g1_ref, be1_ref,
               c_wq_ref, c_bq_ref, c_wkv_ref, c_bkv_ref, c_wo_ref, c_bo_ref,
               g2_ref, be2_ref,
               w1_ref, b1_ref, w2_ref, b2_ref, g3_ref, be3_ref,
               *out_refs):
        if emit_cov:
            y_out_ref, cov_ref = out_refs
        else:
            (y_out_ref,) = out_refs

        y = y_ref[0]                           # (St, D)
        ctx = ctx_ref[0]                       # (Ss, D)
        tbias = tbias_ref[0]                   # (St, St) causal + pad
        sbias = sbias_ref[0]                   # (1, Ss)  src pad

        # ---- masked self-attention ----
        qkv = jnp.dot(y, s_wqkv_ref[...],
                      preferred_element_type=jnp.float32) + s_bqkv_ref[...]
        q = qkv[:, :D_MODEL]
        k = qkv[:, D_MODEL:2 * D_MODEL]
        v = qkv[:, 2 * D_MODEL:]
        a, _ = _mha_block(q, k, v, s_wo_ref[...], s_bo_ref[...], tbias)
        y = _ln(y + a, g1_ref[...], be1_ref[...])

        # ---- cross-attention (coverage only on last layer) ----
        q = jnp.dot(y, c_wq_ref[...],
                    preferred_element_type=jnp.float32) + c_bq_ref[...]
        kv = jnp.dot(ctx, c_wkv_ref[...],
                     preferred_element_type=jnp.float32) + c_bkv_ref[...]
        k = kv[:, :D_MODEL]
        v = kv[:, D_MODEL:]
        c, cov = _mha_block(q, k, v, c_wo_ref[...], c_bo_ref[...], sbias,
                            compute_cov=emit_cov)
        y = _ln(y + c, g2_ref[...], be2_ref[...])

        # ---- feed forward ----
        f = _ffn(y, w1_ref[...], b1_ref[...], w2_ref[...], b2_ref[...])
        y = _ln(y + f, g3_ref[...], be3_ref[...])

        y_out_ref[0] = y
        if emit_cov:
            cov_ref[0] = cov

    return kernel


def generator_kernel(y_ref, emb_ref, o_ref):
    """Fused tied-embedding projection + log-softmax."""
    y = y_ref[...]                              # (M, D)
    w = emb_ref[...]                            # (V, D)
    logits = jax.lax.dot_general(y, w, (((1,), (1,)), ((), ())),
                                 preferred_element_type=jnp.float32)  # (M, V)
    m = jnp.max(logits, axis=-1, keepdims=True)
    lse = jnp.log(jnp.sum(jnp.exp(logits - m), axis=-1, keepdims=True)) + m
    o_ref[...] = logits - lse


# ----------------------------- pallas_call wrappers ---------------------------
def _w_spec(arr):
    """Full-array block, constant index_map -> weight stays VMEM-resident."""
    n = arr.ndim
    return pl.BlockSpec(arr.shape, lambda b, _n=n: (0,) * _n)


_PAR = pltpu.CompilerParams(dimension_semantics=("parallel",))


def encoder_layer_call(p, x, src_bias):
    B, S, D = x.shape
    weights = [p['wqkv'], p['bqkv'], p['wo'], p['bo'],
               p['g1'], p['be1'],
               p['w1'], p['b1'], p['w2'], p['b2'],
               p['g2'], p['be2']]
    in_specs = [pl.BlockSpec((1, S, D), lambda b: (b, 0, 0)),
                pl.BlockSpec((1, 1, S), lambda b: (b, 0, 0))]
    in_specs += [_w_spec(w) for w in weights]
    return pl.pallas_call(
        encoder_layer_kernel,
        out_shape=jax.ShapeDtypeStruct((B, S, D), jnp.float32),
        grid=(B,),
        in_specs=in_specs,
        out_specs=pl.BlockSpec((1, S, D), lambda b: (b, 0, 0)),
        compiler_params=_PAR,
    )(x, src_bias, *weights)


def decoder_layer_call(p, y, ctx, tgt_bias, src_bias, emit_cov):
    B, St, D = y.shape
    Ss = ctx.shape[1]
    weights = [p['s_wqkv'], p['s_bqkv'], p['s_wo'], p['s_bo'],
               p['g1'], p['be1'],
               p['c_wq'], p['c_bq'], p['c_wkv'], p['c_bkv'], p['c_wo'], p['c_bo'],
               p['g2'], p['be2'],
               p['w1'], p['b1'], p['w2'], p['b2'],
               p['g3'], p['be3']]
    in_specs = [pl.BlockSpec((1, St, D), lambda b: (b, 0, 0)),
                pl.BlockSpec((1, Ss, D), lambda b: (b, 0, 0)),
                pl.BlockSpec((1, St, St), lambda b: (b, 0, 0)),
                pl.BlockSpec((1, 1, Ss), lambda b: (b, 0, 0))]
    in_specs += [_w_spec(w) for w in weights]

    if emit_cov:
        out_shape = (jax.ShapeDtypeStruct((B, St, D), jnp.float32),
                     jax.ShapeDtypeStruct((B, St, Ss), jnp.float32))
        out_specs = (pl.BlockSpec((1, St, D), lambda b: (b, 0, 0)),
                     pl.BlockSpec((1, St, Ss), lambda b: (b, 0, 0)))
    else:
        out_shape = jax.ShapeDtypeStruct((B, St, D), jnp.float32)
        out_specs = pl.BlockSpec((1, St, D), lambda b: (b, 0, 0))

    return pl.pallas_call(
        make_decoder_layer_kernel(emit_cov),
        out_shape=out_shape,
        grid=(B,),
        in_specs=in_specs,
        out_specs=out_specs,
        compiler_params=_PAR,
    )(y, ctx, tgt_bias, src_bias, *weights)


def generator_call(y2d, emb):
    M, D = y2d.shape
    V = emb.shape[0]
    return pl.pallas_call(
        generator_kernel,
        out_shape=jax.ShapeDtypeStruct((M, V), jnp.float32),
        grid=(1,),
        in_specs=[pl.BlockSpec((M, D), lambda i: (0, 0)),
                  pl.BlockSpec((V, D), lambda i: (0, 0))],
        out_specs=pl.BlockSpec((M, V), lambda i: (0, 0)),
    )(y2d, emb)


# ----------------------------- model forward ----------------------------------
def transformer_forward(params, src, tgt):
    emb = params['emb']
    pe = params['pe']
    B, Ss = src.shape
    St = tgt.shape[1]
    scale_e = math.sqrt(D_MODEL)

    # additive masks, built once per forward and shared by all layers/heads
    src_bias = jnp.where(src == 0, NEG_INF, 0.0).astype(jnp.float32)[:, None, :]  # (B,1,Ss)
    tri = jnp.triu(jnp.ones((St, St), dtype=bool), k=1)
    mask_tgt = (tgt == 0)[:, None, :] | tri[None]                                 # (B,St,St)
    tgt_bias = jnp.where(mask_tgt, NEG_INF, 0.0).astype(jnp.float32)

    # ---- encode ----
    x = emb[src] * scale_e + pe[:Ss][None]
    for lp in params['encoder']:
        x = encoder_layer_call(lp, x, src_bias)
    context = x

    # ---- decode ----
    y = emb[tgt] * scale_e + pe[:St][None]
    coverage = None
    n_dec = len(params['decoder'])
    for idx, lp in enumerate(params['decoder']):
        if idx == n_dec - 1:
            y, coverage = decoder_layer_call(lp, y, context, tgt_bias, src_bias, True)
        else:
            y = decoder_layer_call(lp, y, context, tgt_bias, src_bias, False)

    # generator (tied to embedding, no bias) + log-softmax, fused
    out = generator_call(y.reshape(-1, D_MODEL), emb)
    return out, coverage


# ----------------------------- parameter init ---------------------------------
def init_params(key):
    keys = iter(jax.random.split(key, 1024))

    def dense(shape):
        bound = 1.0 / math.sqrt(shape[0])
        return jax.random.uniform(next(keys), shape, jnp.float32, -bound, bound)

    def zeros(shape):
        return jnp.zeros(shape, jnp.float32)

    def enc_layer():
        wq, wk, wv, wo = (dense((D_MODEL, D_MODEL)) for _ in range(4))
        return {
            'wqkv': jnp.concatenate([wq, wk, wv], axis=1),       # (D, 3D)
            'bqkv': zeros((1, 3 * D_MODEL)),
            'wo': wo, 'bo': zeros((1, D_MODEL)),
            'g1': jnp.ones((1, D_MODEL), jnp.float32), 'be1': zeros((1, D_MODEL)),
            'w1': dense((D_MODEL, D_FF)), 'b1': zeros((1, D_FF)),
            'w2': dense((D_FF, D_MODEL)), 'b2': zeros((1, D_MODEL)),
            'g2': jnp.ones((1, D_MODEL), jnp.float32), 'be2': zeros((1, D_MODEL)),
        }

    def dec_layer():
        s_wq, s_wk, s_wv, s_wo = (dense((D_MODEL, D_MODEL)) for _ in range(4))
        c_wq, c_wk, c_wv, c_wo = (dense((D_MODEL, D_MODEL)) for _ in range(4))
        return {
            's_wqkv': jnp.concatenate([s_wq, s_wk, s_wv], axis=1),
            's_bqkv': zeros((1, 3 * D_MODEL)),
            's_wo': s_wo, 's_bo': zeros((1, D_MODEL)),
            'g1': jnp.ones((1, D_MODEL), jnp.float32), 'be1': zeros((1, D_MODEL)),
            'c_wq': c_wq, 'c_bq': zeros((1, D_MODEL)),
            'c_wkv': jnp.concatenate([c_wk, c_wv], axis=1),       # (D, 2D)
            'c_bkv': zeros((1, 2 * D_MODEL)),
            'c_wo': c_wo, 'c_bo': zeros((1, D_MODEL)),
            'g2': jnp.ones((1, D_MODEL), jnp.float32), 'be2': zeros((1, D_MODEL)),
            'w1': dense((D_MODEL, D_FF)), 'b1': zeros((1, D_FF)),
            'w2': dense((D_FF, D_MODEL)), 'b2': zeros((1, D_MODEL)),
            'g3': jnp.ones((1, D_MODEL), jnp.float32), 'be3': zeros((1, D_MODEL)),
        }

    emb = jax.random.normal(next(keys), (BPE_SIZE, D_MODEL), jnp.float32) * 0.02
    emb = emb.at[0].set(0.0)   # padding_idx=0

    # sinusoidal positional encoding table
    pos = np.arange(MAX_LEN)[:, None].astype(np.float32)
    i = np.arange(D_MODEL)[None, :].astype(np.float32)
    angle = pos / np.power(10000.0, (2.0 * np.floor(i / 2.0)) / D_MODEL)
    pe = np.where((np.arange(D_MODEL) % 2) == 0, np.sin(angle), np.cos(angle))
    pe = jnp.asarray(pe, jnp.float32)

    return {'emb': emb, 'pe': pe,
            'encoder': [enc_layer() for _ in range(N_LAYERS)],
            'decoder': [dec_layer() for _ in range(N_LAYERS)]}


# ----------------------------- main --------------------------------------------
if __name__ == "__main__":
    B, LEN_SRC, LEN_TGT = 2, 8, 8
    key = jax.random.PRNGKey(0)
    k_param, k_src, k_tgt = jax.random.split(key, 3)

    params = init_params(k_param)

    src = jax.random.randint(k_src, (B, LEN_SRC), 1, BPE_SIZE, dtype=jnp.int32)
    tgt = jax.random.randint(k_tgt, (B, LEN_TGT), 1, BPE_SIZE, dtype=jnp.int32)
    # add some padding tokens to exercise the masks
    src = src.at[0, -2:].set(0)
    tgt = tgt.at[1, -1].set(0)

    fwd = jax.jit(transformer_forward)
    out, coverage = fwd(params, src, tgt)
    out = jax.block_until_ready(out)
    coverage = jax.block_until_ready(coverage)

    assert out.shape == (B * LEN_TGT, BPE_SIZE), out.shape
    assert coverage.shape == (B, LEN_TGT, LEN_SRC), coverage.shape
    assert bool(jnp.all(jnp.isfinite(out))) and bool(jnp.all(jnp.isfinite(coverage)))
    # log-softmax rows should sum (in prob space) to ~1
    assert bool(jnp.allclose(jnp.sum(jnp.exp(out), axis=-1), 1.0, atol=1e-4))

    print("KERNEL_OK")
</pallas_src>

<mosaic_0001>
module attributes {stable_mosaic.version = 11 : i64} {
  func.func @encoder_layer_kernel(%arg0: i32, %arg1: memref<1x8x32xf32, #tpu.memory_space<vmem>>, %arg2: memref<1x1x8xf32, #tpu.memory_space<vmem>>, %arg3: memref<32x96xf32, #tpu.memory_space<vmem>>, %arg4: memref<1x96xf32, #tpu.memory_space<vmem>>, %arg5: memref<32x32xf32, #tpu.memory_space<vmem>>, %arg6: memref<1x32xf32, #tpu.memory_space<vmem>>, %arg7: memref<1x32xf32, #tpu.memory_space<vmem>>, %arg8: memref<1x32xf32, #tpu.memory_space<vmem>>, %arg9: memref<32x64xf32, #tpu.memory_space<vmem>>, %arg10: memref<1x64xf32, #tpu.memory_space<vmem>>, %arg11: memref<64x32xf32, #tpu.memory_space<vmem>>, %arg12: memref<1x32xf32, #tpu.memory_space<vmem>>, %arg13: memref<1x32xf32, #tpu.memory_space<vmem>>, %arg14: memref<1x32xf32, #tpu.memory_space<vmem>>, %arg15: memref<1x8x32xf32, #tpu.memory_space<vmem>>) attributes {dimension_semantics = [#tpu.dimension_semantics<parallel>], iteration_bounds = array<i64: 2>, scalar_prefetch = 0 : i64, scratch_operands = 0 : i64, tpu.core_type = #tpu.core_type<tc>, window_params = [{transform_indices = @transform_0, window_bounds = array<i64: 1, 8, 32>}, {transform_indices = @transform_1, window_bounds = array<i64: 1, 1, 8>}, {pipeline_mode = #tpu.pipeline_mode<synchronous>, transform_indices = @transform_2, window_bounds = array<i64: 32, 96>}, {pipeline_mode = #tpu.pipeline_mode<synchronous>, transform_indices = @transform_3, window_bounds = array<i64: 1, 96>}, {pipeline_mode = #tpu.pipeline_mode<synchronous>, transform_indices = @transform_4, window_bounds = array<i64: 32, 32>}, {pipeline_mode = #tpu.pipeline_mode<synchronous>, transform_indices = @transform_5, window_bounds = array<i64: 1, 32>}, {pipeline_mode = #tpu.pipeline_mode<synchronous>, transform_indices = @transform_6, window_bounds = array<i64: 1, 32>}, {pipeline_mode = #tpu.pipeline_mode<synchronous>, transform_indices = @transform_7, window_bounds = array<i64: 1, 32>}, {pipeline_mode = #tpu.pipeline_mode<synchronous>, transform_indices = @transform_8, window_bounds = array<i64: 32, 64>}, {pipeline_mode = #tpu.pipeline_mode<synchronous>, transform_indices = @transform_9, window_bounds = array<i64: 1, 64>}, {pipeline_mode = #tpu.pipeline_mode<synchronous>, transform_indices = @transform_10, window_bounds = array<i64: 64, 32>}, {pipeline_mode = #tpu.pipeline_mode<synchronous>, transform_indices = @transform_11, window_bounds = array<i64: 1, 32>}, {pipeline_mode = #tpu.pipeline_mode<synchronous>, transform_indices = @transform_12, window_bounds = array<i64: 1, 32>}, {pipeline_mode = #tpu.pipeline_mode<synchronous>, transform_indices = @transform_13, window_bounds = array<i64: 1, 32>}, {transform_indices = @transform_14, window_bounds = array<i64: 1, 8, 32>}]} {
    %c0 = arith.constant 0 : index
    %c0_0 = arith.constant 0 : index
    %c0_1 = arith.constant 0 : index
    %0 = vector.load %arg1[%c0, %c0_0, %c0_1] : memref<1x8x32xf32, #tpu.memory_space<vmem>>, vector<1x8x32xf32>
    %1 = vector.shape_cast %0 : vector<1x8x32xf32> to vector<8x32xf32>
    %c0_2 = arith.constant 0 : index
    %c0_3 = arith.constant 0 : index
    %c0_4 = arith.constant 0 : index
    %2 = vector.load %arg2[%c0_2, %c0_3, %c0_4] : memref<1x1x8xf32, #tpu.memory_space<vmem>>, vector<1x1x8xf32>
    %3 = vector.shape_cast %2 : vector<1x1x8xf32> to vector<1x8xf32>
    %c0_5 = arith.constant 0 : index
    %c0_6 = arith.constant 0 : index
    %4 = vector.load %arg3[%c0_5, %c0_6] : memref<32x96xf32, #tpu.memory_space<vmem>>, vector<32x96xf32>
    %cst = arith.constant dense<0.000000e+00> : vector<8x96xf32>
    %5 = tpu.matmul %1, %4, %cst {dimension_numbers = #tpu.dot_dimension_numbers<[1], [0], [0], [1], [0, 0, 1, 1], [], []>} : vector<8x32xf32>, vector<32x96xf32>, vector<8x96xf32> -> vector<8x96xf32>
    %c0_7 = arith.constant 0 : index
    %c0_8 = arith.constant 0 : index
    %6 = vector.load %arg4[%c0_7, %c0_8] : memref<1x96xf32, #tpu.memory_space<vmem>>, vector<1x96xf32>
    %7 = vector.broadcast %6 : vector<1x96xf32> to vector<8x96xf32>
    %8 = arith.addf %5, %7 : vector<8x96xf32>
    %9 = vector.extract_strided_slice %8 {offsets = [0, 0], sizes = [8, 32], strides = [1, 1]} : vector<8x96xf32> to vector<8x32xf32>
    %10 = vector.extract_strided_slice %8 {offsets = [0, 32], sizes = [8, 32], strides = [1, 1]} : vector<8x96xf32> to vector<8x32xf32>
    %11 = vector.extract_strided_slice %8 {offsets = [0, 64], sizes = [8, 32], strides = [1, 1]} : vector<8x96xf32> to vector<8x32xf32>
    %c0_9 = arith.constant 0 : index
    %c0_10 = arith.constant 0 : index
    %12 = vector.load %arg5[%c0_9, %c0_10] : memref<32x32xf32, #tpu.memory_space<vmem>>, vector<32x32xf32>
    %c0_11 = arith.constant 0 : index
    %c0_12 = arith.constant 0 : index
    %13 = vector.load %arg6[%c0_11, %c0_12] : memref<1x32xf32, #tpu.memory_space<vmem>>, vector<1x32xf32>
    %cst_13 = arith.constant 0.000000e+00 : f32
    %14 = vector.broadcast %cst_13 : f32 to vector<8x32xf32>
    %15 = vector.extract_strided_slice %9 {offsets = [0, 0], sizes = [8, 8], strides = [1, 1]} : vector<8x32xf32> to vector<8x8xf32>
    %16 = vector.extract_strided_slice %10 {offsets = [0, 0], sizes = [8, 8], strides = [1, 1]} : vector<8x32xf32> to vector<8x8xf32>
    %17 = vector.extract_strided_slice %11 {offsets = [0, 0], sizes = [8, 8], strides = [1, 1]} : vector<8x32xf32> to vector<8x8xf32>
    %cst_14 = arith.constant dense<0.000000e+00> : vector<8x8xf32>
    %18 = tpu.matmul %15, %16, %cst_14 {dimension_numbers = #tpu.dot_dimension_numbers<[1], [1], [0], [0], [0, 0, 1, 0], [], []>} : vector<8x8xf32>, vector<8x8xf32>, vector<8x8xf32> -> vector<8x8xf32>
    %cst_15 = arith.constant 0.353553385 : f32
    %19 = vector.broadcast %cst_15 : f32 to vector<8x8xf32>
    %20 = arith.mulf %18, %19 : vector<8x8xf32>
    %21 = vector.broadcast %3 : vector<1x8xf32> to vector<8x8xf32>
    %22 = arith.addf %20, %21 : vector<8x8xf32>
    %cst_16 = arith.constant dense<0xFF800000> : vector<8xf32>
    %23 = vector.multi_reduction <maximumf>, %22, %cst_16 [1] : vector<8x8xf32> to vector<8xf32>
    %24 = vector.shape_cast %23 : vector<8xf32> to vector<8x1xf32>
    %25 = vector.broadcast %24 : vector<8x1xf32> to vector<8x8xf32>
    %26 = arith.subf %22, %25 : vector<8x8xf32>
    %27 = math.exp %26 : vector<8x8xf32>
    %cst_17 = arith.constant dense<0.000000e+00> : vector<8xf32>
    %28 = vector.multi_reduction <add>, %27, %cst_17 [1] : vector<8x8xf32> to vector<8xf32>
    %29 = vector.shape_cast %28 : vector<8xf32> to vector<8x1xf32>
    %30 = tpu.reciprocal %29 {approx = true} : vector<8x1xf32> -> vector<8x1xf32>
    %31 = vector.broadcast %30 : vector<8x1xf32> to vector<8x8xf32>
    %32 = arith.mulf %27, %31 : vector<8x8xf32>
    %cst_18 = arith.constant dense<0.000000e+00> : vector<8x8xf32>
    %33 = tpu.matmul %32, %17, %cst_18 {dimension_numbers = #tpu.dot_dimension_numbers<[1], [0], [0], [1], [0, 0, 1, 1], [], []>} : vector<8x8xf32>, vector<8x8xf32>, vector<8x8xf32> -> vector<8x8xf32>
    %34 = vector.extract_strided_slice %12 {offsets = [0, 0], sizes = [8, 32], strides = [1, 1]} : vector<32x32xf32> to vector<8x32xf32>
    %cst_19 = arith.constant dense<0.000000e+00> : vector<8x32xf32>
    %35 = tpu.matmul %33, %34, %cst_19 {dimension_numbers = #tpu.dot_dimension_numbers<[1], [0], [0], [1], [0, 0, 1, 1], [], []>} : vector<8x8xf32>, vector<8x32xf32>, vector<8x32xf32> -> vector<8x32xf32>
    %36 = arith.addf %14, %35 : vector<8x32xf32>
    %37 = vector.extract_strided_slice %9 {offsets = [0, 8], sizes = [8, 8], strides = [1, 1]} : vector<8x32xf32> to vector<8x8xf32>
    %38 = vector.extract_strided_slice %10 {offsets = [0, 8], sizes = [8, 8], strides = [1, 1]} : vector<8x32xf32> to vector<8x8xf32>
    %39 = vector.extract_strided_slice %11 {offsets = [0, 8], sizes = [8, 8], strides = [1, 1]} : vector<8x32xf32> to vector<8x8xf32>
    %cst_20 = arith.constant dense<0.000000e+00> : vector<8x8xf32>
    %40 = tpu.matmul %37, %38, %cst_20 {dimension_numbers = #tpu.dot_dimension_numbers<[1], [1], [0], [0], [0, 0, 1, 0], [], []>} : vector<8x8xf32>, vector<8x8xf32>, vector<8x8xf32> -> vector<8x8xf32>
    %cst_21 = arith.constant 0.353553385 : f32
    %41 = vector.broadcast %cst_21 : f32 to vector<8x8xf32>
    %42 = arith.mulf %40, %41 : vector<8x8xf32>
    %43 = vector.broadcast %3 : vector<1x8xf32> to vector<8x8xf32>
    %44 = arith.addf %42, %43 : vector<8x8xf32>
    %cst_22 = arith.constant dense<0xFF800000> : vector<8xf32>
    %45 = vector.multi_reduction <maximumf>, %44, %cst_22 [1] : vector<8x8xf32> to vector<8xf32>
    %46 = vector.shape_cast %45 : vector<8xf32> to vector<8x1xf32>
    %47 = vector.broadcast %46 : vector<8x1xf32> to vector<8x8xf32>
    %48 = arith.subf %44, %47 : vector<8x8xf32>
    %49 = math.exp %48 : vector<8x8xf32>
    %cst_23 = arith.constant dense<0.000000e+00> : vector<8xf32>
    %50 = vector.multi_reduction <add>, %49, %cst_23 [1] : vector<8x8xf32> to vector<8xf32>
    %51 = vector.shape_cast %50 : vector<8xf32> to vector<8x1xf32>
    %52 = tpu.reciprocal %51 {approx = true} : vector<8x1xf32> -> vector<8x1xf32>
    %53 = vector.broadcast %52 : vector<8x1xf32> to vector<8x8xf32>
    %54 = arith.mulf %49, %53 : vector<8x8xf32>
    %cst_24 = arith.constant dense<0.000000e+00> : vector<8x8xf32>
    %55 = tpu.matmul %54, %39, %cst_24 {dimension_numbers = #tpu.dot_dimension_numbers<[1], [0], [0], [1], [0, 0, 1, 1], [], []>} : vector<8x8xf32>, vector<8x8xf32>, vector<8x8xf32> -> vector<8x8xf32>
    %56 = vector.extract_strided_slice %12 {offsets = [8, 0], sizes = [8, 32], strides = [1, 1]} : vector<32x32xf32> to vector<8x32xf32>
    %cst_25 = arith.constant dense<0.000000e+00> : vector<8x32xf32>
    %57 = tpu.matmul %55, %56, %cst_25 {dimension_numbers = #tpu.dot_dimension_numbers<[1], [0], [0], [1], [0, 0, 1, 1], [], []>} : vector<8x8xf32>, vector<8x32xf32>, vector<8x32xf32> -> vector<8x32xf32>
    %58 = arith.addf %36, %57 : vector<8x32xf32>
    %59 = vector.extract_strided_slice %9 {offsets = [0, 16], sizes = [8, 8], strides = [1, 1]} : vector<8x32xf32> to vector<8x8xf32>
    %60 = vector.extract_strided_slice %10 {offsets = [0, 16], sizes = [8, 8], strides = [1, 1]} : vector<8x32xf32> to vector<8x8xf32>
    %61 = vector.extract_strided_slice %11 {offsets = [0, 16], sizes = [8, 8], strides = [1, 1]} : vector<8x32xf32> to vector<8x8xf32>
    %cst_26 = arith.constant dense<0.000000e+00> : vector<8x8xf32>
    %62 = tpu.matmul %59, %60, %cst_26 {dimension_numbers = #tpu.dot_dimension_numbers<[1], [1], [0], [0], [0, 0, 1, 0], [], []>} : vector<8x8xf32>, vector<8x8xf32>, vector<8x8xf32> -> vector<8x8xf32>
    %cst_27 = arith.constant 0.353553385 : f32
    %63 = vector.broadcast %cst_27 : f32 to vector<8x8xf32>
    %64 = arith.mulf %62, %63 : vector<8x8xf32>
    %65 = vector.broadcast %3 : vector<1x8xf32> to vector<8x8xf32>
    %66 = arith.addf %64, %65 : vector<8x8xf32>
    %cst_28 = arith.constant dense<0xFF800000> : vector<8xf32>
    %67 = vector.multi_reduction <maximumf>, %66, %cst_28 [1] : vector<8x8xf32> to vector<8xf32>
    %68 = vector.shape_cast %67 : vector<8xf32> to vector<8x1xf32>
    %69 = vector.broadcast %68 : vector<8x1xf32> to vector<8x8xf32>
    %70 = arith.subf %66, %69 : vector<8x8xf32>
    %71 = math.exp %70 : vector<8x8xf32>
    %cst_29 = arith.constant dense<0.000000e+00> : vector<8xf32>
    %72 = vector.multi_reduction <add>, %71, %cst_29 [1] : vector<8x8xf32> to vector<8xf32>
    %73 = vector.shape_cast %72 : vector<8xf32> to vector<8x1xf32>
    %74 = tpu.reciprocal %73 {approx = true} : vector<8x1xf32> -> vector<8x1xf32>
    %75 = vector.broadcast %74 : vector<8x1xf32> to vector<8x8xf32>
    %76 = arith.mulf %71, %75 : vector<8x8xf32>
    %cst_30 = arith.constant dense<0.000000e+00> : vector<8x8xf32>
    %77 = tpu.matmul %76, %61, %cst_30 {dimension_numbers = #tpu.dot_dimension_numbers<[1], [0], [0], [1], [0, 0, 1, 1], [], []>} : vector<8x8xf32>, vector<8x8xf32>, vector<8x8xf32> -> vector<8x8xf32>
    %78 = vector.extract_strided_slice %12 {offsets = [16, 0], sizes = [8, 32], strides = [1, 1]} : vector<32x32xf32> to vector<8x32xf32>
    %cst_31 = arith.constant dense<0.000000e+00> : vector<8x32xf32>
    %79 = tpu.matmul %77, %78, %cst_31 {dimension_numbers = #tpu.dot_dimension_numbers<[1], [0], [0], [1], [0, 0, 1, 1], [], []>} : vector<8x8xf32>, vector<8x32xf32>, vector<8x32xf32> -> vector<8x32xf32>
    %80 = arith.addf %58, %79 : vector<8x32xf32>
    %81 = vector.extract_strided_slice %9 {offsets = [0, 24], sizes = [8, 8], strides = [1, 1]} : vector<8x32xf32> to vector<8x8xf32>
    %82 = vector.extract_strided_slice %10 {offsets = [0, 24], sizes = [8, 8], strides = [1, 1]} : vector<8x32xf32> to vector<8x8xf32>
    %83 = vector.extract_strided_slice %11 {offsets = [0, 24], sizes = [8, 8], strides = [1, 1]} : vector<8x32xf32> to vector<8x8xf32>
    %cst_32 = arith.constant dense<0.000000e+00> : vector<8x8xf32>
    %84 = tpu.matmul %81, %82, %cst_32 {dimension_numbers = #tpu.dot_dimension_numbers<[1], [1], [0], [0], [0, 0, 1, 0], [], []>} : vector<8x8xf32>, vector<8x8xf32>, vector<8x8xf32> -> vector<8x8xf32>
    %cst_33 = arith.constant 0.353553385 : f32
    %85 = vector.broadcast %cst_33 : f32 to vector<8x8xf32>
    %86 = arith.mulf %84, %85 : vector<8x8xf32>
    %87 = vector.broadcast %3 : vector<1x8xf32> to vector<8x8xf32>
    %88 = arith.addf %86, %87 : vector<8x8xf32>
    %cst_34 = arith.constant dense<0xFF800000> : vector<8xf32>
    %89 = vector.multi_reduction <maximumf>, %88, %cst_34 [1] : vector<8x8xf32> to vector<8xf32>
    %90 = vector.shape_cast %89 : vector<8xf32> to vector<8x1xf32>
    %91 = vector.broadcast %90 : vector<8x1xf32> to vector<8x8xf32>
    %92 = arith.subf %88, %91 : vector<8x8xf32>
    %93 = math.exp %92 : vector<8x8xf32>
    %cst_35 = arith.constant dense<0.000000e+00> : vector<8xf32>
    %94 = vector.multi_reduction <add>, %93, %cst_35 [1] : vector<8x8xf32> to vector<8xf32>
    %95 = vector.shape_cast %94 : vector<8xf32> to vector<8x1xf32>
    %96 = tpu.reciprocal %95 {approx = true} : vector<8x1xf32> -> vector<8x1xf32>
    %97 = vector.broadcast %96 : vector<8x1xf32> to vector<8x8xf32>
    %98 = arith.mulf %93, %97 : vector<8x8xf32>
    %cst_36 = arith.constant dense<0.000000e+00> : vector<8x8xf32>
    %99 = tpu.matmul %98, %83, %cst_36 {dimension_numbers = #tpu.dot_dimension_numbers<[1], [0], [0], [1], [0, 0, 1, 1], [], []>} : vector<8x8xf32>, vector<8x8xf32>, vector<8x8xf32> -> vector<8x8xf32>
    %100 = vector.extract_strided_slice %12 {offsets = [24, 0], sizes = [8, 32], strides = [1, 1]} : vector<32x32xf32> to vector<8x32xf32>
    %cst_37 = arith.constant dense<0.000000e+00> : vector<8x32xf32>
    %101 = tpu.matmul %99, %100, %cst_37 {dimension_numbers = #tpu.dot_dimension_numbers<[1], [0], [0], [1], [0, 0, 1, 1], [], []>} : vector<8x8xf32>, vector<8x32xf32>, vector<8x32xf32> -> vector<8x32xf32>
    %102 = arith.addf %80, %101 : vector<8x32xf32>
    %103 = vector.broadcast %13 : vector<1x32xf32> to vector<8x32xf32>
    %104 = arith.addf %102, %103 : vector<8x32xf32>
    %105 = arith.addf %1, %104 : vector<8x32xf32>
    %c0_38 = arith.constant 0 : index
    %c0_39 = arith.constant 0 : index
    %106 = vector.load %arg7[%c0_38, %c0_39] : memref<1x32xf32, #tpu.memory_space<vmem>>, vector<1x32xf32>
    %c0_40 = arith.constant 0 : index
    %c0_41 = arith.constant 0 : index
    %107 = vector.load %arg8[%c0_40, %c0_41] : memref<1x32xf32, #tpu.memory_space<vmem>>, vector<1x32xf32>
    %cst_42 = arith.constant dense<0.000000e+00> : vector<8xf32>
    %108 = vector.multi_reduction <add>, %105, %cst_42 [1] : vector<8x32xf32> to vector<8xf32>
    %109 = vector.shape_cast %108 : vector<8xf32> to vector<8x1xf32>
    %cst_43 = arith.constant 3.200000e+01 : f32
    %110 = vector.broadcast %cst_43 : f32 to vector<8x1xf32>
    %111 = arith.divf %109, %110 : vector<8x1xf32>
    %112 = vector.broadcast %111 : vector<8x1xf32> to vector<8x32xf32>
    %113 = arith.subf %105, %112 : vector<8x32xf32>
    %114 = arith.mulf %113, %113 : vector<8x32xf32>
    %cst_44 = arith.constant dense<0.000000e+00> : vector<8xf32>
    %115 = vector.multi_reduction <add>, %114, %cst_44 [1] : vector<8x32xf32> to vector<8xf32>
    %116 = vector.shape_cast %115 : vector<8xf32> to vector<8x1xf32>
    %cst_45 = arith.constant 3.200000e+01 : f32
    %117 = vector.broadcast %cst_45 : f32 to vector<8x1xf32>
    %118 = arith.divf %116, %117 : vector<8x1xf32>
    %119 = vector.broadcast %111 : vector<8x1xf32> to vector<8x32xf32>
    %120 = arith.subf %105, %119 : vector<8x32xf32>
    %cst_46 = arith.constant 9.99999974E-6 : f32
    %121 = vector.broadcast %cst_46 : f32 to vector<8x1xf32>
    %122 = arith.addf %118, %121 : vector<8x1xf32>
    %123 = math.rsqrt %122 : vector<8x1xf32>
    %124 = vector.broadcast %123 : vector<8x1xf32> to vector<8x32xf32>
    %125 = arith.mulf %120, %124 : vector<8x32xf32>
    %126 = vector.broadcast %106 : vector<1x32xf32> to vector<8x32xf32>
    %127 = arith.mulf %125, %126 : vector<8x32xf32>
    %128 = vector.broadcast %107 : vector<1x32xf32> to vector<8x32xf32>
    %129 = arith.addf %127, %128 : vector<8x32xf32>
    %c0_47 = arith.constant 0 : index
    %c0_48 = arith.constant 0 : index
    %130 = vector.load %arg9[%c0_47, %c0_48] : memref<32x64xf32, #tpu.memory_space<vmem>>, vector<32x64xf32>
    %c0_49 = arith.constant 0 : index
    %c0_50 = arith.constant 0 : index
    %131 = vector.load %arg10[%c0_49, %c0_50] : memref<1x64xf32, #tpu.memory_space<vmem>>, vector<1x64xf32>
    %c0_51 = arith.constant 0 : index
    %c0_52 = arith.constant 0 : index
    %132 = vector.load %arg11[%c0_51, %c0_52] : memref<64x32xf32, #tpu.memory_space<vmem>>, vector<64x32xf32>
    %c0_53 = arith.constant 0 : index
    %c0_54 = arith.constant 0 : index
    %133 = vector.load %arg12[%c0_53, %c0_54] : memref<1x32xf32, #tpu.memory_space<vmem>>, vector<1x32xf32>
    %cst_55 = arith.constant dense<0.000000e+00> : vector<8x64xf32>
    %134 = tpu.matmul %129, %130, %cst_55 {dimension_numbers = #tpu.dot_dimension_numbers<[1], [0], [0], [1], [0, 0, 1, 1], [], []>} : vector<8x32xf32>, vector<32x64xf32>, vector<8x64xf32> -> vector<8x64xf32>
    %135 = vector.broadcast %131 : vector<1x64xf32> to vector<8x64xf32>
    %136 = arith.addf %134, %135 : vector<8x64xf32>
    %cst_56 = arith.constant 0.000000e+00 : f32
    %137 = vector.broadcast %cst_56 : f32 to vector<8x64xf32>
    %138 = arith.maximumf %136, %137 : vector<8x64xf32>
    %cst_57 = arith.constant dense<0.000000e+00> : vector<8x32xf32>
    %139 = tpu.matmul %138, %132, %cst_57 {dimension_numbers = #tpu.dot_dimension_numbers<[1], [0], [0], [1], [0, 0, 1, 1], [], []>} : vector<8x64xf32>, vector<64x32xf32>, vector<8x32xf32> -> vector<8x32xf32>
    %140 = vector.broadcast %133 : vector<1x32xf32> to vector<8x32xf32>
    %141 = arith.addf %139, %140 : vector<8x32xf32>
    %142 = arith.addf %129, %141 : vector<8x32xf32>
    %c0_58 = arith.constant 0 : index
    %c0_59 = arith.constant 0 : index
    %143 = vector.load %arg13[%c0_58, %c0_59] : memref<1x32xf32, #tpu.memory_space<vmem>>, vector<1x32xf32>
    %c0_60 = arith.constant 0 : index
    %c0_61 = arith.constant 0 : index
    %144 = vector.load %arg14[%c0_60, %c0_61] : memref<1x32xf32, #tpu.memory_space<vmem>>, vector<1x32xf32>
    %cst_62 = arith.constant dense<0.000000e+00> : vector<8xf32>
    %145 = vector.multi_reduction <add>, %142, %cst_62 [1] : vector<8x32xf32> to vector<8xf32>
    %146 = vector.shape_cast %145 : vector<8xf32> to vector<8x1xf32>
    %cst_63 = arith.constant 3.200000e+01 : f32
    %147 = vector.broadcast %cst_63 : f32 to vector<8x1xf32>
    %148 = arith.divf %146, %147 : vector<8x1xf32>
    %149 = vector.broadcast %148 : vector<8x1xf32> to vector<8x32xf32>
    %150 = arith.subf %142, %149 : vector<8x32xf32>
    %151 = arith.mulf %150, %150 : vector<8x32xf32>
    %cst_64 = arith.constant dense<0.000000e+00> : vector<8xf32>
    %152 = vector.multi_reduction <add>, %151, %cst_64 [1] : vector<8x32xf32> to vector<8xf32>
    %153 = vector.shape_cast %152 : vector<8xf32> to vector<8x1xf32>
    %cst_65 = arith.constant 3.200000e+01 : f32
    %154 = vector.broadcast %cst_65 : f32 to vector<8x1xf32>
    %155 = arith.divf %153, %154 : vector<8x1xf32>
    %156 = vector.broadcast %148 : vector<8x1xf32> to vector<8x32xf32>
    %157 = arith.subf %142, %156 : vector<8x32xf32>
    %cst_66 = arith.constant 9.99999974E-6 : f32
    %158 = vector.broadcast %cst_66 : f32 to vector<8x1xf32>
    %159 = arith.addf %155, %158 : vector<8x1xf32>
    %160 = math.rsqrt %159 : vector<8x1xf32>
    %161 = vector.broadcast %160 : vector<8x1xf32> to vector<8x32xf32>
    %162 = arith.mulf %157, %161 : vector<8x32xf32>
    %163 = vector.broadcast %143 : vector<1x32xf32> to vector<8x32xf32>
    %164 = arith.mulf %162, %163 : vector<8x32xf32>
    %165 = vector.broadcast %144 : vector<1x32xf32> to vector<8x32xf32>
    %166 = arith.addf %164, %165 : vector<8x32xf32>
    %c0_67 = arith.constant 0 : index
    %c0_68 = arith.constant 0 : index
    %c0_69 = arith.constant 0 : index
    %167 = vector.load %arg15[%c0_67, %c0_68, %c0_69] : memref<1x8x32xf32, #tpu.memory_space<vmem>>, vector<1x8x32xf32>
    %168 = vector.shape_cast %167 : vector<1x8x32xf32> to vector<8x32xf32>
    %169 = vector.shape_cast %166 : vector<8x32xf32> to vector<1x8x32xf32>
    tpu.vector_store %arg15[%c0_67, %c0_68, %c0_69], %169 {strides = array<i32>} : memref<1x8x32xf32, #tpu.memory_space<vmem>>, vector<1x8x32xf32>,
    return
  }
  func.func @transform_0(%arg0: i32) -> (i32, i32, i32) {
    %c0_i32 = arith.constant 0 : i32
    %c0_i32_0 = arith.constant 0 : i32
    %c0_i32_1 = arith.constant 0 : i32
    return %arg0, %c0_i32, %c0_i32_0 : i32, i32, i32
  }
  func.func @transform_1(%arg0: i32) -> (i32, i32, i32) {
    %c0_i32 = arith.constant 0 : i32
    %c0_i32_0 = arith.constant 0 : i32
    %c0_i32_1 = arith.constant 0 : i32
    return %arg0, %c0_i32, %c0_i32_0 : i32, i32, i32
  }
  func.func @transform_2(%arg0: i32) -> (i32, i32) {
    %c0_i32 = arith.constant 0 : i32
    %c0_i32_0 = arith.constant 0 : i32
    %c0_i32_1 = arith.constant 0 : i32
    return %c0_i32, %c0_i32_0 : i32, i32
  }
  func.func @transform_3(%arg0: i32) -> (i32, i32) {
    %c0_i32 = arith.constant 0 : i32
    %c0_i32_0 = arith.constant 0 : i32
    %c0_i32_1 = arith.constant 0 : i32
    return %c0_i32, %c0_i32_0 : i32, i32
  }
  func.func @transform_4(%arg0: i32) -> (i32, i32) {
    %c0_i32 = arith.constant 0 : i32
    %c0_i32_0 = arith.constant 0 : i32
    %c0_i32_1 = arith.constant 0 : i32
    return %c0_i32, %c0_i32_0 : i32, i32
  }
  func.func @transform_5(%arg0: i32) -> (i32, i32) {
    %c0_i32 = arith.constant 0 : i32
    %c0_i32_0 = arith.constant 0 : i32
    %c0_i32_1 = arith.constant 0 : i32
    return %c0_i32, %c0_i32_0 : i32, i32
  }
  func.func @transform_6(%arg0: i32) -> (i32, i32) {
    %c0_i32 = arith.constant 0 : i32
    %c0_i32_0 = arith.constant 0 : i32
    %c0_i32_1 = arith.constant 0 : i32
    return %c0_i32, %c0_i32_0 : i32, i32
  }
  func.func @transform_7(%arg0: i32) -> (i32, i32) {
    %c0_i32 = arith.constant 0 : i32
    %c0_i32_0 = arith.constant 0 : i32
    %c0_i32_1 = arith.constant 0 : i32
    return %c0_i32, %c0_i32_0 : i32, i32
  }
  func.func @transform_8(%arg0: i32) -> (i32, i32) {
    %c0_i32 = arith.constant 0 : i32
    %c0_i32_0 = arith.constant 0 : i32
    %c0_i32_1 = arith.constant 0 : i32
    return %c0_i32, %c0_i32_0 : i32, i32
  }
  func.func @transform_9(%arg0: i32) -> (i32, i32) {
    %c0_i32 = arith.constant 0 : i32
    %c0_i32_0 = arith.constant 0 : i32
    %c0_i32_1 = arith.constant 0 : i32
    return %c0_i32, %c0_i32_0 : i32, i32
  }
  func.func @transform_10(%arg0: i32) -> (i32, i32) {
    %c0_i32 = arith.constant 0 : i32
    %c0_i32_0 = arith.constant 0 : i32
    %c0_i32_1 = arith.constant 0 : i32
    return %c0_i32, %c0_i32_0 : i32, i32
  }
  func.func @transform_11(%arg0: i32) -> (i32, i32) {
    %c0_i32 = arith.constant 0 : i32
    %c0_i32_0 = arith.constant 0 : i32
    %c0_i32_1 = arith.constant 0 : i32
    return %c0_i32, %c0_i32_0 : i32, i32
  }
  func.func @transform_12(%arg0: i32) -> (i32, i32) {
    %c0_i32 = arith.constant 0 : i32
    %c0_i32_0 = arith.constant 0 : i32
    %c0_i32_1 = arith.constant 0 : i32
    return %c0_i32, %c0_i32_0 : i32, i32
  }
  func.func @transform_13(%arg0: i32) -> (i32, i32) {
    %c0_i32 = arith.constant 0 : i32
    %c0_i32_0 = arith.constant 0 : i32
    %c0_i32_1 = arith.constant 0 : i32
    return %c0_i32, %c0_i32_0 : i32, i32
  }
  func.func @transform_14(%arg0: i32) -> (i32, i32, i32) {
    %c0_i32 = arith.constant 0 : i32
    %c0_i32_0 = arith.constant 0 : i32
    %c0_i32_1 = arith.constant 0 : i32
    return %arg0, %c0_i32, %c0_i32_0 : i32, i32, i32
  }
}

module attributes {stable_mosaic.version = 11 : i64} {
  func.func @kernel(%arg0: i32, %arg1: memref<1x8x32xf32, #tpu.memory_space<vmem>>, %arg2: memref<1x8x32xf32, #tpu.memory_space<vmem>>, %arg3: memref<1x8x8xf32, #tpu.memory_space<vmem>>, %arg4: memref<1x1x8xf32, #tpu.memory_space<vmem>>, %arg5: memref<32x96xf32, #tpu.memory_space<vmem>>, %arg6: memref<1x96xf32, #tpu.memory_space<vmem>>, %arg7: memref<32x32xf32, #tpu.memory_space<vmem>>, %arg8: memref<1x32xf32, #tpu.memory_space<vmem>>, %arg9: memref<1x32xf32, #tpu.memory_space<vmem>>, %arg10: memref<1x32xf32, #tpu.memory_space<vmem>>, %arg11: memref<32x32xf32, #tpu.memory_space<vmem>>, %arg12: memref<1x32xf32, #tpu.memory_space<vmem>>, %arg13: memref<32x64xf32, #tpu.memory_space<vmem>>, %arg14: memref<1x64xf32, #tpu.memory_space<vmem>>, %arg15: memref<32x32xf32, #tpu.memory_space<vmem>>, %arg16: memref<1x32xf32, #tpu.memory_space<vmem>>, %arg17: memref<1x32xf32, #tpu.memory_space<vmem>>, %arg18: memref<1x32xf32, #tpu.memory_space<vmem>>, %arg19: memref<32x64xf32, #tpu.memory_space<vmem>>, %arg20: memref<1x64xf32, #tpu.memory_space<vmem>>, %arg21: memref<64x32xf32, #tpu.memory_space<vmem>>, %arg22: memref<1x32xf32, #tpu.memory_space<vmem>>, %arg23: memref<1x32xf32, #tpu.memory_space<vmem>>, %arg24: memref<1x32xf32, #tpu.memory_space<vmem>>, %arg25: memref<1x8x32xf32, #tpu.memory_space<vmem>>) attributes {dimension_semantics = [#tpu.dimension_semantics<parallel>], iteration_bounds = array<i64: 2>, scalar_prefetch = 0 : i64, scratch_operands = 0 : i64, tpu.core_type = #tpu.core_type<tc>, window_params = [{transform_indices = @transform_0, window_bounds = array<i64: 1, 8, 32>}, {transform_indices = @transform_1, window_bounds = array<i64: 1, 8, 32>}, {transform_indices = @transform_2, window_bounds = array<i64: 1, 8, 8>}, {transform_indices = @transform_3, window_bounds = array<i64: 1, 1, 8>}, {pipeline_mode = #tpu.pipeline_mode<synchronous>, transform_indices = @transform_4, window_bounds = array<i64: 32, 96>}, {pipeline_mode = #tpu.pipeline_mode<synchronous>, transform_indices = @transform_5, window_bounds = array<i64: 1, 96>}, {pipeline_mode = #tpu.pipeline_mode<synchronous>, transform_indices = @transform_6, window_bounds = array<i64: 32, 32>}, {pipeline_mode = #tpu.pipeline_mode<synchronous>, transform_indices = @transform_7, window_bounds = array<i64: 1, 32>}, {pipeline_mode = #tpu.pipeline_mode<synchronous>, transform_indices = @transform_8, window_bounds = array<i64: 1, 32>}, {pipeline_mode = #tpu.pipeline_mode<synchronous>, transform_indices = @transform_9, window_bounds = array<i64: 1, 32>}, {pipeline_mode = #tpu.pipeline_mode<synchronous>, transform_indices = @transform_10, window_bounds = array<i64: 32, 32>}, {pipeline_mode = #tpu.pipeline_mode<synchronous>, transform_indices = @transform_11, window_bounds = array<i64: 1, 32>}, {pipeline_mode = #tpu.pipeline_mode<synchronous>, transform_indices = @transform_12, window_bounds = array<i64: 32, 64>}, {pipeline_mode = #tpu.pipeline_mode<synchronous>, transform_indices = @transform_13, window_bounds = array<i64: 1, 64>}, {pipeline_mode = #tpu.pipeline_mode<synchronous>, transform_indices = @transform_14, window_bounds = array<i64: 32, 32>}, {pipeline_mode = #tpu.pipeline_mode<synchronous>, transform_indices = @transform_15, window_bounds = array<i64: 1, 32>}, {pipeline_mode = #tpu.pipeline_mode<synchronous>, transform_indices = @transform_16, window_bounds = array<i64: 1, 32>}, {pipeline_mode = #tpu.pipeline_mode<synchronous>, transform_indices = @transform_17, window_bounds = array<i64: 1, 32>}, {pipeline_mode = #tpu.pipeline_mode<synchronous>, transform_indices = @transform_18, window_bounds = array<i64: 32, 64>}, {pipeline_mode = #tpu.pipeline_mode<synchronous>, transform_indices = @transform_19, window_bounds = array<i64: 1, 64>}, {pipeline_mode = #tpu.pipeline_mode<synchronous>, transform_indices = @transform_20, window_bounds = array<i64: 64, 32>}, {pipeline_mode = #tpu.pipeline_mode<synchronous>, transform_indices = @transform_21, window_bounds = array<i64: 1, 32>}, {pipeline_mode = #tpu.pipeline_mode<synchronous>, transform_indices = @transform_22, window_bounds = array<i64: 1, 32>}, {pipeline_mode = #tpu.pipeline_mode<synchronous>, transform_indices = @transform_23, window_bounds = array<i64: 1, 32>}, {transform_indices = @transform_24, window_bounds = array<i64: 1, 8, 32>}]} {
    %c0 = arith.constant 0 : index
    %c0_0 = arith.constant 0 : index
    %c0_1 = arith.constant 0 : index
    %0 = vector.load %arg1[%c0, %c0_0, %c0_1] : memref<1x8x32xf32, #tpu.memory_space<vmem>>, vector<1x8x32xf32>
    %1 = vector.shape_cast %0 : vector<1x8x32xf32> to vector<8x32xf32>
    %c0_2 = arith.constant 0 : index
    %c0_3 = arith.constant 0 : index
    %c0_4 = arith.constant 0 : index
    %2 = vector.load %arg2[%c0_2, %c0_3, %c0_4] : memref<1x8x32xf32, #tpu.memory_space<vmem>>, vector<1x8x32xf32>
    %3 = vector.shape_cast %2 : vector<1x8x32xf32> to vector<8x32xf32>
    %c0_5 = arith.constant 0 : index
    %c0_6 = arith.constant 0 : index
    %c0_7 = arith.constant 0 : index
    %4 = vector.load %arg3[%c0_5, %c0_6, %c0_7] : memref<1x8x8xf32, #tpu.memory_space<vmem>>, vector<1x8x8xf32>
    %5 = vector.shape_cast %4 : vector<1x8x8xf32> to vector<8x8xf32>
    %c0_8 = arith.constant 0 : index
    %c0_9 = arith.constant 0 : index
    %c0_10 = arith.constant 0 : index
    %6 = vector.load %arg4[%c0_8, %c0_9, %c0_10] : memref<1x1x8xf32, #tpu.memory_space<vmem>>, vector<1x1x8xf32>
    %7 = vector.shape_cast %6 : vector<1x1x8xf32> to vector<1x8xf32>
    %c0_11 = arith.constant 0 : index
    %c0_12 = arith.constant 0 : index
    %8 = vector.load %arg5[%c0_11, %c0_12] : memref<32x96xf32, #tpu.memory_space<vmem>>, vector<32x96xf32>
    %cst = arith.constant dense<0.000000e+00> : vector<8x96xf32>
    %9 = tpu.matmul %1, %8, %cst {dimension_numbers = #tpu.dot_dimension_numbers<[1], [0], [0], [1], [0, 0, 1, 1], [], []>} : vector<8x32xf32>, vector<32x96xf32>, vector<8x96xf32> -> vector<8x96xf32>
    %c0_13 = arith.constant 0 : index
    %c0_14 = arith.constant 0 : index
    %10 = vector.load %arg6[%c0_13, %c0_14] : memref<1x96xf32, #tpu.memory_space<vmem>>, vector<1x96xf32>
    %11 = vector.broadcast %10 : vector<1x96xf32> to vector<8x96xf32>
    %12 = arith.addf %9, %11 : vector<8x96xf32>
    %13 = vector.extract_strided_slice %12 {offsets = [0, 0], sizes = [8, 32], strides = [1, 1]} : vector<8x96xf32> to vector<8x32xf32>
    %14 = vector.extract_strided_slice %12 {offsets = [0, 32], sizes = [8, 32], strides = [1, 1]} : vector<8x96xf32> to vector<8x32xf32>
    %15 = vector.extract_strided_slice %12 {offsets = [0, 64], sizes = [8, 32], strides = [1, 1]} : vector<8x96xf32> to vector<8x32xf32>
    %c0_15 = arith.constant 0 : index
    %c0_16 = arith.constant 0 : index
    %16 = vector.load %arg7[%c0_15, %c0_16] : memref<32x32xf32, #tpu.memory_space<vmem>>, vector<32x32xf32>
    %c0_17 = arith.constant 0 : index
    %c0_18 = arith.constant 0 : index
    %17 = vector.load %arg8[%c0_17, %c0_18] : memref<1x32xf32, #tpu.memory_space<vmem>>, vector<1x32xf32>
    %cst_19 = arith.constant 0.000000e+00 : f32
    %18 = vector.broadcast %cst_19 : f32 to vector<8x32xf32>
    %19 = vector.extract_strided_slice %13 {offsets = [0, 0], sizes = [8, 8], strides = [1, 1]} : vector<8x32xf32> to vector<8x8xf32>
    %20 = vector.extract_strided_slice %14 {offsets = [0, 0], sizes = [8, 8], strides = [1, 1]} : vector<8x32xf32> to vector<8x8xf32>
    %21 = vector.extract_strided_slice %15 {offsets = [0, 0], sizes = [8, 8], strides = [1, 1]} : vector<8x32xf32> to vector<8x8xf32>
    %cst_20 = arith.constant dense<0.000000e+00> : vector<8x8xf32>
    %22 = tpu.matmul %19, %20, %cst_20 {dimension_numbers = #tpu.dot_dimension_numbers<[1], [1], [0], [0], [0, 0, 1, 0], [], []>} : vector<8x8xf32>, vector<8x8xf32>, vector<8x8xf32> -> vector<8x8xf32>
    %cst_21 = arith.constant 0.353553385 : f32
    %23 = vector.broadcast %cst_21 : f32 to vector<8x8xf32>
    %24 = arith.mulf %22, %23 : vector<8x8xf32>
    %25 = arith.addf %24, %5 : vector<8x8xf32>
    %cst_22 = arith.constant dense<0xFF800000> : vector<8xf32>
    %26 = vector.multi_reduction <maximumf>, %25, %cst_22 [1] : vector<8x8xf32> to vector<8xf32>
    %27 = vector.shape_cast %26 : vector<8xf32> to vector<8x1xf32>
    %28 = vector.broadcast %27 : vector<8x1xf32> to vector<8x8xf32>
    %29 = arith.subf %25, %28 : vector<8x8xf32>
    %30 = math.exp %29 : vector<8x8xf32>
    %cst_23 = arith.constant dense<0.000000e+00> : vector<8xf32>
    %31 = vector.multi_reduction <add>, %30, %cst_23 [1] : vector<8x8xf32> to vector<8xf32>
    %32 = vector.shape_cast %31 : vector<8xf32> to vector<8x1xf32>
    %33 = tpu.reciprocal %32 {approx = true} : vector<8x1xf32> -> vector<8x1xf32>
    %34 = vector.broadcast %33 : vector<8x1xf32> to vector<8x8xf32>
    %35 = arith.mulf %30, %34 : vector<8x8xf32>
    %cst_24 = arith.constant dense<0.000000e+00> : vector<8x8xf32>
    %36 = tpu.matmul %35, %21, %cst_24 {dimension_numbers = #tpu.dot_dimension_numbers<[1], [0], [0], [1], [0, 0, 1, 1], [], []>} : vector<8x8xf32>, vector<8x8xf32>, vector<8x8xf32> -> vector<8x8xf32>
    %37 = vector.extract_strided_slice %16 {offsets = [0, 0], sizes = [8, 32], strides = [1, 1]} : vector<32x32xf32> to vector<8x32xf32>
    %cst_25 = arith.constant dense<0.000000e+00> : vector<8x32xf32>
    %38 = tpu.matmul %36, %37, %cst_25 {dimension_numbers = #tpu.dot_dimension_numbers<[1], [0], [0], [1], [0, 0, 1, 1], [], []>} : vector<8x8xf32>, vector<8x32xf32>, vector<8x32xf32> -> vector<8x32xf32>
    %39 = arith.addf %18, %38 : vector<8x32xf32>
    %40 = vector.extract_strided_slice %13 {offsets = [0, 8], sizes = [8, 8], strides = [1, 1]} : vector<8x32xf32> to vector<8x8xf32>
    %41 = vector.extract_strided_slice %14 {offsets = [0, 8], sizes = [8, 8], strides = [1, 1]} : vector<8x32xf32> to vector<8x8xf32>
    %42 = vector.extract_strided_slice %15 {offsets = [0, 8], sizes = [8, 8], strides = [1, 1]} : vector<8x32xf32> to vector<8x8xf32>
    %cst_26 = arith.constant dense<0.000000e+00> : vector<8x8xf32>
    %43 = tpu.matmul %40, %41, %cst_26 {dimension_numbers = #tpu.dot_dimension_numbers<[1], [1], [0], [0], [0, 0, 1, 0], [], []>} : vector<8x8xf32>, vector<8x8xf32>, vector<8x8xf32> -> vector<8x8xf32>
    %cst_27 = arith.constant 0.353553385 : f32
    %44 = vector.broadcast %cst_27 : f32 to vector<8x8xf32>
    %45 = arith.mulf %43, %44 : vector<8x8xf32>
    %46 = arith.addf %45, %5 : vector<8x8xf32>
    %cst_28 = arith.constant dense<0xFF800000> : vector<8xf32>
    %47 = vector.multi_reduction <maximumf>, %46, %cst_28 [1] : vector<8x8xf32> to vector<8xf32>
    %48 = vector.shape_cast %47 : vector<8xf32> to vector<8x1xf32>
    %49 = vector.broadcast %48 : vector<8x1xf32> to vector<8x8xf32>
    %50 = arith.subf %46, %49 : vector<8x8xf32>
    %51 = math.exp %50 : vector<8x8xf32>
    %cst_29 = arith.constant dense<0.000000e+00> : vector<8xf32>
    %52 = vector.multi_reduction <add>, %51, %cst_29 [1] : vector<8x8xf32> to vector<8xf32>
    %53 = vector.shape_cast %52 : vector<8xf32> to vector<8x1xf32>
    %54 = tpu.reciprocal %53 {approx = true} : vector<8x1xf32> -> vector<8x1xf32>
    %55 = vector.broadcast %54 : vector<8x1xf32> to vector<8x8xf32>
    %56 = arith.mulf %51, %55 : vector<8x8xf32>
    %cst_30 = arith.constant dense<0.000000e+00> : vector<8x8xf32>
    %57 = tpu.matmul %56, %42, %cst_30 {dimension_numbers = #tpu.dot_dimension_numbers<[1], [0], [0], [1], [0, 0, 1, 1], [], []>} : vector<8x8xf32>, vector<8x8xf32>, vector<8x8xf32> -> vector<8x8xf32>
    %58 = vector.extract_strided_slice %16 {offsets = [8, 0], sizes = [8, 32], strides = [1, 1]} : vector<32x32xf32> to vector<8x32xf32>
    %cst_31 = arith.constant dense<0.000000e+00> : vector<8x32xf32>
    %59 = tpu.matmul %57, %58, %cst_31 {dimension_numbers = #tpu.dot_dimension_numbers<[1], [0], [0], [1], [0, 0, 1, 1], [], []>} : vector<8x8xf32>, vector<8x32xf32>, vector<8x32xf32> -> vector<8x32xf32>
    %60 = arith.addf %39, %59 : vector<8x32xf32>
    %61 = vector.extract_strided_slice %13 {offsets = [0, 16], sizes = [8, 8], strides = [1, 1]} : vector<8x32xf32> to vector<8x8xf32>
    %62 = vector.extract_strided_slice %14 {offsets = [0, 16], sizes = [8, 8], strides = [1, 1]} : vector<8x32xf32> to vector<8x8xf32>
    %63 = vector.extract_strided_slice %15 {offsets = [0, 16], sizes = [8, 8], strides = [1, 1]} : vector<8x32xf32> to vector<8x8xf32>
    %cst_32 = arith.constant dense<0.000000e+00> : vector<8x8xf32>
    %64 = tpu.matmul %61, %62, %cst_32 {dimension_numbers = #tpu.dot_dimension_numbers<[1], [1], [0], [0], [0, 0, 1, 0], [], []>} : vector<8x8xf32>, vector<8x8xf32>, vector<8x8xf32> -> vector<8x8xf32>
    %cst_33 = arith.constant 0.353553385 : f32
    %65 = vector.broadcast %cst_33 : f32 to vector<8x8xf32>
    %66 = arith.mulf %64, %65 : vector<8x8xf32>
    %67 = arith.addf %66, %5 : vector<8x8xf32>
    %cst_34 = arith.constant dense<0xFF800000> : vector<8xf32>
    %68 = vector.multi_reduction <maximumf>, %67, %cst_34 [1] : vector<8x8xf32> to vector<8xf32>
    %69 = vector.shape_cast %68 : vector<8xf32> to vector<8x1xf32>
    %70 = vector.broadcast %69 : vector<8x1xf32> to vector<8x8xf32>
    %71 = arith.subf %67, %70 : vector<8x8xf32>
    %72 = math.exp %71 : vector<8x8xf32>
    %cst_35 = arith.constant dense<0.000000e+00> : vector<8xf32>
    %73 = vector.multi_reduction <add>, %72, %cst_35 [1] : vector<8x8xf32> to vector<8xf32>
    %74 = vector.shape_cast %73 : vector<8xf32> to vector<8x1xf32>
    %75 = tpu.reciprocal %74 {approx = true} : vector<8x1xf32> -> vector<8x1xf32>
    %76 = vector.broadcast %75 : vector<8x1xf32> to vector<8x8xf32>
    %77 = arith.mulf %72, %76 : vector<8x8xf32>
    %cst_36 = arith.constant dense<0.000000e+00> : vector<8x8xf32>
    %78 = tpu.matmul %77, %63, %cst_36 {dimension_numbers = #tpu.dot_dimension_numbers<[1], [0], [0], [1], [0, 0, 1, 1], [], []>} : vector<8x8xf32>, vector<8x8xf32>, vector<8x8xf32> -> vector<8x8xf32>
    %79 = vector.extract_strided_slice %16 {offsets = [16, 0], sizes = [8, 32], strides = [1, 1]} : vector<32x32xf32> to vector<8x32xf32>
    %cst_37 = arith.constant dense<0.000000e+00> : vector<8x32xf32>
    %80 = tpu.matmul %78, %79, %cst_37 {dimension_numbers = #tpu.dot_dimension_numbers<[1], [0], [0], [1], [0, 0, 1, 1], [], []>} : vector<8x8xf32>, vector<8x32xf32>, vector<8x32xf32> -> vector<8x32xf32>
    %81 = arith.addf %60, %80 : vector<8x32xf32>
    %82 = vector.extract_strided_slice %13 {offsets = [0, 24], sizes = [8, 8], strides = [1, 1]} : vector<8x32xf32> to vector<8x8xf32>
    %83 = vector.extract_strided_slice %14 {offsets = [0, 24], sizes = [8, 8], strides = [1, 1]} : vector<8x32xf32> to vector<8x8xf32>
    %84 = vector.extract_strided_slice %15 {offsets = [0, 24], sizes = [8, 8], strides = [1, 1]} : vector<8x32xf32> to vector<8x8xf32>
    %cst_38 = arith.constant dense<0.000000e+00> : vector<8x8xf32>
    %85 = tpu.matmul %82, %83, %cst_38 {dimension_numbers = #tpu.dot_dimension_numbers<[1], [1], [0], [0], [0, 0, 1, 0], [], []>} : vector<8x8xf32>, vector<8x8xf32>, vector<8x8xf32> -> vector<8x8xf32>
    %cst_39 = arith.constant 0.353553385 : f32
    %86 = vector.broadcast %cst_39 : f32 to vector<8x8xf32>
    %87 = arith.mulf %85, %86 : vector<8x8xf32>
    %88 = arith.addf %87, %5 : vector<8x8xf32>
    %cst_40 = arith.constant dense<0xFF800000> : vector<8xf32>
    %89 = vector.multi_reduction <maximumf>, %88, %cst_40 [1] : vector<8x8xf32> to vector<8xf32>
    %90 = vector.shape_cast %89 : vector<8xf32> to vector<8x1xf32>
    %91 = vector.broadcast %90 : vector<8x1xf32> to vector<8x8xf32>
    %92 = arith.subf %88, %91 : vector<8x8xf32>
    %93 = math.exp %92 : vector<8x8xf32>
    %cst_41 = arith.constant dense<0.000000e+00> : vector<8xf32>
    %94 = vector.multi_reduction <add>, %93, %cst_41 [1] : vector<8x8xf32> to vector<8xf32>
    %95 = vector.shape_cast %94 : vector<8xf32> to vector<8x1xf32>
    %96 = tpu.reciprocal %95 {approx = true} : vector<8x1xf32> -> vector<8x1xf32>
    %97 = vector.broadcast %96 : vector<8x1xf32> to vector<8x8xf32>
    %98 = arith.mulf %93, %97 : vector<8x8xf32>
    %cst_42 = arith.constant dense<0.000000e+00> : vector<8x8xf32>
    %99 = tpu.matmul %98, %84, %cst_42 {dimension_numbers = #tpu.dot_dimension_numbers<[1], [0], [0], [1], [0, 0, 1, 1], [], []>} : vector<8x8xf32>, vector<8x8xf32>, vector<8x8xf32> -> vector<8x8xf32>
    %100 = vector.extract_strided_slice %16 {offsets = [24, 0], sizes = [8, 32], strides = [1, 1]} : vector<32x32xf32> to vector<8x32xf32>
    %cst_43 = arith.constant dense<0.000000e+00> : vector<8x32xf32>
    %101 = tpu.matmul %99, %100, %cst_43 {dimension_numbers = #tpu.dot_dimension_numbers<[1], [0], [0], [1], [0, 0, 1, 1], [], []>} : vector<8x8xf32>, vector<8x32xf32>, vector<8x32xf32> -> vector<8x32xf32>
    %102 = arith.addf %81, %101 : vector<8x32xf32>
    %103 = vector.broadcast %17 : vector<1x32xf32> to vector<8x32xf32>
    %104 = arith.addf %102, %103 : vector<8x32xf32>
    %105 = arith.addf %1, %104 : vector<8x32xf32>
    %c0_44 = arith.constant 0 : index
    %c0_45 = arith.constant 0 : index
    %106 = vector.load %arg9[%c0_44, %c0_45] : memref<1x32xf32, #tpu.memory_space<vmem>>, vector<1x32xf32>
    %c0_46 = arith.constant 0 : index
    %c0_47 = arith.constant 0 : index
    %107 = vector.load %arg10[%c0_46, %c0_47] : memref<1x32xf32, #tpu.memory_space<vmem>>, vector<1x32xf32>
    %cst_48 = arith.constant dense<0.000000e+00> : vector<8xf32>
    %108 = vector.multi_reduction <add>, %105, %cst_48 [1] : vector<8x32xf32> to vector<8xf32>
    %109 = vector.shape_cast %108 : vector<8xf32> to vector<8x1xf32>
    %cst_49 = arith.constant 3.200000e+01 : f32
    %110 = vector.broadcast %cst_49 : f32 to vector<8x1xf32>
    %111 = arith.divf %109, %110 : vector<8x1xf32>
    %112 = vector.broadcast %111 : vector<8x1xf32> to vector<8x32xf32>
    %113 = arith.subf %105, %112 : vector<8x32xf32>
    %114 = arith.mulf %113, %113 : vector<8x32xf32>
    %cst_50 = arith.constant dense<0.000000e+00> : vector<8xf32>
    %115 = vector.multi_reduction <add>, %114, %cst_50 [1] : vector<8x32xf32> to vector<8xf32>
    %116 = vector.shape_cast %115 : vector<8xf32> to vector<8x1xf32>
    %cst_51 = arith.constant 3.200000e+01 : f32
    %117 = vector.broadcast %cst_51 : f32 to vector<8x1xf32>
    %118 = arith.divf %116, %117 : vector<8x1xf32>
    %119 = vector.broadcast %111 : vector<8x1xf32> to vector<8x32xf32>
    %120 = arith.subf %105, %119 : vector<8x32xf32>
    %cst_52 = arith.constant 9.99999974E-6 : f32
    %121 = vector.broadcast %cst_52 : f32 to vector<8x1xf32>
    %122 = arith.addf %118, %121 : vector<8x1xf32>
    %123 = math.rsqrt %122 : vector<8x1xf32>
    %124 = vector.broadcast %123 : vector<8x1xf32> to vector<8x32xf32>
    %125 = arith.mulf %120, %124 : vector<8x32xf32>
    %126 = vector.broadcast %106 : vector<1x32xf32> to vector<8x32xf32>
    %127 = arith.mulf %125, %126 : vector<8x32xf32>
    %128 = vector.broadcast %107 : vector<1x32xf32> to vector<8x32xf32>
    %129 = arith.addf %127, %128 : vector<8x32xf32>
    %c0_53 = arith.constant 0 : index
    %c0_54 = arith.constant 0 : index
    %130 = vector.load %arg11[%c0_53, %c0_54] : memref<32x32xf32, #tpu.memory_space<vmem>>, vector<32x32xf32>
    %cst_55 = arith.constant dense<0.000000e+00> : vector<8x32xf32>
    %131 = tpu.matmul %129, %130, %cst_55 {dimension_numbers = #tpu.dot_dimension_numbers<[1], [0], [0], [1], [0, 0, 1, 1], [], []>} : vector<8x32xf32>, vector<32x32xf32>, vector<8x32xf32> -> vector<8x32xf32>
    %c0_56 = arith.constant 0 : index
    %c0_57 = arith.constant 0 : index
    %132 = vector.load %arg12[%c0_56, %c0_57] : memref<1x32xf32, #tpu.memory_space<vmem>>, vector<1x32xf32>
    %133 = vector.broadcast %132 : vector<1x32xf32> to vector<8x32xf32>
    %134 = arith.addf %131, %133 : vector<8x32xf32>
    %c0_58 = arith.constant 0 : index
    %c0_59 = arith.constant 0 : index
    %135 = vector.load %arg13[%c0_58, %c0_59] : memref<32x64xf32, #tpu.memory_space<vmem>>, vector<32x64xf32>
    %cst_60 = arith.constant dense<0.000000e+00> : vector<8x64xf32>
    %136 = tpu.matmul %3, %135, %cst_60 {dimension_numbers = #tpu.dot_dimension_numbers<[1], [0], [0], [1], [0, 0, 1, 1], [], []>} : vector<8x32xf32>, vector<32x64xf32>, vector<8x64xf32> -> vector<8x64xf32>
    %c0_61 = arith.constant 0 : index
    %c0_62 = arith.constant 0 : index
    %137 = vector.load %arg14[%c0_61, %c0_62] : memref<1x64xf32, #tpu.memory_space<vmem>>, vector<1x64xf32>
    %138 = vector.broadcast %137 : vector<1x64xf32> to vector<8x64xf32>
    %139 = arith.addf %136, %138 : vector<8x64xf32>
    %140 = vector.extract_strided_slice %139 {offsets = [0, 0], sizes = [8, 32], strides = [1, 1]} : vector<8x64xf32> to vector<8x32xf32>
    %141 = vector.extract_strided_slice %139 {offsets = [0, 32], sizes = [8, 32], strides = [1, 1]} : vector<8x64xf32> to vector<8x32xf32>
    %c0_63 = arith.constant 0 : index
    %c0_64 = arith.constant 0 : index
    %142 = vector.load %arg15[%c0_63, %c0_64] : memref<32x32xf32, #tpu.memory_space<vmem>>, vector<32x32xf32>
    %c0_65 = arith.constant 0 : index
    %c0_66 = arith.constant 0 : index
    %143 = vector.load %arg16[%c0_65, %c0_66] : memref<1x32xf32, #tpu.memory_space<vmem>>, vector<1x32xf32>
    %cst_67 = arith.constant 0.000000e+00 : f32
    %144 = vector.broadcast %cst_67 : f32 to vector<8x32xf32>
    %145 = vector.extract_strided_slice %134 {offsets = [0, 0], sizes = [8, 8], strides = [1, 1]} : vector<8x32xf32> to vector<8x8xf32>
    %146 = vector.extract_strided_slice %140 {offsets = [0, 0], sizes = [8, 8], strides = [1, 1]} : vector<8x32xf32> to vector<8x8xf32>
    %147 = vector.extract_strided_slice %141 {offsets = [0, 0], sizes = [8, 8], strides = [1, 1]} : vector<8x32xf32> to vector<8x8xf32>
    %cst_68 = arith.constant dense<0.000000e+00> : vector<8x8xf32>
    %148 = tpu.matmul %145, %146, %cst_68 {dimension_numbers = #tpu.dot_dimension_numbers<[1], [1], [0], [0], [0, 0, 1, 0], [], []>} : vector<8x8xf32>, vector<8x8xf32>, vector<8x8xf32> -> vector<8x8xf32>
    %cst_69 = arith.constant 0.353553385 : f32
    %149 = vector.broadcast %cst_69 : f32 to vector<8x8xf32>
    %150 = arith.mulf %148, %149 : vector<8x8xf32>
    %151 = vector.broadcast %7 : vector<1x8xf32> to vector<8x8xf32>
    %152 = arith.addf %150, %151 : vector<8x8xf32>
    %cst_70 = arith.constant dense<0xFF800000> : vector<8xf32>
    %153 = vector.multi_reduction <maximumf>, %152, %cst_70 [1] : vector<8x8xf32> to vector<8xf32>
    %154 = vector.shape_cast %153 : vector<8xf32> to vector<8x1xf32>
    %155 = vector.broadcast %154 : vector<8x1xf32> to vector<8x8xf32>
    %156 = arith.subf %152, %155 : vector<8x8xf32>
    %157 = math.exp %156 : vector<8x8xf32>
    %cst_71 = arith.constant dense<0.000000e+00> : vector<8xf32>
    %158 = vector.multi_reduction <add>, %157, %cst_71 [1] : vector<8x8xf32> to vector<8xf32>
    %159 = vector.shape_cast %158 : vector<8xf32> to vector<8x1xf32>
    %160 = tpu.reciprocal %159 {approx = true} : vector<8x1xf32> -> vector<8x1xf32>
    %161 = vector.broadcast %160 : vector<8x1xf32> to vector<8x8xf32>
    %162 = arith.mulf %157, %161 : vector<8x8xf32>
    %cst_72 = arith.constant dense<0.000000e+00> : vector<8x8xf32>
    %163 = tpu.matmul %162, %147, %cst_72 {dimension_numbers = #tpu.dot_dimension_numbers<[1], [0], [0], [1], [0, 0, 1, 1], [], []>} : vector<8x8xf32>, vector<8x8xf32>, vector<8x8xf32> -> vector<8x8xf32>
    %164 = vector.extract_strided_slice %142 {offsets = [0, 0], sizes = [8, 32], strides = [1, 1]} : vector<32x32xf32> to vector<8x32xf32>
    %cst_73 = arith.constant dense<0.000000e+00> : vector<8x32xf32>
    %165 = tpu.matmul %163, %164, %cst_73 {dimension_numbers = #tpu.dot_dimension_numbers<[1], [0], [0], [1], [0, 0, 1, 1], [], []>} : vector<8x8xf32>, vector<8x32xf32>, vector<8x32xf32> -> vector<8x32xf32>
    %166 = arith.addf %144, %165 : vector<8x32xf32>
    %167 = vector.extract_strided_slice %134 {offsets = [0, 8], sizes = [8, 8], strides = [1, 1]} : vector<8x32xf32> to vector<8x8xf32>
    %168 = vector.extract_strided_slice %140 {offsets = [0, 8], sizes = [8, 8], strides = [1, 1]} : vector<8x32xf32> to vector<8x8xf32>
    %169 = vector.extract_strided_slice %141 {offsets = [0, 8], sizes = [8, 8], strides = [1, 1]} : vector<8x32xf32> to vector<8x8xf32>
    %cst_74 = arith.constant dense<0.000000e+00> : vector<8x8xf32>
    %170 = tpu.matmul %167, %168, %cst_74 {dimension_numbers = #tpu.dot_dimension_numbers<[1], [1], [0], [0], [0, 0, 1, 0], [], []>} : vector<8x8xf32>, vector<8x8xf32>, vector<8x8xf32> -> vector<8x8xf32>
    %cst_75 = arith.constant 0.353553385 : f32
    %171 = vector.broadcast %cst_75 : f32 to vector<8x8xf32>
    %172 = arith.mulf %170, %171 : vector<8x8xf32>
    %173 = vector.broadcast %7 : vector<1x8xf32> to vector<8x8xf32>
    %174 = arith.addf %172, %173 : vector<8x8xf32>
    %cst_76 = arith.constant dense<0xFF800000> : vector<8xf32>
    %175 = vector.multi_reduction <maximumf>, %174, %cst_76 [1] : vector<8x8xf32> to vector<8xf32>
    %176 = vector.shape_cast %175 : vector<8xf32> to vector<8x1xf32>
    %177 = vector.broadcast %176 : vector<8x1xf32> to vector<8x8xf32>
    %178 = arith.subf %174, %177 : vector<8x8xf32>
    %179 = math.exp %178 : vector<8x8xf32>
    %cst_77 = arith.constant dense<0.000000e+00> : vector<8xf32>
    %180 = vector.multi_reduction <add>, %179, %cst_77 [1] : vector<8x8xf32> to vector<8xf32>
    %181 = vector.shape_cast %180 : vector<8xf32> to vector<8x1xf32>
    %182 = tpu.reciprocal %181 {approx = true} : vector<8x1xf32> -> vector<8x1xf32>
    %183 = vector.broadcast %182 : vector<8x1xf32> to vector<8x8xf32>
    %184 = arith.mulf %179, %183 : vector<8x8xf32>
    %cst_78 = arith.constant dense<0.000000e+00> : vector<8x8xf32>
    %185 = tpu.matmul %184, %169, %cst_78 {dimension_numbers = #tpu.dot_dimension_numbers<[1], [0], [0], [1], [0, 0, 1, 1], [], []>} : vector<8x8xf32>, vector<8x8xf32>, vector<8x8xf32> -> vector<8x8xf32>
    %186 = vector.extract_strided_slice %142 {offsets = [8, 0], sizes = [8, 32], strides = [1, 1]} : vector<32x32xf32> to vector<8x32xf32>
    %cst_79 = arith.constant dense<0.000000e+00> : vector<8x32xf32>
    %187 = tpu.matmul %185, %186, %cst_79 {dimension_numbers = #tpu.dot_dimension_numbers<[1], [0], [0], [1], [0, 0, 1, 1], [], []>} : vector<8x8xf32>, vector<8x32xf32>, vector<8x32xf32> -> vector<8x32xf32>
    %188 = arith.addf %166, %187 : vector<8x32xf32>
    %189 = vector.extract_strided_slice %134 {offsets = [0, 16], sizes = [8, 8], strides = [1, 1]} : vector<8x32xf32> to vector<8x8xf32>
    %190 = vector.extract_strided_slice %140 {offsets = [0, 16], sizes = [8, 8], strides = [1, 1]} : vector<8x32xf32> to vector<8x8xf32>
    %191 = vector.extract_strided_slice %141 {offsets = [0, 16], sizes = [8, 8], strides = [1, 1]} : vector<8x32xf32> to vector<8x8xf32>
    %cst_80 = arith.constant dense<0.000000e+00> : vector<8x8xf32>
    %192 = tpu.matmul %189, %190, %cst_80 {dimension_numbers = #tpu.dot_dimension_numbers<[1], [1], [0], [0], [0, 0, 1, 0], [], []>} : vector<8x8xf32>, vector<8x8xf32>, vector<8x8xf32> -> vector<8x8xf32>
    %cst_81 = arith.constant 0.353553385 : f32
    %193 = vector.broadcast %cst_81 : f32 to vector<8x8xf32>
    %194 = arith.mulf %192, %193 : vector<8x8xf32>
    %195 = vector.broadcast %7 : vector<1x8xf32> to vector<8x8xf32>
    %196 = arith.addf %194, %195 : vector<8x8xf32>
    %cst_82 = arith.constant dense<0xFF800000> : vector<8xf32>
    %197 = vector.multi_reduction <maximumf>, %196, %cst_82 [1] : vector<8x8xf32> to vector<8xf32>
    %198 = vector.shape_cast %197 : vector<8xf32> to vector<8x1xf32>
    %199 = vector.broadcast %198 : vector<8x1xf32> to vector<8x8xf32>
    %200 = arith.subf %196, %199 : vector<8x8xf32>
    %201 = math.exp %200 : vector<8x8xf32>
    %cst_83 = arith.constant dense<0.000000e+00> : vector<8xf32>
    %202 = vector.multi_reduction <add>, %201, %cst_83 [1] : vector<8x8xf32> to vector<8xf32>
    %203 = vector.shape_cast %202 : vector<8xf32> to vector<8x1xf32>
    %204 = tpu.reciprocal %203 {approx = true} : vector<8x1xf32> -> vector<8x1xf32>
    %205 = vector.broadcast %204 : vector<8x1xf32> to vector<8x8xf32>
    %206 = arith.mulf %201, %205 : vector<8x8xf32>
    %cst_84 = arith.constant dense<0.000000e+00> : vector<8x8xf32>
    %207 = tpu.matmul %206, %191, %cst_84 {dimension_numbers = #tpu.dot_dimension_numbers<[1], [0], [0], [1], [0, 0, 1, 1], [], []>} : vector<8x8xf32>, vector<8x8xf32>, vector<8x8xf32> -> vector<8x8xf32>
    %208 = vector.extract_strided_slice %142 {offsets = [16, 0], sizes = [8, 32], strides = [1, 1]} : vector<32x32xf32> to vector<8x32xf32>
    %cst_85 = arith.constant dense<0.000000e+00> : vector<8x32xf32>
    %209 = tpu.matmul %207, %208, %cst_85 {dimension_numbers = #tpu.dot_dimension_numbers<[1], [0], [0], [1], [0, 0, 1, 1], [], []>} : vector<8x8xf32>, vector<8x32xf32>, vector<8x32xf32> -> vector<8x32xf32>
    %210 = arith.addf %188, %209 : vector<8x32xf32>
    %211 = vector.extract_strided_slice %134 {offsets = [0, 24], sizes = [8, 8], strides = [1, 1]} : vector<8x32xf32> to vector<8x8xf32>
    %212 = vector.extract_strided_slice %140 {offsets = [0, 24], sizes = [8, 8], strides = [1, 1]} : vector<8x32xf32> to vector<8x8xf32>
    %213 = vector.extract_strided_slice %141 {offsets = [0, 24], sizes = [8, 8], strides = [1, 1]} : vector<8x32xf32> to vector<8x8xf32>
    %cst_86 = arith.constant dense<0.000000e+00> : vector<8x8xf32>
    %214 = tpu.matmul %211, %212, %cst_86 {dimension_numbers = #tpu.dot_dimension_numbers<[1], [1], [0], [0], [0, 0, 1, 0], [], []>} : vector<8x8xf32>, vector<8x8xf32>, vector<8x8xf32> -> vector<8x8xf32>
    %cst_87 = arith.constant 0.353553385 : f32
    %215 = vector.broadcast %cst_87 : f32 to vector<8x8xf32>
    %216 = arith.mulf %214, %215 : vector<8x8xf32>
    %217 = vector.broadcast %7 : vector<1x8xf32> to vector<8x8xf32>
    %218 = arith.addf %216, %217 : vector<8x8xf32>
    %cst_88 = arith.constant dense<0xFF800000> : vector<8xf32>
    %219 = vector.multi_reduction <maximumf>, %218, %cst_88 [1] : vector<8x8xf32> to vector<8xf32>
    %220 = vector.shape_cast %219 : vector<8xf32> to vector<8x1xf32>
    %221 = vector.broadcast %220 : vector<8x1xf32> to vector<8x8xf32>
    %222 = arith.subf %218, %221 : vector<8x8xf32>
    %223 = math.exp %222 : vector<8x8xf32>
    %cst_89 = arith.constant dense<0.000000e+00> : vector<8xf32>
    %224 = vector.multi_reduction <add>, %223, %cst_89 [1] : vector<8x8xf32> to vector<8xf32>
    %225 = vector.shape_cast %224 : vector<8xf32> to vector<8x1xf32>
    %226 = tpu.reciprocal %225 {approx = true} : vector<8x1xf32> -> vector<8x1xf32>
    %227 = vector.broadcast %226 : vector<8x1xf32> to vector<8x8xf32>
    %228 = arith.mulf %223, %227 : vector<8x8xf32>
    %cst_90 = arith.constant dense<0.000000e+00> : vector<8x8xf32>
    %229 = tpu.matmul %228, %213, %cst_90 {dimension_numbers = #tpu.dot_dimension_numbers<[1], [0], [0], [1], [0, 0, 1, 1], [], []>} : vector<8x8xf32>, vector<8x8xf32>, vector<8x8xf32> -> vector<8x8xf32>
    %230 = vector.extract_strided_slice %142 {offsets = [24, 0], sizes = [8, 32], strides = [1, 1]} : vector<32x32xf32> to vector<8x32xf32>
    %cst_91 = arith.constant dense<0.000000e+00> : vector<8x32xf32>
    %231 = tpu.matmul %229, %230, %cst_91 {dimension_numbers = #tpu.dot_dimension_numbers<[1], [0], [0], [1], [0, 0, 1, 1], [], []>} : vector<8x8xf32>, vector<8x32xf32>, vector<8x32xf32> -> vector<8x32xf32>
    %232 = arith.addf %210, %231 : vector<8x32xf32>
    %233 = vector.broadcast %143 : vector<1x32xf32> to vector<8x32xf32>
    %234 = arith.addf %232, %233 : vector<8x32xf32>
    %235 = arith.addf %129, %234 : vector<8x32xf32>
    %c0_92 = arith.constant 0 : index
    %c0_93 = arith.constant 0 : index
    %236 = vector.load %arg17[%c0_92, %c0_93] : memref<1x32xf32, #tpu.memory_space<vmem>>, vector<1x32xf32>
    %c0_94 = arith.constant 0 : index
    %c0_95 = arith.constant 0 : index
    %237 = vector.load %arg18[%c0_94, %c0_95] : memref<1x32xf32, #tpu.memory_space<vmem>>, vector<1x32xf32>
    %cst_96 = arith.constant dense<0.000000e+00> : vector<8xf32>
    %238 = vector.multi_reduction <add>, %235, %cst_96 [1] : vector<8x32xf32> to vector<8xf32>
    %239 = vector.shape_cast %238 : vector<8xf32> to vector<8x1xf32>
    %cst_97 = arith.constant 3.200000e+01 : f32
    %240 = vector.broadcast %cst_97 : f32 to vector<8x1xf32>
    %241 = arith.divf %239, %240 : vector<8x1xf32>
    %242 = vector.broadcast %241 : vector<8x1xf32> to vector<8x32xf32>
    %243 = arith.subf %235, %242 : vector<8x32xf32>
    %244 = arith.mulf %243, %243 : vector<8x32xf32>
    %cst_98 = arith.constant dense<0.000000e+00> : vector<8xf32>
    %245 = vector.multi_reduction <add>, %244, %cst_98 [1] : vector<8x32xf32> to vector<8xf32>
    %246 = vector.shape_cast %245 : vector<8xf32> to vector<8x1xf32>
    %cst_99 = arith.constant 3.200000e+01 : f32
    %247 = vector.broadcast %cst_99 : f32 to vector<8x1xf32>
    %248 = arith.divf %246, %247 : vector<8x1xf32>
    %249 = vector.broadcast %241 : vector<8x1xf32> to vector<8x32xf32>
    %250 = arith.subf %235, %249 : vector<8x32xf32>
    %cst_100 = arith.constant 9.99999974E-6 : f32
    %251 = vector.broadcast %cst_100 : f32 to vector<8x1xf32>
    %252 = arith.addf %248, %251 : vector<8x1xf32>
    %253 = math.rsqrt %252 : vector<8x1xf32>
    %254 = vector.broadcast %253 : vector<8x1xf32> to vector<8x32xf32>
    %255 = arith.mulf %250, %254 : vector<8x32xf32>
    %256 = vector.broadcast %236 : vector<1x32xf32> to vector<8x32xf32>
    %257 = arith.mulf %255, %256 : vector<8x32xf32>
    %258 = vector.broadcast %237 : vector<1x32xf32> to vector<8x32xf32>
    %259 = arith.addf %257, %258 : vector<8x32xf32>
    %c0_101 = arith.constant 0 : index
    %c0_102 = arith.constant 0 : index
    %260 = vector.load %arg19[%c0_101, %c0_102] : memref<32x64xf32, #tpu.memory_space<vmem>>, vector<32x64xf32>
    %c0_103 = arith.constant 0 : index
    %c0_104 = arith.constant 0 : index
    %261 = vector.load %arg20[%c0_103, %c0_104] : memref<1x64xf32, #tpu.memory_space<vmem>>, vector<1x64xf32>
    %c0_105 = arith.constant 0 : index
    %c0_106 = arith.constant 0 : index
    %262 = vector.load %arg21[%c0_105, %c0_106] : memref<64x32xf32, #tpu.memory_space<vmem>>, vector<64x32xf32>
    %c0_107 = arith.constant 0 : index
    %c0_108 = arith.constant 0 : index
    %263 = vector.load %arg22[%c0_107, %c0_108] : memref<1x32xf32, #tpu.memory_space<vmem>>, vector<1x32xf32>
    %cst_109 = arith.constant dense<0.000000e+00> : vector<8x64xf32>
    %264 = tpu.matmul %259, %260, %cst_109 {dimension_numbers = #tpu.dot_dimension_numbers<[1], [0], [0], [1], [0, 0, 1, 1], [], []>} : vector<8x32xf32>, vector<32x64xf32>, vector<8x64xf32> -> vector<8x64xf32>
    %265 = vector.broadcast %261 : vector<1x64xf32> to vector<8x64xf32>
    %266 = arith.addf %264, %265 : vector<8x64xf32>
    %cst_110 = arith.constant 0.000000e+00 : f32
    %267 = vector.broadcast %cst_110 : f32 to vector<8x64xf32>
    %268 = arith.maximumf %266, %267 : vector<8x64xf32>
    %cst_111 = arith.constant dense<0.000000e+00> : vector<8x32xf32>
    %269 = tpu.matmul %268, %262, %cst_111 {dimension_numbers = #tpu.dot_dimension_numbers<[1], [0], [0], [1], [0, 0, 1, 1], [], []>} : vector<8x64xf32>, vector<64x32xf32>, vector<8x32xf32> -> vector<8x32xf32>
    %270 = vector.broadcast %263 : vector<1x32xf32> to vector<8x32xf32>
    %271 = arith.addf %269, %270 : vector<8x32xf32>
    %272 = arith.addf %259, %271 : vector<8x32xf32>
    %c0_112 = arith.constant 0 : index
    %c0_113 = arith.constant 0 : index
    %273 = vector.load %arg23[%c0_112, %c0_113] : memref<1x32xf32, #tpu.memory_space<vmem>>, vector<1x32xf32>
    %c0_114 = arith.constant 0 : index
    %c0_115 = arith.constant 0 : index
    %274 = vector.load %arg24[%c0_114, %c0_115] : memref<1x32xf32, #tpu.memory_space<vmem>>, vector<1x32xf32>
    %cst_116 = arith.constant dense<0.000000e+00> : vector<8xf32>
    %275 = vector.multi_reduction <add>, %272, %cst_116 [1] : vector<8x32xf32> to vector<8xf32>
    %276 = vector.shape_cast %275 : vector<8xf32> to vector<8x1xf32>
    %cst_117 = arith.constant 3.200000e+01 : f32
    %277 = vector.broadcast %cst_117 : f32 to vector<8x1xf32>
    %278 = arith.divf %276, %277 : vector<8x1xf32>
    %279 = vector.broadcast %278 : vector<8x1xf32> to vector<8x32xf32>
    %280 = arith.subf %272, %279 : vector<8x32xf32>
    %281 = arith.mulf %280, %280 : vector<8x32xf32>
    %cst_118 = arith.constant dense<0.000000e+00> : vector<8xf32>
    %282 = vector.multi_reduction <add>, %281, %cst_118 [1] : vector<8x32xf32> to vector<8xf32>
    %283 = vector.shape_cast %282 : vector<8xf32> to vector<8x1xf32>
    %cst_119 = arith.constant 3.200000e+01 : f32
    %284 = vector.broadcast %cst_119 : f32 to vector<8x1xf32>
    %285 = arith.divf %283, %284 : vector<8x1xf32>
    %286 = vector.broadcast %278 : vector<8x1xf32> to vector<8x32xf32>
    %287 = arith.subf %272, %286 : vector<8x32xf32>
    %cst_120 = arith.constant 9.99999974E-6 : f32
    %288 = vector.broadcast %cst_120 : f32 to vector<8x1xf32>
    %289 = arith.addf %285, %288 : vector<8x1xf32>
    %290 = math.rsqrt %289 : vector<8x1xf32>
    %291 = vector.broadcast %290 : vector<8x1xf32> to vector<8x32xf32>
    %292 = arith.mulf %287, %291 : vector<8x32xf32>
    %293 = vector.broadcast %273 : vector<1x32xf32> to vector<8x32xf32>
    %294 = arith.mulf %292, %293 : vector<8x32xf32>
    %295 = vector.broadcast %274 : vector<1x32xf32> to vector<8x32xf32>
    %296 = arith.addf %294, %295 : vector<8x32xf32>
    %c0_121 = arith.constant 0 : index
    %c0_122 = arith.constant 0 : index
    %c0_123 = arith.constant 0 : index
    %297 = vector.load %arg25[%c0_121, %c0_122, %c0_123] : memref<1x8x32xf32, #tpu.memory_space<vmem>>, vector<1x8x32xf32>
    %298 = vector.shape_cast %297 : vector<1x8x32xf32> to vector<8x32xf32>
    %299 = vector.shape_cast %296 : vector<8x32xf32> to vector<1x8x32xf32>
    tpu.vector_store %arg25[%c0_121, %c0_122, %c0_123], %299 {strides = array<i32>} : memref<1x8x32xf32, #tpu.memory_space<vmem>>, vector<1x8x32xf32>,
    return
  }
  func.func @transform_0(%arg0: i32) -> (i32, i32, i32) {
    %c0_i32 = arith.constant 0 : i32
    %c0_i32_0 = arith.constant 0 : i32
    %c0_i32_1 = arith.constant 0 : i32
    return %arg0, %c0_i32, %c0_i32_0 : i32, i32, i32
  }
  func.func @transform_1(%arg0: i32) -> (i32, i32, i32) {
    %c0_i32 = arith.constant 0 : i32
    %c0_i32_0 = arith.constant 0 : i32
    %c0_i32_1 = arith.constant 0 : i32
    return %arg0, %c0_i32, %c0_i32_0 : i32, i32, i32
  }
  func.func @transform_2(%arg0: i32) -> (i32, i32, i32) {
    %c0_i32 = arith.constant 0 : i32
    %c0_i32_0 = arith.constant 0 : i32
    %c0_i32_1 = arith.constant 0 : i32
    return %arg0, %c0_i32, %c0_i32_0 : i32, i32, i32
  }
  func.func @transform_3(%arg0: i32) -> (i32, i32, i32) {
    %c0_i32 = arith.constant 0 : i32
    %c0_i32_0 = arith.constant 0 : i32
    %c0_i32_1 = arith.constant 0 : i32
    return %arg0, %c0_i32, %c0_i32_0 : i32, i32, i32
  }
  func.func @transform_4(%arg0: i32) -> (i32, i32) {
    %c0_i32 = arith.constant 0 : i32
    %c0_i32_0 = arith.constant 0 : i32
    %c0_i32_1 = arith.constant 0 : i32
    return %c0_i32, %c0_i32_0 : i32, i32
  }
  func.func @transform_5(%arg0: i32) -> (i32, i32) {
    %c0_i32 = arith.constant 0 : i32
    %c0_i32_0 = arith.constant 0 : i32
    %c0_i32_1 = arith.constant 0 : i32
    return %c0_i32, %c0_i32_0 : i32, i32
  }
  func.func @transform_6(%arg0: i32) -> (i32, i32) {
    %c0_i32 = arith.constant 0 : i32
    %c0_i32_0 = arith.constant 0 : i32
    %c0_i32_1 = arith.constant 0 : i32
    return %c0_i32, %c0_i32_0 : i32, i32
  }
  func.func @transform_7(%arg0: i32) -> (i32, i32) {
    %c0_i32 = arith.constant 0 : i32
    %c0_i32_0 = arith.constant 0 : i32
    %c0_i32_1 = arith.constant 0 : i32
    return %c0_i32, %c0_i32_0 : i32, i32
  }
  func.func @transform_8(%arg0: i32) -> (i32, i32) {
    %c0_i32 = arith.constant 0 : i32
    %c0_i32_0 = arith.constant 0 : i32
    %c0_i32_1 = arith.constant 0 : i32
    return %c0_i32, %c0_i32_0 : i32, i32
  }
  func.func @transform_9(%arg0: i32) -> (i32, i32) {
    %c0_i32 = arith.constant 0 : i32
    %c0_i32_0 = arith.constant 0 : i32
    %c0_i32_1 = arith.constant 0 : i32
    return %c0_i32, %c0_i32_0 : i32, i32
  }
  func.func @transform_10(%arg0: i32) -> (i32, i32) {
    %c0_i32 = arith.constant 0 : i32
    %c0_i32_0 = arith.constant 0 : i32
    %c0_i32_1 = arith.constant 0 : i32
    return %c0_i32, %c0_i32_0 : i32, i32
  }
  func.func @transform_11(%arg0: i32) -> (i32, i32) {
    %c0_i32 = arith.constant 0 : i32
    %c0_i32_0 = arith.constant 0 : i32
    %c0_i32_1 = arith.constant 0 : i32
    return %c0_i32, %c0_i32_0 : i32, i32
  }
  func.func @transform_12(%arg0: i32) -> (i32, i32) {
    %c0_i32 = arith.constant 0 : i32
    %c0_i32_0 = arith.constant 0 : i32
    %c0_i32_1 = arith.constant 0 : i32
    return %c0_i32, %c0_i32_0 : i32, i32
  }
  func.func @transform_13(%arg0: i32) -> (i32, i32) {
    %c0_i32 = arith.constant 0 : i32
    %c0_i32_0 = arith.constant 0 : i32
    %c0_i32_1 = arith.constant 0 : i32
    return %c0_i32, %c0_i32_0 : i32, i32
  }
  func.func @transform_14(%arg0: i32) -> (i32, i32) {
    %c0_i32 = arith.constant 0 : i32
    %c0_i32_0 = arith.constant 0 : i32
    %c0_i32_1 = arith.constant 0 : i32
    return %c0_i32, %c0_i32_0 : i32, i32
  }
  func.func @transform_15(%arg0: i32) -> (i32, i32) {
    %c0_i32 = arith.constant 0 : i32
    %c0_i32_0 = arith.constant 0 : i32
    %c0_i32_1 = arith.constant 0 : i32
    return %c0_i32, %c0_i32_0 : i32, i32
  }
  func.func @transform_16(%arg0: i32) -> (i32, i32) {
    %c0_i32 = arith.constant 0 : i32
    %c0_i32_0 = arith.constant 0 : i32
    %c0_i32_1 = arith.constant 0 : i32
    return %c0_i32, %c0_i32_0 : i32, i32
  }
  func.func @transform_17(%arg0: i32) -> (i32, i32) {
    %c0_i32 = arith.constant 0 : i32
    %c0_i32_0 = arith.constant 0 : i32
    %c0_i32_1 = arith.constant 0 : i32
    return %c0_i32, %c0_i32_0 : i32, i32
  }
  func.func @transform_18(%arg0: i32) -> (i32, i32) {
    %c0_i32 = arith.constant 0 : i32
    %c0_i32_0 = arith.constant 0 : i32
    %c0_i32_1 = arith.constant 0 : i32
    return %c0_i32, %c0_i32_0 : i32, i32
  }
  func.func @transform_19(%arg0: i32) -> (i32, i32) {
    %c0_i32 = arith.constant 0 : i32
    %c0_i32_0 = arith.constant 0 : i32
    %c0_i32_1 = arith.constant 0 : i32
    return %c0_i32, %c0_i32_0 : i32, i32
  }
  func.func @transform_20(%arg0: i32) -> (i32, i32) {
    %c0_i32 = arith.constant 0 : i32
    %c0_i32_0 = arith.constant 0 : i32
    %c0_i32_1 = arith.constant 0 : i32
    return %c0_i32, %c0_i32_0 : i32, i32
  }
  func.func @transform_21(%arg0: i32) -> (i32, i32) {
    %c0_i32 = arith.constant 0 : i32
    %c0_i32_0 = arith.constant 0 : i32
    %c0_i32_1 = arith.constant 0 : i32
    return %c0_i32, %c0_i32_0 : i32, i32
  }
  func.func @transform_22(%arg0: i32) -> (i32, i32) {
    %c0_i32 = arith.constant 0 : i32
    %c0_i32_0 = arith.constant 0 : i32
    %c0_i32_1 = arith.constant 0 : i32
    return %c0_i32, %c0_i32_0 : i32, i32
  }
  func.func @transform_23(%arg0: i32) -> (i32, i32) {
    %c0_i32 = arith.constant 0 : i32
    %c0_i32_0 = arith.constant 0 : i32
    %c0_i32_1 = arith.constant 0 : i32
    return %c0_i32, %c0_i32_0 : i32, i32
  }
  func.func @transform_24(%arg0: i32) -> (i32, i32, i32) {
    %c0_i32 = arith.constant 0 : i32
    %c0_i32_0 = arith.constant 0 : i32
    %c0_i32_1 = arith.constant 0 : i32
    return %arg0, %c0_i32, %c0_i32_0 : i32, i32, i32
  }
}

module attributes {stable_mosaic.version = 11 : i64} {
  func.func @kernel(%arg0: i32, %arg1: memref<1x8x32xf32, #tpu.memory_space<vmem>>, %arg2: memref<1x8x32xf32, #tpu.memory_space<vmem>>, %arg3: memref<1x8x8xf32, #tpu.memory_space<vmem>>, %arg4: memref<1x1x8xf32, #tpu.memory_space<vmem>>, %arg5: memref<32x96xf32, #tpu.memory_space<vmem>>, %arg6: memref<1x96xf32, #tpu.memory_space<vmem>>, %arg7: memref<32x32xf32, #tpu.memory_space<vmem>>, %arg8: memref<1x32xf32, #tpu.memory_space<vmem>>, %arg9: memref<1x32xf32, #tpu.memory_space<vmem>>, %arg10: memref<1x32xf32, #tpu.memory_space<vmem>>, %arg11: memref<32x32xf32, #tpu.memory_space<vmem>>, %arg12: memref<1x32xf32, #tpu.memory_space<vmem>>, %arg13: memref<32x64xf32, #tpu.memory_space<vmem>>, %arg14: memref<1x64xf32, #tpu.memory_space<vmem>>, %arg15: memref<32x32xf32, #tpu.memory_space<vmem>>, %arg16: memref<1x32xf32, #tpu.memory_space<vmem>>, %arg17: memref<1x32xf32, #tpu.memory_space<vmem>>, %arg18: memref<1x32xf32, #tpu.memory_space<vmem>>, %arg19: memref<32x64xf32, #tpu.memory_space<vmem>>, %arg20: memref<1x64xf32, #tpu.memory_space<vmem>>, %arg21: memref<64x32xf32, #tpu.memory_space<vmem>>, %arg22: memref<1x32xf32, #tpu.memory_space<vmem>>, %arg23: memref<1x32xf32, #tpu.memory_space<vmem>>, %arg24: memref<1x32xf32, #tpu.memory_space<vmem>>, %arg25: memref<1x8x32xf32, #tpu.memory_space<vmem>>, %arg26: memref<1x8x8xf32, #tpu.memory_space<vmem>>) attributes {dimension_semantics = [#tpu.dimension_semantics<parallel>], iteration_bounds = array<i64: 2>, scalar_prefetch = 0 : i64, scratch_operands = 0 : i64, tpu.core_type = #tpu.core_type<tc>, window_params = [{transform_indices = @transform_0, window_bounds = array<i64: 1, 8, 32>}, {transform_indices = @transform_1, window_bounds = array<i64: 1, 8, 32>}, {transform_indices = @transform_2, window_bounds = array<i64: 1, 8, 8>}, {transform_indices = @transform_3, window_bounds = array<i64: 1, 1, 8>}, {pipeline_mode = #tpu.pipeline_mode<synchronous>, transform_indices = @transform_4, window_bounds = array<i64: 32, 96>}, {pipeline_mode = #tpu.pipeline_mode<synchronous>, transform_indices = @transform_5, window_bounds = array<i64: 1, 96>}, {pipeline_mode = #tpu.pipeline_mode<synchronous>, transform_indices = @transform_6, window_bounds = array<i64: 32, 32>}, {pipeline_mode = #tpu.pipeline_mode<synchronous>, transform_indices = @transform_7, window_bounds = array<i64: 1, 32>}, {pipeline_mode = #tpu.pipeline_mode<synchronous>, transform_indices = @transform_8, window_bounds = array<i64: 1, 32>}, {pipeline_mode = #tpu.pipeline_mode<synchronous>, transform_indices = @transform_9, window_bounds = array<i64: 1, 32>}, {pipeline_mode = #tpu.pipeline_mode<synchronous>, transform_indices = @transform_10, window_bounds = array<i64: 32, 32>}, {pipeline_mode = #tpu.pipeline_mode<synchronous>, transform_indices = @transform_11, window_bounds = array<i64: 1, 32>}, {pipeline_mode = #tpu.pipeline_mode<synchronous>, transform_indices = @transform_12, window_bounds = array<i64: 32, 64>}, {pipeline_mode = #tpu.pipeline_mode<synchronous>, transform_indices = @transform_13, window_bounds = array<i64: 1, 64>}, {pipeline_mode = #tpu.pipeline_mode<synchronous>, transform_indices = @transform_14, window_bounds = array<i64: 32, 32>}, {pipeline_mode = #tpu.pipeline_mode<synchronous>, transform_indices = @transform_15, window_bounds = array<i64: 1, 32>}, {pipeline_mode = #tpu.pipeline_mode<synchronous>, transform_indices = @transform_16, window_bounds = array<i64: 1, 32>}, {pipeline_mode = #tpu.pipeline_mode<synchronous>, transform_indices = @transform_17, window_bounds = array<i64: 1, 32>}, {pipeline_mode = #tpu.pipeline_mode<synchronous>, transform_indices = @transform_18, window_bounds = array<i64: 32, 64>}, {pipeline_mode = #tpu.pipeline_mode<synchronous>, transform_indices = @transform_19, window_bounds = array<i64: 1, 64>}, {pipeline_mode = #tpu.pipeline_mode<synchronous>, transform_indices = @transform_20, window_bounds = array<i64: 64, 32>}, {pipeline_mode = #tpu.pipeline_mode<synchronous>, transform_indices = @transform_21, window_bounds = array<i64: 1, 32>}, {pipeline_mode = #tpu.pipeline_mode<synchronous>, transform_indices = @transform_22, window_bounds = array<i64: 1, 32>}, {pipeline_mode = #tpu.pipeline_mode<synchronous>, transform_indices = @transform_23, window_bounds = array<i64: 1, 32>}, {transform_indices = @transform_24, window_bounds = array<i64: 1, 8, 32>}, {transform_indices = @transform_25, window_bounds = array<i64: 1, 8, 8>}]} {
    %c0 = arith.constant 0 : index
    %c0_0 = arith.constant 0 : index
    %c0_1 = arith.constant 0 : index
    %0 = vector.load %arg1[%c0, %c0_0, %c0_1] : memref<1x8x32xf32, #tpu.memory_space<vmem>>, vector<1x8x32xf32>
    %1 = vector.shape_cast %0 : vector<1x8x32xf32> to vector<8x32xf32>
    %c0_2 = arith.constant 0 : index
    %c0_3 = arith.constant 0 : index
    %c0_4 = arith.constant 0 : index
    %2 = vector.load %arg2[%c0_2, %c0_3, %c0_4] : memref<1x8x32xf32, #tpu.memory_space<vmem>>, vector<1x8x32xf32>
    %3 = vector.shape_cast %2 : vector<1x8x32xf32> to vector<8x32xf32>
    %c0_5 = arith.constant 0 : index
    %c0_6 = arith.constant 0 : index
    %c0_7 = arith.constant 0 : index
    %4 = vector.load %arg3[%c0_5, %c0_6, %c0_7] : memref<1x8x8xf32, #tpu.memory_space<vmem>>, vector<1x8x8xf32>
    %5 = vector.shape_cast %4 : vector<1x8x8xf32> to vector<8x8xf32>
    %c0_8 = arith.constant 0 : index
    %c0_9 = arith.constant 0 : index
    %c0_10 = arith.constant 0 : index
    %6 = vector.load %arg4[%c0_8, %c0_9, %c0_10] : memref<1x1x8xf32, #tpu.memory_space<vmem>>, vector<1x1x8xf32>
    %7 = vector.shape_cast %6 : vector<1x1x8xf32> to vector<1x8xf32>
    %c0_11 = arith.constant 0 : index
    %c0_12 = arith.constant 0 : index
    %8 = vector.load %arg5[%c0_11, %c0_12] : memref<32x96xf32, #tpu.memory_space<vmem>>, vector<32x96xf32>
    %cst = arith.constant dense<0.000000e+00> : vector<8x96xf32>
    %9 = tpu.matmul %1, %8, %cst {dimension_numbers = #tpu.dot_dimension_numbers<[1], [0], [0], [1], [0, 0, 1, 1], [], []>} : vector<8x32xf32>, vector<32x96xf32>, vector<8x96xf32> -> vector<8x96xf32>
    %c0_13 = arith.constant 0 : index
    %c0_14 = arith.constant 0 : index
    %10 = vector.load %arg6[%c0_13, %c0_14] : memref<1x96xf32, #tpu.memory_space<vmem>>, vector<1x96xf32>
    %11 = vector.broadcast %10 : vector<1x96xf32> to vector<8x96xf32>
    %12 = arith.addf %9, %11 : vector<8x96xf32>
    %13 = vector.extract_strided_slice %12 {offsets = [0, 0], sizes = [8, 32], strides = [1, 1]} : vector<8x96xf32> to vector<8x32xf32>
    %14 = vector.extract_strided_slice %12 {offsets = [0, 32], sizes = [8, 32], strides = [1, 1]} : vector<8x96xf32> to vector<8x32xf32>
    %15 = vector.extract_strided_slice %12 {offsets = [0, 64], sizes = [8, 32], strides = [1, 1]} : vector<8x96xf32> to vector<8x32xf32>
    %c0_15 = arith.constant 0 : index
    %c0_16 = arith.constant 0 : index
    %16 = vector.load %arg7[%c0_15, %c0_16] : memref<32x32xf32, #tpu.memory_space<vmem>>, vector<32x32xf32>
    %c0_17 = arith.constant 0 : index
    %c0_18 = arith.constant 0 : index
    %17 = vector.load %arg8[%c0_17, %c0_18] : memref<1x32xf32, #tpu.memory_space<vmem>>, vector<1x32xf32>
    %cst_19 = arith.constant 0.000000e+00 : f32
    %18 = vector.broadcast %cst_19 : f32 to vector<8x32xf32>
    %19 = vector.extract_strided_slice %13 {offsets = [0, 0], sizes = [8, 8], strides = [1, 1]} : vector<8x32xf32> to vector<8x8xf32>
    %20 = vector.extract_strided_slice %14 {offsets = [0, 0], sizes = [8, 8], strides = [1, 1]} : vector<8x32xf32> to vector<8x8xf32>
    %21 = vector.extract_strided_slice %15 {offsets = [0, 0], sizes = [8, 8], strides = [1, 1]} : vector<8x32xf32> to vector<8x8xf32>
    %cst_20 = arith.constant dense<0.000000e+00> : vector<8x8xf32>
    %22 = tpu.matmul %19, %20, %cst_20 {dimension_numbers = #tpu.dot_dimension_numbers<[1], [1], [0], [0], [0, 0, 1, 0], [], []>} : vector<8x8xf32>, vector<8x8xf32>, vector<8x8xf32> -> vector<8x8xf32>
    %cst_21 = arith.constant 0.353553385 : f32
    %23 = vector.broadcast %cst_21 : f32 to vector<8x8xf32>
    %24 = arith.mulf %22, %23 : vector<8x8xf32>
    %25 = arith.addf %24, %5 : vector<8x8xf32>
    %cst_22 = arith.constant dense<0xFF800000> : vector<8xf32>
    %26 = vector.multi_reduction <maximumf>, %25, %cst_22 [1] : vector<8x8xf32> to vector<8xf32>
    %27 = vector.shape_cast %26 : vector<8xf32> to vector<8x1xf32>
    %28 = vector.broadcast %27 : vector<8x1xf32> to vector<8x8xf32>
    %29 = arith.subf %25, %28 : vector<8x8xf32>
    %30 = math.exp %29 : vector<8x8xf32>
    %cst_23 = arith.constant dense<0.000000e+00> : vector<8xf32>
    %31 = vector.multi_reduction <add>, %30, %cst_23 [1] : vector<8x8xf32> to vector<8xf32>
    %32 = vector.shape_cast %31 : vector<8xf32> to vector<8x1xf32>
    %33 = tpu.reciprocal %32 {approx = true} : vector<8x1xf32> -> vector<8x1xf32>
    %34 = vector.broadcast %33 : vector<8x1xf32> to vector<8x8xf32>
    %35 = arith.mulf %30, %34 : vector<8x8xf32>
    %cst_24 = arith.constant dense<0.000000e+00> : vector<8x8xf32>
    %36 = tpu.matmul %35, %21, %cst_24 {dimension_numbers = #tpu.dot_dimension_numbers<[1], [0], [0], [1], [0, 0, 1, 1], [], []>} : vector<8x8xf32>, vector<8x8xf32>, vector<8x8xf32> -> vector<8x8xf32>
    %37 = vector.extract_strided_slice %16 {offsets = [0, 0], sizes = [8, 32], strides = [1, 1]} : vector<32x32xf32> to vector<8x32xf32>
    %cst_25 = arith.constant dense<0.000000e+00> : vector<8x32xf32>
    %38 = tpu.matmul %36, %37, %cst_25 {dimension_numbers = #tpu.dot_dimension_numbers<[1], [0], [0], [1], [0, 0, 1, 1], [], []>} : vector<8x8xf32>, vector<8x32xf32>, vector<8x32xf32> -> vector<8x32xf32>
    %39 = arith.addf %18, %38 : vector<8x32xf32>
    %40 = vector.extract_strided_slice %13 {offsets = [0, 8], sizes = [8, 8], strides = [1, 1]} : vector<8x32xf32> to vector<8x8xf32>
    %41 = vector.extract_strided_slice %14 {offsets = [0, 8], sizes = [8, 8], strides = [1, 1]} : vector<8x32xf32> to vector<8x8xf32>
    %42 = vector.extract_strided_slice %15 {offsets = [0, 8], sizes = [8, 8], strides = [1, 1]} : vector<8x32xf32> to vector<8x8xf32>
    %cst_26 = arith.constant dense<0.000000e+00> : vector<8x8xf32>
    %43 = tpu.matmul %40, %41, %cst_26 {dimension_numbers = #tpu.dot_dimension_numbers<[1], [1], [0], [0], [0, 0, 1, 0], [], []>} : vector<8x8xf32>, vector<8x8xf32>, vector<8x8xf32> -> vector<8x8xf32>
    %cst_27 = arith.constant 0.353553385 : f32
    %44 = vector.broadcast %cst_27 : f32 to vector<8x8xf32>
    %45 = arith.mulf %43, %44 : vector<8x8xf32>
    %46 = arith.addf %45, %5 : vector<8x8xf32>
    %cst_28 = arith.constant dense<0xFF800000> : vector<8xf32>
    %47 = vector.multi_reduction <maximumf>, %46, %cst_28 [1] : vector<8x8xf32> to vector<8xf32>
    %48 = vector.shape_cast %47 : vector<8xf32> to vector<8x1xf32>
    %49 = vector.broadcast %48 : vector<8x1xf32> to vector<8x8xf32>
    %50 = arith.subf %46, %49 : vector<8x8xf32>
    %51 = math.exp %50 : vector<8x8xf32>
    %cst_29 = arith.constant dense<0.000000e+00> : vector<8xf32>
    %52 = vector.multi_reduction <add>, %51, %cst_29 [1] : vector<8x8xf32> to vector<8xf32>
    %53 = vector.shape_cast %52 : vector<8xf32> to vector<8x1xf32>
    %54 = tpu.reciprocal %53 {approx = true} : vector<8x1xf32> -> vector<8x1xf32>
    %55 = vector.broadcast %54 : vector<8x1xf32> to vector<8x8xf32>
    %56 = arith.mulf %51, %55 : vector<8x8xf32>
    %cst_30 = arith.constant dense<0.000000e+00> : vector<8x8xf32>
    %57 = tpu.matmul %56, %42, %cst_30 {dimension_numbers = #tpu.dot_dimension_numbers<[1], [0], [0], [1], [0, 0, 1, 1], [], []>} : vector<8x8xf32>, vector<8x8xf32>, vector<8x8xf32> -> vector<8x8xf32>
    %58 = vector.extract_strided_slice %16 {offsets = [8, 0], sizes = [8, 32], strides = [1, 1]} : vector<32x32xf32> to vector<8x32xf32>
    %cst_31 = arith.constant dense<0.000000e+00> : vector<8x32xf32>
    %59 = tpu.matmul %57, %58, %cst_31 {dimension_numbers = #tpu.dot_dimension_numbers<[1], [0], [0], [1], [0, 0, 1, 1], [], []>} : vector<8x8xf32>, vector<8x32xf32>, vector<8x32xf32> -> vector<8x32xf32>
    %60 = arith.addf %39, %59 : vector<8x32xf32>
    %61 = vector.extract_strided_slice %13 {offsets = [0, 16], sizes = [8, 8], strides = [1, 1]} : vector<8x32xf32> to vector<8x8xf32>
    %62 = vector.extract_strided_slice %14 {offsets = [0, 16], sizes = [8, 8], strides = [1, 1]} : vector<8x32xf32> to vector<8x8xf32>
    %63 = vector.extract_strided_slice %15 {offsets = [0, 16], sizes = [8, 8], strides = [1, 1]} : vector<8x32xf32> to vector<8x8xf32>
    %cst_32 = arith.constant dense<0.000000e+00> : vector<8x8xf32>
    %64 = tpu.matmul %61, %62, %cst_32 {dimension_numbers = #tpu.dot_dimension_numbers<[1], [1], [0], [0], [0, 0, 1, 0], [], []>} : vector<8x8xf32>, vector<8x8xf32>, vector<8x8xf32> -> vector<8x8xf32>
    %cst_33 = arith.constant 0.353553385 : f32
    %65 = vector.broadcast %cst_33 : f32 to vector<8x8xf32>
    %66 = arith.mulf %64, %65 : vector<8x8xf32>
    %67 = arith.addf %66, %5 : vector<8x8xf32>
    %cst_34 = arith.constant dense<0xFF800000> : vector<8xf32>
    %68 = vector.multi_reduction <maximumf>, %67, %cst_34 [1] : vector<8x8xf32> to vector<8xf32>
    %69 = vector.shape_cast %68 : vector<8xf32> to vector<8x1xf32>
    %70 = vector.broadcast %69 : vector<8x1xf32> to vector<8x8xf32>
    %71 = arith.subf %67, %70 : vector<8x8xf32>
    %72 = math.exp %71 : vector<8x8xf32>
    %cst_35 = arith.constant dense<0.000000e+00> : vector<8xf32>
    %73 = vector.multi_reduction <add>, %72, %cst_35 [1] : vector<8x8xf32> to vector<8xf32>
    %74 = vector.shape_cast %73 : vector<8xf32> to vector<8x1xf32>
    %75 = tpu.reciprocal %74 {approx = true} : vector<8x1xf32> -> vector<8x1xf32>
    %76 = vector.broadcast %75 : vector<8x1xf32> to vector<8x8xf32>
    %77 = arith.mulf %72, %76 : vector<8x8xf32>
    %cst_36 = arith.constant dense<0.000000e+00> : vector<8x8xf32>
    %78 = tpu.matmul %77, %63, %cst_36 {dimension_numbers = #tpu.dot_dimension_numbers<[1], [0], [0], [1], [0, 0, 1, 1], [], []>} : vector<8x8xf32>, vector<8x8xf32>, vector<8x8xf32> -> vector<8x8xf32>
    %79 = vector.extract_strided_slice %16 {offsets = [16, 0], sizes = [8, 32], strides = [1, 1]} : vector<32x32xf32> to vector<8x32xf32>
    %cst_37 = arith.constant dense<0.000000e+00> : vector<8x32xf32>
    %80 = tpu.matmul %78, %79, %cst_37 {dimension_numbers = #tpu.dot_dimension_numbers<[1], [0], [0], [1], [0, 0, 1, 1], [], []>} : vector<8x8xf32>, vector<8x32xf32>, vector<8x32xf32> -> vector<8x32xf32>
    %81 = arith.addf %60, %80 : vector<8x32xf32>
    %82 = vector.extract_strided_slice %13 {offsets = [0, 24], sizes = [8, 8], strides = [1, 1]} : vector<8x32xf32> to vector<8x8xf32>
    %83 = vector.extract_strided_slice %14 {offsets = [0, 24], sizes = [8, 8], strides = [1, 1]} : vector<8x32xf32> to vector<8x8xf32>
    %84 = vector.extract_strided_slice %15 {offsets = [0, 24], sizes = [8, 8], strides = [1, 1]} : vector<8x32xf32> to vector<8x8xf32>
    %cst_38 = arith.constant dense<0.000000e+00> : vector<8x8xf32>
    %85 = tpu.matmul %82, %83, %cst_38 {dimension_numbers = #tpu.dot_dimension_numbers<[1], [1], [0], [0], [0, 0, 1, 0], [], []>} : vector<8x8xf32>, vector<8x8xf32>, vector<8x8xf32> -> vector<8x8xf32>
    %cst_39 = arith.constant 0.353553385 : f32
    %86 = vector.broadcast %cst_39 : f32 to vector<8x8xf32>
    %87 = arith.mulf %85, %86 : vector<8x8xf32>
    %88 = arith.addf %87, %5 : vector<8x8xf32>
    %cst_40 = arith.constant dense<0xFF800000> : vector<8xf32>
    %89 = vector.multi_reduction <maximumf>, %88, %cst_40 [1] : vector<8x8xf32> to vector<8xf32>
    %90 = vector.shape_cast %89 : vector<8xf32> to vector<8x1xf32>
    %91 = vector.broadcast %90 : vector<8x1xf32> to vector<8x8xf32>
    %92 = arith.subf %88, %91 : vector<8x8xf32>
    %93 = math.exp %92 : vector<8x8xf32>
    %cst_41 = arith.constant dense<0.000000e+00> : vector<8xf32>
    %94 = vector.multi_reduction <add>, %93, %cst_41 [1] : vector<8x8xf32> to vector<8xf32>
    %95 = vector.shape_cast %94 : vector<8xf32> to vector<8x1xf32>
    %96 = tpu.reciprocal %95 {approx = true} : vector<8x1xf32> -> vector<8x1xf32>
    %97 = vector.broadcast %96 : vector<8x1xf32> to vector<8x8xf32>
    %98 = arith.mulf %93, %97 : vector<8x8xf32>
    %cst_42 = arith.constant dense<0.000000e+00> : vector<8x8xf32>
    %99 = tpu.matmul %98, %84, %cst_42 {dimension_numbers = #tpu.dot_dimension_numbers<[1], [0], [0], [1], [0, 0, 1, 1], [], []>} : vector<8x8xf32>, vector<8x8xf32>, vector<8x8xf32> -> vector<8x8xf32>
    %100 = vector.extract_strided_slice %16 {offsets = [24, 0], sizes = [8, 32], strides = [1, 1]} : vector<32x32xf32> to vector<8x32xf32>
    %cst_43 = arith.constant dense<0.000000e+00> : vector<8x32xf32>
    %101 = tpu.matmul %99, %100, %cst_43 {dimension_numbers = #tpu.dot_dimension_numbers<[1], [0], [0], [1], [0, 0, 1, 1], [], []>} : vector<8x8xf32>, vector<8x32xf32>, vector<8x32xf32> -> vector<8x32xf32>
    %102 = arith.addf %81, %101 : vector<8x32xf32>
    %103 = vector.broadcast %17 : vector<1x32xf32> to vector<8x32xf32>
    %104 = arith.addf %102, %103 : vector<8x32xf32>
    %105 = arith.addf %1, %104 : vector<8x32xf32>
    %c0_44 = arith.constant 0 : index
    %c0_45 = arith.constant 0 : index
    %106 = vector.load %arg9[%c0_44, %c0_45] : memref<1x32xf32, #tpu.memory_space<vmem>>, vector<1x32xf32>
    %c0_46 = arith.constant 0 : index
    %c0_47 = arith.constant 0 : index
    %107 = vector.load %arg10[%c0_46, %c0_47] : memref<1x32xf32, #tpu.memory_space<vmem>>, vector<1x32xf32>
    %cst_48 = arith.constant dense<0.000000e+00> : vector<8xf32>
    %108 = vector.multi_reduction <add>, %105, %cst_48 [1] : vector<8x32xf32> to vector<8xf32>
    %109 = vector.shape_cast %108 : vector<8xf32> to vector<8x1xf32>
    %cst_49 = arith.constant 3.200000e+01 : f32
    %110 = vector.broadcast %cst_49 : f32 to vector<8x1xf32>
    %111 = arith.divf %109, %110 : vector<8x1xf32>
    %112 = vector.broadcast %111 : vector<8x1xf32> to vector<8x32xf32>
    %113 = arith.subf %105, %112 : vector<8x32xf32>
    %114 = arith.mulf %113, %113 : vector<8x32xf32>
    %cst_50 = arith.constant dense<0.000000e+00> : vector<8xf32>
    %115 = vector.multi_reduction <add>, %114, %cst_50 [1] : vector<8x32xf32> to vector<8xf32>
    %116 = vector.shape_cast %115 : vector<8xf32> to vector<8x1xf32>
    %cst_51 = arith.constant 3.200000e+01 : f32
    %117 = vector.broadcast %cst_51 : f32 to vector<8x1xf32>
    %118 = arith.divf %116, %117 : vector<8x1xf32>
    %119 = vector.broadcast %111 : vector<8x1xf32> to vector<8x32xf32>
    %120 = arith.subf %105, %119 : vector<8x32xf32>
    %cst_52 = arith.constant 9.99999974E-6 : f32
    %121 = vector.broadcast %cst_52 : f32 to vector<8x1xf32>
    %122 = arith.addf %118, %121 : vector<8x1xf32>
    %123 = math.rsqrt %122 : vector<8x1xf32>
    %124 = vector.broadcast %123 : vector<8x1xf32> to vector<8x32xf32>
    %125 = arith.mulf %120, %124 : vector<8x32xf32>
    %126 = vector.broadcast %106 : vector<1x32xf32> to vector<8x32xf32>
    %127 = arith.mulf %125, %126 : vector<8x32xf32>
    %128 = vector.broadcast %107 : vector<1x32xf32> to vector<8x32xf32>
    %129 = arith.addf %127, %128 : vector<8x32xf32>
    %c0_53 = arith.constant 0 : index
    %c0_54 = arith.constant 0 : index
    %130 = vector.load %arg11[%c0_53, %c0_54] : memref<32x32xf32, #tpu.memory_space<vmem>>, vector<32x32xf32>
    %cst_55 = arith.constant dense<0.000000e+00> : vector<8x32xf32>
    %131 = tpu.matmul %129, %130, %cst_55 {dimension_numbers = #tpu.dot_dimension_numbers<[1], [0], [0], [1], [0, 0, 1, 1], [], []>} : vector<8x32xf32>, vector<32x32xf32>, vector<8x32xf32> -> vector<8x32xf32>
    %c0_56 = arith.constant 0 : index
    %c0_57 = arith.constant 0 : index
    %132 = vector.load %arg12[%c0_56, %c0_57] : memref<1x32xf32, #tpu.memory_space<vmem>>, vector<1x32xf32>
    %133 = vector.broadcast %132 : vector<1x32xf32> to vector<8x32xf32>
    %134 = arith.addf %131, %133 : vector<8x32xf32>
    %c0_58 = arith.constant 0 : index
    %c0_59 = arith.constant 0 : index
    %135 = vector.load %arg13[%c0_58, %c0_59] : memref<32x64xf32, #tpu.memory_space<vmem>>, vector<32x64xf32>
    %cst_60 = arith.constant dense<0.000000e+00> : vector<8x64xf32>
    %136 = tpu.matmul %3, %135, %cst_60 {dimension_numbers = #tpu.dot_dimension_numbers<[1], [0], [0], [1], [0, 0, 1, 1], [], []>} : vector<8x32xf32>, vector<32x64xf32>, vector<8x64xf32> -> vector<8x64xf32>
    %c0_61 = arith.constant 0 : index
    %c0_62 = arith.constant 0 : index
    %137 = vector.load %arg14[%c0_61, %c0_62] : memref<1x64xf32, #tpu.memory_space<vmem>>, vector<1x64xf32>
    %138 = vector.broadcast %137 : vector<1x64xf32> to vector<8x64xf32>
    %139 = arith.addf %136, %138 : vector<8x64xf32>
    %140 = vector.extract_strided_slice %139 {offsets = [0, 0], sizes = [8, 32], strides = [1, 1]} : vector<8x64xf32> to vector<8x32xf32>
    %141 = vector.extract_strided_slice %139 {offsets = [0, 32], sizes = [8, 32], strides = [1, 1]} : vector<8x64xf32> to vector<8x32xf32>
    %c0_63 = arith.constant 0 : index
    %c0_64 = arith.constant 0 : index
    %142 = vector.load %arg15[%c0_63, %c0_64] : memref<32x32xf32, #tpu.memory_space<vmem>>, vector<32x32xf32>
    %c0_65 = arith.constant 0 : index
    %c0_66 = arith.constant 0 : index
    %143 = vector.load %arg16[%c0_65, %c0_66] : memref<1x32xf32, #tpu.memory_space<vmem>>, vector<1x32xf32>
    %cst_67 = arith.constant 0.000000e+00 : f32
    %144 = vector.broadcast %cst_67 : f32 to vector<8x32xf32>
    %cst_68 = arith.constant 0.000000e+00 : f32
    %145 = vector.broadcast %cst_68 : f32 to vector<8x8xf32>
    %146 = vector.extract_strided_slice %134 {offsets = [0, 0], sizes = [8, 8], strides = [1, 1]} : vector<8x32xf32> to vector<8x8xf32>
    %147 = vector.extract_strided_slice %140 {offsets = [0, 0], sizes = [8, 8], strides = [1, 1]} : vector<8x32xf32> to vector<8x8xf32>
    %148 = vector.extract_strided_slice %141 {offsets = [0, 0], sizes = [8, 8], strides = [1, 1]} : vector<8x32xf32> to vector<8x8xf32>
    %cst_69 = arith.constant dense<0.000000e+00> : vector<8x8xf32>
    %149 = tpu.matmul %146, %147, %cst_69 {dimension_numbers = #tpu.dot_dimension_numbers<[1], [1], [0], [0], [0, 0, 1, 0], [], []>} : vector<8x8xf32>, vector<8x8xf32>, vector<8x8xf32> -> vector<8x8xf32>
    %cst_70 = arith.constant 0.353553385 : f32
    %150 = vector.broadcast %cst_70 : f32 to vector<8x8xf32>
    %151 = arith.mulf %149, %150 : vector<8x8xf32>
    %152 = vector.broadcast %7 : vector<1x8xf32> to vector<8x8xf32>
    %153 = arith.addf %151, %152 : vector<8x8xf32>
    %cst_71 = arith.constant dense<0xFF800000> : vector<8xf32>
    %154 = vector.multi_reduction <maximumf>, %153, %cst_71 [1] : vector<8x8xf32> to vector<8xf32>
    %155 = vector.shape_cast %154 : vector<8xf32> to vector<8x1xf32>
    %156 = vector.broadcast %155 : vector<8x1xf32> to vector<8x8xf32>
    %157 = arith.subf %153, %156 : vector<8x8xf32>
    %158 = math.exp %157 : vector<8x8xf32>
    %cst_72 = arith.constant dense<0.000000e+00> : vector<8xf32>
    %159 = vector.multi_reduction <add>, %158, %cst_72 [1] : vector<8x8xf32> to vector<8xf32>
    %160 = vector.shape_cast %159 : vector<8xf32> to vector<8x1xf32>
    %161 = tpu.reciprocal %160 {approx = true} : vector<8x1xf32> -> vector<8x1xf32>
    %162 = vector.broadcast %161 : vector<8x1xf32> to vector<8x8xf32>
    %163 = arith.mulf %158, %162 : vector<8x8xf32>
    %cst_73 = arith.constant dense<0.000000e+00> : vector<8x8xf32>
    %164 = tpu.matmul %163, %148, %cst_73 {dimension_numbers = #tpu.dot_dimension_numbers<[1], [0], [0], [1], [0, 0, 1, 1], [], []>} : vector<8x8xf32>, vector<8x8xf32>, vector<8x8xf32> -> vector<8x8xf32>
    %165 = vector.extract_strided_slice %142 {offsets = [0, 0], sizes = [8, 32], strides = [1, 1]} : vector<32x32xf32> to vector<8x32xf32>
    %cst_74 = arith.constant dense<0.000000e+00> : vector<8x32xf32>
    %166 = tpu.matmul %164, %165, %cst_74 {dimension_numbers = #tpu.dot_dimension_numbers<[1], [0], [0], [1], [0, 0, 1, 1], [], []>} : vector<8x8xf32>, vector<8x32xf32>, vector<8x32xf32> -> vector<8x32xf32>
    %167 = arith.addf %144, %166 : vector<8x32xf32>
    %168 = arith.addf %145, %163 : vector<8x8xf32>
    %169 = vector.extract_strided_slice %134 {offsets = [0, 8], sizes = [8, 8], strides = [1, 1]} : vector<8x32xf32> to vector<8x8xf32>
    %170 = vector.extract_strided_slice %140 {offsets = [0, 8], sizes = [8, 8], strides = [1, 1]} : vector<8x32xf32> to vector<8x8xf32>
    %171 = vector.extract_strided_slice %141 {offsets = [0, 8], sizes = [8, 8], strides = [1, 1]} : vector<8x32xf32> to vector<8x8xf32>
    %cst_75 = arith.constant dense<0.000000e+00> : vector<8x8xf32>
    %172 = tpu.matmul %169, %170, %cst_75 {dimension_numbers = #tpu.dot_dimension_numbers<[1], [1], [0], [0], [0, 0, 1, 0], [], []>} : vector<8x8xf32>, vector<8x8xf32>, vector<8x8xf32> -> vector<8x8xf32>
    %cst_76 = arith.constant 0.353553385 : f32
    %173 = vector.broadcast %cst_76 : f32 to vector<8x8xf32>
    %174 = arith.mulf %172, %173 : vector<8x8xf32>
    %175 = vector.broadcast %7 : vector<1x8xf32> to vector<8x8xf32>
    %176 = arith.addf %174, %175 : vector<8x8xf32>
    %cst_77 = arith.constant dense<0xFF800000> : vector<8xf32>
    %177 = vector.multi_reduction <maximumf>, %176, %cst_77 [1] : vector<8x8xf32> to vector<8xf32>
    %178 = vector.shape_cast %177 : vector<8xf32> to vector<8x1xf32>
    %179 = vector.broadcast %178 : vector<8x1xf32> to vector<8x8xf32>
    %180 = arith.subf %176, %179 : vector<8x8xf32>
    %181 = math.exp %180 : vector<8x8xf32>
    %cst_78 = arith.constant dense<0.000000e+00> : vector<8xf32>
    %182 = vector.multi_reduction <add>, %181, %cst_78 [1] : vector<8x8xf32> to vector<8xf32>
    %183 = vector.shape_cast %182 : vector<8xf32> to vector<8x1xf32>
    %184 = tpu.reciprocal %183 {approx = true} : vector<8x1xf32> -> vector<8x1xf32>
    %185 = vector.broadcast %184 : vector<8x1xf32> to vector<8x8xf32>
    %186 = arith.mulf %181, %185 : vector<8x8xf32>
    %cst_79 = arith.constant dense<0.000000e+00> : vector<8x8xf32>
    %187 = tpu.matmul %186, %171, %cst_79 {dimension_numbers = #tpu.dot_dimension_numbers<[1], [0], [0], [1], [0, 0, 1, 1], [], []>} : vector<8x8xf32>, vector<8x8xf32>, vector<8x8xf32> -> vector<8x8xf32>
    %188 = vector.extract_strided_slice %142 {offsets = [8, 0], sizes = [8, 32], strides = [1, 1]} : vector<32x32xf32> to vector<8x32xf32>
    %cst_80 = arith.constant dense<0.000000e+00> : vector<8x32xf32>
    %189 = tpu.matmul %187, %188, %cst_80 {dimension_numbers = #tpu.dot_dimension_numbers<[1], [0], [0], [1], [0, 0, 1, 1], [], []>} : vector<8x8xf32>, vector<8x32xf32>, vector<8x32xf32> -> vector<8x32xf32>
    %190 = arith.addf %167, %189 : vector<8x32xf32>
    %191 = arith.addf %168, %186 : vector<8x8xf32>
    %192 = vector.extract_strided_slice %134 {offsets = [0, 16], sizes = [8, 8], strides = [1, 1]} : vector<8x32xf32> to vector<8x8xf32>
    %193 = vector.extract_strided_slice %140 {offsets = [0, 16], sizes = [8, 8], strides = [1, 1]} : vector<8x32xf32> to vector<8x8xf32>
    %194 = vector.extract_strided_slice %141 {offsets = [0, 16], sizes = [8, 8], strides = [1, 1]} : vector<8x32xf32> to vector<8x8xf32>
    %cst_81 = arith.constant dense<0.000000e+00> : vector<8x8xf32>
    %195 = tpu.matmul %192, %193, %cst_81 {dimension_numbers = #tpu.dot_dimension_numbers<[1], [1], [0], [0], [0, 0, 1, 0], [], []>} : vector<8x8xf32>, vector<8x8xf32>, vector<8x8xf32> -> vector<8x8xf32>
    %cst_82 = arith.constant 0.353553385 : f32
    %196 = vector.broadcast %cst_82 : f32 to vector<8x8xf32>
    %197 = arith.mulf %195, %196 : vector<8x8xf32>
    %198 = vector.broadcast %7 : vector<1x8xf32> to vector<8x8xf32>
    %199 = arith.addf %197, %198 : vector<8x8xf32>
    %cst_83 = arith.constant dense<0xFF800000> : vector<8xf32>
    %200 = vector.multi_reduction <maximumf>, %199, %cst_83 [1] : vector<8x8xf32> to vector<8xf32>
    %201 = vector.shape_cast %200 : vector<8xf32> to vector<8x1xf32>
    %202 = vector.broadcast %201 : vector<8x1xf32> to vector<8x8xf32>
    %203 = arith.subf %199, %202 : vector<8x8xf32>
    %204 = math.exp %203 : vector<8x8xf32>
    %cst_84 = arith.constant dense<0.000000e+00> : vector<8xf32>
    %205 = vector.multi_reduction <add>, %204, %cst_84 [1] : vector<8x8xf32> to vector<8xf32>
    %206 = vector.shape_cast %205 : vector<8xf32> to vector<8x1xf32>
    %207 = tpu.reciprocal %206 {approx = true} : vector<8x1xf32> -> vector<8x1xf32>
    %208 = vector.broadcast %207 : vector<8x1xf32> to vector<8x8xf32>
    %209 = arith.mulf %204, %208 : vector<8x8xf32>
    %cst_85 = arith.constant dense<0.000000e+00> : vector<8x8xf32>
    %210 = tpu.matmul %209, %194, %cst_85 {dimension_numbers = #tpu.dot_dimension_numbers<[1], [0], [0], [1], [0, 0, 1, 1], [], []>} : vector<8x8xf32>, vector<8x8xf32>, vector<8x8xf32> -> vector<8x8xf32>
    %211 = vector.extract_strided_slice %142 {offsets = [16, 0], sizes = [8, 32], strides = [1, 1]} : vector<32x32xf32> to vector<8x32xf32>
    %cst_86 = arith.constant dense<0.000000e+00> : vector<8x32xf32>
    %212 = tpu.matmul %210, %211, %cst_86 {dimension_numbers = #tpu.dot_dimension_numbers<[1], [0], [0], [1], [0, 0, 1, 1], [], []>} : vector<8x8xf32>, vector<8x32xf32>, vector<8x32xf32> -> vector<8x32xf32>
    %213 = arith.addf %190, %212 : vector<8x32xf32>
    %214 = arith.addf %191, %209 : vector<8x8xf32>
    %215 = vector.extract_strided_slice %134 {offsets = [0, 24], sizes = [8, 8], strides = [1, 1]} : vector<8x32xf32> to vector<8x8xf32>
    %216 = vector.extract_strided_slice %140 {offsets = [0, 24], sizes = [8, 8], strides = [1, 1]} : vector<8x32xf32> to vector<8x8xf32>
    %217 = vector.extract_strided_slice %141 {offsets = [0, 24], sizes = [8, 8], strides = [1, 1]} : vector<8x32xf32> to vector<8x8xf32>
    %cst_87 = arith.constant dense<0.000000e+00> : vector<8x8xf32>
    %218 = tpu.matmul %215, %216, %cst_87 {dimension_numbers = #tpu.dot_dimension_numbers<[1], [1], [0], [0], [0, 0, 1, 0], [], []>} : vector<8x8xf32>, vector<8x8xf32>, vector<8x8xf32> -> vector<8x8xf32>
    %cst_88 = arith.constant 0.353553385 : f32
    %219 = vector.broadcast %cst_88 : f32 to vector<8x8xf32>
    %220 = arith.mulf %218, %219 : vector<8x8xf32>
    %221 = vector.broadcast %7 : vector<1x8xf32> to vector<8x8xf32>
    %222 = arith.addf %220, %221 : vector<8x8xf32>
    %cst_89 = arith.constant dense<0xFF800000> : vector<8xf32>
    %223 = vector.multi_reduction <maximumf>, %222, %cst_89 [1] : vector<8x8xf32> to vector<8xf32>
    %224 = vector.shape_cast %223 : vector<8xf32> to vector<8x1xf32>
    %225 = vector.broadcast %224 : vector<8x1xf32> to vector<8x8xf32>
    %226 = arith.subf %222, %225 : vector<8x8xf32>
    %227 = math.exp %226 : vector<8x8xf32>
    %cst_90 = arith.constant dense<0.000000e+00> : vector<8xf32>
    %228 = vector.multi_reduction <add>, %227, %cst_90 [1] : vector<8x8xf32> to vector<8xf32>
    %229 = vector.shape_cast %228 : vector<8xf32> to vector<8x1xf32>
    %230 = tpu.reciprocal %229 {approx = true} : vector<8x1xf32> -> vector<8x1xf32>
    %231 = vector.broadcast %230 : vector<8x1xf32> to vector<8x8xf32>
    %232 = arith.mulf %227, %231 : vector<8x8xf32>
    %cst_91 = arith.constant dense<0.000000e+00> : vector<8x8xf32>
    %233 = tpu.matmul %232, %217, %cst_91 {dimension_numbers = #tpu.dot_dimension_numbers<[1], [0], [0], [1], [0, 0, 1, 1], [], []>} : vector<8x8xf32>, vector<8x8xf32>, vector<8x8xf32> -> vector<8x8xf32>
    %234 = vector.extract_strided_slice %142 {offsets = [24, 0], sizes = [8, 32], strides = [1, 1]} : vector<32x32xf32> to vector<8x32xf32>
    %cst_92 = arith.constant dense<0.000000e+00> : vector<8x32xf32>
    %235 = tpu.matmul %233, %234, %cst_92 {dimension_numbers = #tpu.dot_dimension_numbers<[1], [0], [0], [1], [0, 0, 1, 1], [], []>} : vector<8x8xf32>, vector<8x32xf32>, vector<8x32xf32> -> vector<8x32xf32>
    %236 = arith.addf %213, %235 : vector<8x32xf32>
    %237 = arith.addf %214, %232 : vector<8x8xf32>
    %238 = vector.broadcast %143 : vector<1x32xf32> to vector<8x32xf32>
    %239 = arith.addf %236, %238 : vector<8x32xf32>
    %cst_93 = arith.constant 2.500000e-01 : f32
    %240 = vector.broadcast %cst_93 : f32 to vector<8x8xf32>
    %241 = arith.mulf %237, %240 : vector<8x8xf32>
    %242 = arith.addf %129, %239 : vector<8x32xf32>
    %c0_94 = arith.constant 0 : index
    %c0_95 = arith.constant 0 : index
    %243 = vector.load %arg17[%c0_94, %c0_95] : memref<1x32xf32, #tpu.memory_space<vmem>>, vector<1x32xf32>
    %c0_96 = arith.constant 0 : index
    %c0_97 = arith.constant 0 : index
    %244 = vector.load %arg18[%c0_96, %c0_97] : memref<1x32xf32, #tpu.memory_space<vmem>>, vector<1x32xf32>
    %cst_98 = arith.constant dense<0.000000e+00> : vector<8xf32>
    %245 = vector.multi_reduction <add>, %242, %cst_98 [1] : vector<8x32xf32> to vector<8xf32>
    %246 = vector.shape_cast %245 : vector<8xf32> to vector<8x1xf32>
    %cst_99 = arith.constant 3.200000e+01 : f32
    %247 = vector.broadcast %cst_99 : f32 to vector<8x1xf32>
    %248 = arith.divf %246, %247 : vector<8x1xf32>
    %249 = vector.broadcast %248 : vector<8x1xf32> to vector<8x32xf32>
    %250 = arith.subf %242, %249 : vector<8x32xf32>
    %251 = arith.mulf %250, %250 : vector<8x32xf32>
    %cst_100 = arith.constant dense<0.000000e+00> : vector<8xf32>
    %252 = vector.multi_reduction <add>, %251, %cst_100 [1] : vector<8x32xf32> to vector<8xf32>
    %253 = vector.shape_cast %252 : vector<8xf32> to vector<8x1xf32>
    %cst_101 = arith.constant 3.200000e+01 : f32
    %254 = vector.broadcast %cst_101 : f32 to vector<8x1xf32>
    %255 = arith.divf %253, %254 : vector<8x1xf32>
    %256 = vector.broadcast %248 : vector<8x1xf32> to vector<8x32xf32>
    %257 = arith.subf %242, %256 : vector<8x32xf32>
    %cst_102 = arith.constant 9.99999974E-6 : f32
    %258 = vector.broadcast %cst_102 : f32 to vector<8x1xf32>
    %259 = arith.addf %255, %258 : vector<8x1xf32>
    %260 = math.rsqrt %259 : vector<8x1xf32>
    %261 = vector.broadcast %260 : vector<8x1xf32> to vector<8x32xf32>
    %262 = arith.mulf %257, %261 : vector<8x32xf32>
    %263 = vector.broadcast %243 : vector<1x32xf32> to vector<8x32xf32>
    %264 = arith.mulf %262, %263 : vector<8x32xf32>
    %265 = vector.broadcast %244 : vector<1x32xf32> to vector<8x32xf32>
    %266 = arith.addf %264, %265 : vector<8x32xf32>
    %c0_103 = arith.constant 0 : index
    %c0_104 = arith.constant 0 : index
    %267 = vector.load %arg19[%c0_103, %c0_104] : memref<32x64xf32, #tpu.memory_space<vmem>>, vector<32x64xf32>
    %c0_105 = arith.constant 0 : index
    %c0_106 = arith.constant 0 : index
    %268 = vector.load %arg20[%c0_105, %c0_106] : memref<1x64xf32, #tpu.memory_space<vmem>>, vector<1x64xf32>
    %c0_107 = arith.constant 0 : index
    %c0_108 = arith.constant 0 : index
    %269 = vector.load %arg21[%c0_107, %c0_108] : memref<64x32xf32, #tpu.memory_space<vmem>>, vector<64x32xf32>
    %c0_109 = arith.constant 0 : index
    %c0_110 = arith.constant 0 : index
    %270 = vector.load %arg22[%c0_109, %c0_110] : memref<1x32xf32, #tpu.memory_space<vmem>>, vector<1x32xf32>
    %cst_111 = arith.constant dense<0.000000e+00> : vector<8x64xf32>
    %271 = tpu.matmul %266, %267, %cst_111 {dimension_numbers = #tpu.dot_dimension_numbers<[1], [0], [0], [1], [0, 0, 1, 1], [], []>} : vector<8x32xf32>, vector<32x64xf32>, vector<8x64xf32> -> vector<8x64xf32>
    %272 = vector.broadcast %268 : vector<1x64xf32> to vector<8x64xf32>
    %273 = arith.addf %271, %272 : vector<8x64xf32>
    %cst_112 = arith.constant 0.000000e+00 : f32
    %274 = vector.broadcast %cst_112 : f32 to vector<8x64xf32>
    %275 = arith.maximumf %273, %274 : vector<8x64xf32>
    %cst_113 = arith.constant dense<0.000000e+00> : vector<8x32xf32>
    %276 = tpu.matmul %275, %269, %cst_113 {dimension_numbers = #tpu.dot_dimension_numbers<[1], [0], [0], [1], [0, 0, 1, 1], [], []>} : vector<8x64xf32>, vector<64x32xf32>, vector<8x32xf32> -> vector<8x32xf32>
    %277 = vector.broadcast %270 : vector<1x32xf32> to vector<8x32xf32>
    %278 = arith.addf %276, %277 : vector<8x32xf32>
    %279 = arith.addf %266, %278 : vector<8x32xf32>
    %c0_114 = arith.constant 0 : index
    %c0_115 = arith.constant 0 : index
    %280 = vector.load %arg23[%c0_114, %c0_115] : memref<1x32xf32, #tpu.memory_space<vmem>>, vector<1x32xf32>
    %c0_116 = arith.constant 0 : index
    %c0_117 = arith.constant 0 : index
    %281 = vector.load %arg24[%c0_116, %c0_117] : memref<1x32xf32, #tpu.memory_space<vmem>>, vector<1x32xf32>
    %cst_118 = arith.constant dense<0.000000e+00> : vector<8xf32>
    %282 = vector.multi_reduction <add>, %279, %cst_118 [1] : vector<8x32xf32> to vector<8xf32>
    %283 = vector.shape_cast %282 : vector<8xf32> to vector<8x1xf32>
    %cst_119 = arith.constant 3.200000e+01 : f32
    %284 = vector.broadcast %cst_119 : f32 to vector<8x1xf32>
    %285 = arith.divf %283, %284 : vector<8x1xf32>
    %286 = vector.broadcast %285 : vector<8x1xf32> to vector<8x32xf32>
    %287 = arith.subf %279, %286 : vector<8x32xf32>
    %288 = arith.mulf %287, %287 : vector<8x32xf32>
    %cst_120 = arith.constant dense<0.000000e+00> : vector<8xf32>
    %289 = vector.multi_reduction <add>, %288, %cst_120 [1] : vector<8x32xf32> to vector<8xf32>
    %290 = vector.shape_cast %289 : vector<8xf32> to vector<8x1xf32>
    %cst_121 = arith.constant 3.200000e+01 : f32
    %291 = vector.broadcast %cst_121 : f32 to vector<8x1xf32>
    %292 = arith.divf %290, %291 : vector<8x1xf32>
    %293 = vector.broadcast %285 : vector<8x1xf32> to vector<8x32xf32>
    %294 = arith.subf %279, %293 : vector<8x32xf32>
    %cst_122 = arith.constant 9.99999974E-6 : f32
    %295 = vector.broadcast %cst_122 : f32 to vector<8x1xf32>
    %296 = arith.addf %292, %295 : vector<8x1xf32>
    %297 = math.rsqrt %296 : vector<8x1xf32>
    %298 = vector.broadcast %297 : vector<8x1xf32> to vector<8x32xf32>
    %299 = arith.mulf %294, %298 : vector<8x32xf32>
    %300 = vector.broadcast %280 : vector<1x32xf32> to vector<8x32xf32>
    %301 = arith.mulf %299, %300 : vector<8x32xf32>
    %302 = vector.broadcast %281 : vector<1x32xf32> to vector<8x32xf32>
    %303 = arith.addf %301, %302 : vector<8x32xf32>
    %c0_123 = arith.constant 0 : index
    %c0_124 = arith.constant 0 : index
    %c0_125 = arith.constant 0 : index
    %304 = vector.load %arg25[%c0_123, %c0_124, %c0_125] : memref<1x8x32xf32, #tpu.memory_space<vmem>>, vector<1x8x32xf32>
    %305 = vector.shape_cast %304 : vector<1x8x32xf32> to vector<8x32xf32>
    %306 = vector.shape_cast %303 : vector<8x32xf32> to vector<1x8x32xf32>
    tpu.vector_store %arg25[%c0_123, %c0_124, %c0_125], %306 {strides = array<i32>} : memref<1x8x32xf32, #tpu.memory_space<vmem>>, vector<1x8x32xf32>,
    %c0_126 = arith.constant 0 : index
    %c0_127 = arith.constant 0 : index
    %c0_128 = arith.constant 0 : index
    %307 = vector.load %arg26[%c0_126, %c0_127, %c0_128] : memref<1x8x8xf32, #tpu.memory_space<vmem>>, vector<1x8x8xf32>
    %308 = vector.shape_cast %307 : vector<1x8x8xf32> to vector<8x8xf32>
    %309 = vector.shape_cast %241 : vector<8x8xf32> to vector<1x8x8xf32>
    tpu.vector_store %arg26[%c0_126, %c0_127, %c0_128], %309 {strides = array<i32>} : memref<1x8x8xf32, #tpu.memory_space<vmem>>, vector<1x8x8xf32>,
    return
  }
  func.func @transform_0(%arg0: i32) -> (i32, i32, i32) {
    %c0_i32 = arith.constant 0 : i32
    %c0_i32_0 = arith.constant 0 : i32
    %c0_i32_1 = arith.constant 0 : i32
    return %arg0, %c0_i32, %c0_i32_0 : i32, i32, i32
  }
  func.func @transform_1(%arg0: i32) -> (i32, i32, i32) {
    %c0_i32 = arith.constant 0 : i32
    %c0_i32_0 = arith.constant 0 : i32
    %c0_i32_1 = arith.constant 0 : i32
    return %arg0, %c0_i32, %c0_i32_0 : i32, i32, i32
  }
  func.func @transform_2(%arg0: i32) -> (i32, i32, i32) {
    %c0_i32 = arith.constant 0 : i32
    %c0_i32_0 = arith.constant 0 : i32
    %c0_i32_1 = arith.constant 0 : i32
    return %arg0, %c0_i32, %c0_i32_0 : i32, i32, i32
  }
  func.func @transform_3(%arg0: i32) -> (i32, i32, i32) {
    %c0_i32 = arith.constant 0 : i32
    %c0_i32_0 = arith.constant 0 : i32
    %c0_i32_1 = arith.constant 0 : i32
    return %arg0, %c0_i32, %c0_i32_0 : i32, i32, i32
  }
  func.func @transform_4(%arg0: i32) -> (i32, i32) {
    %c0_i32 = arith.constant 0 : i32
    %c0_i32_0 = arith.constant 0 : i32
    %c0_i32_1 = arith.constant 0 : i32
    return %c0_i32, %c0_i32_0 : i32, i32
  }
  func.func @transform_5(%arg0: i32) -> (i32, i32) {
    %c0_i32 = arith.constant 0 : i32
    %c0_i32_0 = arith.constant 0 : i32
    %c0_i32_1 = arith.constant 0 : i32
    return %c0_i32, %c0_i32_0 : i32, i32
  }
  func.func @transform_6(%arg0: i32) -> (i32, i32) {
    %c0_i32 = arith.constant 0 : i32
    %c0_i32_0 = arith.constant 0 : i32
    %c0_i32_1 = arith.constant 0 : i32
    return %c0_i32, %c0_i32_0 : i32, i32
  }
  func.func @transform_7(%arg0: i32) -> (i32, i32) {
    %c0_i32 = arith.constant 0 : i32
    %c0_i32_0 = arith.constant 0 : i32
    %c0_i32_1 = arith.constant 0 : i32
    return %c0_i32, %c0_i32_0 : i32, i32
  }
  func.func @transform_8(%arg0: i32) -> (i32, i32) {
    %c0_i32 = arith.constant 0 : i32
    %c0_i32_0 = arith.constant 0 : i32
    %c0_i32_1 = arith.constant 0 : i32
    return %c0_i32, %c0_i32_0 : i32, i32
  }
  func.func @transform_9(%arg0: i32) -> (i32, i32) {
    %c0_i32 = arith.constant 0 : i32
    %c0_i32_0 = arith.constant 0 : i32
    %c0_i32_1 = arith.constant 0 : i32
    return %c0_i32, %c0_i32_0 : i32, i32
  }
  func.func @transform_10(%arg0: i32) -> (i32, i32) {
    %c0_i32 = arith.constant 0 : i32
    %c0_i32_0 = arith.constant 0 : i32
    %c0_i32_1 = arith.constant 0 : i32
    return %c0_i32, %c0_i32_0 : i32, i32
  }
  func.func @transform_11(%arg0: i32) -> (i32, i32) {
    %c0_i32 = arith.constant 0 : i32
    %c0_i32_0 = arith.constant 0 : i32
    %c0_i32_1 = arith.constant 0 : i32
    return %c0_i32, %c0_i32_0 : i32, i32
  }
  func.func @transform_12(%arg0: i32) -> (i32, i32) {
    %c0_i32 = arith.constant 0 : i32
    %c0_i32_0 = arith.constant 0 : i32
    %c0_i32_1 = arith.constant 0 : i32
    return %c0_i32, %c0_i32_0 : i32, i32
  }
  func.func @transform_13(%arg0: i32) -> (i32, i32) {
    %c0_i32 = arith.constant 0 : i32
    %c0_i32_0 = arith.constant 0 : i32
    %c0_i32_1 = arith.constant 0 : i32
    return %c0_i32, %c0_i32_0 : i32, i32
  }
  func.func @transform_14(%arg0: i32) -> (i32, i32) {
    %c0_i32 = arith.constant 0 : i32
    %c0_i32_0 = arith.constant 0 : i32
    %c0_i32_1 = arith.constant 0 : i32
    return %c0_i32, %c0_i32_0 : i32, i32
  }
  func.func @transform_15(%arg0: i32) -> (i32, i32) {
    %c0_i32 = arith.constant 0 : i32
    %c0_i32_0 = arith.constant 0 : i32
    %c0_i32_1 = arith.constant 0 : i32
    return %c0_i32, %c0_i32_0 : i32, i32
  }
  func.func @transform_16(%arg0: i32) -> (i32, i32) {
    %c0_i32 = arith.constant 0 : i32
    %c0_i32_0 = arith.constant 0 : i32
    %c0_i32_1 = arith.constant 0 : i32
    return %c0_i32, %c0_i32_0 : i32, i32
  }
  func.func @transform_17(%arg0: i32) -> (i32, i32) {
    %c0_i32 = arith.constant 0 : i32
    %c0_i32_0 = arith.constant 0 : i32
    %c0_i32_1 = arith.constant 0 : i32
    return %c0_i32, %c0_i32_0 : i32, i32
  }
  func.func @transform_18(%arg0: i32) -> (i32, i32) {
    %c0_i32 = arith.constant 0 : i32
    %c0_i32_0 = arith.constant 0 : i32
    %c0_i32_1 = arith.constant 0 : i32
    return %c0_i32, %c0_i32_0 : i32, i32
  }
  func.func @transform_19(%arg0: i32) -> (i32, i32) {
    %c0_i32 = arith.constant 0 : i32
    %c0_i32_0 = arith.constant 0 : i32
    %c0_i32_1 = arith.constant 0 : i32
    return %c0_i32, %c0_i32_0 : i32, i32
  }
  func.func @transform_20(%arg0: i32) -> (i32, i32) {
    %c0_i32 = arith.constant 0 : i32
    %c0_i32_0 = arith.constant 0 : i32
    %c0_i32_1 = arith.constant 0 : i32
    return %c0_i32, %c0_i32_0 : i32, i32
  }
  func.func @transform_21(%arg0: i32) -> (i32, i32) {
    %c0_i32 = arith.constant 0 : i32
    %c0_i32_0 = arith.constant 0 : i32
    %c0_i32_1 = arith.constant 0 : i32
    return %c0_i32, %c0_i32_0 : i32, i32
  }
  func.func @transform_22(%arg0: i32) -> (i32, i32) {
    %c0_i32 = arith.constant 0 : i32
    %c0_i32_0 = arith.constant 0 : i32
    %c0_i32_1 = arith.constant 0 : i32
    return %c0_i32, %c0_i32_0 : i32, i32
  }
  func.func @transform_23(%arg0: i32) -> (i32, i32) {
    %c0_i32 = arith.constant 0 : i32
    %c0_i32_0 = arith.constant 0 : i32
    %c0_i32_1 = arith.constant 0 : i32
    return %c0_i32, %c0_i32_0 : i32, i32
  }
  func.func @transform_24(%arg0: i32) -> (i32, i32, i32) {
    %c0_i32 = arith.constant 0 : i32
    %c0_i32_0 = arith.constant 0 : i32
    %c0_i32_1 = arith.constant 0 : i32
    return %arg0, %c0_i32, %c0_i32_0 : i32, i32, i32
  }
  func.func @transform_25(%arg0: i32) -> (i32, i32, i32) {
    %c0_i32 = arith.constant 0 : i32
    %c0_i32_0 = arith.constant 0 : i32
    %c0_i32_1 = arith.constant 0 : i32
    return %arg0, %c0_i32, %c0_i32_0 : i32, i32, i32
  }
}

module attributes {stable_mosaic.version = 11 : i64} {
  func.func @kernel(%arg0: i32, %arg1: memref<1x8x32xf32, #tpu.memory_space<vmem>>, %arg2: memref<1x8x32xf32, #tpu.memory_space<vmem>>, %arg3: memref<1x8x8xf32, #tpu.memory_space<vmem>>, %arg4: memref<1x1x8xf32, #tpu.memory_space<vmem>>, %arg5: memref<32x96xf32, #tpu.memory_space<vmem>>, %arg6: memref<1x96xf32, #tpu.memory_space<vmem>>, %arg7: memref<32x32xf32, #tpu.memory_space<vmem>>, %arg8: memref<1x32xf32, #tpu.memory_space<vmem>>, %arg9: memref<1x32xf32, #tpu.memory_space<vmem>>, %arg10: memref<1x32xf32, #tpu.memory_space<vmem>>, %arg11: memref<32x32xf32, #tpu.memory_space<vmem>>, %arg12: memref<1x32xf32, #tpu.memory_space<vmem>>, %arg13: memref<32x64xf32, #tpu.memory_space<vmem>>, %arg14: memref<1x64xf32, #tpu.memory_space<vmem>>, %arg15: memref<32x32xf32, #tpu.memory_space<vmem>>, %arg16: memref<1x32xf32, #tpu.memory_space<vmem>>, %arg17: memref<1x32xf32, #tpu.memory_space<vmem>>, %arg18: memref<1x32xf32, #tpu.memory_space<vmem>>, %arg19: memref<32x64xf32, #tpu.memory_space<vmem>>, %arg20: memref<1x64xf32, #tpu.memory_space<vmem>>, %arg21: memref<64x32xf32, #tpu.memory_space<vmem>>, %arg22: memref<1x32xf32, #tpu.memory_space<vmem>>, %arg23: memref<1x32xf32, #tpu.memory_space<vmem>>, %arg24: memref<1x32xf32, #tpu.memory_space<vmem>>, %arg25: memref<1x8x32xf32, #tpu.memory_space<vmem>>) attributes {dimension_semantics = [#tpu.dimension_semantics<parallel>], iteration_bounds = array<i64: 2>, scalar_prefetch = 0 : i64, scratch_operands = 0 : i64, tpu.core_type = #tpu.core_type<tc>, window_params = [{transform_indices = @transform_0, window_bounds = array<i64: 1, 8, 32>}, {transform_indices = @transform_1, window_bounds = array<i64: 1, 8, 32>}, {transform_indices = @transform_2, window_bounds = array<i64: 1, 8, 8>}, {transform_indices = @transform_3, window_bounds = array<i64: 1, 1, 8>}, {pipeline_mode = #tpu.pipeline_mode<synchronous>, transform_indices = @transform_4, window_bounds = array<i64: 32, 96>}, {pipeline_mode = #tpu.pipeline_mode<synchronous>, transform_indices = @transform_5, window_bounds = array<i64: 1, 96>}, {pipeline_mode = #tpu.pipeline_mode<synchronous>, transform_indices = @transform_6, window_bounds = array<i64: 32, 32>}, {pipeline_mode = #tpu.pipeline_mode<synchronous>, transform_indices = @transform_7, window_bounds = array<i64: 1, 32>}, {pipeline_mode = #tpu.pipeline_mode<synchronous>, transform_indices = @transform_8, window_bounds = array<i64: 1, 32>}, {pipeline_mode = #tpu.pipeline_mode<synchronous>, transform_indices = @transform_9, window_bounds = array<i64: 1, 32>}, {pipeline_mode = #tpu.pipeline_mode<synchronous>, transform_indices = @transform_10, window_bounds = array<i64: 32, 32>}, {pipeline_mode = #tpu.pipeline_mode<synchronous>, transform_indices = @transform_11, window_bounds = array<i64: 1, 32>}, {pipeline_mode = #tpu.pipeline_mode<synchronous>, transform_indices = @transform_12, window_bounds = array<i64: 32, 64>}, {pipeline_mode = #tpu.pipeline_mode<synchronous>, transform_indices = @transform_13, window_bounds = array<i64: 1, 64>}, {pipeline_mode = #tpu.pipeline_mode<synchronous>, transform_indices = @transform_14, window_bounds = array<i64: 32, 32>}, {pipeline_mode = #tpu.pipeline_mode<synchronous>, transform_indices = @transform_15, window_bounds = array<i64: 1, 32>}, {pipeline_mode = #tpu.pipeline_mode<synchronous>, transform_indices = @transform_16, window_bounds = array<i64: 1, 32>}, {pipeline_mode = #tpu.pipeline_mode<synchronous>, transform_indices = @transform_17, window_bounds = array<i64: 1, 32>}, {pipeline_mode = #tpu.pipeline_mode<synchronous>, transform_indices = @transform_18, window_bounds = array<i64: 32, 64>}, {pipeline_mode = #tpu.pipeline_mode<synchronous>, transform_indices = @transform_19, window_bounds = array<i64: 1, 64>}, {pipeline_mode = #tpu.pipeline_mode<synchronous>, transform_indices = @transform_20, window_bounds = array<i64: 64, 32>}, {pipeline_mode = #tpu.pipeline_mode<synchronous>, transform_indices = @transform_21, window_bounds = array<i64: 1, 32>}, {pipeline_mode = #tpu.pipeline_mode<synchronous>, transform_indices = @transform_22, window_bounds = array<i64: 1, 32>}, {pipeline_mode = #tpu.pipeline_mode<synchronous>, transform_indices = @transform_23, window_bounds = array<i64: 1, 32>}, {transform_indices = @transform_24, window_bounds = array<i64: 1, 8, 32>}]} {
    %c0 = arith.constant 0 : index
    %c0_0 = arith.constant 0 : index
    %c0_1 = arith.constant 0 : index
    %0 = vector.load %arg1[%c0, %c0_0, %c0_1] : memref<1x8x32xf32, #tpu.memory_space<vmem>>, vector<1x8x32xf32>
    %1 = vector.shape_cast %0 : vector<1x8x32xf32> to vector<8x32xf32>
    %c0_2 = arith.constant 0 : index
    %c0_3 = arith.constant 0 : index
    %c0_4 = arith.constant 0 : index
    %2 = vector.load %arg2[%c0_2, %c0_3, %c0_4] : memref<1x8x32xf32, #tpu.memory_space<vmem>>, vector<1x8x32xf32>
    %3 = vector.shape_cast %2 : vector<1x8x32xf32> to vector<8x32xf32>
    %c0_5 = arith.constant 0 : index
    %c0_6 = arith.constant 0 : index
    %c0_7 = arith.constant 0 : index
    %4 = vector.load %arg3[%c0_5, %c0_6, %c0_7] : memref<1x8x8xf32, #tpu.memory_space<vmem>>, vector<1x8x8xf32>
    %5 = vector.shape_cast %4 : vector<1x8x8xf32> to vector<8x8xf32>
    %c0_8 = arith.constant 0 : index
    %c0_9 = arith.constant 0 : index
    %c0_10 = arith.constant 0 : index
    %6 = vector.load %arg4[%c0_8, %c0_9, %c0_10] : memref<1x1x8xf32, #tpu.memory_space<vmem>>, vector<1x1x8xf32>
    %7 = vector.shape_cast %6 : vector<1x1x8xf32> to vector<1x8xf32>
    %c0_11 = arith.constant 0 : index
    %c0_12 = arith.constant 0 : index
    %8 = vector.load %arg5[%c0_11, %c0_12] : memref<32x96xf32, #tpu.memory_space<vmem>>, vector<32x96xf32>
    %cst = arith.constant dense<0.000000e+00> : vector<8x96xf32>
    %9 = tpu.matmul %1, %8, %cst {dimension_numbers = #tpu.dot_dimension_numbers<[1], [0], [0], [1], [0, 0, 1, 1], [], []>} : vector<8x32xf32>, vector<32x96xf32>, vector<8x96xf32> -> vector<8x96xf32>
    %c0_13 = arith.constant 0 : index
    %c0_14 = arith.constant 0 : index
    %10 = vector.load %arg6[%c0_13, %c0_14] : memref<1x96xf32, #tpu.memory_space<vmem>>, vector<1x96xf32>
    %11 = vector.broadcast %10 : vector<1x96xf32> to vector<8x96xf32>
    %12 = arith.addf %9, %11 : vector<8x96xf32>
    %13 = vector.extract_strided_slice %12 {offsets = [0, 0], sizes = [8, 32], strides = [1, 1]} : vector<8x96xf32> to vector<8x32xf32>
    %14 = vector.extract_strided_slice %12 {offsets = [0, 32], sizes = [8, 32], strides = [1, 1]} : vector<8x96xf32> to vector<8x32xf32>
    %15 = vector.extract_strided_slice %12 {offsets = [0, 64], sizes = [8, 32], strides = [1, 1]} : vector<8x96xf32> to vector<8x32xf32>
    %c0_15 = arith.constant 0 : index
    %c0_16 = arith.constant 0 : index
    %16 = vector.load %arg7[%c0_15, %c0_16] : memref<32x32xf32, #tpu.memory_space<vmem>>, vector<32x32xf32>
    %c0_17 = arith.constant 0 : index
    %c0_18 = arith.constant 0 : index
    %17 = vector.load %arg8[%c0_17, %c0_18] : memref<1x32xf32, #tpu.memory_space<vmem>>, vector<1x32xf32>
    %cst_19 = arith.constant 0.000000e+00 : f32
    %18 = vector.broadcast %cst_19 : f32 to vector<8x32xf32>
    %19 = vector.extract_strided_slice %13 {offsets = [0, 0], sizes = [8, 8], strides = [1, 1]} : vector<8x32xf32> to vector<8x8xf32>
    %20 = vector.extract_strided_slice %14 {offsets = [0, 0], sizes = [8, 8], strides = [1, 1]} : vector<8x32xf32> to vector<8x8xf32>
    %21 = vector.extract_strided_slice %15 {offsets = [0, 0], sizes = [8, 8], strides = [1, 1]} : vector<8x32xf32> to vector<8x8xf32>
    %cst_20 = arith.constant dense<0.000000e+00> : vector<8x8xf32>
    %22 = tpu.matmul %19, %20, %cst_20 {dimension_numbers = #tpu.dot_dimension_numbers<[1], [1], [0], [0], [0, 0, 1, 0], [], []>} : vector<8x8xf32>, vector<8x8xf32>, vector<8x8xf32> -> vector<8x8xf32>
    %cst_21 = arith.constant 0.353553385 : f32
    %23 = vector.broadcast %cst_21 : f32 to vector<8x8xf32>
    %24 = arith.mulf %22, %23 : vector<8x8xf32>
    %25 = arith.addf %24, %5 : vector<8x8xf32>
    %cst_22 = arith.constant dense<0xFF800000> : vector<8xf32>
    %26 = vector.multi_reduction <maximumf>, %25, %cst_22 [1] : vector<8x8xf32> to vector<8xf32>
    %27 = vector.shape_cast %26 : vector<8xf32> to vector<8x1xf32>
    %28 = vector.broadcast %27 : vector<8x1xf32> to vector<8x8xf32>
    %29 = arith.subf %25, %28 : vector<8x8xf32>
    %30 = math.exp %29 : vector<8x8xf32>
    %cst_23 = arith.constant dense<0.000000e+00> : vector<8xf32>
    %31 = vector.multi_reduction <add>, %30, %cst_23 [1] : vector<8x8xf32> to vector<8xf32>
    %32 = vector.shape_cast %31 : vector<8xf32> to vector<8x1xf32>
    %33 = tpu.reciprocal %32 {approx = true} : vector<8x1xf32> -> vector<8x1xf32>
    %34 = vector.broadcast %33 : vector<8x1xf32> to vector<8x8xf32>
    %35 = arith.mulf %30, %34 : vector<8x8xf32>
    %cst_24 = arith.constant dense<0.000000e+00> : vector<8x8xf32>
    %36 = tpu.matmul %35, %21, %cst_24 {dimension_numbers = #tpu.dot_dimension_numbers<[1], [0], [0], [1], [0, 0, 1, 1], [], []>} : vector<8x8xf32>, vector<8x8xf32>, vector<8x8xf32> -> vector<8x8xf32>
    %37 = vector.extract_strided_slice %16 {offsets = [0, 0], sizes = [8, 32], strides = [1, 1]} : vector<32x32xf32> to vector<8x32xf32>
    %cst_25 = arith.constant dense<0.000000e+00> : vector<8x32xf32>
    %38 = tpu.matmul %36, %37, %cst_25 {dimension_numbers = #tpu.dot_dimension_numbers<[1], [0], [0], [1], [0, 0, 1, 1], [], []>} : vector<8x8xf32>, vector<8x32xf32>, vector<8x32xf32> -> vector<8x32xf32>
    %39 = arith.addf %18, %38 : vector<8x32xf32>
    %40 = vector.extract_strided_slice %13 {offsets = [0, 8], sizes = [8, 8], strides = [1, 1]} : vector<8x32xf32> to vector<8x8xf32>
    %41 = vector.extract_strided_slice %14 {offsets = [0, 8], sizes = [8, 8], strides = [1, 1]} : vector<8x32xf32> to vector<8x8xf32>
    %42 = vector.extract_strided_slice %15 {offsets = [0, 8], sizes = [8, 8], strides = [1, 1]} : vector<8x32xf32> to vector<8x8xf32>
    %cst_26 = arith.constant dense<0.000000e+00> : vector<8x8xf32>
    %43 = tpu.matmul %40, %41, %cst_26 {dimension_numbers = #tpu.dot_dimension_numbers<[1], [1], [0], [0], [0, 0, 1, 0], [], []>} : vector<8x8xf32>, vector<8x8xf32>, vector<8x8xf32> -> vector<8x8xf32>
    %cst_27 = arith.constant 0.353553385 : f32
    %44 = vector.broadcast %cst_27 : f32 to vector<8x8xf32>
    %45 = arith.mulf %43, %44 : vector<8x8xf32>
    %46 = arith.addf %45, %5 : vector<8x8xf32>
    %cst_28 = arith.constant dense<0xFF800000> : vector<8xf32>
    %47 = vector.multi_reduction <maximumf>, %46, %cst_28 [1] : vector<8x8xf32> to vector<8xf32>
    %48 = vector.shape_cast %47 : vector<8xf32> to vector<8x1xf32>
    %49 = vector.broadcast %48 : vector<8x1xf32> to vector<8x8xf32>
    %50 = arith.subf %46, %49 : vector<8x8xf32>
    %51 = math.exp %50 : vector<8x8xf32>
    %cst_29 = arith.constant dense<0.000000e+00> : vector<8xf32>
    %52 = vector.multi_reduction <add>, %51, %cst_29 [1] : vector<8x8xf32> to vector<8xf32>
    %53 = vector.shape_cast %52 : vector<8xf32> to vector<8x1xf32>
    %54 = tpu.reciprocal %53 {approx = true} : vector<8x1xf32> -> vector<8x1xf32>
    %55 = vector.broadcast %54 : vector<8x1xf32> to vector<8x8xf32>
    %56 = arith.mulf %51, %55 : vector<8x8xf32>
    %cst_30 = arith.constant dense<0.000000e+00> : vector<8x8xf32>
    %57 = tpu.matmul %56, %42, %cst_30 {dimension_numbers = #tpu.dot_dimension_numbers<[1], [0], [0], [1], [0, 0, 1, 1], [], []>} : vector<8x8xf32>, vector<8x8xf32>, vector<8x8xf32> -> vector<8x8xf32>
    %58 = vector.extract_strided_slice %16 {offsets = [8, 0], sizes = [8, 32], strides = [1, 1]} : vector<32x32xf32> to vector<8x32xf32>
    %cst_31 = arith.constant dense<0.000000e+00> : vector<8x32xf32>
    %59 = tpu.matmul %57, %58, %cst_31 {dimension_numbers = #tpu.dot_dimension_numbers<[1], [0], [0], [1], [0, 0, 1, 1], [], []>} : vector<8x8xf32>, vector<8x32xf32>, vector<8x32xf32> -> vector<8x32xf32>
    %60 = arith.addf %39, %59 : vector<8x32xf32>
    %61 = vector.extract_strided_slice %13 {offsets = [0, 16], sizes = [8, 8], strides = [1, 1]} : vector<8x32xf32> to vector<8x8xf32>
    %62 = vector.extract_strided_slice %14 {offsets = [0, 16], sizes = [8, 8], strides = [1, 1]} : vector<8x32xf32> to vector<8x8xf32>
    %63 = vector.extract_strided_slice %15 {offsets = [0, 16], sizes = [8, 8], strides = [1, 1]} : vector<8x32xf32> to vector<8x8xf32>
    %cst_32 = arith.constant dense<0.000000e+00> : vector<8x8xf32>
    %64 = tpu.matmul %61, %62, %cst_32 {dimension_numbers = #tpu.dot_dimension_numbers<[1], [1], [0], [0], [0, 0, 1, 0], [], []>} : vector<8x8xf32>, vector<8x8xf32>, vector<8x8xf32> -> vector<8x8xf32>
    %cst_33 = arith.constant 0.353553385 : f32
    %65 = vector.broadcast %cst_33 : f32 to vector<8x8xf32>
    %66 = arith.mulf %64, %65 : vector<8x8xf32>
    %67 = arith.addf %66, %5 : vector<8x8xf32>
    %cst_34 = arith.constant dense<0xFF800000> : vector<8xf32>
    %68 = vector.multi_reduction <maximumf>, %67, %cst_34 [1] : vector<8x8xf32> to vector<8xf32>
    %69 = vector.shape_cast %68 : vector<8xf32> to vector<8x1xf32>
    %70 = vector.broadcast %69 : vector<8x1xf32> to vector<8x8xf32>
    %71 = arith.subf %67, %70 : vector<8x8xf32>
    %72 = math.exp %71 : vector<8x8xf32>
    %cst_35 = arith.constant dense<0.000000e+00> : vector<8xf32>
    %73 = vector.multi_reduction <add>, %72, %cst_35 [1] : vector<8x8xf32> to vector<8xf32>
    %74 = vector.shape_cast %73 : vector<8xf32> to vector<8x1xf32>
    %75 = tpu.reciprocal %74 {approx = true} : vector<8x1xf32> -> vector<8x1xf32>
    %76 = vector.broadcast %75 : vector<8x1xf32> to vector<8x8xf32>
    %77 = arith.mulf %72, %76 : vector<8x8xf32>
    %cst_36 = arith.constant dense<0.000000e+00> : vector<8x8xf32>
    %78 = tpu.matmul %77, %63, %cst_36 {dimension_numbers = #tpu.dot_dimension_numbers<[1], [0], [0], [1], [0, 0, 1, 1], [], []>} : vector<8x8xf32>, vector<8x8xf32>, vector<8x8xf32> -> vector<8x8xf32>
    %79 = vector.extract_strided_slice %16 {offsets = [16, 0], sizes = [8, 32], strides = [1, 1]} : vector<32x32xf32> to vector<8x32xf32>
    %cst_37 = arith.constant dense<0.000000e+00> : vector<8x32xf32>
    %80 = tpu.matmul %78, %79, %cst_37 {dimension_numbers = #tpu.dot_dimension_numbers<[1], [0], [0], [1], [0, 0, 1, 1], [], []>} : vector<8x8xf32>, vector<8x32xf32>, vector<8x32xf32> -> vector<8x32xf32>
    %81 = arith.addf %60, %80 : vector<8x32xf32>
    %82 = vector.extract_strided_slice %13 {offsets = [0, 24], sizes = [8, 8], strides = [1, 1]} : vector<8x32xf32> to vector<8x8xf32>
    %83 = vector.extract_strided_slice %14 {offsets = [0, 24], sizes = [8, 8], strides = [1, 1]} : vector<8x32xf32> to vector<8x8xf32>
    %84 = vector.extract_strided_slice %15 {offsets = [0, 24], sizes = [8, 8], strides = [1, 1]} : vector<8x32xf32> to vector<8x8xf32>
    %cst_38 = arith.constant dense<0.000000e+00> : vector<8x8xf32>
    %85 = tpu.matmul %82, %83, %cst_38 {dimension_numbers = #tpu.dot_dimension_numbers<[1], [1], [0], [0], [0, 0, 1, 0], [], []>} : vector<8x8xf32>, vector<8x8xf32>, vector<8x8xf32> -> vector<8x8xf32>
    %cst_39 = arith.constant 0.353553385 : f32
    %86 = vector.broadcast %cst_39 : f32 to vector<8x8xf32>
    %87 = arith.mulf %85, %86 : vector<8x8xf32>
    %88 = arith.addf %87, %5 : vector<8x8xf32>
    %cst_40 = arith.constant dense<0xFF800000> : vector<8xf32>
    %89 = vector.multi_reduction <maximumf>, %88, %cst_40 [1] : vector<8x8xf32> to vector<8xf32>
    %90 = vector.shape_cast %89 : vector<8xf32> to vector<8x1xf32>
    %91 = vector.broadcast %90 : vector<8x1xf32> to vector<8x8xf32>
    %92 = arith.subf %88, %91 : vector<8x8xf32>
    %93 = math.exp %92 : vector<8x8xf32>
    %cst_41 = arith.constant dense<0.000000e+00> : vector<8xf32>
    %94 = vector.multi_reduction <add>, %93, %cst_41 [1] : vector<8x8xf32> to vector<8xf32>
    %95 = vector.shape_cast %94 : vector<8xf32> to vector<8x1xf32>
    %96 = tpu.reciprocal %95 {approx = true} : vector<8x1xf32> -> vector<8x1xf32>
    %97 = vector.broadcast %96 : vector<8x1xf32> to vector<8x8xf32>
    %98 = arith.mulf %93, %97 : vector<8x8xf32>
    %cst_42 = arith.constant dense<0.000000e+00> : vector<8x8xf32>
    %99 = tpu.matmul %98, %84, %cst_42 {dimension_numbers = #tpu.dot_dimension_numbers<[1], [0], [0], [1], [0, 0, 1, 1], [], []>} : vector<8x8xf32>, vector<8x8xf32>, vector<8x8xf32> -> vector<8x8xf32>
    %100 = vector.extract_strided_slice %16 {offsets = [24, 0], sizes = [8, 32], strides = [1, 1]} : vector<32x32xf32> to vector<8x32xf32>
    %cst_43 = arith.constant dense<0.000000e+00> : vector<8x32xf32>
    %101 = tpu.matmul %99, %100, %cst_43 {dimension_numbers = #tpu.dot_dimension_numbers<[1], [0], [0], [1], [0, 0, 1, 1], [], []>} : vector<8x8xf32>, vector<8x32xf32>, vector<8x32xf32> -> vector<8x32xf32>
    %102 = arith.addf %81, %101 : vector<8x32xf32>
    %103 = vector.broadcast %17 : vector<1x32xf32> to vector<8x32xf32>
    %104 = arith.addf %102, %103 : vector<8x32xf32>
    %105 = arith.addf %1, %104 : vector<8x32xf32>
    %c0_44 = arith.constant 0 : index
    %c0_45 = arith.constant 0 : index
    %106 = vector.load %arg9[%c0_44, %c0_45] : memref<1x32xf32, #tpu.memory_space<vmem>>, vector<1x32xf32>
    %c0_46 = arith.constant 0 : index
    %c0_47 = arith.constant 0 : index
    %107 = vector.load %arg10[%c0_46, %c0_47] : memref<1x32xf32, #tpu.memory_space<vmem>>, vector<1x32xf32>
    %cst_48 = arith.constant dense<0.000000e+00> : vector<8xf32>
    %108 = vector.multi_reduction <add>, %105, %cst_48 [1] : vector<8x32xf32> to vector<8xf32>
    %109 = vector.shape_cast %108 : vector<8xf32> to vector<8x1xf32>
    %cst_49 = arith.constant 3.200000e+01 : f32
    %110 = vector.broadcast %cst_49 : f32 to vector<8x1xf32>
    %111 = arith.divf %109, %110 : vector<8x1xf32>
    %112 = vector.broadcast %111 : vector<8x1xf32> to vector<8x32xf32>
    %113 = arith.subf %105, %112 : vector<8x32xf32>
    %114 = arith.mulf %113, %113 : vector<8x32xf32>
    %cst_50 = arith.constant dense<0.000000e+00> : vector<8xf32>
    %115 = vector.multi_reduction <add>, %114, %cst_50 [1] : vector<8x32xf32> to vector<8xf32>
    %116 = vector.shape_cast %115 : vector<8xf32> to vector<8x1xf32>
    %cst_51 = arith.constant 3.200000e+01 : f32
    %117 = vector.broadcast %cst_51 : f32 to vector<8x1xf32>
    %118 = arith.divf %116, %117 : vector<8x1xf32>
    %119 = vector.broadcast %111 : vector<8x1xf32> to vector<8x32xf32>
    %120 = arith.subf %105, %119 : vector<8x32xf32>
    %cst_52 = arith.constant 9.99999974E-6 : f32
    %121 = vector.broadcast %cst_52 : f32 to vector<8x1xf32>
    %122 = arith.addf %118, %121 : vector<8x1xf32>
    %123 = math.rsqrt %122 : vector<8x1xf32>
    %124 = vector.broadcast %123 : vector<8x1xf32> to vector<8x32xf32>
    %125 = arith.mulf %120, %124 : vector<8x32xf32>
    %126 = vector.broadcast %106 : vector<1x32xf32> to vector<8x32xf32>
    %127 = arith.mulf %125, %126 : vector<8x32xf32>
    %128 = vector.broadcast %107 : vector<1x32xf32> to vector<8x32xf32>
    %129 = arith.addf %127, %128 : vector<8x32xf32>
    %c0_53 = arith.constant 0 : index
    %c0_54 = arith.constant 0 : index
    %130 = vector.load %arg11[%c0_53, %c0_54] : memref<32x32xf32, #tpu.memory_space<vmem>>, vector<32x32xf32>
    %cst_55 = arith.constant dense<0.000000e+00> : vector<8x32xf32>
    %131 = tpu.matmul %129, %130, %cst_55 {dimension_numbers = #tpu.dot_dimension_numbers<[1], [0], [0], [1], [0, 0, 1, 1], [], []>} : vector<8x32xf32>, vector<32x32xf32>, vector<8x32xf32> -> vector<8x32xf32>
    %c0_56 = arith.constant 0 : index
    %c0_57 = arith.constant 0 : index
    %132 = vector.load %arg12[%c0_56, %c0_57] : memref<1x32xf32, #tpu.memory_space<vmem>>, vector<1x32xf32>
    %133 = vector.broadcast %132 : vector<1x32xf32> to vector<8x32xf32>
    %134 = arith.addf %131, %133 : vector<8x32xf32>
    %c0_58 = arith.constant 0 : index
    %c0_59 = arith.constant 0 : index
    %135 = vector.load %arg13[%c0_58, %c0_59] : memref<32x64xf32, #tpu.memory_space<vmem>>, vector<32x64xf32>
    %cst_60 = arith.constant dense<0.000000e+00> : vector<8x64xf32>
    %136 = tpu.matmul %3, %135, %cst_60 {dimension_numbers = #tpu.dot_dimension_numbers<[1], [0], [0], [1], [0, 0, 1, 1], [], []>} : vector<8x32xf32>, vector<32x64xf32>, vector<8x64xf32> -> vector<8x64xf32>
    %c0_61 = arith.constant 0 : index
    %c0_62 = arith.constant 0 : index
    %137 = vector.load %arg14[%c0_61, %c0_62] : memref<1x64xf32, #tpu.memory_space<vmem>>, vector<1x64xf32>
    %138 = vector.broadcast %137 : vector<1x64xf32> to vector<8x64xf32>
    %139 = arith.addf %136, %138 : vector<8x64xf32>
    %140 = vector.extract_strided_slice %139 {offsets = [0, 0], sizes = [8, 32], strides = [1, 1]} : vector<8x64xf32> to vector<8x32xf32>
    %141 = vector.extract_strided_slice %139 {offsets = [0, 32], sizes = [8, 32], strides = [1, 1]} : vector<8x64xf32> to vector<8x32xf32>
    %c0_63 = arith.constant 0 : index
    %c0_64 = arith.constant 0 : index
    %142 = vector.load %arg15[%c0_63, %c0_64] : memref<32x32xf32, #tpu.memory_space<vmem>>, vector<32x32xf32>
    %c0_65 = arith.constant 0 : index
    %c0_66 = arith.constant 0 : index
    %143 = vector.load %arg16[%c0_65, %c0_66] : memref<1x32xf32, #tpu.memory_space<vmem>>, vector<1x32xf32>
    %cst_67 = arith.constant 0.000000e+00 : f32
    %144 = vector.broadcast %cst_67 : f32 to vector<8x32xf32>
    %145 = vector.extract_strided_slice %134 {offsets = [0, 0], sizes = [8, 8], strides = [1, 1]} : vector<8x32xf32> to vector<8x8xf32>
    %146 = vector.extract_strided_slice %140 {offsets = [0, 0], sizes = [8, 8], strides = [1, 1]} : vector<8x32xf32> to vector<8x8xf32>
    %147 = vector.extract_strided_slice %141 {offsets = [0, 0], sizes = [8, 8], strides = [1, 1]} : vector<8x32xf32> to vector<8x8xf32>
    %cst_68 = arith.constant dense<0.000000e+00> : vector<8x8xf32>
    %148 = tpu.matmul %145, %146, %cst_68 {dimension_numbers = #tpu.dot_dimension_numbers<[1], [1], [0], [0], [0, 0, 1, 0], [], []>} : vector<8x8xf32>, vector<8x8xf32>, vector<8x8xf32> -> vector<8x8xf32>
    %cst_69 = arith.constant 0.353553385 : f32
    %149 = vector.broadcast %cst_69 : f32 to vector<8x8xf32>
    %150 = arith.mulf %148, %149 : vector<8x8xf32>
    %151 = vector.broadcast %7 : vector<1x8xf32> to vector<8x8xf32>
    %152 = arith.addf %150, %151 : vector<8x8xf32>
    %cst_70 = arith.constant dense<0xFF800000> : vector<8xf32>
    %153 = vector.multi_reduction <maximumf>, %152, %cst_70 [1] : vector<8x8xf32> to vector<8xf32>
    %154 = vector.shape_cast %153 : vector<8xf32> to vector<8x1xf32>
    %155 = vector.broadcast %154 : vector<8x1xf32> to vector<8x8xf32>
    %156 = arith.subf %152, %155 : vector<8x8xf32>
    %157 = math.exp %156 : vector<8x8xf32>
    %cst_71 = arith.constant dense<0.000000e+00> : vector<8xf32>
    %158 = vector.multi_reduction <add>, %157, %cst_71 [1] : vector<8x8xf32> to vector<8xf32>
    %159 = vector.shape_cast %158 : vector<8xf32> to vector<8x1xf32>
    %160 = tpu.reciprocal %159 {approx = true} : vector<8x1xf32> -> vector<8x1xf32>
    %161 = vector.broadcast %160 : vector<8x1xf32> to vector<8x8xf32>
    %162 = arith.mulf %157, %161 : vector<8x8xf32>
    %cst_72 = arith.constant dense<0.000000e+00> : vector<8x8xf32>
    %163 = tpu.matmul %162, %147, %cst_72 {dimension_numbers = #tpu.dot_dimension_numbers<[1], [0], [0], [1], [0, 0, 1, 1], [], []>} : vector<8x8xf32>, vector<8x8xf32>, vector<8x8xf32> -> vector<8x8xf32>
    %164 = vector.extract_strided_slice %142 {offsets = [0, 0], sizes = [8, 32], strides = [1, 1]} : vector<32x32xf32> to vector<8x32xf32>
    %cst_73 = arith.constant dense<0.000000e+00> : vector<8x32xf32>
    %165 = tpu.matmul %163, %164, %cst_73 {dimension_numbers = #tpu.dot_dimension_numbers<[1], [0], [0], [1], [0, 0, 1, 1], [], []>} : vector<8x8xf32>, vector<8x32xf32>, vector<8x32xf32> -> vector<8x32xf32>
    %166 = arith.addf %144, %165 : vector<8x32xf32>
    %167 = vector.extract_strided_slice %134 {offsets = [0, 8], sizes = [8, 8], strides = [1, 1]} : vector<8x32xf32> to vector<8x8xf32>
    %168 = vector.extract_strided_slice %140 {offsets = [0, 8], sizes = [8, 8], strides = [1, 1]} : vector<8x32xf32> to vector<8x8xf32>
    %169 = vector.extract_strided_slice %141 {offsets = [0, 8], sizes = [8, 8], strides = [1, 1]} : vector<8x32xf32> to vector<8x8xf32>
    %cst_74 = arith.constant dense<0.000000e+00> : vector<8x8xf32>
    %170 = tpu.matmul %167, %168, %cst_74 {dimension_numbers = #tpu.dot_dimension_numbers<[1], [1], [0], [0], [0, 0, 1, 0], [], []>} : vector<8x8xf32>, vector<8x8xf32>, vector<8x8xf32> -> vector<8x8xf32>
    %cst_75 = arith.constant 0.353553385 : f32
    %171 = vector.broadcast %cst_75 : f32 to vector<8x8xf32>
    %172 = arith.mulf %170, %171 : vector<8x8xf32>
    %173 = vector.broadcast %7 : vector<1x8xf32> to vector<8x8xf32>
    %174 = arith.addf %172, %173 : vector<8x8xf32>
    %cst_76 = arith.constant dense<0xFF800000> : vector<8xf32>
    %175 = vector.multi_reduction <maximumf>, %174, %cst_76 [1] : vector<8x8xf32> to vector<8xf32>
    %176 = vector.shape_cast %175 : vector<8xf32> to vector<8x1xf32>
    %177 = vector.broadcast %176 : vector<8x1xf32> to vector<8x8xf32>
    %178 = arith.subf %174, %177 : vector<8x8xf32>
    %179 = math.exp %178 : vector<8x8xf32>
    %cst_77 = arith.constant dense<0.000000e+00> : vector<8xf32>
    %180 = vector.multi_reduction <add>, %179, %cst_77 [1] : vector<8x8xf32> to vector<8xf32>
    %181 = vector.shape_cast %180 : vector<8xf32> to vector<8x1xf32>
    %182 = tpu.reciprocal %181 {approx = true} : vector<8x1xf32> -> vector<8x1xf32>
    %183 = vector.broadcast %182 : vector<8x1xf32> to vector<8x8xf32>
    %184 = arith.mulf %179, %183 : vector<8x8xf32>
    %cst_78 = arith.constant dense<0.000000e+00> : vector<8x8xf32>
    %185 = tpu.matmul %184, %169, %cst_78 {dimension_numbers = #tpu.dot_dimension_numbers<[1], [0], [0], [1], [0, 0, 1, 1], [], []>} : vector<8x8xf32>, vector<8x8xf32>, vector<8x8xf32> -> vector<8x8xf32>
    %186 = vector.extract_strided_slice %142 {offsets = [8, 0], sizes = [8, 32], strides = [1, 1]} : vector<32x32xf32> to vector<8x32xf32>
    %cst_79 = arith.constant dense<0.000000e+00> : vector<8x32xf32>
    %187 = tpu.matmul %185, %186, %cst_79 {dimension_numbers = #tpu.dot_dimension_numbers<[1], [0], [0], [1], [0, 0, 1, 1], [], []>} : vector<8x8xf32>, vector<8x32xf32>, vector<8x32xf32> -> vector<8x32xf32>
    %188 = arith.addf %166, %187 : vector<8x32xf32>
    %189 = vector.extract_strided_slice %134 {offsets = [0, 16], sizes = [8, 8], strides = [1, 1]} : vector<8x32xf32> to vector<8x8xf32>
    %190 = vector.extract_strided_slice %140 {offsets = [0, 16], sizes = [8, 8], strides = [1, 1]} : vector<8x32xf32> to vector<8x8xf32>
    %191 = vector.extract_strided_slice %141 {offsets = [0, 16], sizes = [8, 8], strides = [1, 1]} : vector<8x32xf32> to vector<8x8xf32>
    %cst_80 = arith.constant dense<0.000000e+00> : vector<8x8xf32>
    %192 = tpu.matmul %189, %190, %cst_80 {dimension_numbers = #tpu.dot_dimension_numbers<[1], [1], [0], [0], [0, 0, 1, 0], [], []>} : vector<8x8xf32>, vector<8x8xf32>, vector<8x8xf32> -> vector<8x8xf32>
    %cst_81 = arith.constant 0.353553385 : f32
    %193 = vector.broadcast %cst_81 : f32 to vector<8x8xf32>
    %194 = arith.mulf %192, %193 : vector<8x8xf32>
    %195 = vector.broadcast %7 : vector<1x8xf32> to vector<8x8xf32>
    %196 = arith.addf %194, %195 : vector<8x8xf32>
    %cst_82 = arith.constant dense<0xFF800000> : vector<8xf32>
    %197 = vector.multi_reduction <maximumf>, %196, %cst_82 [1] : vector<8x8xf32> to vector<8xf32>
    %198 = vector.shape_cast %197 : vector<8xf32> to vector<8x1xf32>
    %199 = vector.broadcast %198 : vector<8x1xf32> to vector<8x8xf32>
    %200 = arith.subf %196, %199 : vector<8x8xf32>
    %201 = math.exp %200 : vector<8x8xf32>
    %cst_83 = arith.constant dense<0.000000e+00> : vector<8xf32>
    %202 = vector.multi_reduction <add>, %201, %cst_83 [1] : vector<8x8xf32> to vector<8xf32>
    %203 = vector.shape_cast %202 : vector<8xf32> to vector<8x1xf32>
    %204 = tpu.reciprocal %203 {approx = true} : vector<8x1xf32> -> vector<8x1xf32>
    %205 = vector.broadcast %204 : vector<8x1xf32> to vector<8x8xf32>
    %206 = arith.mulf %201, %205 : vector<8x8xf32>
    %cst_84 = arith.constant dense<0.000000e+00> : vector<8x8xf32>
    %207 = tpu.matmul %206, %191, %cst_84 {dimension_numbers = #tpu.dot_dimension_numbers<[1], [0], [0], [1], [0, 0, 1, 1], [], []>} : vector<8x8xf32>, vector<8x8xf32>, vector<8x8xf32> -> vector<8x8xf32>
    %208 = vector.extract_strided_slice %142 {offsets = [16, 0], sizes = [8, 32], strides = [1, 1]} : vector<32x32xf32> to vector<8x32xf32>
    %cst_85 = arith.constant dense<0.000000e+00> : vector<8x32xf32>
    %209 = tpu.matmul %207, %208, %cst_85 {dimension_numbers = #tpu.dot_dimension_numbers<[1], [0], [0], [1], [0, 0, 1, 1], [], []>} : vector<8x8xf32>, vector<8x32xf32>, vector<8x32xf32> -> vector<8x32xf32>
    %210 = arith.addf %188, %209 : vector<8x32xf32>
    %211 = vector.extract_strided_slice %134 {offsets = [0, 24], sizes = [8, 8], strides = [1, 1]} : vector<8x32xf32> to vector<8x8xf32>
    %212 = vector.extract_strided_slice %140 {offsets = [0, 24], sizes = [8, 8], strides = [1, 1]} : vector<8x32xf32> to vector<8x8xf32>
    %213 = vector.extract_strided_slice %141 {offsets = [0, 24], sizes = [8, 8], strides = [1, 1]} : vector<8x32xf32> to vector<8x8xf32>
    %cst_86 = arith.constant dense<0.000000e+00> : vector<8x8xf32>
    %214 = tpu.matmul %211, %212, %cst_86 {dimension_numbers = #tpu.dot_dimension_numbers<[1], [1], [0], [0], [0, 0, 1, 0], [], []>} : vector<8x8xf32>, vector<8x8xf32>, vector<8x8xf32> -> vector<8x8xf32>
    %cst_87 = arith.constant 0.353553385 : f32
    %215 = vector.broadcast %cst_87 : f32 to vector<8x8xf32>
    %216 = arith.mulf %214, %215 : vector<8x8xf32>
    %217 = vector.broadcast %7 : vector<1x8xf32> to vector<8x8xf32>
    %218 = arith.addf %216, %217 : vector<8x8xf32>
    %cst_88 = arith.constant dense<0xFF800000> : vector<8xf32>
    %219 = vector.multi_reduction <maximumf>, %218, %cst_88 [1] : vector<8x8xf32> to vector<8xf32>
    %220 = vector.shape_cast %219 : vector<8xf32> to vector<8x1xf32>
    %221 = vector.broadcast %220 : vector<8x1xf32> to vector<8x8xf32>
    %222 = arith.subf %218, %221 : vector<8x8xf32>
    %223 = math.exp %222 : vector<8x8xf32>
    %cst_89 = arith.constant dense<0.000000e+00> : vector<8xf32>
    %224 = vector.multi_reduction <add>, %223, %cst_89 [1] : vector<8x8xf32> to vector<8xf32>
    %225 = vector.shape_cast %224 : vector<8xf32> to vector<8x1xf32>
    %226 = tpu.reciprocal %225 {approx = true} : vector<8x1xf32> -> vector<8x1xf32>
    %227 = vector.broadcast %226 : vector<8x1xf32> to vector<8x8xf32>
    %228 = arith.mulf %223, %227 : vector<8x8xf32>
    %cst_90 = arith.constant dense<0.000000e+00> : vector<8x8xf32>
    %229 = tpu.matmul %228, %213, %cst_90 {dimension_numbers = #tpu.dot_dimension_numbers<[1], [0], [0], [1], [0, 0, 1, 1], [], []>} : vector<8x8xf32>, vector<8x8xf32>, vector<8x8xf32> -> vector<8x8xf32>
    %230 = vector.extract_strided_slice %142 {offsets = [24, 0], sizes = [8, 32], strides = [1, 1]} : vector<32x32xf32> to vector<8x32xf32>
    %cst_91 = arith.constant dense<0.000000e+00> : vector<8x32xf32>
    %231 = tpu.matmul %229, %230, %cst_91 {dimension_numbers = #tpu.dot_dimension_numbers<[1], [0], [0], [1], [0, 0, 1, 1], [], []>} : vector<8x8xf32>, vector<8x32xf32>, vector<8x32xf32> -> vector<8x32xf32>
    %232 = arith.addf %210, %231 : vector<8x32xf32>
    %233 = vector.broadcast %143 : vector<1x32xf32> to vector<8x32xf32>
    %234 = arith.addf %232, %233 : vector<8x32xf32>
    %235 = arith.addf %129, %234 : vector<8x32xf32>
    %c0_92 = arith.constant 0 : index
    %c0_93 = arith.constant 0 : index
    %236 = vector.load %arg17[%c0_92, %c0_93] : memref<1x32xf32, #tpu.memory_space<vmem>>, vector<1x32xf32>
    %c0_94 = arith.constant 0 : index
    %c0_95 = arith.constant 0 : index
    %237 = vector.load %arg18[%c0_94, %c0_95] : memref<1x32xf32, #tpu.memory_space<vmem>>, vector<1x32xf32>
    %cst_96 = arith.constant dense<0.000000e+00> : vector<8xf32>
    %238 = vector.multi_reduction <add>, %235, %cst_96 [1] : vector<8x32xf32> to vector<8xf32>
    %239 = vector.shape_cast %238 : vector<8xf32> to vector<8x1xf32>
    %cst_97 = arith.constant 3.200000e+01 : f32
    %240 = vector.broadcast %cst_97 : f32 to vector<8x1xf32>
    %241 = arith.divf %239, %240 : vector<8x1xf32>
    %242 = vector.broadcast %241 : vector<8x1xf32> to vector<8x32xf32>
    %243 = arith.subf %235, %242 : vector<8x32xf32>
    %244 = arith.mulf %243, %243 : vector<8x32xf32>
    %cst_98 = arith.constant dense<0.000000e+00> : vector<8xf32>
    %245 = vector.multi_reduction <add>, %244, %cst_98 [1] : vector<8x32xf32> to vector<8xf32>
    %246 = vector.shape_cast %245 : vector<8xf32> to vector<8x1xf32>
    %cst_99 = arith.constant 3.200000e+01 : f32
    %247 = vector.broadcast %cst_99 : f32 to vector<8x1xf32>
    %248 = arith.divf %246, %247 : vector<8x1xf32>
    %249 = vector.broadcast %241 : vector<8x1xf32> to vector<8x32xf32>
    %250 = arith.subf %235, %249 : vector<8x32xf32>
    %cst_100 = arith.constant 9.99999974E-6 : f32
    %251 = vector.broadcast %cst_100 : f32 to vector<8x1xf32>
    %252 = arith.addf %248, %251 : vector<8x1xf32>
    %253 = math.rsqrt %252 : vector<8x1xf32>
    %254 = vector.broadcast %253 : vector<8x1xf32> to vector<8x32xf32>
    %255 = arith.mulf %250, %254 : vector<8x32xf32>
    %256 = vector.broadcast %236 : vector<1x32xf32> to vector<8x32xf32>
    %257 = arith.mulf %255, %256 : vector<8x32xf32>
    %258 = vector.broadcast %237 : vector<1x32xf32> to vector<8x32xf32>
    %259 = arith.addf %257, %258 : vector<8x32xf32>
    %c0_101 = arith.constant 0 : index
    %c0_102 = arith.constant 0 : index
    %260 = vector.load %arg19[%c0_101, %c0_102] : memref<32x64xf32, #tpu.memory_space<vmem>>, vector<32x64xf32>
    %c0_103 = arith.constant 0 : index
    %c0_104 = arith.constant 0 : index
    %261 = vector.load %arg20[%c0_103, %c0_104] : memref<1x64xf32, #tpu.memory_space<vmem>>, vector<1x64xf32>
    %c0_105 = arith.constant 0 : index
    %c0_106 = arith.constant 0 : index
    %262 = vector.load %arg21[%c0_105, %c0_106] : memref<64x32xf32, #tpu.memory_space<vmem>>, vector<64x32xf32>
    %c0_107 = arith.constant 0 : index
    %c0_108 = arith.constant 0 : index
    %263 = vector.load %arg22[%c0_107, %c0_108] : memref<1x32xf32, #tpu.memory_space<vmem>>, vector<1x32xf32>
    %cst_109 = arith.constant dense<0.000000e+00> : vector<8x64xf32>
    %264 = tpu.matmul %259, %260, %cst_109 {dimension_numbers = #tpu.dot_dimension_numbers<[1], [0], [0], [1], [0, 0, 1, 1], [], []>} : vector<8x32xf32>, vector<32x64xf32>, vector<8x64xf32> -> vector<8x64xf32>
    %265 = vector.broadcast %261 : vector<1x64xf32> to vector<8x64xf32>
    %266 = arith.addf %264, %265 : vector<8x64xf32>
    %cst_110 = arith.constant 0.000000e+00 : f32
    %267 = vector.broadcast %cst_110 : f32 to vector<8x64xf32>
    %268 = arith.maximumf %266, %267 : vector<8x64xf32>
    %cst_111 = arith.constant dense<0.000000e+00> : vector<8x32xf32>
    %269 = tpu.matmul %268, %262, %cst_111 {dimension_numbers = #tpu.dot_dimension_numbers<[1], [0], [0], [1], [0, 0, 1, 1], [], []>} : vector<8x64xf32>, vector<64x32xf32>, vector<8x32xf32> -> vector<8x32xf32>
    %270 = vector.broadcast %263 : vector<1x32xf32> to vector<8x32xf32>
    %271 = arith.addf %269, %270 : vector<8x32xf32>
    %272 = arith.addf %259, %271 : vector<8x32xf32>
    %c0_112 = arith.constant 0 : index
    %c0_113 = arith.constant 0 : index
    %273 = vector.load %arg23[%c0_112, %c0_113] : memref<1x32xf32, #tpu.memory_space<vmem>>, vector<1x32xf32>
    %c0_114 = arith.constant 0 : index
    %c0_115 = arith.constant 0 : index
    %274 = vector.load %arg24[%c0_114, %c0_115] : memref<1x32xf32, #tpu.memory_space<vmem>>, vector<1x32xf32>
    %cst_116 = arith.constant dense<0.000000e+00> : vector<8xf32>
    %275 = vector.multi_reduction <add>, %272, %cst_116 [1] : vector<8x32xf32> to vector<8xf32>
    %276 = vector.shape_cast %275 : vector<8xf32> to vector<8x1xf32>
    %cst_117 = arith.constant 3.200000e+01 : f32
    %277 = vector.broadcast %cst_117 : f32 to vector<8x1xf32>
    %278 = arith.divf %276, %277 : vector<8x1xf32>
    %279 = vector.broadcast %278 : vector<8x1xf32> to vector<8x32xf32>
    %280 = arith.subf %272, %279 : vector<8x32xf32>
    %281 = arith.mulf %280, %280 : vector<8x32xf32>
    %cst_118 = arith.constant dense<0.000000e+00> : vector<8xf32>
    %282 = vector.multi_reduction <add>, %281, %cst_118 [1] : vector<8x32xf32> to vector<8xf32>
    %283 = vector.shape_cast %282 : vector<8xf32> to vector<8x1xf32>
    %cst_119 = arith.constant 3.200000e+01 : f32
    %284 = vector.broadcast %cst_119 : f32 to vector<8x1xf32>
    %285 = arith.divf %283, %284 : vector<8x1xf32>
    %286 = vector.broadcast %278 : vector<8x1xf32> to vector<8x32xf32>
    %287 = arith.subf %272, %286 : vector<8x32xf32>
    %cst_120 = arith.constant 9.99999974E-6 : f32
    %288 = vector.broadcast %cst_120 : f32 to vector<8x1xf32>
    %289 = arith.addf %285, %288 : vector<8x1xf32>
    %290 = math.rsqrt %289 : vector<8x1xf32>
    %291 = vector.broadcast %290 : vector<8x1xf32> to vector<8x32xf32>
    %292 = arith.mulf %287, %291 : vector<8x32xf32>
    %293 = vector.broadcast %273 : vector<1x32xf32> to vector<8x32xf32>
    %294 = arith.mulf %292, %293 : vector<8x32xf32>
    %295 = vector.broadcast %274 : vector<1x32xf32> to vector<8x32xf32>
    %296 = arith.addf %294, %295 : vector<8x32xf32>
    %c0_121 = arith.constant 0 : index
    %c0_122 = arith.constant 0 : index
    %c0_123 = arith.constant 0 : index
    %297 = vector.load %arg25[%c0_121, %c0_122, %c0_123] : memref<1x8x32xf32, #tpu.memory_space<vmem>>, vector<1x8x32xf32>
    %298 = vector.shape_cast %297 : vector<1x8x32xf32> to vector<8x32xf32>
    %299 = vector.shape_cast %296 : vector<8x32xf32> to vector<1x8x32xf32>
    tpu.vector_store %arg25[%c0_121, %c0_122, %c0_123], %299 {strides = array<i32>} : memref<1x8x32xf32, #tpu.memory_space<vmem>>, vector<1x8x32xf32>,
    return
  }
  func.func @transform_0(%arg0: i32) -> (i32, i32, i32) {
    %c0_i32 = arith.constant 0 : i32
    %c0_i32_0 = arith.constant 0 : i32
    %c0_i32_1 = arith.constant 0 : i32
    return %arg0, %c0_i32, %c0_i32_0 : i32, i32, i32
  }
  func.func @transform_1(%arg0: i32) -> (i32, i32, i32) {
    %c0_i32 = arith.constant 0 : i32
    %c0_i32_0 = arith.constant 0 : i32
    %c0_i32_1 = arith.constant 0 : i32
    return %arg0, %c0_i32, %c0_i32_0 : i32, i32, i32
  }
  func.func @transform_2(%arg0: i32) -> (i32, i32, i32) {
    %c0_i32 = arith.constant 0 : i32
    %c0_i32_0 = arith.constant 0 : i32
    %c0_i32_1 = arith.constant 0 : i32
    return %arg0, %c0_i32, %c0_i32_0 : i32, i32, i32
  }
  func.func @transform_3(%arg0: i32) -> (i32, i32, i32) {
    %c0_i32 = arith.constant 0 : i32
    %c0_i32_0 = arith.constant 0 : i32
    %c0_i32_1 = arith.constant 0 : i32
    return %arg0, %c0_i32, %c0_i32_0 : i32, i32, i32
  }
  func.func @transform_4(%arg0: i32) -> (i32, i32) {
    %c0_i32 = arith.constant 0 : i32
    %c0_i32_0 = arith.constant 0 : i32
    %c0_i32_1 = arith.constant 0 : i32
    return %c0_i32, %c0_i32_0 : i32, i32
  }
  func.func @transform_5(%arg0: i32) -> (i32, i32) {
    %c0_i32 = arith.constant 0 : i32
    %c0_i32_0 = arith.constant 0 : i32
    %c0_i32_1 = arith.constant 0 : i32
    return %c0_i32, %c0_i32_0 : i32, i32
  }
  func.func @transform_6(%arg0: i32) -> (i32, i32) {
    %c0_i32 = arith.constant 0 : i32
    %c0_i32_0 = arith.constant 0 : i32
    %c0_i32_1 = arith.constant 0 : i32
    return %c0_i32, %c0_i32_0 : i32, i32
  }
  func.func @transform_7(%arg0: i32) -> (i32, i32) {
    %c0_i32 = arith.constant 0 : i32
    %c0_i32_0 = arith.constant 0 : i32
    %c0_i32_1 = arith.constant 0 : i32
    return %c0_i32, %c0_i32_0 : i32, i32
  }
  func.func @transform_8(%arg0: i32) -> (i32, i32) {
    %c0_i32 = arith.constant 0 : i32
    %c0_i32_0 = arith.constant 0 : i32
    %c0_i32_1 = arith.constant 0 : i32
    return %c0_i32, %c0_i32_0 : i32, i32
  }
  func.func @transform_9(%arg0: i32) -> (i32, i32) {
    %c0_i32 = arith.constant 0 : i32
    %c0_i32_0 = arith.constant 0 : i32
    %c0_i32_1 = arith.constant 0 : i32
    return %c0_i32, %c0_i32_0 : i32, i32
  }
  func.func @transform_10(%arg0: i32) -> (i32, i32) {
    %c0_i32 = arith.constant 0 : i32
    %c0_i32_0 = arith.constant 0 : i32
    %c0_i32_1 = arith.constant 0 : i32
    return %c0_i32, %c0_i32_0 : i32, i32
  }
  func.func @transform_11(%arg0: i32) -> (i32, i32) {
    %c0_i32 = arith.constant 0 : i32
    %c0_i32_0 = arith.constant 0 : i32
    %c0_i32_1 = arith.constant 0 : i32
    return %c0_i32, %c0_i32_0 : i32, i32
  }
  func.func @transform_12(%arg0: i32) -> (i32, i32) {
    %c0_i32 = arith.constant 0 : i32
    %c0_i32_0 = arith.constant 0 : i32
    %c0_i32_1 = arith.constant 0 : i32
    return %c0_i32, %c0_i32_0 : i32, i32
  }
  func.func @transform_13(%arg0: i32) -> (i32, i32) {
    %c0_i32 = arith.constant 0 : i32
    %c0_i32_0 = arith.constant 0 : i32
    %c0_i32_1 = arith.constant 0 : i32
    return %c0_i32, %c0_i32_0 : i32, i32
  }
  func.func @transform_14(%arg0: i32) -> (i32, i32) {
    %c0_i32 = arith.constant 0 : i32
    %c0_i32_0 = arith.constant 0 : i32
    %c0_i32_1 = arith.constant 0 : i32
    return %c0_i32, %c0_i32_0 : i32, i32
  }
  func.func @transform_15(%arg0: i32) -> (i32, i32) {
    %c0_i32 = arith.constant 0 : i32
    %c0_i32_0 = arith.constant 0 : i32
    %c0_i32_1 = arith.constant 0 : i32
    return %c0_i32, %c0_i32_0 : i32, i32
  }
  func.func @transform_16(%arg0: i32) -> (i32, i32) {
    %c0_i32 = arith.constant 0 : i32
    %c0_i32_0 = arith.constant 0 : i32
    %c0_i32_1 = arith.constant 0 : i32
    return %c0_i32, %c0_i32_0 : i32, i32
  }
  func.func @transform_17(%arg0: i32) -> (i32, i32) {
    %c0_i32 = arith.constant 0 : i32
    %c0_i32_0 = arith.constant 0 : i32
    %c0_i32_1 = arith.constant 0 : i32
    return %c0_i32, %c0_i32_0 : i32, i32
  }
  func.func @transform_18(%arg0: i32) -> (i32, i32) {
    %c0_i32 = arith.constant 0 : i32
    %c0_i32_0 = arith.constant 0 : i32
    %c0_i32_1 = arith.constant 0 : i32
    return %c0_i32, %c0_i32_0 : i32, i32
  }
  func.func @transform_19(%arg0: i32) -> (i32, i32) {
    %c0_i32 = arith.constant 0 : i32
    %c0_i32_0 = arith.constant 0 : i32
    %c0_i32_1 = arith.constant 0 : i32
    return %c0_i32, %c0_i32_0 : i32, i32
  }
  func.func @transform_20(%arg0: i32) -> (i32, i32) {
    %c0_i32 = arith.constant 0 : i32
    %c0_i32_0 = arith.constant 0 : i32
    %c0_i32_1 = arith.constant 0 : i32
    return %c0_i32, %c0_i32_0 : i32, i32
  }
  func.func @transform_21(%arg0: i32) -> (i32, i32) {
    %c0_i32 = arith.constant 0 : i32
    %c0_i32_0 = arith.constant 0 : i32
    %c0_i32_1 = arith.constant 0 : i32
    return %c0_i32, %c0_i32_0 : i32, i32
  }
  func.func @transform_22(%arg0: i32) -> (i32, i32) {
    %c0_i32 = arith.constant 0 : i32
    %c0_i32_0 = arith.constant 0 : i32
    %c0_i32_1 = arith.constant 0 : i32
    return %c0_i32, %c0_i32_0 : i32, i32
  }
  func.func @transform_23(%arg0: i32) -> (i32, i32) {
    %c0_i32 = arith.constant 0 : i32
    %c0_i32_0 = arith.constant 0 : i32
    %c0_i32_1 = arith.constant 0 : i32
    return %c0_i32, %c0_i32_0 : i32, i32
  }
  func.func @transform_24(%arg0: i32) -> (i32, i32, i32) {
    %c0_i32 = arith.constant 0 : i32
    %c0_i32_0 = arith.constant 0 : i32
    %c0_i32_1 = arith.constant 0 : i32
    return %arg0, %c0_i32, %c0_i32_0 : i32, i32, i32
  }
}

module attributes {stable_mosaic.version = 11 : i64} {
  func.func @generator_kernel(%arg0: i32, %arg1: memref<16x32xf32, #tpu.memory_space<vmem>>, %arg2: memref<64x32xf32, #tpu.memory_space<vmem>>, %arg3: memref<16x64xf32, #tpu.memory_space<vmem>>) attributes {dimension_semantics = [#tpu.dimension_semantics<arbitrary>], iteration_bounds = array<i64: 1>, scalar_prefetch = 0 : i64, scratch_operands = 0 : i64, tpu.core_type = #tpu.core_type<tc>, window_params = [{pipeline_mode = #tpu.pipeline_mode<synchronous>, transform_indices = @transform_0, window_bounds = array<i64: 16, 32>}, {pipeline_mode = #tpu.pipeline_mode<synchronous>, transform_indices = @transform_1, window_bounds = array<i64: 64, 32>}, {pipeline_mode = #tpu.pipeline_mode<synchronous>, transform_indices = @transform_2, window_bounds = array<i64: 16, 64>}]} {
    %c0 = arith.constant 0 : index
    %c0_0 = arith.constant 0 : index
    %0 = vector.load %arg1[%c0, %c0_0] : memref<16x32xf32, #tpu.memory_space<vmem>>, vector<16x32xf32>
    %c0_1 = arith.constant 0 : index
    %c0_2 = arith.constant 0 : index
    %1 = vector.load %arg2[%c0_1, %c0_2] : memref<64x32xf32, #tpu.memory_space<vmem>>, vector<64x32xf32>
    %cst = arith.constant dense<0.000000e+00> : vector<16x64xf32>
    %2 = tpu.matmul %0, %1, %cst {dimension_numbers = #tpu.dot_dimension_numbers<[1], [1], [0], [0], [0, 0, 1, 0], [], []>} : vector<16x32xf32>, vector<64x32xf32>, vector<16x64xf32> -> vector<16x64xf32>
    %cst_3 = arith.constant dense<0xFF800000> : vector<16xf32>
    %3 = vector.multi_reduction <maximumf>, %2, %cst_3 [1] : vector<16x64xf32> to vector<16xf32>
    %4 = vector.shape_cast %3 : vector<16xf32> to vector<16x1xf32>
    %5 = vector.broadcast %4 : vector<16x1xf32> to vector<16x64xf32>
    %6 = arith.subf %2, %5 : vector<16x64xf32>
    %7 = math.exp %6 : vector<16x64xf32>
    %cst_4 = arith.constant dense<0.000000e+00> : vector<16xf32>
    %8 = vector.multi_reduction <add>, %7, %cst_4 [1] : vector<16x64xf32> to vector<16xf32>
    %9 = vector.shape_cast %8 : vector<16xf32> to vector<16x1xf32>
    %10 = math.log %9 : vector<16x1xf32>
    %11 = arith.addf %10, %4 : vector<16x1xf32>
    %12 = vector.broadcast %11 : vector<16x1xf32> to vector<16x64xf32>
    %13 = arith.subf %2, %12 : vector<16x64xf32>
    %c0_5 = arith.constant 0 : index
    %c0_6 = arith.constant 0 : index
    %14 = vector.load %arg3[%c0_5, %c0_6] : memref<16x64xf32, #tpu.memory_space<vmem>>, vector<16x64xf32>
    tpu.vector_store %arg3[%c0_5, %c0_6], %13 {strides = array<i32>} : memref<16x64xf32, #tpu.memory_space<vmem>>, vector<16x64xf32>,
    return
  }
  func.func @transform_0(%arg0: i32) -> (i32, i32) {
    %c0_i32 = arith.constant 0 : i32
    %c0_i32_0 = arith.constant 0 : i32
    %c0_i32_1 = arith.constant 0 : i32
    return %c0_i32, %c0_i32_0 : i32, i32
  }
  func.func @transform_1(%arg0: i32) -> (i32, i32) {
    %c0_i32 = arith.constant 0 : i32
    %c0_i32_0 = arith.constant 0 : i32
    %c0_i32_1 = arith.constant 0 : i32
    return %c0_i32, %c0_i32_0 : i32, i32
  }
  func.func @transform_2(%arg0: i32) -> (i32, i32) {
    %c0_i32 = arith.constant 0 : i32
    %c0_i32_0 = arith.constant 0 : i32
    %c0_i32_1 = arith.constant 0 : i32
    return %c0_i32, %c0_i32_0 : i32, i32
  }
}

</mosaic_0001>

<bundles_post_ra>
// kernel: transformer_forward.13
= control target key start
LH: loop header
LB: loop body
LE: loop exit
PB: predicated region body
PF: predicated region fallthrough
CT: control target
= control target key end

     0   :  { %s2186_s29 = smov 0   ;;  %s2406_s0 = inlined_call_operand.vmem [shape: f32[2,8,32], index: 0, kind: input, shape index: {}]   ;;  %s2407_s1 = inlined_call_operand.vmem [shape: f32[2,1,8], index: 1, kind: input, shape index: {}]   ;;  %s2408_s2 = inlined_call_operand.vmem [shape: f32[32,96], index: 2, kind: input, shape index: {}]   ;;  %s2409_s3 = inlined_call_operand.vmem [shape: f32[1,96], index: 3, kind: input, shape index: {}]   ;;  %s2410_s4 = inlined_call_operand.vmem [shape: f32[32,32], index: 4, kind: input, shape index: {}]   ;;  %s2411_s5 = inlined_call_operand.vmem [shape: f32[1,32], index: 5, kind: input, shape index: {}]   ;;  %s2412_s6 = inlined_call_operand.vmem [shape: f32[1,32], index: 6, kind: input, shape index: {}]   ;;  %s2413_s7 = inlined_call_operand.vmem [shape: f32[1,32], index: 7, kind: input, shape index: {}]   ;;  %s2414_s8 = inlined_call_operand.vmem [shape: f32[32,64], index: 8, kind: input, shape index: {}]   ;;  %s2415_s9 = inlined_call_operand.vmem [shape: f32[1,64], index: 9, kind: input, shape index: {}]   ;;  %s2416_s10 = inlined_call_operand.vmem [shape: f32[64,32], index: 10, kind: input, shape index: {}]   ;;  %s2417_s11 = inlined_call_operand.vmem [shape: f32[1,32], index: 11, kind: input, shape index: {}]   ;;  %s2418_s12 = inlined_call_operand.vmem [shape: f32[1,32], index: 12, kind: input, shape index: {}]   ;;  %s2419_s13 = inlined_call_operand.vmem [shape: f32[1,32], index: 13, kind: input, shape index: {}]   ;;  %s2420_s14 = inlined_call_operand.vmem [shape: f32[2,8,32], index: 14, kind: output, shape index: {}]  }
   0x1 LB: > { %s1842_s30 = sadd.s32 4294967295, %s2095_s29   ;;  %p1846_p0 = scmp.ge.s32.totalorder %s2095_s29, 1  ;;  %s2095_s29 = sphi %s2186_s29, %s24_s29  }
   0x2   : > { %p419_p1 = scmp.lt.s32.totalorder %s2095_s29, 3 }
   0x4   : > { %p420_p2 = pnand %p1846_p0, %p419_p1 }
   0x5   : > { %v479_v0 = vld [vmem:[%s2408_s2] sm:$0xff] (!%p420_p2)  ;;  %v480_v1 = vld [vmem:[%s2408_s2 + $0x8] sm:$0xff] (!%p420_p2)  ;;  %v481_v2 = vld [vmem:[%s2408_s2 + $0x10] sm:$0xff] (!%p420_p2)  ;;  %v2097_v3 = vmov (!%p420_p2), 0.0|0.0   ;;  %vm2098_vm0 = vmmov (!%p420_p2), 0   ;;  %v2099_v6 = vmov (!%p420_p2), 0.0  }
   0x6   : > { %423 = sbr.rel (%p420_p2) target bundleno = 3652 (0xe44), region = 76  ;;  %2023 = vmatprep.subr.bf16.mxu0 (!%p420_p2), %v2097_v3  ;;  %v2024_v4 = vpack.c.bf16 (!%p420_p2), %v480_v1, %v479_v0  ;;  %v482_v5 = vld [vmem:[%s2408_s2 + $0x18] sm:$0xff] (!%p420_p2)  ;;  %1930 = vmatprep.mubr.msk.f32.mxu0 (!%p420_p2), %vm2098_vm0, %v2099_v6  ;;  %p466_p3 = scmp.lt.s32.totalorder (!%p420_p2), %s1842_s30, 1  ;;  %vm490_vm1 = vcmask (!%p420_p2), 261120   ;;  %v1849_v9 = vld [vmem:[%s2409_s3] ss:$0 sm:$0xff] (!%p420_p2) }
   0x7   : > { %1938 = vmatprep.subr.mxu1 (!%p420_p2), %v2099_v6  ;;  %1940 = vmatprep.mubr.msk.f32.mxu1 (!%p420_p2), %vm2098_vm0, %v2099_v6  ;;  %v2027_v7 = vpack.c.bf16 (!%p420_p2), %v482_v5, %v481_v2  ;;  %s2100_s15 = smov (!%p420_p2), 120   ;;  %s2101_s16 = smov (!%p420_p2), 96   ;;  %vm572_vm2 = vcmask (!%p420_p2), 64512   ;;  %v565_v37 = vld [vmem:[%s2410_s4 + $0x8] sm:$0xff] (!%p420_p2)  ;;  %v564_v46 = vld [vmem:[%s2410_s4] sm:$0xff] (!%p420_p2)  ;;  %vm1675_vm3 = vcmask (!%p420_p2), 523264  }
   0x8   : > { %2025 = vmatpush3.bf16.msra.mxu0 (!%p420_p2), %v2024_v4  ;;  %s2102_s17 = smov (!%p420_p2), 88   ;;  %s2103_s21 = smov (!%p420_p2), 56  }
   0x9   : > { %2026 = vmatprep.subr.bf16.mxu0 (!%p420_p2), %v2097_v3  ;;  %s2104_s22 = smov (!%p420_p2), 64   ;;  %s2105_s24 = smov (!%p420_p2), 80  }
   0xa   : > { %s2106_s25 = smov (!%p420_p2), 112   ;;  %s2109_s18 = smov (!%p420_p2), 48  }
   0xc   : > { %2028 = vmatpush3.bf16.msra.mxu0 (!%p420_p2), %v2027_v7 }
   0xd   : > { %s2422_s30 = smov (!%p466_p3, %s1842_s30), 1  ;;  %1933 = vmatprep.subr.mxu0 %v2099_v6 }
   0xe   : > { %s1847_s23 = sshll.u32 %s2422_s30, 3  ;;  %s472_s20 = scalar_lea.vmem %s2407_s1, %s2422_s30 }
   0xf   : > { %s469_s26 = scalar_lea.vmem %s2406_s0, %s1847_s23  ;;  %v2251_v17 = vld [vmem:[%s472_s20] ss:$0 sm:$0xff] }
  0x10   : > { %v2221_v8 = vld [vmem:[%s469_s26] sm:$0xff]  ;;  %s476_s26 = scalar_lea.vmem %s2420_s14, %s1847_s23 }
  0x11   : > { %1931 = vmatmul.mubr.msk.f32.vlgmr.msra.gmra.mrb[0].mxu0 %vm490_vm1, %v2221_v8 }
  0x12   : > { %1935 = vmatprep.mubr.msk.f32.mxu0 %vm2098_vm0, %v2099_v6 }
  0xe4   : > { %v560_v10 = vpop.f32.mrb[0].mxu0 }
  0xe5   : > { %v2231_v11 = vadd.f32 %v1849_v9, %v560_v10  ;;  %v1932_v12 = vpop.f32.mrb[1].mxu0 }
  0xe7   : > { %742 = vrot.lane.b32.xlu1 %v2231_v11, %s2100_s15  ;;  %570 = vrot.lane.b32.xlu0 %v2231_v11, %s2101_s16  ;;  %s2107_s16 = smov 72  }
  0xeb   : > { %744 = vrot.lane.b32.xlu0 %v2231_v11, %s2102_s17  ;;  %s2108_s17 = smov 104  }
 0x159   : > { %v571_v13 = vpop.permute.xlu0 %570  ;;  %v743_v15 = vpop.permute.xlu1 %742 }
 0x15a   : > { %1934 = vmatpush3.xpose.msk.msra.mxu0 %vm572_vm2, %v571_v13 }
 0x15b   : > { %1943 = vmatprep.subr.mxu0 %v2099_v6 }
 0x15d   : > { %1936 = vmatmul.mubr.msk.f32.vlgmr.msra.gmra.mrb[2].mxu0 %vm572_vm2, %v2231_v11  ;;  %v745_v14 = vpop.permute.xlu0 %744 }
 0x15e   : > { %1944 = vmatpush3.xpose.msk.msra.mxu0 %vm572_vm2, %v745_v14  ;;  %1945 = vmatprep.mubr.msk.f32.mxu0 %vm2098_vm0, %v2099_v6  ;;  %v566_v14 = vld [vmem:[%s2410_s4 + $0x10] sm:$0xff] }
 0x15f   : > { %1953 = vmatprep.subr.mxu0 %v2099_v6 }
 0x161   : > { %1946 = vmatmul.mubr.msk.f32.vlgmr.msra.gmra.mrb[4].mxu0 %vm572_vm2, %v743_v15 }
 0x162   : > { %1955 = vmatprep.mubr.msk.f32.mxu0 %vm2098_vm0, %v2099_v6  ;;  %1954 = vmatpush3.msra.mxu0 %v565_v37 }
 0x163   : > { %1963 = vmatprep.subr.mxu0 %v2099_v6 }
 0x230   : > { %v643_v16 = vpop.f32.mrb[2].mxu0 }
 0x231   : > { %v647_v18 = vmul.f32 0.35355338, %v643_v16  ;;  %v1937_v19 = vpop.f32.mrb[3].mxu0 }
 0x233   : > { %v654_v20 = vadd.f32 %v2251_v17, %v647_v18 }
 0x234   : > { %v816_v21 = vpop.f32.mrb[4].mxu0 }
 0x235   : > { %v820_v22 = vmul.f32 0.35355338, %v816_v21  ;;  %v1947_v23 = vpop.f32.mrb[5].mxu0  ;;  %v655_v24 = vsel %vm572_vm2, %v654_v20, -inf }
 0x236   : > { %656 = vmax.xlane.f32.xlu1 %v655_v24 }
 0x237   : > { %v821_v25 = vadd.f32 %v2251_v17, %v820_v22 }
 0x239   : > { %v822_v26 = vsel %vm572_vm2, %v821_v25, -inf }
 0x23a   : > { %823 = vmax.xlane.f32.xlu0 %v822_v26 }
 0x2c3   : > { %v657_v27 = vpop.xlane.xlu1 %656 }
 0x2c4   : > { %v658_v28 = vsub.f32 %v654_v20, %v657_v27 }
 0x2c6   : > { %v659_v29 = vmul.f32 1.442695, %v658_v28 }
 0x2c7   : > { %v824_v30 = vpop.xlane.xlu0 %823 }
 0x2c8   : > { %2069 = vpow2.f32 %v659_v29  ;;  %v825_v31 = vsub.f32 %v821_v25, %v824_v30 }
 0x2ca   : > { %v826_v32 = vmul.f32 1.442695, %v825_v31 }
 0x2cc   : > { %2071 = vpow2.f32 %v826_v32 }
 0x2d2   : > { %v2070_v33 = vpop.eup %2069 }
 0x2d3   : > { %v661_v34 = vsel %vm572_vm2, %v2070_v33, 0.0 }
 0x2d4   : > { %662 = vadd.xlane.f32.xlu0 %v661_v34 }
 0x2d6   : > { %v2072_v35 = vpop.eup %2071 }
 0x2d7   : > { %v828_v36 = vsel %vm572_vm2, %v2072_v35, 0.0 }
 0x2d8   : > { %829 = vadd.xlane.f32.xlu1 %v828_v36  ;;  %v1868_v36 = vld [vmem:[%s2411_s5] ss:$0 sm:$0xff] }
 0x2e9   : > { %833 = vrot.lane.b32.xlu1 %v2231_v11, %s2103_s21  ;;  %s2110_s21 = smov 40  }
 0x2ea   : > { %666 = vrot.lane.b32.xlu0 %v2231_v11, %s2104_s22 }
 0x2ed   : > { %1057 = vrot.lane.b32.xlu1 %v2231_v11, %s2105_s24 }
 0x2ee   : > { %1055 = vrot.lane.b32.xlu0 %v2231_v11, %s2106_s25 }
 0x361   : > { %v663_v38 = vpop.xlane.xlu0 %662 }
 0x362   : > { %2073 = vrcp.f32 %v663_v38 }
 0x365   : > { %v830_v39 = vpop.xlane.xlu1 %829  ;;  %v667_v40 = vpop.permute.xlu0 %666 }
 0x366   : > { %2075 = vrcp.f32 %v830_v39  ;;  %1939 = vmatpush3.msra.mxu1 %v667_v40 }
 0x367   : > { %1948 = vmatprep.subr.mxu1 %v2099_v6 }
 0x369   : > { %v834_v43 = vpop.permute.xlu1 %833  ;;  %v1056_v52 = vpop.permute.xlu0 %1055 }
 0x36c   : > { %v2074_v41 = vpop.eup %2073 }
 0x36d   : > { %v665_v42 = vmul.f32 %v2074_v41, %v2070_v33  ;;  %v1058_v50 = vpop.permute.xlu1 %1057 }
 0x36f   : > { %1941 = vmatmul.mubr.msk.f32.vlgmr.msra.gmra.mrb[0].mxu1 %vm572_vm2, %v665_v42 }
 0x370   : > { %v2076_v44 = vpop.eup %2075  ;;  %1949 = vmatpush3.msra.mxu1 %v834_v43  ;;  %1950 = vmatprep.mubr.msk.f32.mxu1 %vm2098_vm0, %v2099_v6 }
 0x371   : > { %v832_v45 = vmul.f32 %v2076_v44, %v2072_v35  ;;  %1958 = vmatprep.subr.mxu1 %v2099_v6 }
 0x373   : > { %1951 = vmatmul.mubr.msk.f32.vlgmr.msra.gmra.mrb[2].mxu1 %vm572_vm2, %v832_v45 }
 0x374   : > { %1960 = vmatprep.mubr.msk.f32.mxu1 %vm2098_vm0, %v2099_v6  ;;  %1959 = vmatpush3.msra.mxu1 %v564_v46 }
 0x375   : > { %1968 = vmatprep.subr.mxu1 %v2099_v6 }
 0x442   : > { %v738_v47 = vpop.f32.mrb[0].mxu1 }
 0x443   : > { %v1942_v48 = vpop.f32.mrb[1].mxu1  ;;  %1961 = vmatmul.mubr.msk.f32.vlgmr.msra.gmra.mrb[4].mxu1 %vm572_vm2, %v738_v47 }
 0x444   : > { %1970 = vmatprep.mubr.msk.f32.mxu1 %vm2098_vm0, %v2099_v6  ;;  %v1576_v48 = vld [vmem:[%s2414_s8 + $0x8] sm:$0xff] }
 0x446   : > { %v905_v49 = vpop.f32.mrb[2].mxu1 }
 0x447   : > { %v1952_v51 = vpop.f32.mrb[3].mxu1  ;;  %1956 = vmatmul.mubr.msk.f32.vlgmr.msra.gmra.mrb[6].mxu0 %vm572_vm2, %v905_v49 }
 0x448   : > { %1964 = vmatpush3.xpose.msk.msra.mxu0 %vm572_vm2, %v1058_v50  ;;  %1965 = vmatprep.mubr.msk.f32.mxu0 %vm2098_vm0, %v2099_v6  ;;  %v1578_v50 = vld [vmem:[%s2414_s8 + $0x18] sm:$0xff] }
 0x449   : > { %1973 = vmatprep.subr.mxu0 %v2099_v6 }
 0x44b   : > { %1966 = vmatmul.mubr.msk.f32.vlgmr.msra.gmra.mrb[8].mxu0 %vm572_vm2, %v1056_v52  ;;  %v1580_v52 = vld [vmem:[%s2416_s10] sm:$0xff] }
 0x44c   : > { %1975 = vmatprep.mubr.msk.f32.mxu0 %vm2098_vm0, %v2099_v6  ;;  %1974 = vmatpush3.msra.mxu0 %v566_v14 }
 0x44d   : > { %1983 = vmatprep.subr.mxu0 %v2099_v6 }
 0x516   : > { %v1051_v53 = vpop.f32.mrb[4].mxu1 }
 0x517   : > { %v1962_v54 = vpop.f32.mrb[5].mxu1 }
 0x518   : > { %v1582_v54 = vld [vmem:[%s2416_s10 + $0x10] sm:$0xff] }
 0x51a   : > { %v978_v55 = vpop.f32.mrb[6].mxu0 }
 0x51b   : > { %v2290_v56 = vadd.f32 %v1051_v53, %v978_v55  ;;  %v1957_v57 = vpop.f32.mrb[7].mxu0  ;;  %v1581_v53 = vld [vmem:[%s2416_s10 + $0x8] sm:$0xff] }
 0x51c   : > { %v2036_v55 = vpack.c.bf16 %v1581_v53, %v1580_v52 }
 0x51e   : > { %v1129_v58 = vpop.f32.mrb[8].mxu0 }
 0x51f   : > { %v1133_v59 = vmul.f32 0.35355338, %v1129_v58  ;;  %v1967_v60 = vpop.f32.mrb[9].mxu0  ;;  %v1584_v58 = vld [vmem:[%s2416_s10 + $0x20] sm:$0xff] }
 0x521   : > { %v1134_v61 = vadd.f32 %v2251_v17, %v1133_v59  ;;  %v1585_v59 = vld [vmem:[%s2416_s10 + $0x28] sm:$0xff] }
 0x522   : > { %v2042_v60 = vpack.c.bf16 %v1585_v59, %v1584_v58 }
 0x523   : > { %v1135_v62 = vsel %vm572_vm2, %v1134_v61, -inf }
 0x524   : > { %1136 = vmax.xlane.f32.xlu1 %v1135_v62 }
 0x535   : > { %1298 = vrot.lane.b32.xlu1 %v2231_v11, %s2107_s16 }
 0x539   : > { %1296 = vrot.lane.b32.xlu1 %v2231_v11, %s2108_s17 }
 0x5b1   : > { %v1137_v63 = vpop.xlane.xlu1 %1136 }
 0x5b2   : > { %v1138_v0 = vsub.f32 %v1134_v61, %v1137_v63 }
 0x5b4   : > { %v1139_v1 = vmul.f32 1.442695, %v1138_v0 }
 0x5b5   : > { %v1299_v10 = vpop.permute.xlu1 %1298 }
 0x5b6   : > { %2077 = vpow2.f32 %v1139_v1  ;;  %v1869_v1 = vld [vmem:[%s2412_s6] ss:$0 sm:$0xff] }
 0x5b9   : > { %v1297_v13 = vpop.permute.xlu1 %1296 }
 0x5c0   : > { %v2078_v2 = vpop.eup %2077 }
 0x5c1   : > { %v1141_v4 = vsel %vm572_vm2, %v2078_v2, 0.0 }
 0x5c2   : > { %1142 = vadd.xlane.f32.xlu0 %v1141_v4  ;;  %v1870_v4 = vld [vmem:[%s2413_s7] ss:$0 sm:$0xff] }
 0x5d8   : > { %1146 = vrot.lane.b32.xlu0 %v2231_v11, %s2109_s18 }
 0x64f   : > { %v1143_v5 = vpop.xlane.xlu0 %1142 }
 0x650   : > { %2079 = vrcp.f32 %v1143_v5 }
 0x653   : > { %v1147_v7 = vpop.permute.xlu0 %1146 }
 0x654   : > { %1969 = vmatpush3.msra.mxu1 %v1147_v7 }
 0x655   : > { %1978 = vmatprep.subr.mxu1 %v2099_v6 }
 0x65a   : > { %v2080_v9 = vpop.eup %2079 }
 0x65b   : > { %v1145_v12 = vmul.f32 %v2080_v9, %v2078_v2  ;;  %v1587_v9 = vld [vmem:[%s2416_s10 + $0x38] sm:$0xff] }
 0x65d   : > { %1971 = vmatmul.mubr.msk.f32.vlgmr.msra.gmra.mrb[6].mxu1 %vm572_vm2, %v1145_v12  ;;  %v1871_v12 = vld [vmem:[%s2415_s9] ss:$0 sm:$0xff] }
 0x65e   : > { %1979 = vmatpush3.xpose.msk.msra.mxu1 %vm572_vm2, %v1299_v10  ;;  %1980 = vmatprep.mubr.msk.f32.mxu1 %vm2098_vm0, %v2099_v6 }
 0x65f   : > { %1988 = vmatprep.subr.mxu1 %v2099_v6 }
 0x661   : > { %1981 = vmatmul.mubr.msk.f32.vlgmr.msra.gmra.mrb[8].mxu1 %vm572_vm2, %v1297_v13 }
 0x662   : > { %1990 = vmatprep.mubr.msk.f32.mxu1 %vm2098_vm0, %v2099_v6 }
 0x730   : > { %v1218_v15 = vpop.f32.mrb[6].mxu1 }
 0x731   : > { %v1972_v16 = vpop.f32.mrb[7].mxu1  ;;  %1976 = vmatmul.mubr.msk.f32.vlgmr.msra.gmra.mrb[10].mxu0 %vm572_vm2, %v1218_v15 }
 0x732   : > { %1985 = vmatprep.mubr.msk.f32.mxu0 %vm2098_vm0, %v2099_v6 }
 0x734   : > { %v1370_v18 = vpop.f32.mrb[8].mxu1 }
 0x735   : > { %v1374_v19 = vmul.f32 0.35355338, %v1370_v18  ;;  %v1982_v20 = vpop.f32.mrb[9].mxu1  ;;  %v1873_v18 = vld [vmem:[%s2417_s11] ss:$0 sm:$0xff] }
 0x737   : > { %v1375_v21 = vadd.f32 %v2251_v17, %v1374_v19  ;;  %v567_v17 = vld [vmem:[%s2410_s4 + $0x18] sm:$0xff] }
 0x738   : > { %1989 = vmatpush3.msra.mxu1 %v567_v17 }
 0x739   : > { %v1376_v22 = vsel %vm572_vm2, %v1375_v21, -inf  ;;  %2035 = vmatprep.subr.bf16.mxu1 %v2097_v3 }
 0x73a   : > { %1377 = vmax.xlane.f32.xlu0 %v1376_v22 }
 0x750   : > { %1387 = vrot.lane.b32.xlu0 %v2231_v11, %s2110_s21 }
 0x7c7   : > { %v1378_v23 = vpop.xlane.xlu0 %1377 }
 0x7c8   : > { %v1379_v24 = vsub.f32 %v1375_v21, %v1378_v23 }
 0x7ca   : > { %v1380_v25 = vmul.f32 1.442695, %v1379_v24 }
 0x7cb   : > { %v1388_v26 = vpop.permute.xlu0 %1387 }
 0x7cc   : > { %2081 = vpow2.f32 %v1380_v25  ;;  %1984 = vmatpush3.msra.mxu0 %v1388_v26 }
 0x7cd   : > { %2029 = vmatprep.subr.bf16.mxu0 %v2097_v3 }
 0x7d6   : > { %v2082_v27 = vpop.eup %2081 }
 0x7d7   : > { %v1382_v28 = vsel %vm572_vm2, %v2082_v27, 0.0 }
 0x7d8   : > { %1383 = vadd.xlane.f32.xlu1 %v1382_v28 }
 0x804   : > { %v1291_v11 = vpop.f32.mrb[10].mxu0 }
 0x805   : > { %v1295_v29 = vadd.f32 %v1291_v11, %v2290_v56  ;;  %v1977_v30 = vpop.f32.mrb[11].mxu0  ;;  %v1583_v56 = vld [vmem:[%s2416_s10 + $0x18] sm:$0xff] }
 0x806   : > { %v2039_v57 = vpack.c.bf16 %v1583_v56, %v1582_v54 }
 0x865   : > { %v1384_v31 = vpop.xlane.xlu1 %1383 }
 0x866   : > { %2083 = vrcp.f32 %v1384_v31  ;;  %v1875_v31 = vld [vmem:[%s2418_s12] ss:$0 sm:$0xff] }
 0x870   : > { %v2084_v32 = vpop.eup %2083 }
 0x871   : > { %v1386_v33 = vmul.f32 %v2084_v32, %v2082_v27 }
 0x873   : > { %1986 = vmatmul.mubr.msk.f32.vlgmr.msra.gmra.mrb[12].mxu0 %vm572_vm2, %v1386_v33  ;;  %v1876_v33 = vld [vmem:[%s2419_s13] ss:$0 sm:$0xff] }
 0x874   : > { %2001 = vmatprep.mubr.msk.f32.mxu0 %vm2098_vm0, %v2099_v6 }
 0x946   : > { %v1459_v34 = vpop.f32.mrb[12].mxu0 }
 0x947   : > { %v1987_v35 = vpop.f32.mrb[13].mxu0  ;;  %1991 = vmatmul.mubr.msk.f32.vlgmr.msra.gmra.mrb[10].mxu1 %vm572_vm2, %v1459_v34 }
 0x948   : > { %2020 = vmatprep.mubr.msk.f32.mxu1 %vm2098_vm0, %v2099_v6  ;;  %v1575_v6 = vld [vmem:[%s2414_s8] sm:$0xff]  ;;  %2037 = vmatpush3.bf16.msra.mxu1 %v2036_v55 }
 0x949   : > { %v2030_v49 = vpack.c.bf16 %v1576_v48, %v1575_v6  ;;  %2038 = vmatprep.subr.bf16.mxu1 %v2097_v3 }
 0x94b   : > { %2031 = vmatpush3.bf16.msra.mxu0 %v2030_v49 }
 0x94c   : > { %2032 = vmatprep.subr.bf16.mxu0 %v2097_v3  ;;  %2040 = vmatpush3.bf16.msra.mxu1 %v2039_v57 }
 0x94d   : > { %2041 = vmatprep.subr.bf16.mxu1 %v2097_v3 }
 0x950   : > { %2043 = vmatpush3.bf16.msra.mxu1 %v2042_v60 }
 0x951   : > { %2044 = vmatprep.subr.bf16.mxu1 %v2097_v3  ;;  %v1586_v3 = vld [vmem:[%s2416_s10 + $0x30] sm:$0xff] }
 0x952   : > { %v2045_v10 = vpack.c.bf16 %v1587_v9, %v1586_v3 }
 0x954   : > { %2046 = vmatpush3.bf16.msra.mxu1 %v2045_v10 }
 0xa1a   : > { %v1532_v37 = vpop.f32.mrb[10].mxu1 }
 0xa1b   : > { %v1536_v38 = vadd.f32 %v1532_v37, %v1295_v29  ;;  %v1992_v39 = vpop.f32.mrb[11].mxu1 }
 0xa1d   : > { %v1543_v40 = vadd.f32 %v1868_v36, %v1536_v38 }
 0xa1f   : > { %v1544_v41 = vadd.f32 %v1543_v40, %v2221_v8  ;;  %v1577_v8 = vld [vmem:[%s2414_s8 + $0x10] sm:$0xff] }
 0xa20   : > { %v2033_v51 = vpack.c.bf16 %v1578_v50, %v1577_v8 }
 0xa21   : > { %v1547_v42 = vsel %vm490_vm1, %v1544_v41, 0.0 }
 0xa22   : > { %1548 = vadd.xlane.f32.xlu1 %v1547_v42  ;;  %2034 = vmatpush3.bf16.msra.mxu0 %v2033_v51 }
 0xaaf   : > { %v1549_v43 = vpop.xlane.xlu1 %1548 }
 0xab0   : > { %v1551_v44 = vmul.f32 0.03125, %v1549_v43 }
 0xab2   : > { %v1552_v45 = vsub.f32 %v1544_v41, %v1551_v44 }
 0xab4   : > { %v1553_v46 = vmul.f32 %v1552_v45, %v1552_v45 }
 0xab6   : > { %v1554_v47 = vsel %vm490_vm1, %v1553_v46, 0.0 }
 0xab7   : > { %1555 = vadd.xlane.f32.xlu1 %v1554_v47 }
 0xb44   : > { %v1556_v61 = vpop.xlane.xlu1 %1555 }
 0xb45   : > { %v1557_v62 = vmul.f32 0.03125, %v1556_v61 }
 0xb47   : > { %v1558_v63 = vadd.f32 1e-05, %v1557_v62 }
 0xb49   : > { %2085 = vrsqrt.f32 %v1558_v63 }
 0xb53   : > { %v2086_v0 = vpop.eup %2085 }
 0xb54   : > { %v1560_v2 = vmul.f32 %v2086_v0, %v1552_v45 }
 0xb56   : > { %v1567_v5 = vmul.f32 %v1869_v1, %v1560_v2 }
 0xb58   : > { %v1574_v7 = vadd.f32 %v1870_v4, %v1567_v5 }
 0xb5a   : > { %2002 = vmatmul.mubr.msk.f32.vlgmr.msra.gmra.mrb[14].mxu0 %vm490_vm1, %v1574_v7 }
 0xc2d   : > { %v1664_v13 = vpop.f32.mrb[14].mxu0 }
 0xc2e   : > { %v1665_v14 = vadd.f32 %v1871_v12, %v1664_v13  ;;  %v2003_v15 = vpop.f32.mrb[15].mxu0 }
 0xc30   : > { %v1668_v16 = vmax.f32 %v1665_v14, 0.0 }
 0xc32   : > { %2021 = vmatmul.mubr.msk.f32.vlgmr.msra.gmra.mrb[12].mxu1 %vm1675_vm3, %v1668_v16 }
 0xd05   : > { %v1745_v19 = vpop.f32.mrb[12].mxu1 }
 0xd06   : > { %v1746_v20 = vadd.f32 %v1873_v18, %v1745_v19  ;;  %v2022_v21 = vpop.f32.mrb[13].mxu1 }
 0xd08   : > { %v1749_v22 = vadd.f32 %v1746_v20, %v1574_v7 }
 0xd0a   : > { %v1752_v23 = vsel %vm490_vm1, %v1749_v22, 0.0 }
 0xd0b   : > { %1753 = vadd.xlane.f32.xlu1 %v1752_v23 }
 0xd98   : > { %v1754_v24 = vpop.xlane.xlu1 %1753 }
 0xd99   : > { %v1755_v25 = vmul.f32 0.03125, %v1754_v24 }
 0xd9b   : > { %v1756_v26 = vsub.f32 %v1749_v22, %v1755_v25 }
 0xd9d   : > { %v1757_v27 = vmul.f32 %v1756_v26, %v1756_v26 }
 0xd9f   : > { %v1758_v28 = vsel %vm490_vm1, %v1757_v27, 0.0 }
 0xda0   : > { %1759 = vadd.xlane.f32.xlu1 %v1758_v28 }
 0xe2d   : > { %v1760_v17 = vpop.xlane.xlu1 %1759 }
 0xe2e   : > { %v1761_v11 = vmul.f32 0.03125, %v1760_v17 }
 0xe30   : > { %v1762_v29 = vadd.f32 1e-05, %v1761_v11 }
 0xe32   : > { %2087 = vrsqrt.f32 %v1762_v29 }
 0xe3c   : > { %v2088_v30 = vpop.eup %2087 }
 0xe3d   : > { %v1764_v32 = vmul.f32 %v2088_v30, %v1756_v26 }
 0xe3f   : > { %v1771_v34 = vmul.f32 %v1875_v31, %v1764_v32 }
 0xe41   : > { %v1778_v35 = vadd.f32 %v1876_v33, %v1771_v34 }
 0xe43   : > { %1779 = vst.msk [vmem:[%s476_s26] sm:$0xff] %vm490_vm1, %v1778_v35 }
 0xe44 PF: > { %s24_s29 = sadd.s32 1, %s2095_s29  }
 0xe45   : > { %p21_p4 = scmp.ge.s32.totalorder %s24_s29, 4  }
 0xe47   :  { %23 = sbr.rel (!%p21_p4) target bundleno = 1 (0x1), region = 109 }

// kernel: transformer_forward.19
= control target key start
LH: loop header
LB: loop body
LE: loop exit
PB: predicated region body
PF: predicated region fallthrough
CT: control target
= control target key end

     0   :  { %s4301_s0 = inlined_call_operand.vmem [shape: f32[2,8,32], index: 0, kind: input, shape index: {}]   ;;  %s4302_s1 = inlined_call_operand.vmem [shape: f32[2,8,32], index: 1, kind: input, shape index: {}]   ;;  %s4303_s2 = inlined_call_operand.vmem [shape: f32[2,8,8], index: 2, kind: input, shape index: {}]   ;;  %s4304_s3 = inlined_call_operand.vmem [shape: f32[2,1,8], index: 3, kind: input, shape index: {}]   ;;  %s4305_s4 = inlined_call_operand.vmem [shape: f32[32,96], index: 4, kind: input, shape index: {}]   ;;  %s4306_s5 = inlined_call_operand.vmem [shape: f32[1,96], index: 5, kind: input, shape index: {}]   ;;  %s4307_s6 = inlined_call_operand.vmem [shape: f32[32,32], index: 6, kind: input, shape index: {}]   ;;  %s4308_s7 = inlined_call_operand.vmem [shape: f32[1,32], index: 7, kind: input, shape index: {}]   ;;  %s4309_s8 = inlined_call_operand.vmem [shape: f32[1,32], index: 8, kind: input, shape index: {}]   ;;  %s4310_s9 = inlined_call_operand.vmem [shape: f32[1,32], index: 9, kind: input, shape index: {}]   ;;  %s4311_s10 = inlined_call_operand.vmem [shape: f32[32,32], index: 10, kind: input, shape index: {}]   ;;  %s4312_s11 = inlined_call_operand.vmem [shape: f32[1,32], index: 11, kind: input, shape index: {}]   ;;  %s4313_s12 = inlined_call_operand.vmem [shape: f32[32,64], index: 12, kind: input, shape index: {}]   ;;  %s4314_s13 = inlined_call_operand.vmem [shape: f32[1,64], index: 13, kind: input, shape index: {}]   ;;  %s4315_s14 = inlined_call_operand.vmem [shape: f32[32,32], index: 14, kind: input, shape index: {}]   ;;  %s4316_s15 = inlined_call_operand.vmem [shape: f32[1,32], index: 15, kind: input, shape index: {}]   ;;  %s4317_s16 = inlined_call_operand.vmem [shape: f32[1,32], index: 16, kind: input, shape index: {}]   ;;  %s4318_s17 = inlined_call_operand.vmem [shape: f32[1,32], index: 17, kind: input, shape index: {}]   ;;  %s4319_s18 = inlined_call_operand.vmem [shape: f32[32,64], index: 18, kind: input, shape index: {}]   ;;  %s4320_s19 = inlined_call_operand.vmem [shape: f32[1,64], index: 19, kind: input, shape index: {}]   ;;  %s4321_s20 = inlined_call_operand.vmem [shape: f32[64,32], index: 20, kind: input, shape index: {}]   ;;  %s4322_s21 = inlined_call_operand.vmem [shape: f32[1,32], index: 21, kind: input, shape index: {}]   ;;  %s4323_s22 = inlined_call_operand.vmem [shape: f32[1,32], index: 22, kind: input, shape index: {}]   ;;  %s4324_s23 = inlined_call_operand.vmem [shape: f32[1,32], index: 23, kind: input, shape index: {}]   ;;  %s4325_s24 = inlined_call_operand.vmem [shape: f32[2,8,32], index: 24, kind: output, shape index: {}]  }
   0x1   :  { %4340 = sst [smem:[#allocation2_spill]] %s4301_s0 }
   0x2   :  { %4341 = sst [smem:[#allocation3_spill]] %s4302_s1 }
   0x3   :  { %4342 = sst [smem:[#allocation4_spill]] %s4303_s2 }
   0x4   :  { %4343 = sst [smem:[#allocation5_spill]] %s4304_s3 }
   0x5   :  { %4344 = sst [smem:[#allocation6_spill]] %s4305_s4 }
   0x6   :  { %4345 = sst [smem:[#allocation7_spill]] %s4306_s5  ;;  %s3907_s5 = smov 0  }
   0x7   :  { %4346 = sst [smem:[#allocation8_spill]] %s4307_s6 }
   0x8   :  { %4347 = sst [smem:[#allocation9_spill]] %s4308_s7 }
   0x9   :  { %4348 = sst [smem:[#allocation10_spill]] %s4309_s8 }
   0xa LB: > { %s3342_s26 = sadd.s32 4294967295, %s3766_s5   ;;  %p3346_p0 = scmp.ge.s32.totalorder %s3766_s5, 1  ;;  %s3766_s5 = sphi %s3907_s5, %s34_s5  }
   0xb   : > { %p687_p1 = scmp.lt.s32.totalorder %s3766_s5, 3 }
   0xd   : > { %p688_p2 = pnand %p3346_p0, %p687_p1 }
   0xe   : > { %s4349_s6 = sld [smem:[#allocation6_spill]] (!%p688_p2)  ;;  %v3768_v3 = vmov (!%p688_p2), 0.0|0.0   ;;  %vm3769_vm0 = vmmov (!%p688_p2), 0   ;;  %v3770_v6 = vmov (!%p688_p2), 0.0   ;;  %p762_p3 = scmp.lt.s32.totalorder (!%p688_p2), %s3342_s26, 1  ;;  %vm796_vm1 = vcmask (!%p688_p2), 261120  }
   0xf   : > { %691 = sbr.rel (%p688_p2) target bundleno = 6547 (0x1993), region = 116  ;;  %3664 = vmatprep.subr.bf16.mxu0 (!%p688_p2), %v3768_v3  ;;  %3489 = vmatprep.mubr.msk.f32.mxu0 (!%p688_p2), %vm3769_vm0, %v3770_v6  ;;  %s4350_s1 = sld [smem:[#allocation2_spill]] (!%p688_p2)  ;;  %vm878_vm2 = vcmask (!%p688_p2), 64512   ;;  %vm3151_vm3 = vcmask (!%p688_p2), 523264  }
  0x10   : > { %3497 = vmatprep.subr.mxu1 (!%p688_p2), %v3770_v6  ;;  %3499 = vmatprep.mubr.msk.f32.mxu1 (!%p688_p2), %vm3769_vm0, %v3770_v6  ;;  %s4351_s29 = sld [smem:[#allocation7_spill]] (!%p688_p2)  ;;  %s4336_s0 = smov (!%p688_p2), 120  }
  0x11   : > { %s4332_s7 = smov (!%p688_p2), 96   ;;  %s4335_s30 = smov (!%p688_p2), 88  }
  0x12   : > { %s4352_s4 = sld [smem:[#allocation4_spill]] (!%p688_p2)  ;;  %s3775_s28 = smov (!%p688_p2), 64  }
  0x13   : > { %s4329_s2 = smov (!%p688_p2), 80   ;;  %s4330_s3 = smov (!%p688_p2), 104  }
  0x14   : > { %v785_v0 = vld [vmem:[%s4349_s6] sm:$0xff] (!%p688_p2)  ;;  %v786_v1 = vld [vmem:[%s4349_s6 + $0x8] sm:$0xff] (!%p688_p2)  ;;  %v787_v2 = vld [vmem:[%s4349_s6 + $0x10] sm:$0xff] (!%p688_p2)  ;;  %s3780_s8 = smov (!%p688_p2), 48  }
  0x15   : > { %v3665_v4 = vpack.c.bf16 (!%p688_p2), %v786_v1, %v785_v0  ;;  %v788_v5 = vld [vmem:[%s4349_s6 + $0x18] sm:$0xff] (!%p688_p2)  ;;  %s4358_s6 = sld [smem:[#allocation5_spill]] (!%p688_p2) }
  0x16   : > { %v3668_v7 = vpack.c.bf16 %v788_v5, %v787_v2  ;;  %s4366_s26 = smov (!%p762_p3, %s3342_s26), 1  ;;  %v3351_v9 = vld [vmem:[%s4351_s29] ss:$0 sm:$0xff]  ;;  %s4333_s29 = smov 112  }
  0x17   : > { %3666 = vmatpush3.bf16.msra.mxu0 %v3665_v4  ;;  %s3937_s25 = sshll.u32 %s4366_s26, 3 }
  0x18   : > { %3667 = vmatprep.subr.bf16.mxu0 %v3768_v3  ;;  %s765_s27 = scalar_lea.vmem %s4350_s1, %s3937_s25  ;;  %s773_s1 = scalar_lea.vmem %s4352_s4, %s3937_s25 }
  0x19   : > { %v3943_v8 = vld [vmem:[%s765_s27] sm:$0xff]  ;;  %s3774_s27 = smov 56   ;;  %s4353_s4 = sld [smem:[#allocation8_spill]] }
  0x1a   : > { %v3976_v17 = vld [vmem:[%s773_s1] sm:$0xff] }
  0x1b   : > { %3669 = vmatpush3.bf16.msra.mxu0 %v3668_v7 }
  0x1c   : > { %3492 = vmatprep.subr.mxu0 %v3770_v6 }
  0x1e   : > { %3490 = vmatmul.mubr.msk.f32.vlgmr.msra.gmra.mrb[0].mxu0 %vm796_vm1, %v3943_v8 }
  0x1f   : > { %3494 = vmatprep.mubr.msk.f32.mxu0 %vm3769_vm0, %v3770_v6  ;;  %v871_v37 = vld [vmem:[%s4353_s4 + $0x8] sm:$0xff]  ;;  %v870_v46 = vld [vmem:[%s4353_s4] sm:$0xff] }
  0xf1   : > { %v866_v10 = vpop.f32.mrb[0].mxu0 }
  0xf2   : > { %v3953_v11 = vadd.f32 %v3351_v9, %v866_v10  ;;  %v3491_v12 = vpop.f32.mrb[1].mxu0 }
  0xf4   : > { %1042 = vrot.lane.b32.xlu1 %v3953_v11, %s4336_s0  ;;  %876 = vrot.lane.b32.xlu0 %v3953_v11, %s4332_s7  ;;  %s776_s0 = scalar_lea.vmem %s4358_s6, %s4366_s26  ;;  %s4360_s26 = smov 112  }
  0xf5   : > { %s4364_s6 = smov 72  }
  0xf8   : > { %1044 = vrot.lane.b32.xlu0 %v3953_v11, %s4335_s30  ;;  %s4356_s30 = sld [smem:[#allocation10_spill]] }
 0x166   : > { %v877_v13 = vpop.permute.xlu0 %876  ;;  %v1043_v15 = vpop.permute.xlu1 %1042 }
 0x167   : > { %3493 = vmatpush3.xpose.msk.msra.mxu0 %vm878_vm2, %v877_v13 }
 0x168   : > { %3502 = vmatprep.subr.mxu0 %v3770_v6 }
 0x16a   : > { %3495 = vmatmul.mubr.msk.f32.vlgmr.msra.gmra.mrb[2].mxu0 %vm878_vm2, %v3953_v11  ;;  %v1045_v14 = vpop.permute.xlu0 %1044 }
 0x16b   : > { %3503 = vmatpush3.xpose.msk.msra.mxu0 %vm878_vm2, %v1045_v14  ;;  %3504 = vmatprep.mubr.msk.f32.mxu0 %vm3769_vm0, %v3770_v6  ;;  %v872_v14 = vld [vmem:[%s4353_s4 + $0x10] sm:$0xff] }
 0x16c   : > { %3512 = vmatprep.subr.mxu0 %v3770_v6 }
 0x16e   : > { %3505 = vmatmul.mubr.msk.f32.vlgmr.msra.gmra.mrb[4].mxu0 %vm878_vm2, %v1043_v15 }
 0x16f   : > { %3514 = vmatprep.mubr.msk.f32.mxu0 %vm3769_vm0, %v3770_v6  ;;  %3513 = vmatpush3.msra.mxu0 %v871_v37 }
 0x170   : > { %3522 = vmatprep.subr.mxu0 %v3770_v6 }
 0x23d   : > { %v949_v16 = vpop.f32.mrb[2].mxu0 }
 0x23e   : > { %v953_v18 = vmul.f32 0.35355338, %v949_v16  ;;  %v3496_v19 = vpop.f32.mrb[3].mxu0 }
 0x240   : > { %v954_v20 = vadd.f32 %v953_v18, %v3976_v17 }
 0x241   : > { %v1116_v21 = vpop.f32.mrb[4].mxu0 }
 0x242   : > { %v1120_v22 = vmul.f32 0.35355338, %v1116_v21  ;;  %v3506_v23 = vpop.f32.mrb[5].mxu0  ;;  %v955_v24 = vsel %vm878_vm2, %v954_v20, -inf }
 0x243   : > { %956 = vmax.xlane.f32.xlu1 %v955_v24 }
 0x244   : > { %v1121_v25 = vadd.f32 %v1120_v22, %v3976_v17 }
 0x246   : > { %v1122_v26 = vsel %vm878_vm2, %v1121_v25, -inf }
 0x247   : > { %1123 = vmax.xlane.f32.xlu0 %v1122_v26 }
 0x2d0   : > { %v957_v27 = vpop.xlane.xlu1 %956 }
 0x2d1   : > { %v958_v28 = vsub.f32 %v954_v20, %v957_v27 }
 0x2d3   : > { %v959_v29 = vmul.f32 1.442695, %v958_v28 }
 0x2d4   : > { %v1124_v30 = vpop.xlane.xlu0 %1123 }
 0x2d5   : > { %3722 = vpow2.f32 %v959_v29  ;;  %v1125_v31 = vsub.f32 %v1121_v25, %v1124_v30 }
 0x2d7   : > { %v1126_v32 = vmul.f32 1.442695, %v1125_v31 }
 0x2d9   : > { %3724 = vpow2.f32 %v1126_v32 }
 0x2df   : > { %v3723_v33 = vpop.eup %3722 }
 0x2e0   : > { %v961_v34 = vsel %vm878_vm2, %v3723_v33, 0.0 }
 0x2e1   : > { %962 = vadd.xlane.f32.xlu0 %v961_v34 }
 0x2e3   : > { %v3725_v35 = vpop.eup %3724 }
 0x2e4   : > { %v1128_v36 = vsel %vm878_vm2, %v3725_v35, 0.0 }
 0x2e5   : > { %1129 = vadd.xlane.f32.xlu1 %v1128_v36 }
 0x2f6   : > { %1133 = vrot.lane.b32.xlu1 %v3953_v11, %s3774_s27  ;;  %s4354_s27 = sld [smem:[#allocation9_spill]] }
 0x2f7   : > { %966 = vrot.lane.b32.xlu0 %v3953_v11, %s3775_s28  ;;  %s4328_s28 = smov 72  }
 0x2fa   : > { %1357 = vrot.lane.b32.xlu1 %v3953_v11, %s4329_s2 }
 0x2fb   : > { %1355 = vrot.lane.b32.xlu0 %v3953_v11, %s4333_s29 }
 0x2fc   : > { %v3369_v36 = vld [vmem:[%s4354_s27] ss:$0 sm:$0xff]  ;;  %s4357_s27 = smov 120  }
 0x36e   : > { %v963_v38 = vpop.xlane.xlu0 %962 }
 0x36f   : > { %3726 = vrcp.f32 %v963_v38 }
 0x372   : > { %v1130_v39 = vpop.xlane.xlu1 %1129  ;;  %v967_v40 = vpop.permute.xlu0 %966 }
 0x373   : > { %3728 = vrcp.f32 %v1130_v39  ;;  %3498 = vmatpush3.msra.mxu1 %v967_v40 }
 0x374   : > { %3507 = vmatprep.subr.mxu1 %v3770_v6 }
 0x376   : > { %v1134_v43 = vpop.permute.xlu1 %1133  ;;  %v1356_v52 = vpop.permute.xlu0 %1355 }
 0x379   : > { %v3727_v41 = vpop.eup %3726 }
 0x37a   : > { %v965_v42 = vmul.f32 %v3727_v41, %v3723_v33  ;;  %v1358_v50 = vpop.permute.xlu1 %1357 }
 0x37c   : > { %3500 = vmatmul.mubr.msk.f32.vlgmr.msra.gmra.mrb[0].mxu1 %vm878_vm2, %v965_v42 }
 0x37d   : > { %v3729_v44 = vpop.eup %3728  ;;  %3508 = vmatpush3.msra.mxu1 %v1134_v43  ;;  %3509 = vmatprep.mubr.msk.f32.mxu1 %vm3769_vm0, %v3770_v6 }
 0x37e   : > { %v1132_v45 = vmul.f32 %v3729_v44, %v3725_v35  ;;  %3517 = vmatprep.subr.mxu1 %v3770_v6 }
 0x380   : > { %3510 = vmatmul.mubr.msk.f32.vlgmr.msra.gmra.mrb[2].mxu1 %vm878_vm2, %v1132_v45 }
 0x381   : > { %3519 = vmatprep.mubr.msk.f32.mxu1 %vm3769_vm0, %v3770_v6  ;;  %3518 = vmatpush3.msra.mxu1 %v870_v46 }
 0x382   : > { %3527 = vmatprep.subr.mxu1 %v3770_v6 }
 0x44f   : > { %v1038_v47 = vpop.f32.mrb[0].mxu1 }
 0x450   : > { %v3501_v48 = vpop.f32.mrb[1].mxu1  ;;  %3520 = vmatmul.mubr.msk.f32.vlgmr.msra.gmra.mrb[4].mxu1 %vm878_vm2, %v1038_v47 }
 0x451   : > { %3529 = vmatprep.mubr.msk.f32.mxu1 %vm3769_vm0, %v3770_v6  ;;  %v1959_v48 = vld [vmem:[%s4313_s12] sm:$0xff] }
 0x453   : > { %v1205_v49 = vpop.f32.mrb[2].mxu1 }
 0x454   : > { %v3511_v51 = vpop.f32.mrb[3].mxu1  ;;  %3515 = vmatmul.mubr.msk.f32.vlgmr.msra.gmra.mrb[6].mxu0 %vm878_vm2, %v1205_v49  ;;  %v1960_v49 = vld [vmem:[%s4313_s12 + $0x8] sm:$0xff] }
 0x455   : > { %3523 = vmatpush3.xpose.msk.msra.mxu0 %vm878_vm2, %v1358_v50  ;;  %3524 = vmatprep.mubr.msk.f32.mxu0 %vm3769_vm0, %v3770_v6  ;;  %v1875_v50 = vld [vmem:[%s4311_s10] sm:$0xff]  ;;  %v1876_v51 = vld [vmem:[%s4311_s10 + $0x8] sm:$0xff] }
 0x456   : > { %3532 = vmatprep.subr.mxu0 %v3770_v6 }
 0x458   : > { %3525 = vmatmul.mubr.msk.f32.vlgmr.msra.gmra.mrb[8].mxu0 %vm878_vm2, %v1356_v52  ;;  %v1961_v52 = vld [vmem:[%s4313_s12 + $0x10] sm:$0xff] }
 0x459   : > { %3534 = vmatprep.mubr.msk.f32.mxu0 %vm3769_vm0, %v3770_v6  ;;  %3533 = vmatpush3.msra.mxu0 %v872_v14 }
 0x45a   : > { %3542 = vmatprep.subr.mxu0 %v3770_v6 }
 0x523   : > { %v1351_v53 = vpop.f32.mrb[4].mxu1 }
 0x524   : > { %v3521_v54 = vpop.f32.mrb[5].mxu1 }
 0x525   : > { %v1962_v54 = vld [vmem:[%s4313_s12 + $0x18] sm:$0xff] }
 0x527   : > { %v1278_v55 = vpop.f32.mrb[6].mxu0 }
 0x528   : > { %v4017_v56 = vadd.f32 %v1351_v53, %v1278_v55  ;;  %v3516_v57 = vpop.f32.mrb[7].mxu0  ;;  %v3671_v53 = vpack.c.bf16 %v1876_v51, %v1875_v50  ;;  %v3680_v55 = vpack.c.bf16 %v1962_v54, %v1961_v52 }
 0x529   : > { %v1878_v57 = vld [vmem:[%s4311_s10 + $0x18] sm:$0xff] }
 0x52b   : > { %v1429_v58 = vpop.f32.mrb[8].mxu0 }
 0x52c   : > { %v1433_v59 = vmul.f32 0.35355338, %v1429_v58  ;;  %v3526_v60 = vpop.f32.mrb[9].mxu0 }
 0x52e   : > { %v1434_v61 = vadd.f32 %v1433_v59, %v3976_v17 }
 0x530   : > { %v1435_v62 = vsel %vm878_vm2, %v1434_v61, -inf }
 0x531   : > { %1436 = vmax.xlane.f32.xlu1 %v1435_v62 }
 0x542   : > { %1598 = vrot.lane.b32.xlu1 %v3953_v11, %s4328_s28 }
 0x546   : > { %1596 = vrot.lane.b32.xlu1 %v3953_v11, %s4330_s3  ;;  %s4363_s3 = smov 80  }
 0x5be   : > { %v1437_v63 = vpop.xlane.xlu1 %1436 }
 0x5bf   : > { %v1438_v0 = vsub.f32 %v1434_v61, %v1437_v63 }
 0x5c1   : > { %v1439_v1 = vmul.f32 1.442695, %v1438_v0  ;;  %v3370_v0 = vld [vmem:[%s4356_s30] ss:$0 sm:$0xff]  ;;  %s4359_s30 = smov 88  }
 0x5c2   : > { %v1599_v10 = vpop.permute.xlu1 %1598 }
 0x5c3   : > { %3730 = vpow2.f32 %v1439_v1 }
 0x5c6   : > { %v1597_v13 = vpop.permute.xlu1 %1596 }
 0x5cd   : > { %v3731_v2 = vpop.eup %3730 }
 0x5ce   : > { %v1441_v4 = vsel %vm878_vm2, %v3731_v2, 0.0 }
 0x5cf   : > { %1442 = vadd.xlane.f32.xlu0 %v1441_v4 }
 0x5e5   : > { %1446 = vrot.lane.b32.xlu0 %v3953_v11, %s3780_s8  ;;  %s3781_s8 = smov 40  }
 0x65c   : > { %v1443_v5 = vpop.xlane.xlu0 %1442 }
 0x65d   : > { %3732 = vrcp.f32 %v1443_v5 }
 0x660   : > { %v1447_v7 = vpop.permute.xlu0 %1446 }
 0x661   : > { %3528 = vmatpush3.msra.mxu1 %v1447_v7  ;;  %v3374_v7 = vld [vmem:[%s4314_s13] ss:$0 sm:$0xff] }
 0x662   : > { %3537 = vmatprep.subr.mxu1 %v3770_v6 }
 0x667   : > { %v3733_v9 = vpop.eup %3732 }
 0x668   : > { %v1445_v12 = vmul.f32 %v3733_v9, %v3731_v2  ;;  %v3371_v2 = vld [vmem:[%s4310_s9] ss:$0 sm:$0xff] }
 0x66a   : > { %3530 = vmatmul.mubr.msk.f32.vlgmr.msra.gmra.mrb[6].mxu1 %vm878_vm2, %v1445_v12 }
 0x66b   : > { %3538 = vmatpush3.xpose.msk.msra.mxu1 %vm878_vm2, %v1599_v10  ;;  %3539 = vmatprep.mubr.msk.f32.mxu1 %vm3769_vm0, %v3770_v6 }
 0x66c   : > { %3547 = vmatprep.subr.mxu1 %v3770_v6 }
 0x66e   : > { %3540 = vmatmul.mubr.msk.f32.vlgmr.msra.gmra.mrb[8].mxu1 %vm878_vm2, %v1597_v13  ;;  %v3372_v13 = vld [vmem:[%s4312_s11] ss:$0 sm:$0xff] }
 0x66f   : > { %3549 = vmatprep.mubr.msk.f32.mxu1 %vm3769_vm0, %v3770_v6 }
 0x73d   : > { %v1518_v15 = vpop.f32.mrb[6].mxu1 }
 0x73e   : > { %v3531_v16 = vpop.f32.mrb[7].mxu1  ;;  %3535 = vmatmul.mubr.msk.f32.vlgmr.msra.gmra.mrb[10].mxu0 %vm878_vm2, %v1518_v15 }
 0x73f   : > { %3544 = vmatprep.mubr.msk.f32.mxu0 %vm3769_vm0, %v3770_v6 }
 0x741   : > { %v1670_v18 = vpop.f32.mrb[8].mxu1 }
 0x742   : > { %v1674_v19 = vmul.f32 0.35355338, %v1670_v18  ;;  %v3541_v20 = vpop.f32.mrb[9].mxu1 }
 0x744   : > { %v1675_v21 = vadd.f32 %v1674_v19, %v3976_v17  ;;  %v873_v17 = vld [vmem:[%s4353_s4 + $0x18] sm:$0xff]  ;;  %s4355_s4 = sld [smem:[#allocation3_spill]] }
 0x745   : > { %3548 = vmatpush3.msra.mxu1 %v873_v17 }
 0x746   : > { %v1676_v22 = vsel %vm878_vm2, %v1675_v21, -inf  ;;  %3676 = vmatprep.subr.bf16.mxu1 %v3768_v3 }
 0x747   : > { %1677 = vmax.xlane.f32.xlu0 %v1676_v22 }
 0x74a   : > { %s769_s2 = scalar_lea.vmem %s4355_s4, %s3937_s25  ;;  %s4361_s4 = smov 96  }
 0x74b   : > { %v782_v58 = vld [vmem:[%s769_s2] sm:$0xff]  ;;  %s4362_s2 = smov 104  }
 0x75d   : > { %1687 = vrot.lane.b32.xlu0 %v3953_v11, %s3781_s8 }
 0x7d4   : > { %v1678_v23 = vpop.xlane.xlu0 %1677 }
 0x7d5   : > { %v1679_v24 = vsub.f32 %v1675_v21, %v1678_v23  ;;  %v4142_v21 = vld [vmem:[%s776_s0] ss:$0 sm:$0xff] }
 0x7d7   : > { %v1680_v25 = vmul.f32 1.442695, %v1679_v24 }
 0x7d8   : > { %v1688_v26 = vpop.permute.xlu0 %1687 }
 0x7d9   : > { %3734 = vpow2.f32 %v1680_v25  ;;  %3543 = vmatpush3.msra.mxu0 %v1688_v26 }
 0x7da   : > { %3670 = vmatprep.subr.bf16.mxu0 %v3768_v3 }
 0x7e3   : > { %v3735_v27 = vpop.eup %3734 }
 0x7e4   : > { %v1682_v28 = vsel %vm878_vm2, %v3735_v27, 0.0 }
 0x7e5   : > { %1683 = vadd.xlane.f32.xlu1 %v1682_v28 }
 0x811   : > { %v1591_v11 = vpop.f32.mrb[10].mxu0 }
 0x812   : > { %v1595_v29 = vadd.f32 %v1591_v11, %v4017_v56  ;;  %v3536_v30 = vpop.f32.mrb[11].mxu0  ;;  %v1877_v56 = vld [vmem:[%s4311_s10 + $0x10] sm:$0xff] }
 0x813   : > { %v3674_v59 = vpack.c.bf16 %v1878_v57, %v1877_v56 }
 0x872   : > { %v1684_v31 = vpop.xlane.xlu1 %1683 }
 0x873   : > { %3736 = vrcp.f32 %v1684_v31 }
 0x87d   : > { %v3737_v32 = vpop.eup %3736 }
 0x87e   : > { %v1686_v33 = vmul.f32 %v3737_v32, %v3735_v27 }
 0x880   : > { %3545 = vmatmul.mubr.msk.f32.vlgmr.msra.gmra.mrb[12].mxu0 %vm878_vm2, %v1686_v33 }
 0x881   : > { %3560 = vmatprep.mubr.msk.f32.mxu0 %vm3769_vm0, %v3770_v6  ;;  %3672 = vmatpush3.bf16.msra.mxu0 %v3671_v53 }
 0x882   : > { %3673 = vmatprep.subr.bf16.mxu0 %v3768_v3 }
 0x885   : > { %3675 = vmatpush3.bf16.msra.mxu0 %v3674_v59 }
 0x886   : > { %3574 = vmatprep.subr.mxu0 %v3770_v6 }
 0x953   : > { %v1759_v34 = vpop.f32.mrb[12].mxu0 }
 0x954   : > { %v3546_v35 = vpop.f32.mrb[13].mxu0  ;;  %3550 = vmatmul.mubr.msk.f32.vlgmr.msra.gmra.mrb[10].mxu1 %vm878_vm2, %v1759_v34 }
 0x955   : > { %3571 = vmatprep.mubr.msk.f32.mxu1 %vm3769_vm0, %v3770_v6 }
 0xa27   : > { %v1832_v37 = vpop.f32.mrb[10].mxu1 }
 0xa28   : > { %v1836_v38 = vadd.f32 %v1832_v37, %v1595_v29  ;;  %v3551_v39 = vpop.f32.mrb[11].mxu1 }
 0xa2a   : > { %v1843_v40 = vadd.f32 %v3369_v36, %v1836_v38 }
 0xa2c   : > { %v1844_v41 = vadd.f32 %v1843_v40, %v3943_v8  ;;  %v3677_v8 = vpack.c.bf16 %v1960_v49, %v1959_v48  ;;  %v2044_v48 = vld [vmem:[%s4315_s14 + $0x8] sm:$0xff] }
 0xa2e   : > { %v1847_v42 = vsel %vm796_vm1, %v1844_v41, 0.0  ;;  %3678 = vmatpush3.bf16.msra.mxu1 %v3677_v8 }
 0xa2f   : > { %1848 = vadd.xlane.f32.xlu1 %v1847_v42  ;;  %3679 = vmatprep.subr.bf16.mxu1 %v3768_v3 }
 0xa32   : > { %3681 = vmatpush3.bf16.msra.mxu1 %v3680_v55 }
 0xa33   : > { %3579 = vmatprep.subr.mxu1 %v3770_v6 }
 0xa35   : > { %3572 = vmatmul.mubr.msk.f32.vlgmr.msra.gmra.mrb[12].mxu1 %vm796_vm1, %v782_v58 }
 0xa36   : > { %3581 = vmatprep.mubr.msk.f32.mxu1 %vm3769_vm0, %v3770_v6 }
 0xabc   : > { %v1849_v43 = vpop.xlane.xlu1 %1848 }
 0xabd   : > { %v1851_v44 = vmul.f32 0.03125, %v1849_v43 }
 0xabf   : > { %v1852_v45 = vsub.f32 %v1844_v41, %v1851_v44 }
 0xac1   : > { %v1853_v46 = vmul.f32 %v1852_v45, %v1852_v45 }
 0xac3   : > { %v1854_v47 = vsel %vm796_vm1, %v1853_v46, 0.0 }
 0xac4   : > { %1855 = vadd.xlane.f32.xlu1 %v1854_v47  ;;  %v2043_v47 = vld [vmem:[%s4315_s14] sm:$0xff] }
 0xb08   : > { %v2039_v9 = vpop.f32.mrb[12].mxu1 }
 0xb09   : > { %v4115_v10 = vadd.f32 %v3374_v7, %v2039_v9  ;;  %v3573_v12 = vpop.f32.mrb[13].mxu1 }
 0xb0b   : > { %2221 = vrot.lane.b32.xlu1 %v4115_v10, %s4357_s27 }
 0xb51   : > { %v1856_v60 = vpop.xlane.xlu1 %1855 }
 0xb52   : > { %v1857_v61 = vmul.f32 0.03125, %v1856_v60 }
 0xb54   : > { %v1858_v62 = vadd.f32 1e-05, %v1857_v61 }
 0xb56   : > { %3738 = vrsqrt.f32 %v1858_v62 }
 0xb60   : > { %v3739_v63 = vpop.eup %3738 }
 0xb61   : > { %v1860_v1 = vmul.f32 %v3739_v63, %v1852_v45 }
 0xb63   : > { %v1867_v4 = vmul.f32 %v3370_v0, %v1860_v1 }
 0xb65   : > { %v4106_v5 = vadd.f32 %v3371_v2, %v1867_v4 }
 0xb67   : > { %3561 = vmatmul.mubr.msk.f32.vlgmr.msra.gmra.mrb[14].mxu0 %vm796_vm1, %v4106_v5 }
 0xb68   : > { %3576 = vmatprep.mubr.msk.f32.mxu0 %vm3769_vm0, %v3770_v6  ;;  %3575 = vmatpush3.xpose.msk.msra.mxu0 %vm878_vm2, %v4115_v10 }
 0xb69   : > { %3584 = vmatprep.subr.mxu0 %v3770_v6 }
 0xb7d   : > { %v2222_v18 = vpop.permute.xlu1 %2221 }
 0xc3a   : > { %v1955_v14 = vpop.f32.mrb[14].mxu0 }
 0xc3b   : > { %v4125_v15 = vadd.f32 %v3372_v13, %v1955_v14  ;;  %v3562_v16 = vpop.f32.mrb[15].mxu0 }
 0xc3d   : > { %2219 = vrot.lane.b32.xlu0 %v4125_v15, %s4357_s27  ;;  %3577 = vmatmul.mubr.msk.f32.vlgmr.msra.gmra.mrb[16].mxu0 %vm878_vm2, %v4125_v15 }
 0xc3e   : > { %3585 = vmatpush3.xpose.msk.msra.mxu0 %vm878_vm2, %v2222_v18  ;;  %3586 = vmatprep.mubr.msk.f32.mxu0 %vm3769_vm0, %v3770_v6  ;;  %v2045_v18 = vld [vmem:[%s4315_s14 + $0x10] sm:$0xff] }
 0xc3f   : > { %3594 = vmatprep.subr.mxu0 %v3770_v6 }
 0xcaf   : > { %v2220_v19 = vpop.permute.xlu0 %2219 }
 0xcb0   : > { %3587 = vmatmul.mubr.msk.f32.vlgmr.msra.gmra.mrb[18].mxu0 %vm878_vm2, %v2220_v19 }
 0xcb1   : > { %3596 = vmatprep.mubr.msk.f32.mxu0 %vm3769_vm0, %v3770_v6  ;;  %3595 = vmatpush3.msra.mxu0 %v2044_v48 }
 0xcb2   : > { %3604 = vmatprep.subr.mxu0 %v3770_v6 }
 0xd10   : > { %v2120_v20 = vpop.f32.mrb[16].mxu0 }
 0xd11   : > { %v2124_v22 = vmul.f32 0.35355338, %v2120_v20  ;;  %v3578_v23 = vpop.f32.mrb[17].mxu0 }
 0xd13   : > { %v2131_v24 = vadd.f32 %v4142_v21, %v2124_v22 }
 0xd15   : > { %v2132_v25 = vsel %vm878_vm2, %v2131_v24, -inf }
 0xd16   : > { %2133 = vmax.xlane.f32.xlu0 %v2132_v25 }
 0xd83   : > { %v2293_v26 = vpop.f32.mrb[18].mxu0 }
 0xd84   : > { %v2297_v27 = vmul.f32 0.35355338, %v2293_v26  ;;  %v3588_v28 = vpop.f32.mrb[19].mxu0 }
 0xd86   : > { %v2298_v17 = vadd.f32 %v4142_v21, %v2297_v27 }
 0xd88   : > { %v2299_v11 = vsel %vm878_vm2, %v2298_v17, -inf }
 0xd89   : > { %2300 = vmax.xlane.f32.xlu1 %v2299_v11 }
 0xd9a   : > { %2310 = vrot.lane.b32.xlu1 %v4115_v10, %s4359_s30 }
 0xd9e   : > { %2534 = vrot.lane.b32.xlu1 %v4115_v10, %s4360_s26 }
 0xda3   : > { %v2134_v29 = vpop.xlane.xlu0 %2133 }
 0xda4   : > { %v2135_v30 = vsub.f32 %v2131_v24, %v2134_v29 }
 0xda6   : > { %v2136_v31 = vmul.f32 1.442695, %v2135_v30 }
 0xda8   : > { %3740 = vpow2.f32 %v2136_v31 }
 0xdb2   : > { %v3741_v32 = vpop.eup %3740 }
 0xdb3   : > { %v2138_v33 = vsel %vm878_vm2, %v3741_v32, 0.0 }
 0xdb4   : > { %2139 = vadd.xlane.f32.xlu0 %v2138_v33 }
 0xe16   : > { %v2301_v34 = vpop.xlane.xlu1 %2300 }
 0xe17   : > { %v2302_v35 = vsub.f32 %v2298_v17, %v2301_v34 }
 0xe19   : > { %v2303_v36 = vmul.f32 1.442695, %v2302_v35 }
 0xe1a   : > { %v2311_v44 = vpop.permute.xlu1 %2310 }
 0xe1b   : > { %3742 = vpow2.f32 %v2303_v36 }
 0xe1e   : > { %v2535_v51 = vpop.permute.xlu1 %2534 }
 0xe25   : > { %v3743_v37 = vpop.eup %3742 }
 0xe26   : > { %v2305_v38 = vsel %vm878_vm2, %v3743_v37, 0.0 }
 0xe27   : > { %2306 = vadd.xlane.f32.xlu0 %v2305_v38  ;;  %v3393_v38 = vld [vmem:[%s4316_s15] ss:$0 sm:$0xff] }
 0xe3d   : > { %2143 = vrot.lane.b32.xlu0 %v4115_v10, %s4361_s4  ;;  %s780_s4 = scalar_lea.vmem %s4325_s24, %s3937_s25 }
 0xe41   : > { %2532 = vrot.lane.b32.xlu0 %v4125_v15, %s4360_s26  ;;  %v2140_v39 = vpop.xlane.xlu0 %2139 }
 0xe42   : > { %3744 = vrcp.f32 %v2140_v39 }
 0xe4c   : > { %v3745_v41 = vpop.eup %3744 }
 0xe4d   : > { %v2142_v42 = vmul.f32 %v3745_v41, %v3741_v32 }
 0xeb4   : > { %v2307_v40 = vpop.xlane.xlu0 %2306 }
 0xeb5   : > { %3746 = vrcp.f32 %v2307_v40 }
 0xeb8   : > { %v2144_v43 = vpop.permute.xlu0 %2143 }
 0xeb9   : > { %3580 = vmatpush3.msra.mxu1 %v2144_v43 }
 0xeba   : > { %3582 = vmatmul.mubr.msk.f32.vlgmr.msra.gmra.mrb[14].mxu1 %vm878_vm2, %v2142_v42  ;;  %3589 = vmatprep.subr.mxu1 %v3770_v6 }
 0xebb   : > { %3590 = vmatpush3.msra.mxu1 %v2311_v44  ;;  %3591 = vmatprep.mubr.msk.f32.mxu1 %vm3769_vm0, %v3770_v6 }
 0xebc   : > { %3599 = vmatprep.subr.mxu1 %v3770_v6  ;;  %v2533_v53 = vpop.permute.xlu0 %2532 }
 0xebf   : > { %v3747_v45 = vpop.eup %3746 }
 0xec0   : > { %v2309_v46 = vmul.f32 %v3747_v45, %v3743_v37 }
 0xec2   : > { %3592 = vmatmul.mubr.msk.f32.vlgmr.msra.gmra.mrb[16].mxu1 %vm878_vm2, %v2309_v46 }
 0xec3   : > { %3601 = vmatprep.mubr.msk.f32.mxu1 %vm3769_vm0, %v3770_v6  ;;  %3600 = vmatpush3.msra.mxu1 %v2043_v47 }
 0xec4   : > { %3609 = vmatprep.subr.mxu1 %v3770_v6 }
 0xf8d   : > { %v2215_v49 = vpop.f32.mrb[14].mxu1 }
 0xf8e   : > { %v3583_v8 = vpop.f32.mrb[15].mxu1  ;;  %3602 = vmatmul.mubr.msk.f32.vlgmr.msra.gmra.mrb[18].mxu1 %vm878_vm2, %v2215_v49 }
 0xf8f   : > { %3611 = vmatprep.mubr.msk.f32.mxu1 %vm3769_vm0, %v3770_v6  ;;  %v3052_v8 = vld [vmem:[%s4319_s18 + $0x8] sm:$0xff] }
 0xf95   : > { %v2382_v50 = vpop.f32.mrb[16].mxu1 }
 0xf96   : > { %v3593_v52 = vpop.f32.mrb[17].mxu1  ;;  %3597 = vmatmul.mubr.msk.f32.vlgmr.msra.gmra.mrb[20].mxu0 %vm878_vm2, %v2382_v50 }
 0xf97   : > { %3605 = vmatpush3.xpose.msk.msra.mxu0 %vm878_vm2, %v2535_v51  ;;  %3606 = vmatprep.mubr.msk.f32.mxu0 %vm3769_vm0, %v3770_v6  ;;  %v3054_v51 = vld [vmem:[%s4319_s18 + $0x18] sm:$0xff] }
 0xf98   : > { %3614 = vmatprep.subr.mxu0 %v3770_v6 }
 0xf9a   : > { %3607 = vmatmul.mubr.msk.f32.vlgmr.msra.gmra.mrb[22].mxu0 %vm878_vm2, %v2533_v53  ;;  %v3056_v53 = vld [vmem:[%s4321_s20] sm:$0xff] }
 0xf9b   : > { %3616 = vmatprep.mubr.msk.f32.mxu0 %vm3769_vm0, %v3770_v6  ;;  %3615 = vmatpush3.msra.mxu0 %v2045_v18 }
 0xf9c   : > { %3624 = vmatprep.subr.mxu0 %v3770_v6 }
0x1061   : > { %v2528_v54 = vpop.f32.mrb[18].mxu1 }
0x1062   : > { %v3603_v55 = vpop.f32.mrb[19].mxu1 }
0x1063   : > { %v3058_v55 = vld [vmem:[%s4321_s20 + $0x10] sm:$0xff] }
0x1069   : > { %v2455_v56 = vpop.f32.mrb[20].mxu0 }
0x106a   : > { %v2529_v57 = vadd.f32 %v2528_v54, %v2455_v56  ;;  %v3598_v58 = vpop.f32.mrb[21].mxu0  ;;  %v3057_v54 = vld [vmem:[%s4321_s20 + $0x8] sm:$0xff] }
0x106b   : > { %v3689_v56 = vpack.c.bf16 %v3057_v54, %v3056_v53 }
0x106d   : > { %v2606_v59 = vpop.f32.mrb[22].mxu0 }
0x106e   : > { %v2610_v60 = vmul.f32 0.35355338, %v2606_v59  ;;  %v3608_v61 = vpop.f32.mrb[23].mxu0  ;;  %v3060_v59 = vld [vmem:[%s4321_s20 + $0x20] sm:$0xff] }
0x1070   : > { %v2611_v62 = vadd.f32 %v4142_v21, %v2610_v60  ;;  %v3061_v60 = vld [vmem:[%s4321_s20 + $0x28] sm:$0xff] }
0x1071   : > { %v3695_v61 = vpack.c.bf16 %v3061_v60, %v3060_v59 }
0x1072   : > { %v2612_v63 = vsel %vm878_vm2, %v2611_v62, -inf }
0x1073   : > { %2613 = vmax.xlane.f32.xlu1 %v2612_v63 }
0x1084   : > { %2775 = vrot.lane.b32.xlu1 %v4115_v10, %s4362_s2 }
0x1088   : > { %2773 = vrot.lane.b32.xlu1 %v4125_v15, %s4362_s2 }
0x1100   : > { %v2614_v0 = vpop.xlane.xlu1 %2613 }
0x1101   : > { %v2615_v1 = vsub.f32 %v2611_v62, %v2614_v0 }
0x1103   : > { %v2616_v2 = vmul.f32 1.442695, %v2615_v1 }
0x1104   : > { %v2776_v14 = vpop.permute.xlu1 %2775 }
0x1105   : > { %3748 = vpow2.f32 %v2616_v2  ;;  %v3394_v2 = vld [vmem:[%s4317_s16] ss:$0 sm:$0xff] }
0x1108   : > { %v2774_v16 = vpop.permute.xlu1 %2773 }
0x110f   : > { %v3749_v4 = vpop.eup %3748 }
0x1110   : > { %v2618_v7 = vsel %vm878_vm2, %v3749_v4, 0.0 }
0x1111   : > { %2619 = vadd.xlane.f32.xlu0 %v2618_v7  ;;  %v3395_v7 = vld [vmem:[%s4318_s17] ss:$0 sm:$0xff] }
0x1127   : > { %2623 = vrot.lane.b32.xlu0 %v4115_v10, %s4363_s3 }
0x119e   : > { %v2620_v9 = vpop.xlane.xlu0 %2619 }
0x119f   : > { %3750 = vrcp.f32 %v2620_v9 }
0x11a2   : > { %v2624_v12 = vpop.permute.xlu0 %2623 }
0x11a3   : > { %3610 = vmatpush3.msra.mxu1 %v2624_v12 }
0x11a4   : > { %3619 = vmatprep.subr.mxu1 %v3770_v6 }
0x11a9   : > { %v3751_v13 = vpop.eup %3750 }
0x11aa   : > { %v2622_v15 = vmul.f32 %v3751_v13, %v3749_v4  ;;  %v3063_v13 = vld [vmem:[%s4321_s20 + $0x38] sm:$0xff] }
0x11ac   : > { %3612 = vmatmul.mubr.msk.f32.vlgmr.msra.gmra.mrb[20].mxu1 %vm878_vm2, %v2622_v15  ;;  %v3396_v15 = vld [vmem:[%s4320_s19] ss:$0 sm:$0xff] }
0x11ad   : > { %3620 = vmatpush3.xpose.msk.msra.mxu1 %vm878_vm2, %v2776_v14  ;;  %3621 = vmatprep.mubr.msk.f32.mxu1 %vm3769_vm0, %v3770_v6 }
0x11ae   : > { %3629 = vmatprep.subr.mxu1 %v3770_v6 }
0x11b0   : > { %3622 = vmatmul.mubr.msk.f32.vlgmr.msra.gmra.mrb[22].mxu1 %vm878_vm2, %v2774_v16 }
0x11b1   : > { %3631 = vmatprep.mubr.msk.f32.mxu1 %vm3769_vm0, %v3770_v6 }
0x127f   : > { %v2695_v19 = vpop.f32.mrb[20].mxu1 }
0x1280   : > { %v3613_v20 = vpop.f32.mrb[21].mxu1  ;;  %3617 = vmatmul.mubr.msk.f32.vlgmr.msra.gmra.mrb[24].mxu0 %vm878_vm2, %v2695_v19 }
0x1281   : > { %3626 = vmatprep.mubr.msk.f32.mxu0 %vm3769_vm0, %v3770_v6 }
0x1283   : > { %v2847_v22 = vpop.f32.mrb[22].mxu1 }
0x1284   : > { %v2851_v23 = vmul.f32 0.35355338, %v2847_v22  ;;  %v3623_v24 = vpop.f32.mrb[23].mxu1  ;;  %v3398_v22 = vld [vmem:[%s4322_s21] ss:$0 sm:$0xff] }
0x1286   : > { %v2852_v25 = vadd.f32 %v4142_v21, %v2851_v23  ;;  %v2046_v21 = vld [vmem:[%s4315_s14 + $0x18] sm:$0xff] }
0x1287   : > { %3630 = vmatpush3.msra.mxu1 %v2046_v21 }
0x1288   : > { %v2853_v26 = vsel %vm878_vm2, %v2852_v25, -inf  ;;  %3688 = vmatprep.subr.bf16.mxu1 %v3768_v3 }
0x1289   : > { %2854 = vmax.xlane.f32.xlu0 %v2853_v26 }
0x129f   : > { %2864 = vrot.lane.b32.xlu0 %v4115_v10, %s4364_s6 }
0x1316   : > { %v2855_v27 = vpop.xlane.xlu0 %2854 }
0x1317   : > { %v2856_v28 = vsub.f32 %v2852_v25, %v2855_v27 }
0x1319   : > { %v2857_v17 = vmul.f32 1.442695, %v2856_v28 }
0x131a   : > { %v2865_v11 = vpop.permute.xlu0 %2864 }
0x131b   : > { %3752 = vpow2.f32 %v2857_v17  ;;  %3625 = vmatpush3.msra.mxu0 %v2865_v11 }
0x131c   : > { %3682 = vmatprep.subr.bf16.mxu0 %v3768_v3 }
0x1325   : > { %v3753_v29 = vpop.eup %3752 }
0x1326   : > { %v2859_v30 = vsel %vm878_vm2, %v3753_v29, 0.0 }
0x1327   : > { %2860 = vadd.xlane.f32.xlu1 %v2859_v30 }
0x1353   : > { %v2768_v10 = vpop.f32.mrb[24].mxu0 }
0x1354   : > { %v2772_v31 = vadd.f32 %v2768_v10, %v2529_v57  ;;  %v3618_v32 = vpop.f32.mrb[25].mxu0  ;;  %v3059_v57 = vld [vmem:[%s4321_s20 + $0x18] sm:$0xff] }
0x1355   : > { %v3692_v58 = vpack.c.bf16 %v3059_v57, %v3058_v55 }
0x13b4   : > { %v2861_v33 = vpop.xlane.xlu1 %2860 }
0x13b5   : > { %3754 = vrcp.f32 %v2861_v33  ;;  %v3400_v33 = vld [vmem:[%s4323_s22] ss:$0 sm:$0xff] }
0x13bf   : > { %v3755_v34 = vpop.eup %3754 }
0x13c0   : > { %v2863_v35 = vmul.f32 %v3755_v34, %v3753_v29 }
0x13c2   : > { %3627 = vmatmul.mubr.msk.f32.vlgmr.msra.gmra.mrb[26].mxu0 %vm878_vm2, %v2863_v35  ;;  %v3401_v35 = vld [vmem:[%s4324_s23] ss:$0 sm:$0xff] }
0x13c3   : > { %3642 = vmatprep.mubr.msk.f32.mxu0 %vm3769_vm0, %v3770_v6 }
0x1495   : > { %v2936_v36 = vpop.f32.mrb[26].mxu0 }
0x1496   : > { %v3628_v37 = vpop.f32.mrb[27].mxu0  ;;  %3632 = vmatmul.mubr.msk.f32.vlgmr.msra.gmra.mrb[24].mxu1 %vm878_vm2, %v2936_v36 }
0x1497   : > { %3661 = vmatprep.mubr.msk.f32.mxu1 %vm3769_vm0, %v3770_v6  ;;  %v3051_v6 = vld [vmem:[%s4319_s18] sm:$0xff]  ;;  %3690 = vmatpush3.bf16.msra.mxu1 %v3689_v56 }
0x1498   : > { %v3683_v50 = vpack.c.bf16 %v3052_v8, %v3051_v6  ;;  %3691 = vmatprep.subr.bf16.mxu1 %v3768_v3 }
0x149a   : > { %3684 = vmatpush3.bf16.msra.mxu0 %v3683_v50 }
0x149b   : > { %3685 = vmatprep.subr.bf16.mxu0 %v3768_v3  ;;  %3693 = vmatpush3.bf16.msra.mxu1 %v3692_v58 }
0x149c   : > { %3694 = vmatprep.subr.bf16.mxu1 %v3768_v3 }
0x149f   : > { %3696 = vmatpush3.bf16.msra.mxu1 %v3695_v61 }
0x14a0   : > { %3697 = vmatprep.subr.bf16.mxu1 %v3768_v3  ;;  %v3062_v3 = vld [vmem:[%s4321_s20 + $0x30] sm:$0xff] }
0x14a1   : > { %v3698_v14 = vpack.c.bf16 %v3063_v13, %v3062_v3 }
0x14a3   : > { %3699 = vmatpush3.bf16.msra.mxu1 %v3698_v14 }
0x1569   : > { %v3009_v39 = vpop.f32.mrb[24].mxu1 }
0x156a   : > { %v3013_v40 = vadd.f32 %v3009_v39, %v2772_v31  ;;  %v3633_v41 = vpop.f32.mrb[25].mxu1 }
0x156c   : > { %v3020_v42 = vadd.f32 %v3393_v38, %v3013_v40 }
0x156e   : > { %v3021_v43 = vadd.f32 %v3020_v42, %v4106_v5  ;;  %v3053_v5 = vld [vmem:[%s4319_s18 + $0x10] sm:$0xff] }
0x156f   : > { %v3686_v52 = vpack.c.bf16 %v3054_v51, %v3053_v5 }
0x1570   : > { %v3024_v44 = vsel %vm796_vm1, %v3021_v43, 0.0 }
0x1571   : > { %3025 = vadd.xlane.f32.xlu1 %v3024_v44  ;;  %3687 = vmatpush3.bf16.msra.mxu0 %v3686_v52 }
0x15fe   : > { %v3026_v45 = vpop.xlane.xlu1 %3025 }
0x15ff   : > { %v3027_v46 = vmul.f32 0.03125, %v3026_v45 }
0x1601   : > { %v3028_v47 = vsub.f32 %v3021_v43, %v3027_v46 }
0x1603   : > { %v3029_v48 = vmul.f32 %v3028_v47, %v3028_v47 }
0x1605   : > { %v3030_v49 = vsel %vm796_vm1, %v3029_v48, 0.0 }
0x1606   : > { %3031 = vadd.xlane.f32.xlu1 %v3030_v49 }
0x1693   : > { %v3032_v62 = vpop.xlane.xlu1 %3031 }
0x1694   : > { %v3033_v63 = vmul.f32 0.03125, %v3032_v62 }
0x1696   : > { %v3034_v0 = vadd.f32 1e-05, %v3033_v63 }
0x1698   : > { %3756 = vrsqrt.f32 %v3034_v0 }
0x16a2   : > { %v3757_v1 = vpop.eup %3756 }
0x16a3   : > { %v3036_v4 = vmul.f32 %v3757_v1, %v3028_v47 }
0x16a5   : > { %v3043_v9 = vmul.f32 %v3394_v2, %v3036_v4 }
0x16a7   : > { %v3050_v12 = vadd.f32 %v3395_v7, %v3043_v9 }
0x16a9   : > { %3643 = vmatmul.mubr.msk.f32.vlgmr.msra.gmra.mrb[28].mxu0 %vm796_vm1, %v3050_v12 }
0x177c   : > { %v3140_v16 = vpop.f32.mrb[28].mxu0 }
0x177d   : > { %v3141_v18 = vadd.f32 %v3396_v15, %v3140_v16  ;;  %v3644_v19 = vpop.f32.mrb[29].mxu0 }
0x177f   : > { %v3144_v20 = vmax.f32 %v3141_v18, 0.0 }
0x1781   : > { %3662 = vmatmul.mubr.msk.f32.vlgmr.msra.gmra.mrb[26].mxu1 %vm3151_vm3, %v3144_v20 }
0x1854   : > { %v3221_v23 = vpop.f32.mrb[26].mxu1 }
0x1855   : > { %v3222_v24 = vadd.f32 %v3398_v22, %v3221_v23  ;;  %v3663_v25 = vpop.f32.mrb[27].mxu1 }
0x1857   : > { %v3225_v26 = vadd.f32 %v3222_v24, %v3050_v12 }
0x1859   : > { %v3228_v27 = vsel %vm796_vm1, %v3225_v26, 0.0 }
0x185a   : > { %3229 = vadd.xlane.f32.xlu1 %v3228_v27 }
0x18e7   : > { %v3230_v28 = vpop.xlane.xlu1 %3229 }
0x18e8   : > { %v3231_v17 = vmul.f32 0.03125, %v3230_v28 }
0x18ea   : > { %v3232_v11 = vsub.f32 %v3225_v26, %v3231_v17 }
0x18ec   : > { %v3233_v29 = vmul.f32 %v3232_v11, %v3232_v11 }
0x18ee   : > { %v3234_v30 = vsel %vm796_vm1, %v3233_v29, 0.0 }
0x18ef   : > { %3235 = vadd.xlane.f32.xlu1 %v3234_v30 }
0x197c   : > { %v3236_v21 = vpop.xlane.xlu1 %3235 }
0x197d   : > { %v3237_v10 = vmul.f32 0.03125, %v3236_v21 }
0x197f   : > { %v3238_v31 = vadd.f32 1e-05, %v3237_v10 }
0x1981   : > { %3758 = vrsqrt.f32 %v3238_v31 }
0x198b   : > { %v3759_v32 = vpop.eup %3758 }
0x198c   : > { %v3240_v34 = vmul.f32 %v3759_v32, %v3232_v11 }
0x198e   : > { %v3247_v36 = vmul.f32 %v3400_v33, %v3240_v34 }
0x1990   : > { %v3254_v37 = vadd.f32 %v3401_v35, %v3247_v36 }
0x1992   : > { %3255 = vst.msk [vmem:[%s780_s4] sm:$0xff] %vm796_vm1, %v3254_v37 }
0x1993 PF: > { %s34_s5 = sadd.s32 1, %s3766_s5  }
0x1994   : > { %p31_p4 = scmp.ge.s32.totalorder %s34_s5, 4  }
0x1996   :  { %33 = sbr.rel (!%p31_p4) target bundleno = 10 (0xa), region = 155 }

// kernel: transformer_forward.20
= control target key start
LH: loop header
LB: loop body
LE: loop exit
PB: predicated region body
PF: predicated region fallthrough
CT: control target
= control target key end

     0   :  { %s4691_s0 = inlined_call_operand.vmem [shape: f32[2,8,32], index: 0, kind: input, shape index: {}]   ;;  %s4692_s1 = inlined_call_operand.vmem [shape: f32[2,8,32], index: 1, kind: input, shape index: {}]   ;;  %s4693_s2 = inlined_call_operand.vmem [shape: f32[2,8,8], index: 2, kind: input, shape index: {}]   ;;  %s4694_s3 = inlined_call_operand.vmem [shape: f32[2,1,8], index: 3, kind: input, shape index: {}]   ;;  %s4695_s4 = inlined_call_operand.vmem [shape: f32[32,96], index: 4, kind: input, shape index: {}]   ;;  %s4696_s5 = inlined_call_operand.vmem [shape: f32[1,96], index: 5, kind: input, shape index: {}]   ;;  %s4697_s6 = inlined_call_operand.vmem [shape: f32[32,32], index: 6, kind: input, shape index: {}]   ;;  %s4698_s7 = inlined_call_operand.vmem [shape: f32[1,32], index: 7, kind: input, shape index: {}]   ;;  %s4699_s8 = inlined_call_operand.vmem [shape: f32[1,32], index: 8, kind: input, shape index: {}]   ;;  %s4700_s9 = inlined_call_operand.vmem [shape: f32[1,32], index: 9, kind: input, shape index: {}]   ;;  %s4701_s10 = inlined_call_operand.vmem [shape: f32[32,32], index: 10, kind: input, shape index: {}]   ;;  %s4702_s11 = inlined_call_operand.vmem [shape: f32[1,32], index: 11, kind: input, shape index: {}]   ;;  %s4703_s12 = inlined_call_operand.vmem [shape: f32[32,64], index: 12, kind: input, shape index: {}]   ;;  %s4704_s13 = inlined_call_operand.vmem [shape: f32[1,64], index: 13, kind: input, shape index: {}]   ;;  %s4705_s14 = inlined_call_operand.vmem [shape: f32[32,32], index: 14, kind: input, shape index: {}]   ;;  %s4706_s15 = inlined_call_operand.vmem [shape: f32[1,32], index: 15, kind: input, shape index: {}]   ;;  %s4707_s16 = inlined_call_operand.vmem [shape: f32[1,32], index: 16, kind: input, shape index: {}]   ;;  %s4708_s17 = inlined_call_operand.vmem [shape: f32[1,32], index: 17, kind: input, shape index: {}]   ;;  %s4709_s18 = inlined_call_operand.vmem [shape: f32[32,64], index: 18, kind: input, shape index: {}]   ;;  %s4710_s19 = inlined_call_operand.hbm [shape: f32[1,64], index: 19, kind: input, shape index: {}]   ;;  %s4711_s20 = inlined_call_operand.vmem [shape: f32[64,32], index: 20, kind: input, shape index: {}]   ;;  %s4712_s21 = inlined_call_operand.hbm [shape: f32[1,32], index: 21, kind: input, shape index: {}]   ;;  %s4713_s22 = inlined_call_operand.hbm [shape: f32[1,32], index: 22, kind: input, shape index: {}]   ;;  %s4714_s23 = inlined_call_operand.hbm [shape: f32[1,32], index: 23, kind: input, shape index: {}]   ;;  %s4715_s24 = inlined_call_operand.vmem [shape: f32[2,8,32], index: 24, kind: output, shape index: {}]  }
   0x1   :  { %4729 = sst [smem:[#allocation13_spill]] %s4691_s0 }
   0x2   :  { %4730 = sst [smem:[#allocation14_spill]] %s4692_s1 }
   0x3   :  { %4731 = sst [smem:[#allocation15_spill]] %s4693_s2 }
   0x4   :  { %4732 = sst [smem:[#allocation16_spill]] %s4694_s3 }
   0x5   :  { %4733 = sst [smem:[#allocation17_spill]] %s4695_s4 }
   0x6   :  { %4734 = sst [smem:[#allocation18_spill]] %s4696_s5 }
   0x7   :  { %4735 = sst [smem:[#allocation19_spill]] %s4697_s6 }
   0x8   :  { %4736 = sst [smem:[#allocation20_spill]] %s4698_s7 }
   0x9   :  { %4737 = sst [smem:[#allocation21_spill]] %s4699_s8 }
   0xa   :  { %4738 = sst [smem:[#allocation22_spill]] %s4708_s17 }
   0xb   :  { %4739 = sst [smem:[#allocation23_spill]] %s4715_s24 }
   0xc   :  { %29 = vsyncpa [#allocation3], 0 }
   0xd   :  { %30 = vsyncpa [#allocation5], 0 }
   0xe   :  { %31 = vsyncpa [#allocation8], 0  ;;  %s4176_s5 = smov 0  }
   0xf LB: > { %4740 = sst [smem:[#allocation12_spill]] %s4031_s5  ;;  %s4182_s26 = sadd.s32 4294967295, %s4031_s5   ;;  %s4031_s5 = sphi %s4176_s5, %s37_s5  }
  0x10   : > { %p3436_p0 = scmp.ge.s32.totalorder %s4031_s5, 1  ;;  %p592_p1 = scmp.lt.s32.totalorder %s4031_s5, 3 }
  0x11   : > { %p4719_p2 = scmp.eq.s32.totalorder %s4182_s26, 0  ;;  %s4033_s27 = smov [#allocation4]  }
  0x12   : > { %s664_s28 = sshll.u32 %s4033_s27, 4  ;;  %p4187_p3 = pnand %p3436_p0, %p592_p1  ;;  %s665_s28 = int_to_ptr.vmem [resolvable:$true] %s664_s28 }
  0x13   : > { %s4034_s2 = smov [#allocation2]   ;;  %s4035_s0 = smov [#allocation6]  }
  0x14   : > { %s4741_s6 = scalar_select %p4187_p3, 1, 0 }
  0x15   : > { %s650_s29 = sshll.u32 %s4034_s2, 4  ;;  %p3816_p4 = pneg %p4187_p3  ;;  %s4199_s29 = int_to_ptr.vmem [resolvable:$true] %s650_s29 }
  0x16   : > { %s675_s7 = sshll.u32 %s4035_s0, 4  ;;  %s4036_s3 = smov [#allocation7]   ;;  %s4201_s7 = int_to_ptr.vmem [resolvable:$true] %s675_s7 }
  0x17   : > { %p4195_p5 = pnand %p4719_p2, %p3816_p4  ;;  %s686_s25 = sshll.u32 %s4036_s3, 4  ;;  %s4203_s25 = int_to_ptr.vmem [resolvable:$true] %s686_s25 }
  0x18   : > { %s3901_s1 = scalar_lea.hbm %s4712_s21, 16 }
  0x19   : > { %p3902_p6 = scmp.ne.s32.totalorder %s4712_s21, %s3901_s1  ;;  %p4213_p7 = pneg %p4195_p5 }
  0x1a   : > { %p3908_p10 = scmp.lt.u32.totalorder %s3901_s1, %s4712_s21 }
  0x1b   : > { %p3904_p8 = pnand %p4213_p7, %p3902_p6 }
  0x1d   : > { %p3905_p9 = pneg %p3904_p8 }
  0x1f   : > { %p3910_p11 = pnand %p3908_p10, %p3905_p9 }
  0x21   : > { %3913 = shalt.err (!%p3910_p11)
}
  0x22   : > { %s3914_s8 = scalar_lea.vmem %s665_s28, 16  ;;  %s3921_s4 = scalar_lea.vmem %s665_s28, 32 }
  0x23   : > { %p3915_p12 = scmp.ne.s32.totalorder %s665_s28, %s3914_s8  ;;  %p3922_p1 = scmp.lt.s32.totalorder %s665_s28, %s665_s28 }
  0x24   : > { %p3923_p4 = scmp.lt.s32.totalorder %s3921_s4, %s3914_s8 }
  0x25   : > { %p3917_p13 = pnand %p3915_p12, %p4213_p7 }
  0x26   : > { %p3924_p2 = por %p3923_p4, %p3922_p1 }
  0x27   : > { %p3918_p0 = pneg %p3917_p13 }
  0x29   : > { %p3925_p3 = pnand %p3924_p2, %p3918_p0 }
  0x2b   : > { %3928 = shalt.err (!%p3925_p3)
}
  0x2c   : > { %3822 = dma.hbm_to_vmem [thread:$0]  (!%p4195_p5), %s4712_s21, 16, %s665_s28, [#allocation5]  }
  0x2d   : > { %s3929_s3 = scalar_lea.hbm %s4710_s19, 16 }
  0x2e   : > { %p3930_p6 = scmp.ne.s32.totalorder %s4710_s19, %s3929_s3  ;;  %p3936_p2 = scmp.lt.u32.totalorder %s3929_s3, %s4710_s19 }
  0x30   : > { %p3932_p8 = pnand %p3930_p6, %p4213_p7 }
  0x32   : > { %p3933_p9 = pneg %p3932_p8 }
  0x34   : > { %p3938_p3 = pnand %p3936_p2, %p3933_p9 }
  0x36   : > { %3941 = shalt.err (!%p3938_p3)
}
  0x37   : > { %s3942_s28 = scalar_lea.vmem %s4199_s29, 16  ;;  %s3949_s17 = scalar_lea.vmem %s4199_s29, 32 }
  0x38   : > { %p3943_p10 = scmp.ne.s32.totalorder %s4199_s29, %s3942_s28  ;;  %p3950_p13 = scmp.lt.s32.totalorder %s4199_s29, %s4199_s29 }
  0x39   : > { %p3951_p0 = scmp.lt.s32.totalorder %s3949_s17, %s3942_s28 }
  0x3a   : > { %p3945_p11 = pnand %p3943_p10, %p4213_p7 }
  0x3b   : > { %p3952_p1 = por %p3951_p0, %p3950_p13 }
  0x3c   : > { %p3946_p12 = pneg %p3945_p11 }
  0x3e   : > { %p3953_p4 = pnand %p3952_p1, %p3946_p12 }
  0x40   : > { %3956 = shalt.err (!%p3953_p4)
}
  0x41   : > { %3819 = dma.hbm_to_vmem [thread:$0]  (!%p4195_p5), %s4710_s19, 16, %s4199_s29, [#allocation3]  }
  0x42   : > { %s3957_s1 = scalar_lea.hbm %s4713_s22, 16 }
  0x43   : > { %p3958_p6 = scmp.ne.s32.totalorder %s4713_s22, %s3957_s1  ;;  %p3964_p2 = scmp.lt.u32.totalorder %s3957_s1, %s4713_s22 }
  0x45   : > { %p3960_p8 = pnand %p3958_p6, %p4213_p7 }
  0x47   : > { %p3961_p9 = pneg %p3960_p8 }
  0x49   : > { %p3966_p3 = pnand %p3964_p2, %p3961_p9 }
  0x4b   : > { %3969 = shalt.err (!%p3966_p3)
}
  0x4c   : > { %s3970_s29 = scalar_lea.vmem %s4201_s7, 16  ;;  %s3977_s17 = scalar_lea.vmem %s4201_s7, 32 }
  0x4d   : > { %p3971_p10 = scmp.ne.s32.totalorder %s4201_s7, %s3970_s29  ;;  %p3978_p13 = scmp.lt.s32.totalorder %s4201_s7, %s4201_s7 }
  0x4e   : > { %p3979_p0 = scmp.lt.s32.totalorder %s3977_s17, %s3970_s29 }
  0x4f   : > { %p3973_p11 = pnand %p3971_p10, %p4213_p7 }
  0x50   : > { %p3980_p1 = por %p3979_p0, %p3978_p13 }
  0x51   : > { %p3974_p12 = pneg %p3973_p11 }
  0x53   : > { %p3981_p4 = pnand %p3980_p1, %p3974_p12 }
  0x55   : > { %3984 = shalt.err (!%p3981_p4)
}
  0x56   : > { %3825 = dma.hbm_to_vmem [thread:$0]  (!%p4195_p5), %s4713_s22, 16, %s4201_s7, [#allocation5]  }
  0x57   : > { %s3985_s1 = scalar_lea.hbm %s4714_s23, 16 }
  0x58   : > { %p3986_p6 = scmp.ne.s32.totalorder %s4714_s23, %s3985_s1  ;;  %p3992_p2 = scmp.lt.u32.totalorder %s3985_s1, %s4714_s23 }
  0x5a   : > { %p3988_p8 = pnand %p3986_p6, %p4213_p7 }
  0x5c   : > { %p3989_p9 = pneg %p3988_p8 }
  0x5e   : > { %p3994_p3 = pnand %p3992_p2, %p3989_p9 }
  0x60   : > { %3997 = shalt.err (!%p3994_p3)
}
  0x61   : > { %s3998_s7 = scalar_lea.vmem %s4203_s25, 16  ;;  %s4005_s29 = scalar_lea.vmem %s4203_s25, 32 }
  0x62   : > { %p3999_p10 = scmp.ne.s32.totalorder %s4203_s25, %s3998_s7  ;;  %p4006_p13 = scmp.lt.s32.totalorder %s4203_s25, %s4203_s25 }
  0x63   : > { %p4007_p0 = scmp.lt.s32.totalorder %s4005_s29, %s3998_s7 }
  0x64   : > { %p4001_p11 = pnand %p3999_p10, %p4213_p7 }
  0x65   : > { %p4008_p1 = por %p4007_p0, %p4006_p13 }
  0x66   : > { %p4002_p12 = pneg %p4001_p11 }
  0x68   : > { %p4009_p4 = pnand %p4008_p1, %p4002_p12 }
  0x6a   : > { %4012 = shalt.err (!%p4009_p4)
}
  0x6b   : > { %3828 = dma.hbm_to_vmem [thread:$0]  (!%p4195_p5), %s4714_s23, 16, %s4203_s25, [#allocation8]  }
  0x6c   : > { %p4744_p6 = scmp.ne.s32.totalorder %s4741_s6, 0 }
  0x6d   : > { %p4745_p7 = scmp.eq.s32.totalorder (!%p4744_p6), %s4182_s26, 0 }
  0x6e   : > { %726 = sbr.rel (%p4744_p6) target bundleno = 6659 (0x1a03), region = 116 }
  0x75   : > { %4018 = dma.done.wait (%p4745_p7), [#allocation3], 16   ;;  %p4746_p8 = pmov %p4745_p7 }
  0x76   : > { %p4747_p9 = pmov %p4745_p7 }
  0x77   : > { %4020 = vsyncadd (%p4746_p8), [#allocation3], 4294967280 }
  0x78   : > { %4022 = dma.done.wait (%p4747_p9), [#allocation5], 32   ;;  %p4748_p2 = pmov %p4745_p7 }
  0x7a   : > { %4024 = vsyncadd (%p4748_p2), [#allocation5], 4294967264  ;;  %p4749_p3 = pmov %p4748_p2 }
  0x7b   : > { %p4750_p5 = pmov %p4748_p2 }
  0x7c   : > { %4026 = dma.done.wait (%p4749_p3), [#allocation8], 16  }
  0x7d   : > { %4028 = vsyncadd (%p4750_p5), [#allocation8], 4294967280  ;;  %p813_p10 = scmp.lt.s32.totalorder %s4182_s26, 1  ;;  %v4037_v0 = vmov 0.0|0.0   ;;  %vm4038_vm0 = vmmov 0   ;;  %v4039_v1 = vmov 0.0  }
  0x7e   : > { %3764 = vmatprep.subr.bf16.mxu0 %v4037_v0  ;;  %3589 = vmatprep.mubr.msk.f32.mxu0 %vm4038_vm0, %v4039_v1  ;;  %s4751_s25 = sld [smem:[#allocation17_spill]]  ;;  %s4752_s7 = sld [smem:[#allocation13_spill]]  ;;  %vm847_vm1 = vcmask 261120   ;;  %vm929_vm2 = vcmask 64512   ;;  %vm3202_vm3 = vcmask 523264  }
  0x7f   : > { %3597 = vmatprep.subr.mxu1 %v4039_v1  ;;  %3599 = vmatprep.mubr.msk.f32.mxu1 %vm4038_vm0, %v4039_v1  ;;  %s4770_s26 = smov (!%p813_p10, %s4182_s26), 1  ;;  %s4753_s6 = sld [smem:[#allocation18_spill]] }
  0x80   : > { %s4338_s8 = sshll.u32 %s4770_s26, 3  ;;  %s4040_s30 = smov 120  }
  0x81   : > { %s4725_s0 = smov 96   ;;  %s4728_s27 = smov 88  }
  0x82   : > { %s4754_s1 = sld [smem:[#allocation15_spill]]  ;;  %s4043_s4 = smov 56  }
  0x83   : > { %s4044_s28 = smov 64   ;;  %s4050_s24 = smov 40  }
  0x84   : > { %v836_v2 = vld [vmem:[%s4751_s25] sm:$0xff]  ;;  %v837_v3 = vld [vmem:[%s4751_s25 + $0x8] sm:$0xff]  ;;  %v838_v4 = vld [vmem:[%s4751_s25 + $0x10] sm:$0xff]  ;;  %s816_s29 = scalar_lea.vmem %s4752_s7, %s4338_s8  ;;  %s4722_s7 = smov 80  }
  0x85   : > { %v3765_v5 = vpack.c.bf16 %v837_v3, %v836_v2  ;;  %v839_v6 = vld [vmem:[%s4751_s25 + $0x18] sm:$0xff]  ;;  %v4345_v8 = vld [vmem:[%s816_s29] sm:$0xff]  ;;  %s4726_s29 = smov 112   ;;  %s4756_s17 = sld [smem:[#allocation20_spill]] }
  0x86   : > { %v3768_v7 = vpack.c.bf16 %v839_v6, %v838_v4  ;;  %v3451_v9 = vld [vmem:[%s4753_s6] ss:$0 sm:$0xff]  ;;  %s4755_s6 = sld [smem:[#allocation19_spill]]  ;;  %s4763_s5 = smov 104  }
  0x87   : > { %3766 = vmatpush3.bf16.msra.mxu0 %v3765_v5 }
  0x88   : > { %3767 = vmatprep.subr.bf16.mxu0 %v4037_v0  ;;  %s824_s3 = scalar_lea.vmem %s4754_s1, %s4338_s8  ;;  %s4721_s1 = smov 72  }
  0x89   : > { %v4378_v17 = vld [vmem:[%s824_s3] sm:$0xff]  ;;  %s4723_s3 = smov 104  }
  0x8b   : > { %3769 = vmatpush3.bf16.msra.mxu0 %v3768_v7 }
  0x8c   : > { %3592 = vmatprep.subr.mxu0 %v4039_v1  ;;  %v922_v37 = vld [vmem:[%s4755_s6 + $0x8] sm:$0xff]  ;;  %v921_v46 = vld [vmem:[%s4755_s6] sm:$0xff] }
  0x8e   : > { %3590 = vmatmul.mubr.msk.f32.vlgmr.msra.gmra.mrb[0].mxu0 %vm847_vm1, %v4345_v8 }
  0x8f   : > { %3594 = vmatprep.mubr.msk.f32.mxu0 %vm4038_vm0, %v4039_v1 }
 0x161   : > { %v917_v10 = vpop.f32.mrb[0].mxu0 }
 0x162   : > { %v4355_v11 = vadd.f32 %v3451_v9, %v917_v10  ;;  %v3591_v12 = vpop.f32.mrb[1].mxu0 }
 0x164   : > { %1093 = vrot.lane.b32.xlu1 %v4355_v11, %s4040_s30  ;;  %927 = vrot.lane.b32.xlu0 %v4355_v11, %s4725_s0  ;;  %s4760_s0 = smov 88  }
 0x168   : > { %1095 = vrot.lane.b32.xlu0 %v4355_v11, %s4728_s27  ;;  %s4762_s27 = smov 96  }
 0x1d6   : > { %v928_v13 = vpop.permute.xlu0 %927  ;;  %v1094_v15 = vpop.permute.xlu1 %1093 }
 0x1d7   : > { %3593 = vmatpush3.xpose.msk.msra.mxu0 %vm929_vm2, %v928_v13 }
 0x1d8   : > { %3602 = vmatprep.subr.mxu0 %v4039_v1 }
 0x1da   : > { %3595 = vmatmul.mubr.msk.f32.vlgmr.msra.gmra.mrb[2].mxu0 %vm929_vm2, %v4355_v11  ;;  %v1096_v14 = vpop.permute.xlu0 %1095 }
 0x1db   : > { %3603 = vmatpush3.xpose.msk.msra.mxu0 %vm929_vm2, %v1096_v14  ;;  %3604 = vmatprep.mubr.msk.f32.mxu0 %vm4038_vm0, %v4039_v1  ;;  %v923_v14 = vld [vmem:[%s4755_s6 + $0x10] sm:$0xff] }
 0x1dc   : > { %3612 = vmatprep.subr.mxu0 %v4039_v1 }
 0x1de   : > { %3605 = vmatmul.mubr.msk.f32.vlgmr.msra.gmra.mrb[4].mxu0 %vm929_vm2, %v1094_v15 }
 0x1df   : > { %3614 = vmatprep.mubr.msk.f32.mxu0 %vm4038_vm0, %v4039_v1  ;;  %3613 = vmatpush3.msra.mxu0 %v922_v37 }
 0x1e0   : > { %3622 = vmatprep.subr.mxu0 %v4039_v1 }
 0x2ad   : > { %v1000_v16 = vpop.f32.mrb[2].mxu0 }
 0x2ae   : > { %v1004_v18 = vmul.f32 0.35355338, %v1000_v16  ;;  %v3596_v19 = vpop.f32.mrb[3].mxu0 }
 0x2b0   : > { %v1005_v20 = vadd.f32 %v1004_v18, %v4378_v17 }
 0x2b1   : > { %v1167_v21 = vpop.f32.mrb[4].mxu0 }
 0x2b2   : > { %v1171_v22 = vmul.f32 0.35355338, %v1167_v21  ;;  %v3606_v23 = vpop.f32.mrb[5].mxu0  ;;  %v1006_v24 = vsel %vm929_vm2, %v1005_v20, -inf }
 0x2b3   : > { %1007 = vmax.xlane.f32.xlu1 %v1006_v24 }
 0x2b4   : > { %v1172_v25 = vadd.f32 %v1171_v22, %v4378_v17 }
 0x2b6   : > { %v1173_v26 = vsel %vm929_vm2, %v1172_v25, -inf }
 0x2b7   : > { %1174 = vmax.xlane.f32.xlu0 %v1173_v26 }
 0x340   : > { %v1008_v27 = vpop.xlane.xlu1 %1007 }
 0x341   : > { %v1009_v28 = vsub.f32 %v1005_v20, %v1008_v27 }
 0x343   : > { %v1010_v29 = vmul.f32 1.442695, %v1009_v28 }
 0x344   : > { %v1175_v30 = vpop.xlane.xlu0 %1174 }
 0x345   : > { %3863 = vpow2.f32 %v1010_v29  ;;  %v1176_v31 = vsub.f32 %v1172_v25, %v1175_v30 }
 0x347   : > { %v1177_v32 = vmul.f32 1.442695, %v1176_v31 }
 0x349   : > { %3865 = vpow2.f32 %v1177_v32 }
 0x34f   : > { %v3864_v33 = vpop.eup %3863 }
 0x350   : > { %v1012_v34 = vsel %vm929_vm2, %v3864_v33, 0.0 }
 0x351   : > { %1013 = vadd.xlane.f32.xlu0 %v1012_v34 }
 0x353   : > { %v3866_v35 = vpop.eup %3865 }
 0x354   : > { %v1179_v36 = vsel %vm929_vm2, %v3866_v35, 0.0 }
 0x355   : > { %1180 = vadd.xlane.f32.xlu1 %v1179_v36  ;;  %v3469_v36 = vld [vmem:[%s4756_s17] ss:$0 sm:$0xff] }
 0x366   : > { %1184 = vrot.lane.b32.xlu1 %v4355_v11, %s4043_s4  ;;  %s4049_s4 = smov 48  }
 0x367   : > { %1017 = vrot.lane.b32.xlu0 %v4355_v11, %s4044_s28 }
 0x36a   : > { %1408 = vrot.lane.b32.xlu1 %v4355_v11, %s4722_s7  ;;  %s4765_s7 = smov 72  }
 0x36b   : > { %1406 = vrot.lane.b32.xlu0 %v4355_v11, %s4726_s29  ;;  %s4757_s29 = sld [smem:[#allocation14_spill]] }
 0x371   : > { %s820_s28 = scalar_lea.vmem %s4757_s29, %s4338_s8  ;;  %s4758_s29 = sld [smem:[#allocation21_spill]] }
 0x3de   : > { %v1014_v38 = vpop.xlane.xlu0 %1013 }
 0x3df   : > { %3867 = vrcp.f32 %v1014_v38 }
 0x3e2   : > { %v1181_v39 = vpop.xlane.xlu1 %1180  ;;  %v1018_v40 = vpop.permute.xlu0 %1017 }
 0x3e3   : > { %3869 = vrcp.f32 %v1181_v39  ;;  %3598 = vmatpush3.msra.mxu1 %v1018_v40 }
 0x3e4   : > { %3607 = vmatprep.subr.mxu1 %v4039_v1 }
 0x3e6   : > { %v1185_v43 = vpop.permute.xlu1 %1184  ;;  %v1407_v52 = vpop.permute.xlu0 %1406 }
 0x3e9   : > { %v3868_v41 = vpop.eup %3867 }
 0x3ea   : > { %v1016_v42 = vmul.f32 %v3868_v41, %v3864_v33  ;;  %v1409_v50 = vpop.permute.xlu1 %1408 }
 0x3ec   : > { %3600 = vmatmul.mubr.msk.f32.vlgmr.msra.gmra.mrb[0].mxu1 %vm929_vm2, %v1016_v42 }
 0x3ed   : > { %v3870_v44 = vpop.eup %3869  ;;  %3608 = vmatpush3.msra.mxu1 %v1185_v43  ;;  %3609 = vmatprep.mubr.msk.f32.mxu1 %vm4038_vm0, %v4039_v1 }
 0x3ee   : > { %v1183_v45 = vmul.f32 %v3870_v44, %v3866_v35  ;;  %3617 = vmatprep.subr.mxu1 %v4039_v1 }
 0x3f0   : > { %3610 = vmatmul.mubr.msk.f32.vlgmr.msra.gmra.mrb[2].mxu1 %vm929_vm2, %v1183_v45 }
 0x3f1   : > { %3619 = vmatprep.mubr.msk.f32.mxu1 %vm4038_vm0, %v4039_v1  ;;  %3618 = vmatpush3.msra.mxu1 %v921_v46 }
 0x3f2   : > { %3627 = vmatprep.subr.mxu1 %v4039_v1 }
 0x4bf   : > { %v1089_v47 = vpop.f32.mrb[0].mxu1 }
 0x4c0   : > { %v3601_v48 = vpop.f32.mrb[1].mxu1  ;;  %3620 = vmatmul.mubr.msk.f32.vlgmr.msra.gmra.mrb[4].mxu1 %vm929_vm2, %v1089_v47 }
 0x4c1   : > { %3629 = vmatprep.mubr.msk.f32.mxu1 %vm4038_vm0, %v4039_v1  ;;  %v2010_v48 = vld [vmem:[%s4703_s12] sm:$0xff] }
 0x4c3   : > { %v1256_v49 = vpop.f32.mrb[2].mxu1 }
 0x4c4   : > { %v3611_v51 = vpop.f32.mrb[3].mxu1  ;;  %3615 = vmatmul.mubr.msk.f32.vlgmr.msra.gmra.mrb[6].mxu0 %vm929_vm2, %v1256_v49  ;;  %v2011_v49 = vld [vmem:[%s4703_s12 + $0x8] sm:$0xff] }
 0x4c5   : > { %3623 = vmatpush3.xpose.msk.msra.mxu0 %vm929_vm2, %v1409_v50  ;;  %3624 = vmatprep.mubr.msk.f32.mxu0 %vm4038_vm0, %v4039_v1  ;;  %v1926_v50 = vld [vmem:[%s4701_s10] sm:$0xff]  ;;  %v1927_v51 = vld [vmem:[%s4701_s10 + $0x8] sm:$0xff] }
 0x4c6   : > { %3632 = vmatprep.subr.mxu0 %v4039_v1 }
 0x4c8   : > { %3625 = vmatmul.mubr.msk.f32.vlgmr.msra.gmra.mrb[8].mxu0 %vm929_vm2, %v1407_v52  ;;  %v2012_v52 = vld [vmem:[%s4703_s12 + $0x10] sm:$0xff] }
 0x4c9   : > { %3634 = vmatprep.mubr.msk.f32.mxu0 %vm4038_vm0, %v4039_v1  ;;  %3633 = vmatpush3.msra.mxu0 %v923_v14 }
 0x4ca   : > { %3642 = vmatprep.subr.mxu0 %v4039_v1 }
 0x593   : > { %v1402_v53 = vpop.f32.mrb[4].mxu1 }
 0x594   : > { %v3621_v54 = vpop.f32.mrb[5].mxu1 }
 0x595   : > { %v2013_v54 = vld [vmem:[%s4703_s12 + $0x18] sm:$0xff] }
 0x597   : > { %v1329_v55 = vpop.f32.mrb[6].mxu0 }
 0x598   : > { %v4419_v56 = vadd.f32 %v1402_v53, %v1329_v55  ;;  %v3616_v57 = vpop.f32.mrb[7].mxu0  ;;  %v3771_v53 = vpack.c.bf16 %v1927_v51, %v1926_v50  ;;  %v3780_v55 = vpack.c.bf16 %v2013_v54, %v2012_v52 }
 0x599   : > { %v1929_v57 = vld [vmem:[%s4701_s10 + $0x18] sm:$0xff] }
 0x59b   : > { %v1480_v58 = vpop.f32.mrb[8].mxu0 }
 0x59c   : > { %v1484_v59 = vmul.f32 0.35355338, %v1480_v58  ;;  %v3626_v60 = vpop.f32.mrb[9].mxu0  ;;  %v833_v58 = vld [vmem:[%s820_s28] sm:$0xff] }
 0x59e   : > { %v1485_v61 = vadd.f32 %v1484_v59, %v4378_v17 }
 0x5a0   : > { %v1486_v62 = vsel %vm929_vm2, %v1485_v61, -inf }
 0x5a1   : > { %1487 = vmax.xlane.f32.xlu1 %v1486_v62 }
 0x5b2   : > { %1649 = vrot.lane.b32.xlu1 %v4355_v11, %s4721_s1  ;;  %s4759_s1 = sld [smem:[#allocation16_spill]] }
 0x5b6   : > { %1647 = vrot.lane.b32.xlu1 %v4355_v11, %s4723_s3 }
 0x62e   : > { %v1488_v63 = vpop.xlane.xlu1 %1487 }
 0x62f   : > { %v1489_v2 = vsub.f32 %v1485_v61, %v1488_v63 }
 0x631   : > { %v1490_v3 = vmul.f32 1.442695, %v1489_v2  ;;  %v3470_v2 = vld [vmem:[%s4758_s29] ss:$0 sm:$0xff] }
 0x632   : > { %v1650_v10 = vpop.permute.xlu1 %1649 }
 0x633   : > { %3871 = vpow2.f32 %v1490_v3 }
 0x636   : > { %v1648_v13 = vpop.permute.xlu1 %1647 }
 0x63d   : > { %v3872_v4 = vpop.eup %3871 }
 0x63e   : > { %v1492_v5 = vsel %vm929_vm2, %v3872_v4, 0.0 }
 0x63f   : > { %1493 = vadd.xlane.f32.xlu0 %v1492_v5 }
 0x655   : > { %1497 = vrot.lane.b32.xlu0 %v4355_v11, %s4049_s4  ;;  %s4764_s4 = smov 80  }
 0x6cc   : > { %v1494_v6 = vpop.xlane.xlu0 %1493 }
 0x6cd   : > { %3873 = vrcp.f32 %v1494_v6 }
 0x6d0   : > { %v1498_v7 = vpop.permute.xlu0 %1497 }
 0x6d1   : > { %3628 = vmatpush3.msra.mxu1 %v1498_v7  ;;  %v3474_v7 = vld [vmem:[%s4704_s13] ss:$0 sm:$0xff] }
 0x6d2   : > { %3637 = vmatprep.subr.mxu1 %v4039_v1 }
 0x6d7   : > { %v3874_v9 = vpop.eup %3873 }
 0x6d8   : > { %v1496_v12 = vmul.f32 %v3874_v9, %v3872_v4  ;;  %v3471_v4 = vld [vmem:[%s4700_s9] ss:$0 sm:$0xff] }
 0x6da   : > { %3630 = vmatmul.mubr.msk.f32.vlgmr.msra.gmra.mrb[6].mxu1 %vm929_vm2, %v1496_v12 }
 0x6db   : > { %3638 = vmatpush3.xpose.msk.msra.mxu1 %vm929_vm2, %v1650_v10  ;;  %3639 = vmatprep.mubr.msk.f32.mxu1 %vm4038_vm0, %v4039_v1 }
 0x6dc   : > { %3647 = vmatprep.subr.mxu1 %v4039_v1 }
 0x6de   : > { %3640 = vmatmul.mubr.msk.f32.vlgmr.msra.gmra.mrb[8].mxu1 %vm929_vm2, %v1648_v13  ;;  %v3472_v13 = vld [vmem:[%s4702_s11] ss:$0 sm:$0xff] }
 0x6df   : > { %3649 = vmatprep.mubr.msk.f32.mxu1 %vm4038_vm0, %v4039_v1 }
 0x7ad   : > { %v1569_v15 = vpop.f32.mrb[6].mxu1 }
 0x7ae   : > { %v3631_v16 = vpop.f32.mrb[7].mxu1  ;;  %3635 = vmatmul.mubr.msk.f32.vlgmr.msra.gmra.mrb[10].mxu0 %vm929_vm2, %v1569_v15 }
 0x7af   : > { %3644 = vmatprep.mubr.msk.f32.mxu0 %vm4038_vm0, %v4039_v1 }
 0x7b1   : > { %v1721_v18 = vpop.f32.mrb[8].mxu1 }
 0x7b2   : > { %v1725_v19 = vmul.f32 0.35355338, %v1721_v18  ;;  %v3641_v20 = vpop.f32.mrb[9].mxu1 }
 0x7b4   : > { %v1726_v21 = vadd.f32 %v1725_v19, %v4378_v17  ;;  %v924_v17 = vld [vmem:[%s4755_s6 + $0x18] sm:$0xff] }
 0x7b5   : > { %3648 = vmatpush3.msra.mxu1 %v924_v17 }
 0x7b6   : > { %v1727_v22 = vsel %vm929_vm2, %v1726_v21, -inf  ;;  %3776 = vmatprep.subr.bf16.mxu1 %v4037_v0 }
 0x7b7   : > { %1728 = vmax.xlane.f32.xlu0 %v1727_v22 }
 0x7cd   : > { %1738 = vrot.lane.b32.xlu0 %v4355_v11, %s4050_s24  ;;  %s4767_s24 = sld [smem:[#allocation23_spill]] }
 0x7d3   : > { %s831_s2 = scalar_lea.vmem %s4767_s24, %s4338_s8 }
 0x844   : > { %v1729_v23 = vpop.xlane.xlu0 %1728 }
 0x845   : > { %v1730_v24 = vsub.f32 %v1726_v21, %v1729_v23 }
 0x847   : > { %v1731_v25 = vmul.f32 1.442695, %v1730_v24 }
 0x848   : > { %v1739_v26 = vpop.permute.xlu0 %1738 }
 0x849   : > { %3875 = vpow2.f32 %v1731_v25  ;;  %3643 = vmatpush3.msra.mxu0 %v1739_v26 }
 0x84a   : > { %3770 = vmatprep.subr.bf16.mxu0 %v4037_v0 }
 0x853   : > { %v3876_v27 = vpop.eup %3875 }
 0x854   : > { %v1733_v28 = vsel %vm929_vm2, %v3876_v27, 0.0 }
 0x855   : > { %1734 = vadd.xlane.f32.xlu1 %v1733_v28 }
 0x881   : > { %v1642_v11 = vpop.f32.mrb[10].mxu0 }
 0x882   : > { %v1646_v29 = vadd.f32 %v1642_v11, %v4419_v56  ;;  %v3636_v30 = vpop.f32.mrb[11].mxu0  ;;  %v1928_v56 = vld [vmem:[%s4701_s10 + $0x10] sm:$0xff] }
 0x883   : > { %v3774_v59 = vpack.c.bf16 %v1929_v57, %v1928_v56 }
 0x8e2   : > { %v1735_v31 = vpop.xlane.xlu1 %1734 }
 0x8e3   : > { %3877 = vrcp.f32 %v1735_v31 }
 0x8ed   : > { %v3878_v32 = vpop.eup %3877 }
 0x8ee   : > { %v1737_v33 = vmul.f32 %v3878_v32, %v3876_v27 }
 0x8f0   : > { %3645 = vmatmul.mubr.msk.f32.vlgmr.msra.gmra.mrb[12].mxu0 %vm929_vm2, %v1737_v33 }
 0x8f1   : > { %3660 = vmatprep.mubr.msk.f32.mxu0 %vm4038_vm0, %v4039_v1  ;;  %3772 = vmatpush3.bf16.msra.mxu0 %v3771_v53 }
 0x8f2   : > { %3773 = vmatprep.subr.bf16.mxu0 %v4037_v0 }
 0x8f5   : > { %3775 = vmatpush3.bf16.msra.mxu0 %v3774_v59 }
 0x8f6   : > { %3674 = vmatprep.subr.mxu0 %v4039_v1 }
 0x9c3   : > { %v1810_v34 = vpop.f32.mrb[12].mxu0 }
 0x9c4   : > { %v3646_v35 = vpop.f32.mrb[13].mxu0  ;;  %3650 = vmatmul.mubr.msk.f32.vlgmr.msra.gmra.mrb[10].mxu1 %vm929_vm2, %v1810_v34 }
 0x9c5   : > { %3671 = vmatprep.mubr.msk.f32.mxu1 %vm4038_vm0, %v4039_v1 }
 0xa97   : > { %v1883_v37 = vpop.f32.mrb[10].mxu1 }
 0xa98   : > { %v1887_v38 = vadd.f32 %v1883_v37, %v1646_v29  ;;  %v3651_v39 = vpop.f32.mrb[11].mxu1 }
 0xa9a   : > { %v1894_v40 = vadd.f32 %v3469_v36, %v1887_v38 }
 0xa9c   : > { %v1895_v41 = vadd.f32 %v1894_v40, %v4345_v8  ;;  %v3777_v8 = vpack.c.bf16 %v2011_v49, %v2010_v48  ;;  %v2095_v48 = vld [vmem:[%s4705_s14 + $0x8] sm:$0xff] }
 0xa9e   : > { %v1898_v42 = vsel %vm847_vm1, %v1895_v41, 0.0  ;;  %3778 = vmatpush3.bf16.msra.mxu1 %v3777_v8 }
 0xa9f   : > { %1899 = vadd.xlane.f32.xlu1 %v1898_v42  ;;  %3779 = vmatprep.subr.bf16.mxu1 %v4037_v0 }
 0xaa2   : > { %3781 = vmatpush3.bf16.msra.mxu1 %v3780_v55 }
 0xaa3   : > { %3679 = vmatprep.subr.mxu1 %v4039_v1 }
 0xaa5   : > { %3672 = vmatmul.mubr.msk.f32.vlgmr.msra.gmra.mrb[12].mxu1 %vm847_vm1, %v833_v58 }
 0xaa6   : > { %3681 = vmatprep.mubr.msk.f32.mxu1 %vm4038_vm0, %v4039_v1 }
 0xb2c   : > { %v1900_v43 = vpop.xlane.xlu1 %1899 }
 0xb2d   : > { %v1902_v44 = vmul.f32 0.03125, %v1900_v43 }
 0xb2f   : > { %v1903_v45 = vsub.f32 %v1895_v41, %v1902_v44 }
 0xb31   : > { %v1904_v46 = vmul.f32 %v1903_v45, %v1903_v45 }
 0xb33   : > { %v1905_v47 = vsel %vm847_vm1, %v1904_v46, 0.0 }
 0xb34   : > { %1906 = vadd.xlane.f32.xlu1 %v1905_v47  ;;  %v2094_v47 = vld [vmem:[%s4705_s14] sm:$0xff] }
 0xb78   : > { %v2090_v9 = vpop.f32.mrb[12].mxu1 }
 0xb79   : > { %v4517_v10 = vadd.f32 %v3474_v7, %v2090_v9  ;;  %v3673_v12 = vpop.f32.mrb[13].mxu1 }
 0xb7b   : > { %2272 = vrot.lane.b32.xlu1 %v4517_v10, %s4040_s30 }
 0xbc1   : > { %v1907_v60 = vpop.xlane.xlu1 %1906 }
 0xbc2   : > { %v1908_v61 = vmul.f32 0.03125, %v1907_v60 }
 0xbc4   : > { %v1909_v62 = vadd.f32 1e-05, %v1908_v61 }
 0xbc6   : > { %3879 = vrsqrt.f32 %v1909_v62 }
 0xbd0   : > { %v3880_v63 = vpop.eup %3879 }
 0xbd1   : > { %v1911_v3 = vmul.f32 %v3880_v63, %v1903_v45 }
 0xbd3   : > { %v1918_v5 = vmul.f32 %v3470_v2, %v1911_v3 }
 0xbd5   : > { %v4508_v6 = vadd.f32 %v3471_v4, %v1918_v5 }
 0xbd7   : > { %3661 = vmatmul.mubr.msk.f32.vlgmr.msra.gmra.mrb[14].mxu0 %vm847_vm1, %v4508_v6 }
 0xbd8   : > { %3676 = vmatprep.mubr.msk.f32.mxu0 %vm4038_vm0, %v4039_v1  ;;  %3675 = vmatpush3.xpose.msk.msra.mxu0 %vm929_vm2, %v4517_v10 }
 0xbd9   : > { %3684 = vmatprep.subr.mxu0 %v4039_v1 }
 0xbed   : > { %v2273_v18 = vpop.permute.xlu1 %2272 }
 0xcaa   : > { %v2006_v14 = vpop.f32.mrb[14].mxu0 }
 0xcab   : > { %v4527_v15 = vadd.f32 %v3472_v13, %v2006_v14  ;;  %v3662_v16 = vpop.f32.mrb[15].mxu0 }
 0xcad   : > { %2270 = vrot.lane.b32.xlu0 %v4527_v15, %s4040_s30  ;;  %3677 = vmatmul.mubr.msk.f32.vlgmr.msra.gmra.mrb[16].mxu0 %vm929_vm2, %v4527_v15  ;;  %s827_s30 = scalar_lea.vmem %s4759_s1, %s4770_s26  ;;  %s4761_s26 = smov 112  }
 0xcae   : > { %3685 = vmatpush3.xpose.msk.msra.mxu0 %vm929_vm2, %v2273_v18  ;;  %3686 = vmatprep.mubr.msk.f32.mxu0 %vm4038_vm0, %v4039_v1  ;;  %v4544_v21 = vld [vmem:[%s827_s30] ss:$0 sm:$0xff]  ;;  %v2096_v18 = vld [vmem:[%s4705_s14 + $0x10] sm:$0xff]  ;;  %s4766_s1 = sld [smem:[#allocation22_spill]] }
 0xcaf   : > { %3694 = vmatprep.subr.mxu0 %v4039_v1 }
 0xd1f   : > { %v2271_v19 = vpop.permute.xlu0 %2270 }
 0xd20   : > { %3687 = vmatmul.mubr.msk.f32.vlgmr.msra.gmra.mrb[18].mxu0 %vm929_vm2, %v2271_v19 }
 0xd21   : > { %3696 = vmatprep.mubr.msk.f32.mxu0 %vm4038_vm0, %v4039_v1  ;;  %3695 = vmatpush3.msra.mxu0 %v2095_v48 }
 0xd22   : > { %3704 = vmatprep.subr.mxu0 %v4039_v1 }
 0xd80   : > { %v2171_v20 = vpop.f32.mrb[16].mxu0 }
 0xd81   : > { %v2175_v22 = vmul.f32 0.35355338, %v2171_v20  ;;  %v3678_v23 = vpop.f32.mrb[17].mxu0 }
 0xd83   : > { %v2182_v24 = vadd.f32 %v4544_v21, %v2175_v22 }
 0xd85   : > { %v2183_v25 = vsel %vm929_vm2, %v2182_v24, -inf }
 0xd86   : > { %2184 = vmax.xlane.f32.xlu0 %v2183_v25 }
 0xdf3   : > { %v2344_v26 = vpop.f32.mrb[18].mxu0 }
 0xdf4   : > { %v2348_v27 = vmul.f32 0.35355338, %v2344_v26  ;;  %v3688_v28 = vpop.f32.mrb[19].mxu0 }
 0xdf6   : > { %v2349_v17 = vadd.f32 %v4544_v21, %v2348_v27 }
 0xdf8   : > { %v2350_v11 = vsel %vm929_vm2, %v2349_v17, -inf }
 0xdf9   : > { %2351 = vmax.xlane.f32.xlu1 %v2350_v11 }
 0xe0a   : > { %2361 = vrot.lane.b32.xlu1 %v4517_v10, %s4760_s0 }
 0xe0e   : > { %2585 = vrot.lane.b32.xlu1 %v4517_v10, %s4761_s26 }
 0xe13   : > { %v2185_v29 = vpop.xlane.xlu0 %2184 }
 0xe14   : > { %v2186_v30 = vsub.f32 %v2182_v24, %v2185_v29 }
 0xe16   : > { %v2187_v31 = vmul.f32 1.442695, %v2186_v30 }
 0xe18   : > { %3881 = vpow2.f32 %v2187_v31 }
 0xe22   : > { %v3882_v32 = vpop.eup %3881 }
 0xe23   : > { %v2189_v33 = vsel %vm929_vm2, %v3882_v32, 0.0 }
 0xe24   : > { %2190 = vadd.xlane.f32.xlu0 %v2189_v33 }
 0xe86   : > { %v2352_v34 = vpop.xlane.xlu1 %2351 }
 0xe87   : > { %v2353_v35 = vsub.f32 %v2349_v17, %v2352_v34 }
 0xe89   : > { %v2354_v36 = vmul.f32 1.442695, %v2353_v35 }
 0xe8a   : > { %v2362_v44 = vpop.permute.xlu1 %2361 }
 0xe8b   : > { %3883 = vpow2.f32 %v2354_v36 }
 0xe8e   : > { %v2586_v51 = vpop.permute.xlu1 %2585 }
 0xe95   : > { %v3884_v37 = vpop.eup %3883 }
 0xe96   : > { %v2356_v38 = vsel %vm929_vm2, %v3884_v37, 0.0 }
 0xe97   : > { %2357 = vadd.xlane.f32.xlu0 %v2356_v38  ;;  %v3493_v38 = vld [vmem:[%s4706_s15] ss:$0 sm:$0xff] }
 0xead   : > { %2194 = vrot.lane.b32.xlu0 %v4517_v10, %s4762_s27 }
 0xeb1   : > { %2583 = vrot.lane.b32.xlu0 %v4527_v15, %s4761_s26  ;;  %v2191_v39 = vpop.xlane.xlu0 %2190 }
 0xeb2   : > { %3885 = vrcp.f32 %v2191_v39 }
 0xebc   : > { %v3886_v41 = vpop.eup %3885 }
 0xebd   : > { %v2193_v42 = vmul.f32 %v3886_v41, %v3882_v32 }
 0xf24   : > { %v2358_v40 = vpop.xlane.xlu0 %2357 }
 0xf25   : > { %3887 = vrcp.f32 %v2358_v40 }
 0xf28   : > { %v2195_v43 = vpop.permute.xlu0 %2194 }
 0xf29   : > { %3680 = vmatpush3.msra.mxu1 %v2195_v43 }
 0xf2a   : > { %3682 = vmatmul.mubr.msk.f32.vlgmr.msra.gmra.mrb[14].mxu1 %vm929_vm2, %v2193_v42  ;;  %3689 = vmatprep.subr.mxu1 %v4039_v1 }
 0xf2b   : > { %3690 = vmatpush3.msra.mxu1 %v2362_v44  ;;  %3691 = vmatprep.mubr.msk.f32.mxu1 %vm4038_vm0, %v4039_v1 }
 0xf2c   : > { %3699 = vmatprep.subr.mxu1 %v4039_v1  ;;  %v2584_v53 = vpop.permute.xlu0 %2583 }
 0xf2f   : > { %v3888_v45 = vpop.eup %3887 }
 0xf30   : > { %v2360_v46 = vmul.f32 %v3888_v45, %v3884_v37 }
 0xf32   : > { %3692 = vmatmul.mubr.msk.f32.vlgmr.msra.gmra.mrb[16].mxu1 %vm929_vm2, %v2360_v46 }
 0xf33   : > { %3701 = vmatprep.mubr.msk.f32.mxu1 %vm4038_vm0, %v4039_v1  ;;  %3700 = vmatpush3.msra.mxu1 %v2094_v47 }
 0xf34   : > { %3709 = vmatprep.subr.mxu1 %v4039_v1 }
 0xffd   : > { %v2266_v49 = vpop.f32.mrb[14].mxu1 }
 0xffe   : > { %v3683_v8 = vpop.f32.mrb[15].mxu1  ;;  %3702 = vmatmul.mubr.msk.f32.vlgmr.msra.gmra.mrb[18].mxu1 %vm929_vm2, %v2266_v49 }
 0xfff   : > { %3711 = vmatprep.mubr.msk.f32.mxu1 %vm4038_vm0, %v4039_v1  ;;  %v3103_v8 = vld [vmem:[%s4709_s18 + $0x8] sm:$0xff] }
0x1005   : > { %v2433_v50 = vpop.f32.mrb[16].mxu1 }
0x1006   : > { %v3693_v52 = vpop.f32.mrb[17].mxu1  ;;  %3697 = vmatmul.mubr.msk.f32.vlgmr.msra.gmra.mrb[20].mxu0 %vm929_vm2, %v2433_v50 }
0x1007   : > { %3705 = vmatpush3.xpose.msk.msra.mxu0 %vm929_vm2, %v2586_v51  ;;  %3706 = vmatprep.mubr.msk.f32.mxu0 %vm4038_vm0, %v4039_v1  ;;  %v3105_v51 = vld [vmem:[%s4709_s18 + $0x18] sm:$0xff] }
0x1008   : > { %3714 = vmatprep.subr.mxu0 %v4039_v1 }
0x100a   : > { %3707 = vmatmul.mubr.msk.f32.vlgmr.msra.gmra.mrb[22].mxu0 %vm929_vm2, %v2584_v53  ;;  %v3107_v53 = vld [vmem:[%s4711_s20] sm:$0xff] }
0x100b   : > { %3716 = vmatprep.mubr.msk.f32.mxu0 %vm4038_vm0, %v4039_v1  ;;  %3715 = vmatpush3.msra.mxu0 %v2096_v18 }
0x100c   : > { %3724 = vmatprep.subr.mxu0 %v4039_v1 }
0x10d1   : > { %v2579_v54 = vpop.f32.mrb[18].mxu1 }
0x10d2   : > { %v3703_v55 = vpop.f32.mrb[19].mxu1 }
0x10d3   : > { %v3109_v55 = vld [vmem:[%s4711_s20 + $0x10] sm:$0xff] }
0x10d9   : > { %v2506_v56 = vpop.f32.mrb[20].mxu0 }
0x10da   : > { %v2580_v57 = vadd.f32 %v2579_v54, %v2506_v56  ;;  %v3698_v58 = vpop.f32.mrb[21].mxu0  ;;  %v3108_v54 = vld [vmem:[%s4711_s20 + $0x8] sm:$0xff] }
0x10db   : > { %v3789_v56 = vpack.c.bf16 %v3108_v54, %v3107_v53 }
0x10dd   : > { %v2657_v59 = vpop.f32.mrb[22].mxu0 }
0x10de   : > { %v2661_v60 = vmul.f32 0.35355338, %v2657_v59  ;;  %v3708_v61 = vpop.f32.mrb[23].mxu0  ;;  %v3111_v59 = vld [vmem:[%s4711_s20 + $0x20] sm:$0xff] }
0x10e0   : > { %v2662_v62 = vadd.f32 %v4544_v21, %v2661_v60  ;;  %v3112_v60 = vld [vmem:[%s4711_s20 + $0x28] sm:$0xff] }
0x10e1   : > { %v3795_v61 = vpack.c.bf16 %v3112_v60, %v3111_v59 }
0x10e2   : > { %v2663_v63 = vsel %vm929_vm2, %v2662_v62, -inf }
0x10e3   : > { %2664 = vmax.xlane.f32.xlu1 %v2663_v63 }
0x10f4   : > { %2826 = vrot.lane.b32.xlu1 %v4517_v10, %s4763_s5 }
0x10f8   : > { %2824 = vrot.lane.b32.xlu1 %v4527_v15, %s4763_s5 }
0x1170   : > { %v2665_v2 = vpop.xlane.xlu1 %2664 }
0x1171   : > { %v2666_v3 = vsub.f32 %v2662_v62, %v2665_v2 }
0x1173   : > { %v2667_v4 = vmul.f32 1.442695, %v2666_v3 }
0x1174   : > { %v2827_v14 = vpop.permute.xlu1 %2826 }
0x1175   : > { %3889 = vpow2.f32 %v2667_v4  ;;  %v3494_v4 = vld [vmem:[%s4707_s16] ss:$0 sm:$0xff] }
0x1178   : > { %v2825_v16 = vpop.permute.xlu1 %2824 }
0x117f   : > { %v3890_v5 = vpop.eup %3889 }
0x1180   : > { %v2669_v7 = vsel %vm929_vm2, %v3890_v5, 0.0 }
0x1181   : > { %2670 = vadd.xlane.f32.xlu0 %v2669_v7  ;;  %v3495_v7 = vld [vmem:[%s4766_s1] ss:$0 sm:$0xff] }
0x1197   : > { %2674 = vrot.lane.b32.xlu0 %v4517_v10, %s4764_s4 }
0x120e   : > { %v2671_v9 = vpop.xlane.xlu0 %2670 }
0x120f   : > { %3891 = vrcp.f32 %v2671_v9 }
0x1212   : > { %v2675_v12 = vpop.permute.xlu0 %2674 }
0x1213   : > { %3710 = vmatpush3.msra.mxu1 %v2675_v12 }
0x1214   : > { %3719 = vmatprep.subr.mxu1 %v4039_v1 }
0x1219   : > { %v3892_v13 = vpop.eup %3891 }
0x121a   : > { %v2673_v15 = vmul.f32 %v3892_v13, %v3890_v5  ;;  %v3114_v13 = vld [vmem:[%s4711_s20 + $0x38] sm:$0xff] }
0x121c   : > { %3712 = vmatmul.mubr.msk.f32.vlgmr.msra.gmra.mrb[20].mxu1 %vm929_vm2, %v2673_v15  ;;  %v3496_v15 = vld [vmem:[#allocation2] ss:$0 sm:$0xff] }
0x121d   : > { %3720 = vmatpush3.xpose.msk.msra.mxu1 %vm929_vm2, %v2827_v14  ;;  %3721 = vmatprep.mubr.msk.f32.mxu1 %vm4038_vm0, %v4039_v1 }
0x121e   : > { %3729 = vmatprep.subr.mxu1 %v4039_v1 }
0x1220   : > { %3722 = vmatmul.mubr.msk.f32.vlgmr.msra.gmra.mrb[22].mxu1 %vm929_vm2, %v2825_v16 }
0x1221   : > { %3731 = vmatprep.mubr.msk.f32.mxu1 %vm4038_vm0, %v4039_v1 }
0x12ef   : > { %v2746_v19 = vpop.f32.mrb[20].mxu1 }
0x12f0   : > { %v3713_v20 = vpop.f32.mrb[21].mxu1  ;;  %3717 = vmatmul.mubr.msk.f32.vlgmr.msra.gmra.mrb[24].mxu0 %vm929_vm2, %v2746_v19 }
0x12f1   : > { %3726 = vmatprep.mubr.msk.f32.mxu0 %vm4038_vm0, %v4039_v1 }
0x12f3   : > { %v2898_v22 = vpop.f32.mrb[22].mxu1 }
0x12f4   : > { %v2902_v23 = vmul.f32 0.35355338, %v2898_v22  ;;  %v3723_v24 = vpop.f32.mrb[23].mxu1  ;;  %v3498_v22 = vld [vmem:[#allocation4] ss:$0 sm:$0xff] }
0x12f6   : > { %v2903_v25 = vadd.f32 %v4544_v21, %v2902_v23  ;;  %v2097_v21 = vld [vmem:[%s4705_s14 + $0x18] sm:$0xff] }
0x12f7   : > { %3730 = vmatpush3.msra.mxu1 %v2097_v21 }
0x12f8   : > { %v2904_v26 = vsel %vm929_vm2, %v2903_v25, -inf  ;;  %3788 = vmatprep.subr.bf16.mxu1 %v4037_v0 }
0x12f9   : > { %2905 = vmax.xlane.f32.xlu0 %v2904_v26 }
0x130f   : > { %2915 = vrot.lane.b32.xlu0 %v4517_v10, %s4765_s7 }
0x1386   : > { %v2906_v27 = vpop.xlane.xlu0 %2905 }
0x1387   : > { %v2907_v28 = vsub.f32 %v2903_v25, %v2906_v27 }
0x1389   : > { %v2908_v17 = vmul.f32 1.442695, %v2907_v28 }
0x138a   : > { %v2916_v11 = vpop.permute.xlu0 %2915 }
0x138b   : > { %3893 = vpow2.f32 %v2908_v17  ;;  %3725 = vmatpush3.msra.mxu0 %v2916_v11 }
0x138c   : > { %3782 = vmatprep.subr.bf16.mxu0 %v4037_v0 }
0x1395   : > { %v3894_v29 = vpop.eup %3893 }
0x1396   : > { %v2910_v30 = vsel %vm929_vm2, %v3894_v29, 0.0 }
0x1397   : > { %2911 = vadd.xlane.f32.xlu1 %v2910_v30 }
0x13c3   : > { %v2819_v10 = vpop.f32.mrb[24].mxu0 }
0x13c4   : > { %v2823_v31 = vadd.f32 %v2819_v10, %v2580_v57  ;;  %v3718_v32 = vpop.f32.mrb[25].mxu0  ;;  %v3110_v57 = vld [vmem:[%s4711_s20 + $0x18] sm:$0xff] }
0x13c5   : > { %v3792_v58 = vpack.c.bf16 %v3110_v57, %v3109_v55 }
0x1424   : > { %v2912_v33 = vpop.xlane.xlu1 %2911 }
0x1425   : > { %3895 = vrcp.f32 %v2912_v33  ;;  %v3500_v33 = vld [vmem:[#allocation6] ss:$0 sm:$0xff] }
0x142f   : > { %v3896_v34 = vpop.eup %3895 }
0x1430   : > { %v2914_v35 = vmul.f32 %v3896_v34, %v3894_v29 }
0x1432   : > { %3727 = vmatmul.mubr.msk.f32.vlgmr.msra.gmra.mrb[26].mxu0 %vm929_vm2, %v2914_v35  ;;  %v3501_v35 = vld [vmem:[#allocation7] ss:$0 sm:$0xff] }
0x1433   : > { %3742 = vmatprep.mubr.msk.f32.mxu0 %vm4038_vm0, %v4039_v1 }
0x1505   : > { %v2987_v36 = vpop.f32.mrb[26].mxu0 }
0x1506   : > { %v3728_v37 = vpop.f32.mrb[27].mxu0  ;;  %3732 = vmatmul.mubr.msk.f32.vlgmr.msra.gmra.mrb[24].mxu1 %vm929_vm2, %v2987_v36 }
0x1507   : > { %3761 = vmatprep.mubr.msk.f32.mxu1 %vm4038_vm0, %v4039_v1  ;;  %v3102_v1 = vld [vmem:[%s4709_s18] sm:$0xff]  ;;  %3790 = vmatpush3.bf16.msra.mxu1 %v3789_v56 }
0x1508   : > { %v3783_v50 = vpack.c.bf16 %v3103_v8, %v3102_v1  ;;  %3791 = vmatprep.subr.bf16.mxu1 %v4037_v0 }
0x150a   : > { %3784 = vmatpush3.bf16.msra.mxu0 %v3783_v50 }
0x150b   : > { %3785 = vmatprep.subr.bf16.mxu0 %v4037_v0  ;;  %3793 = vmatpush3.bf16.msra.mxu1 %v3792_v58 }
0x150c   : > { %3794 = vmatprep.subr.bf16.mxu1 %v4037_v0 }
0x150f   : > { %3796 = vmatpush3.bf16.msra.mxu1 %v3795_v61 }
0x1510   : > { %3797 = vmatprep.subr.bf16.mxu1 %v4037_v0  ;;  %v3113_v0 = vld [vmem:[%s4711_s20 + $0x30] sm:$0xff] }
0x1511   : > { %v3798_v14 = vpack.c.bf16 %v3114_v13, %v3113_v0 }
0x1513   : > { %3799 = vmatpush3.bf16.msra.mxu1 %v3798_v14 }
0x15d9   : > { %v3060_v39 = vpop.f32.mrb[24].mxu1 }
0x15da   : > { %v3064_v40 = vadd.f32 %v3060_v39, %v2823_v31  ;;  %v3733_v41 = vpop.f32.mrb[25].mxu1 }
0x15dc   : > { %v3071_v42 = vadd.f32 %v3493_v38, %v3064_v40 }
0x15de   : > { %v3072_v43 = vadd.f32 %v3071_v42, %v4508_v6  ;;  %v3104_v6 = vld [vmem:[%s4709_s18 + $0x10] sm:$0xff] }
0x15df   : > { %v3786_v52 = vpack.c.bf16 %v3105_v51, %v3104_v6 }
0x15e0   : > { %v3075_v44 = vsel %vm847_vm1, %v3072_v43, 0.0 }
0x15e1   : > { %3076 = vadd.xlane.f32.xlu1 %v3075_v44  ;;  %3787 = vmatpush3.bf16.msra.mxu0 %v3786_v52 }
0x166e   : > { %v3077_v45 = vpop.xlane.xlu1 %3076 }
0x166f   : > { %v3078_v46 = vmul.f32 0.03125, %v3077_v45 }
0x1671   : > { %v3079_v47 = vsub.f32 %v3072_v43, %v3078_v46 }
0x1673   : > { %v3080_v48 = vmul.f32 %v3079_v47, %v3079_v47 }
0x1675   : > { %v3081_v49 = vsel %vm847_vm1, %v3080_v48, 0.0 }
0x1676   : > { %3082 = vadd.xlane.f32.xlu1 %v3081_v49 }
0x1703   : > { %v3083_v62 = vpop.xlane.xlu1 %3082 }
0x1704   : > { %v3084_v63 = vmul.f32 0.03125, %v3083_v62 }
0x1706   : > { %v3085_v2 = vadd.f32 1e-05, %v3084_v63 }
0x1708   : > { %3897 = vrsqrt.f32 %v3085_v2 }
0x1712   : > { %v3898_v3 = vpop.eup %3897 }
0x1713   : > { %v3087_v5 = vmul.f32 %v3898_v3, %v3079_v47 }
0x1715   : > { %v3094_v9 = vmul.f32 %v3494_v4, %v3087_v5 }
0x1717   : > { %v3101_v12 = vadd.f32 %v3495_v7, %v3094_v9 }
0x1719   : > { %3743 = vmatmul.mubr.msk.f32.vlgmr.msra.gmra.mrb[28].mxu0 %vm847_vm1, %v3101_v12 }
0x17ec   : > { %v3191_v16 = vpop.f32.mrb[28].mxu0 }
0x17ed   : > { %v3192_v18 = vadd.f32 %v3496_v15, %v3191_v16  ;;  %v3744_v19 = vpop.f32.mrb[29].mxu0 }
0x17ef   : > { %v3195_v20 = vmax.f32 %v3192_v18, 0.0 }
0x17f1   : > { %3762 = vmatmul.mubr.msk.f32.vlgmr.msra.gmra.mrb[26].mxu1 %vm3202_vm3, %v3195_v20 }
0x18c4   : > { %v3272_v23 = vpop.f32.mrb[26].mxu1 }
0x18c5   : > { %v3273_v24 = vadd.f32 %v3498_v22, %v3272_v23  ;;  %v3763_v25 = vpop.f32.mrb[27].mxu1 }
0x18c7   : > { %v3276_v26 = vadd.f32 %v3273_v24, %v3101_v12 }
0x18c9   : > { %v3279_v27 = vsel %vm847_vm1, %v3276_v26, 0.0 }
0x18ca   : > { %3280 = vadd.xlane.f32.xlu1 %v3279_v27 }
0x1957   : > { %v3281_v28 = vpop.xlane.xlu1 %3280 }
0x1958   : > { %v3282_v17 = vmul.f32 0.03125, %v3281_v28 }
0x195a   : > { %v3283_v11 = vsub.f32 %v3276_v26, %v3282_v17 }
0x195c   : > { %v3284_v29 = vmul.f32 %v3283_v11, %v3283_v11 }
0x195e   : > { %v3285_v30 = vsel %vm847_vm1, %v3284_v29, 0.0 }
0x195f   : > { %3286 = vadd.xlane.f32.xlu1 %v3285_v30 }
0x19ec   : > { %v3287_v21 = vpop.xlane.xlu1 %3286 }
0x19ed   : > { %v3288_v10 = vmul.f32 0.03125, %v3287_v21 }
0x19ef   : > { %v3289_v31 = vadd.f32 1e-05, %v3288_v10 }
0x19f1   : > { %3899 = vrsqrt.f32 %v3289_v31 }
0x19fb   : > { %v3900_v32 = vpop.eup %3899 }
0x19fc   : > { %v3291_v34 = vmul.f32 %v3900_v32, %v3283_v11 }
0x19fe   : > { %v3298_v36 = vmul.f32 %v3500_v33, %v3291_v34 }
0x1a00   : > { %v3305_v37 = vadd.f32 %v3501_v35, %v3298_v36 }
0x1a02   : > { %3306 = vst.msk [vmem:[%s831_s2] sm:$0xff] %vm847_vm1, %v3305_v37 }
0x1a03 PF: > { %s4768_s5 = sld [smem:[#allocation12_spill]] }
0x1a09   : > { %s37_s5 = sadd.s32 1, %s4768_s5  }
0x1a0a   : > { %p34_p11 = scmp.ge.s32.totalorder %s37_s5, 4  }
0x1a0c   :  { %36 = sbr.rel (!%p34_p11) target bundleno = 15 (0xf), region = 172 }
0x1a13   :  { %3326 = vsyncpa [#allocation3], 1 }
0x1a14   :  { %3328 = vsyncpa [#allocation3 + $0x1], 1 }
0x1a15   :  { %3329 = vsyncpa [#allocation5], 1 }
0x1a16   :  { %3330 = vsyncpa [#allocation8], 1 }

// kernel: transformer_forward.24
= control target key start
LH: loop header
LB: loop body
LE: loop exit
PB: predicated region body
PF: predicated region fallthrough
CT: control target
= control target key end

     0   :  { %s4583_s0 = inlined_call_operand.vmem [shape: f32[2,8,32], index: 0, kind: input, shape index: {}]   ;;  %s4584_s1 = inlined_call_operand.vmem [shape: f32[2,8,32], index: 1, kind: input, shape index: {}]   ;;  %s4585_s2 = inlined_call_operand.vmem [shape: f32[2,8,8], index: 2, kind: input, shape index: {}]   ;;  %s4586_s3 = inlined_call_operand.vmem [shape: f32[2,1,8], index: 3, kind: input, shape index: {}]   ;;  %s4587_s4 = inlined_call_operand.vmem [shape: f32[32,96], index: 4, kind: input, shape index: {}]   ;;  %s4588_s5 = inlined_call_operand.vmem [shape: f32[1,96], index: 5, kind: input, shape index: {}]   ;;  %s4589_s6 = inlined_call_operand.vmem [shape: f32[32,32], index: 6, kind: input, shape index: {}]   ;;  %s4590_s7 = inlined_call_operand.vmem [shape: f32[1,32], index: 7, kind: input, shape index: {}]   ;;  %s4591_s8 = inlined_call_operand.vmem [shape: f32[1,32], index: 8, kind: input, shape index: {}]   ;;  %s4592_s9 = inlined_call_operand.vmem [shape: f32[1,32], index: 9, kind: input, shape index: {}]   ;;  %s4593_s10 = inlined_call_operand.vmem [shape: f32[32,32], index: 10, kind: input, shape index: {}]   ;;  %s4594_s11 = inlined_call_operand.vmem [shape: f32[1,32], index: 11, kind: input, shape index: {}]   ;;  %s4595_s12 = inlined_call_operand.vmem [shape: f32[32,64], index: 12, kind: input, shape index: {}]   ;;  %s4596_s13 = inlined_call_operand.vmem [shape: f32[1,64], index: 13, kind: input, shape index: {}]   ;;  %s4597_s14 = inlined_call_operand.vmem [shape: f32[32,32], index: 14, kind: input, shape index: {}]   ;;  %s4598_s15 = inlined_call_operand.vmem [shape: f32[1,32], index: 15, kind: input, shape index: {}]   ;;  %s4599_s16 = inlined_call_operand.vmem [shape: f32[1,32], index: 16, kind: input, shape index: {}]   ;;  %s4600_s17 = inlined_call_operand.vmem [shape: f32[1,32], index: 17, kind: input, shape index: {}]   ;;  %s4601_s18 = inlined_call_operand.vmem [shape: f32[32,64], index: 18, kind: input, shape index: {}]   ;;  %s4602_s19 = inlined_call_operand.vmem [shape: f32[1,64], index: 19, kind: input, shape index: {}]   ;;  %s4603_s20 = inlined_call_operand.vmem [shape: f32[64,32], index: 20, kind: input, shape index: {}]   ;;  %s4604_s21 = inlined_call_operand.vmem [shape: f32[1,32], index: 21, kind: input, shape index: {}]   ;;  %s4605_s22 = inlined_call_operand.vmem [shape: f32[1,32], index: 22, kind: input, shape index: {}]   ;;  %s4606_s23 = inlined_call_operand.vmem [shape: f32[1,32], index: 23, kind: input, shape index: {}]   ;;  %s4607_s24 = inlined_call_operand.vmem [shape: f32[2,8,32], index: 24, kind: output, shape index: {0}]   ;;  %s4608_s25 = inlined_call_operand.hbm [shape: f32[2,8,8], index: 25, kind: output, shape index: {1}]  }
   0x1   :  { %4629 = sst [smem:[#allocation11_spill]] %s4583_s0 }
   0x2   :  { %4630 = sst [smem:[#allocation12_spill]] %s4584_s1 }
   0x3   :  { %4631 = sst [smem:[#allocation13_spill]] %s4585_s2 }
   0x4   :  { %4632 = sst [smem:[#allocation14_spill]] %s4586_s3 }
   0x5   :  { %4633 = sst [smem:[#allocation15_spill]] %s4587_s4 }
   0x6   :  { %4634 = sst [smem:[#allocation16_spill]] %s4588_s5 }
   0x7   :  { %4635 = sst [smem:[#allocation17_spill]] %s4589_s6 }
   0x8   :  { %4636 = sst [smem:[#allocation18_spill]] %s4590_s7 }
   0x9   :  { %4637 = sst [smem:[#allocation19_spill]] %s4591_s8 }
   0xa   :  { %4638 = sst [smem:[#allocation20_spill]] %s4592_s9 }
   0xb   :  { %4639 = sst [smem:[#allocation21_spill]] %s4606_s23 }
   0xc   :  { %4640 = sst [smem:[#allocation22_spill]] %s4607_s24 }
   0xd   :  { %31 = vsyncpa [#allocation3], 0 }
   0xe   :  { %33 = vsyncpa [#allocation3 + $0x1], 0  ;;  %s4097_s29 = smov 0   ;;  %s4099_s2 = smov 0  }
   0xf   :  { %s4101_s6 = smov 0   ;;  %s4103_s30 = smov 0  }
  0x10 LB: > { %4641 = sst [smem:[#allocation5_spill]] %s3938_s29  ;;  %s4118_s7 = sadd.s32 4294967295, %s3950_s30   ;;  %s3950_s30 = sphi %s4103_s30, %s4671_s30   ;;  %s3946_s6 = sphi %s4101_s6, %s4673_s6   ;;  %s3942_s2 = sphi %s4099_s2, %s4675_s2   ;;  %s3938_s29 = sphi %s4097_s29, %s4674_s29  }
  0x11   : > { %4642 = sst [smem:[#allocation6_spill]] %s3946_s6  ;;  %s3437_s3 = sadd.s32 4294967294, %s3950_s30  }
  0x12   : > { %4643 = sst [smem:[#allocation7_spill]] %s3950_s30  ;;  %s4122_s26 = sadd.s32 1, %s3950_s30  }
  0x13   : > { %4644 = sst [smem:[#allocation8_spill]] %s4122_s26  ;;  %s596_s1 = sadd.s32 1, %s3946_s6 }
  0x14   : > { %s593_s8 = ssub.s32 %s3950_s30, %s4122_s26  ;;  %p606_p0 = scmp.ne.s32.totalorder %s3946_s6, %s3942_s2 }
  0x15   : > { %p594_p1 = scmp.eq.s32.totalorder %s593_s8, 0  ;;  %p607_p2 = scmp.eq.s32.totalorder %s4118_s7, 1 }
  0x16   : > { %p612_p3 = scmp.ne.s32.totalorder %s3942_s2, %s3938_s29  ;;  %p613_p4 = scmp.eq.s32.totalorder %s3437_s3, 1 }
  0x17   : > { %s4133_s27 = scalar_select %p594_p1, %s3946_s6, %s596_s1  }
  0x18   : > { %p4135_p5 = por %p607_p2, %p606_p0  ;;  %p4139_p6 = por %p613_p4, %p612_p3 }
  0x19   : > { %4645 = sst [smem:[#allocation9_spill]] %s4133_s27  ;;  %p3440_p7 = scmp.ge.s32.totalorder %s3950_s30, 1 }
  0x1a   : > { %s4647_s28 = scalar_select %p4139_p6, 1, 0 }
  0x1b   : > { %p718_p8 = scmp.lt.s32.totalorder %s3950_s30, 3 }
  0x1c   : > { %4648 = sst [smem:[#allocation10_spill]] %s4647_s28 }
  0x1d   : > { %p719_p9 = pnand %p3440_p7, %p718_p8 }
  0x1e   : > { %s4649_s0 = sld [smem:[#allocation15_spill]] (!%p719_p9)  ;;  %v3952_v3 = vmov (!%p719_p9), 0.0|0.0   ;;  %vm3953_vm0 = vmmov (!%p719_p9), 0   ;;  %v3954_v6 = vmov (!%p719_p9), 0.0   ;;  %p800_p10 = scmp.lt.s32.totalorder (!%p719_p9), %s4118_s7, 1  ;;  %vm834_vm1 = vcmask (!%p719_p9), 261120  }
  0x1f   : > { %722 = sbr.rel (%p719_p9) target bundleno = 6563 (0x19a3), region = 116  ;;  %3761 = vmatprep.subr.bf16.mxu0 (!%p719_p9), %v3952_v3  ;;  %3586 = vmatprep.mubr.msk.f32.mxu0 (!%p719_p9), %vm3953_vm0, %v3954_v6  ;;  %s4650_s5 = sld [smem:[#allocation11_spill]] (!%p719_p9)  ;;  %vm916_vm2 = vcmask (!%p719_p9), 64512   ;;  %vm3194_vm3 = vcmask (!%p719_p9), 523264  }
  0x20   : > { %3594 = vmatprep.subr.mxu1 (!%p719_p9), %v3954_v6  ;;  %3596 = vmatprep.mubr.msk.f32.mxu1 (!%p719_p9), %vm3953_vm0, %v3954_v6  ;;  %s4617_s26 = smov (!%p719_p9), 120   ;;  %s4615_s9 = smov (!%p719_p9), 96  }
  0x21   : > { %s4652_s1 = sld [smem:[#allocation13_spill]] (!%p719_p9)  ;;  %s4655_s24 = sld [smem:[#allocation12_spill]] (!%p719_p9) }
  0x22   : > { %s4656_s29 = sld [smem:[#allocation19_spill]] (!%p719_p9)  ;;  %s4660_s30 = smov (!%p719_p9), 88  }
  0x23   : > { %s4664_s28 = smov (!%p719_p9), 80  }
  0x24   : > { %v823_v0 = vld [vmem:[%s4649_s0] sm:$0xff] (!%p719_p9)  ;;  %v824_v1 = vld [vmem:[%s4649_s0 + $0x8] sm:$0xff] (!%p719_p9)  ;;  %v825_v2 = vld [vmem:[%s4649_s0 + $0x10] sm:$0xff] (!%p719_p9) }
  0x25   : > { %v3762_v4 = vpack.c.bf16 (!%p719_p9), %v824_v1, %v823_v0  ;;  %v826_v5 = vld [vmem:[%s4649_s0 + $0x18] sm:$0xff] (!%p719_p9)  ;;  %s4651_s0 = sld [smem:[#allocation16_spill]] (!%p719_p9) }
  0x26   : > { %v3765_v7 = vpack.c.bf16 %v826_v5, %v825_v2  ;;  %s4165_s27 = scalar_select %p800_p10, %s4118_s7, 1 }
  0x27   : > { %3763 = vmatpush3.bf16.msra.mxu0 %v3762_v4 }
  0x28   : > { %3764 = vmatprep.subr.bf16.mxu0 %v3952_v3  ;;  %s4169_s6 = sshll.u32 %s4165_s27, 3 }
  0x29   : > { %s803_s3 = scalar_lea.vmem %s4650_s5, %s4169_s6  ;;  %s4616_s5 = smov 88  }
  0x2a   : > { %v4175_v8 = vld [vmem:[%s803_s3] sm:$0xff]  ;;  %s811_s8 = scalar_lea.vmem %s4652_s1, %s4169_s6  ;;  %s3959_s3 = smov 64  }
  0x2b   : > { %3766 = vmatpush3.bf16.msra.mxu0 %v3765_v7  ;;  %v3446_v9 = vld [vmem:[%s4651_s0] ss:$0 sm:$0xff]  ;;  %s3958_s0 = smov 56   ;;  %s4620_s1 = smov 80  }
  0x2c   : > { %3589 = vmatprep.subr.mxu0 %v3954_v6  ;;  %v4208_v17 = vld [vmem:[%s811_s8] sm:$0xff]  ;;  %s4623_s8 = smov 112  }
  0x2e   : > { %3587 = vmatmul.mubr.msk.f32.vlgmr.msra.gmra.mrb[0].mxu0 %vm834_vm1, %v4175_v8 }
  0x2f   : > { %3591 = vmatprep.mubr.msk.f32.mxu0 %vm3953_vm0, %v3954_v6 }
 0x101   : > { %v904_v10 = vpop.f32.mrb[0].mxu0 }
 0x102   : > { %v4185_v11 = vadd.f32 %v3446_v9, %v904_v10  ;;  %v3588_v12 = vpop.f32.mrb[1].mxu0 }
 0x104   : > { %1080 = vrot.lane.b32.xlu1 %v4185_v11, %s4617_s26  ;;  %914 = vrot.lane.b32.xlu0 %v4185_v11, %s4615_s9  ;;  %s4653_s26 = sld [smem:[#allocation17_spill]]  ;;  %s3964_s9 = smov 48  }
 0x108   : > { %1082 = vrot.lane.b32.xlu0 %v4185_v11, %s4616_s5  ;;  %s3965_s5 = smov 40  }
 0x10a   : > { %v909_v37 = vld [vmem:[%s4653_s26 + $0x8] sm:$0xff]  ;;  %v908_v46 = vld [vmem:[%s4653_s26] sm:$0xff] }
 0x176   : > { %v915_v13 = vpop.permute.xlu0 %914  ;;  %v1081_v15 = vpop.permute.xlu1 %1080 }
 0x177   : > { %3590 = vmatpush3.xpose.msk.msra.mxu0 %vm916_vm2, %v915_v13 }
 0x178   : > { %3599 = vmatprep.subr.mxu0 %v3954_v6 }
 0x17a   : > { %3592 = vmatmul.mubr.msk.f32.vlgmr.msra.gmra.mrb[2].mxu0 %vm916_vm2, %v4185_v11  ;;  %v1083_v14 = vpop.permute.xlu0 %1082 }
 0x17b   : > { %3600 = vmatpush3.xpose.msk.msra.mxu0 %vm916_vm2, %v1083_v14  ;;  %3601 = vmatprep.mubr.msk.f32.mxu0 %vm3953_vm0, %v3954_v6  ;;  %v910_v14 = vld [vmem:[%s4653_s26 + $0x10] sm:$0xff] }
 0x17c   : > { %3609 = vmatprep.subr.mxu0 %v3954_v6 }
 0x17e   : > { %3602 = vmatmul.mubr.msk.f32.vlgmr.msra.gmra.mrb[4].mxu0 %vm916_vm2, %v1081_v15 }
 0x17f   : > { %3611 = vmatprep.mubr.msk.f32.mxu0 %vm3953_vm0, %v3954_v6  ;;  %3610 = vmatpush3.msra.mxu0 %v909_v37 }
 0x180   : > { %3619 = vmatprep.subr.mxu0 %v3954_v6 }
 0x24d   : > { %v987_v16 = vpop.f32.mrb[2].mxu0 }
 0x24e   : > { %v991_v18 = vmul.f32 0.35355338, %v987_v16  ;;  %v3593_v19 = vpop.f32.mrb[3].mxu0 }
 0x250   : > { %v992_v20 = vadd.f32 %v991_v18, %v4208_v17 }
 0x251   : > { %v1154_v21 = vpop.f32.mrb[4].mxu0 }
 0x252   : > { %v1158_v22 = vmul.f32 0.35355338, %v1154_v21  ;;  %v3603_v23 = vpop.f32.mrb[5].mxu0  ;;  %v993_v24 = vsel %vm916_vm2, %v992_v20, -inf }
 0x253   : > { %994 = vmax.xlane.f32.xlu1 %v993_v24 }
 0x254   : > { %v1159_v25 = vadd.f32 %v1158_v22, %v4208_v17 }
 0x256   : > { %v1160_v26 = vsel %vm916_vm2, %v1159_v25, -inf }
 0x257   : > { %1161 = vmax.xlane.f32.xlu0 %v1160_v26 }
 0x2e0   : > { %v995_v27 = vpop.xlane.xlu1 %994 }
 0x2e1   : > { %v996_v28 = vsub.f32 %v992_v20, %v995_v27 }
 0x2e3   : > { %v997_v29 = vmul.f32 1.442695, %v996_v28 }
 0x2e4   : > { %v1162_v30 = vpop.xlane.xlu0 %1161 }
 0x2e5   : > { %3850 = vpow2.f32 %v997_v29  ;;  %v1163_v31 = vsub.f32 %v1159_v25, %v1162_v30 }
 0x2e7   : > { %v1164_v32 = vmul.f32 1.442695, %v1163_v31 }
 0x2e9   : > { %3852 = vpow2.f32 %v1164_v32 }
 0x2ef   : > { %v3851_v33 = vpop.eup %3850 }
 0x2f0   : > { %v999_v34 = vsel %vm916_vm2, %v3851_v33, 0.0 }
 0x2f1   : > { %1000 = vadd.xlane.f32.xlu0 %v999_v34 }
 0x2f3   : > { %v3853_v35 = vpop.eup %3852 }
 0x2f4   : > { %v1166_v36 = vsel %vm916_vm2, %v3853_v35, 0.0 }
 0x2f5   : > { %1167 = vadd.xlane.f32.xlu1 %v1166_v36 }
 0x306   : > { %1171 = vrot.lane.b32.xlu1 %v4185_v11, %s3958_s0  ;;  %s4619_s0 = smov 72  }
 0x307   : > { %1004 = vrot.lane.b32.xlu0 %v4185_v11, %s3959_s3  ;;  %s4621_s3 = smov 104  }
 0x30a   : > { %1395 = vrot.lane.b32.xlu1 %v4185_v11, %s4620_s1  ;;  %s4662_s1 = smov 96  }
 0x30b   : > { %1393 = vrot.lane.b32.xlu0 %v4185_v11, %s4623_s8  ;;  %s807_s8 = scalar_lea.vmem %s4655_s24, %s4169_s6  ;;  %s4659_s24 = sld [smem:[#allocation14_spill]] }
 0x37e   : > { %v1001_v38 = vpop.xlane.xlu0 %1000 }
 0x37f   : > { %3854 = vrcp.f32 %v1001_v38 }
 0x382   : > { %v1168_v39 = vpop.xlane.xlu1 %1167  ;;  %v1005_v40 = vpop.permute.xlu0 %1004 }
 0x383   : > { %3856 = vrcp.f32 %v1168_v39  ;;  %3595 = vmatpush3.msra.mxu1 %v1005_v40 }
 0x384   : > { %3604 = vmatprep.subr.mxu1 %v3954_v6 }
 0x386   : > { %v1172_v43 = vpop.permute.xlu1 %1171  ;;  %v1394_v52 = vpop.permute.xlu0 %1393 }
 0x389   : > { %v3855_v41 = vpop.eup %3854 }
 0x38a   : > { %v1003_v42 = vmul.f32 %v3855_v41, %v3851_v33  ;;  %v1396_v50 = vpop.permute.xlu1 %1395 }
 0x38c   : > { %3597 = vmatmul.mubr.msk.f32.vlgmr.msra.gmra.mrb[0].mxu1 %vm916_vm2, %v1003_v42 }
 0x38d   : > { %v3857_v44 = vpop.eup %3856  ;;  %3605 = vmatpush3.msra.mxu1 %v1172_v43  ;;  %3606 = vmatprep.mubr.msk.f32.mxu1 %vm3953_vm0, %v3954_v6 }
 0x38e   : > { %v1170_v45 = vmul.f32 %v3857_v44, %v3853_v35  ;;  %3614 = vmatprep.subr.mxu1 %v3954_v6 }
 0x390   : > { %3607 = vmatmul.mubr.msk.f32.vlgmr.msra.gmra.mrb[2].mxu1 %vm916_vm2, %v1170_v45 }
 0x391   : > { %3616 = vmatprep.mubr.msk.f32.mxu1 %vm3953_vm0, %v3954_v6  ;;  %3615 = vmatpush3.msra.mxu1 %v908_v46 }
 0x392   : > { %3624 = vmatprep.subr.mxu1 %v3954_v6 }
 0x45f   : > { %v1076_v47 = vpop.f32.mrb[0].mxu1 }
 0x460   : > { %v3598_v48 = vpop.f32.mrb[1].mxu1  ;;  %3617 = vmatmul.mubr.msk.f32.vlgmr.msra.gmra.mrb[4].mxu1 %vm916_vm2, %v1076_v47 }
 0x461   : > { %3626 = vmatprep.mubr.msk.f32.mxu1 %vm3953_vm0, %v3954_v6  ;;  %v1997_v48 = vld [vmem:[%s4595_s12] sm:$0xff] }
 0x463   : > { %v1243_v49 = vpop.f32.mrb[2].mxu1 }
 0x464   : > { %v3608_v51 = vpop.f32.mrb[3].mxu1  ;;  %3612 = vmatmul.mubr.msk.f32.vlgmr.msra.gmra.mrb[6].mxu0 %vm916_vm2, %v1243_v49  ;;  %v1998_v49 = vld [vmem:[%s4595_s12 + $0x8] sm:$0xff] }
 0x465   : > { %3620 = vmatpush3.xpose.msk.msra.mxu0 %vm916_vm2, %v1396_v50  ;;  %3621 = vmatprep.mubr.msk.f32.mxu0 %vm3953_vm0, %v3954_v6  ;;  %v1913_v50 = vld [vmem:[%s4593_s10] sm:$0xff]  ;;  %v1914_v51 = vld [vmem:[%s4593_s10 + $0x8] sm:$0xff] }
 0x466   : > { %3629 = vmatprep.subr.mxu0 %v3954_v6 }
 0x468   : > { %3622 = vmatmul.mubr.msk.f32.vlgmr.msra.gmra.mrb[8].mxu0 %vm916_vm2, %v1394_v52  ;;  %v1999_v52 = vld [vmem:[%s4595_s12 + $0x10] sm:$0xff] }
 0x469   : > { %3631 = vmatprep.mubr.msk.f32.mxu0 %vm3953_vm0, %v3954_v6  ;;  %3630 = vmatpush3.msra.mxu0 %v910_v14 }
 0x46a   : > { %3639 = vmatprep.subr.mxu0 %v3954_v6 }
 0x533   : > { %v1389_v53 = vpop.f32.mrb[4].mxu1 }
 0x534   : > { %v3618_v54 = vpop.f32.mrb[5].mxu1 }
 0x535   : > { %v2000_v54 = vld [vmem:[%s4595_s12 + $0x18] sm:$0xff] }
 0x537   : > { %v1316_v55 = vpop.f32.mrb[6].mxu0 }
 0x538   : > { %v4249_v56 = vadd.f32 %v1389_v53, %v1316_v55  ;;  %v3613_v57 = vpop.f32.mrb[7].mxu0  ;;  %v3768_v53 = vpack.c.bf16 %v1914_v51, %v1913_v50  ;;  %v3777_v55 = vpack.c.bf16 %v2000_v54, %v1999_v52 }
 0x539   : > { %v1916_v57 = vld [vmem:[%s4593_s10 + $0x18] sm:$0xff] }
 0x53b   : > { %v1467_v58 = vpop.f32.mrb[8].mxu0 }
 0x53c   : > { %v1471_v59 = vmul.f32 0.35355338, %v1467_v58  ;;  %v3623_v60 = vpop.f32.mrb[9].mxu0  ;;  %v820_v58 = vld [vmem:[%s807_s8] sm:$0xff]  ;;  %s4658_s8 = smov 120  }
 0x53e   : > { %v1472_v61 = vadd.f32 %v1471_v59, %v4208_v17 }
 0x540   : > { %v1473_v62 = vsel %vm916_vm2, %v1472_v61, -inf }
 0x541   : > { %1474 = vmax.xlane.f32.xlu1 %v1473_v62 }
 0x552   : > { %1636 = vrot.lane.b32.xlu1 %v4185_v11, %s4619_s0  ;;  %s4657_s0 = sld [smem:[#allocation20_spill]] }
 0x556   : > { %1634 = vrot.lane.b32.xlu1 %v4185_v11, %s4621_s3  ;;  %s4663_s3 = smov 104  }
 0x5ce   : > { %v1475_v63 = vpop.xlane.xlu1 %1474 }
 0x5cf   : > { %v1476_v0 = vsub.f32 %v1472_v61, %v1475_v63 }
 0x5d1   : > { %v1477_v1 = vmul.f32 1.442695, %v1476_v0  ;;  %v3465_v0 = vld [vmem:[%s4656_s29] ss:$0 sm:$0xff]  ;;  %s814_s29 = scalar_lea.vmem %s4659_s24, %s4165_s27  ;;  %s4661_s27 = smov 112  }
 0x5d2   : > { %v1637_v10 = vpop.permute.xlu1 %1636  ;;  %s4665_s24 = smov 72  }
 0x5d3   : > { %3858 = vpow2.f32 %v1477_v1 }
 0x5d6   : > { %v1635_v13 = vpop.permute.xlu1 %1634 }
 0x5dd   : > { %v3859_v2 = vpop.eup %3858 }
 0x5de   : > { %v1479_v4 = vsel %vm916_vm2, %v3859_v2, 0.0 }
 0x5df   : > { %1480 = vadd.xlane.f32.xlu0 %v1479_v4 }
 0x5f5   : > { %1484 = vrot.lane.b32.xlu0 %v4185_v11, %s3964_s9  ;;  %s4654_s9 = sld [smem:[#allocation18_spill]] }
 0x5fb   : > { %v3464_v36 = vld [vmem:[%s4654_s9] ss:$0 sm:$0xff]  ;;  %s3966_s9 = smov [#allocation2]  }
 0x66c   : > { %v1481_v5 = vpop.xlane.xlu0 %1480 }
 0x66d   : > { %3860 = vrcp.f32 %v1481_v5 }
 0x670   : > { %v1485_v7 = vpop.permute.xlu0 %1484 }
 0x671   : > { %3625 = vmatpush3.msra.mxu1 %v1485_v7  ;;  %v3469_v7 = vld [vmem:[%s4596_s13] ss:$0 sm:$0xff] }
 0x672   : > { %3634 = vmatprep.subr.mxu1 %v3954_v6 }
 0x677   : > { %v3861_v9 = vpop.eup %3860 }
 0x678   : > { %v1483_v12 = vmul.f32 %v3861_v9, %v3859_v2  ;;  %v3466_v2 = vld [vmem:[%s4657_s0] ss:$0 sm:$0xff] }
 0x67a   : > { %3627 = vmatmul.mubr.msk.f32.vlgmr.msra.gmra.mrb[6].mxu1 %vm916_vm2, %v1483_v12 }
 0x67b   : > { %3635 = vmatpush3.xpose.msk.msra.mxu1 %vm916_vm2, %v1637_v10  ;;  %3636 = vmatprep.mubr.msk.f32.mxu1 %vm3953_vm0, %v3954_v6 }
 0x67c   : > { %3644 = vmatprep.subr.mxu1 %v3954_v6 }
 0x67e   : > { %3637 = vmatmul.mubr.msk.f32.vlgmr.msra.gmra.mrb[8].mxu1 %vm916_vm2, %v1635_v13  ;;  %v3467_v13 = vld [vmem:[%s4594_s11] ss:$0 sm:$0xff] }
 0x67f   : > { %3646 = vmatprep.mubr.msk.f32.mxu1 %vm3953_vm0, %v3954_v6 }
 0x74d   : > { %v1556_v15 = vpop.f32.mrb[6].mxu1 }
 0x74e   : > { %v3628_v16 = vpop.f32.mrb[7].mxu1  ;;  %3632 = vmatmul.mubr.msk.f32.vlgmr.msra.gmra.mrb[10].mxu0 %vm916_vm2, %v1556_v15 }
 0x74f   : > { %3641 = vmatprep.mubr.msk.f32.mxu0 %vm3953_vm0, %v3954_v6 }
 0x751   : > { %v1708_v18 = vpop.f32.mrb[8].mxu1 }
 0x752   : > { %v1712_v19 = vmul.f32 0.35355338, %v1708_v18  ;;  %v3638_v20 = vpop.f32.mrb[9].mxu1 }
 0x754   : > { %v1713_v21 = vadd.f32 %v1712_v19, %v4208_v17  ;;  %v911_v17 = vld [vmem:[%s4653_s26 + $0x18] sm:$0xff] }
 0x755   : > { %3645 = vmatpush3.msra.mxu1 %v911_v17 }
 0x756   : > { %v1714_v22 = vsel %vm916_vm2, %v1713_v21, -inf  ;;  %3773 = vmatprep.subr.bf16.mxu1 %v3952_v3 }
 0x757   : > { %1715 = vmax.xlane.f32.xlu0 %v1714_v22 }
 0x76d   : > { %1725 = vrot.lane.b32.xlu0 %v4185_v11, %s3965_s5 }
 0x7e4   : > { %v1716_v23 = vpop.xlane.xlu0 %1715 }
 0x7e5   : > { %v1717_v24 = vsub.f32 %v1713_v21, %v1716_v23  ;;  %v4374_v21 = vld [vmem:[%s814_s29] ss:$0 sm:$0xff] }
 0x7e7   : > { %v1718_v25 = vmul.f32 1.442695, %v1717_v24 }
 0x7e8   : > { %v1726_v26 = vpop.permute.xlu0 %1725 }
 0x7e9   : > { %3862 = vpow2.f32 %v1718_v25  ;;  %3640 = vmatpush3.msra.mxu0 %v1726_v26 }
 0x7ea   : > { %3767 = vmatprep.subr.bf16.mxu0 %v3952_v3 }
 0x7f3   : > { %v3863_v27 = vpop.eup %3862 }
 0x7f4   : > { %v1720_v28 = vsel %vm916_vm2, %v3863_v27, 0.0 }
 0x7f5   : > { %1721 = vadd.xlane.f32.xlu1 %v1720_v28 }
 0x821   : > { %v1629_v11 = vpop.f32.mrb[10].mxu0 }
 0x822   : > { %v1633_v29 = vadd.f32 %v1629_v11, %v4249_v56  ;;  %v3633_v30 = vpop.f32.mrb[11].mxu0  ;;  %v1915_v56 = vld [vmem:[%s4593_s10 + $0x10] sm:$0xff] }
 0x823   : > { %v3771_v59 = vpack.c.bf16 %v1916_v57, %v1915_v56 }
 0x882   : > { %v1722_v31 = vpop.xlane.xlu1 %1721 }
 0x883   : > { %3864 = vrcp.f32 %v1722_v31 }
 0x88d   : > { %v3865_v32 = vpop.eup %3864 }
 0x88e   : > { %v1724_v33 = vmul.f32 %v3865_v32, %v3863_v27 }
 0x890   : > { %3642 = vmatmul.mubr.msk.f32.vlgmr.msra.gmra.mrb[12].mxu0 %vm916_vm2, %v1724_v33 }
 0x891   : > { %3657 = vmatprep.mubr.msk.f32.mxu0 %vm3953_vm0, %v3954_v6  ;;  %3769 = vmatpush3.bf16.msra.mxu0 %v3768_v53 }
 0x892   : > { %3770 = vmatprep.subr.bf16.mxu0 %v3952_v3 }
 0x895   : > { %3772 = vmatpush3.bf16.msra.mxu0 %v3771_v59 }
 0x896   : > { %3671 = vmatprep.subr.mxu0 %v3954_v6 }
 0x963   : > { %v1797_v34 = vpop.f32.mrb[12].mxu0 }
 0x964   : > { %v3643_v35 = vpop.f32.mrb[13].mxu0  ;;  %3647 = vmatmul.mubr.msk.f32.vlgmr.msra.gmra.mrb[10].mxu1 %vm916_vm2, %v1797_v34 }
 0x965   : > { %3668 = vmatprep.mubr.msk.f32.mxu1 %vm3953_vm0, %v3954_v6 }
 0xa37   : > { %v1870_v37 = vpop.f32.mrb[10].mxu1 }
 0xa38   : > { %v1874_v38 = vadd.f32 %v1870_v37, %v1633_v29  ;;  %v3648_v39 = vpop.f32.mrb[11].mxu1 }
 0xa3a   : > { %v1881_v40 = vadd.f32 %v3464_v36, %v1874_v38 }
 0xa3c   : > { %v1882_v41 = vadd.f32 %v1881_v40, %v4175_v8  ;;  %v3774_v8 = vpack.c.bf16 %v1998_v49, %v1997_v48  ;;  %v2081_v48 = vld [vmem:[%s4597_s14] sm:$0xff]  ;;  %v2082_v49 = vld [vmem:[%s4597_s14 + $0x8] sm:$0xff] }
 0xa3e   : > { %v1885_v42 = vsel %vm834_vm1, %v1882_v41, 0.0  ;;  %3775 = vmatpush3.bf16.msra.mxu1 %v3774_v8 }
 0xa3f   : > { %1886 = vadd.xlane.f32.xlu1 %v1885_v42  ;;  %3776 = vmatprep.subr.bf16.mxu1 %v3952_v3 }
 0xa42   : > { %3778 = vmatpush3.bf16.msra.mxu1 %v3777_v55 }
 0xa43   : > { %3676 = vmatprep.subr.mxu1 %v3954_v6 }
 0xa45   : > { %3669 = vmatmul.mubr.msk.f32.vlgmr.msra.gmra.mrb[12].mxu1 %vm834_vm1, %v820_v58 }
 0xa46   : > { %3678 = vmatprep.mubr.msk.f32.mxu1 %vm3953_vm0, %v3954_v6 }
 0xacc   : > { %v1887_v43 = vpop.xlane.xlu1 %1886 }
 0xacd   : > { %v1889_v44 = vmul.f32 0.03125, %v1887_v43 }
 0xacf   : > { %v1890_v45 = vsub.f32 %v1882_v41, %v1889_v44 }
 0xad1   : > { %v1891_v46 = vmul.f32 %v1890_v45, %v1890_v45 }
 0xad3   : > { %v1892_v47 = vsel %vm834_vm1, %v1891_v46, 0.0 }
 0xad4   : > { %1893 = vadd.xlane.f32.xlu1 %v1892_v47 }
 0xb18   : > { %v2077_v9 = vpop.f32.mrb[12].mxu1 }
 0xb19   : > { %v4347_v10 = vadd.f32 %v3469_v7, %v2077_v9  ;;  %v3670_v12 = vpop.f32.mrb[13].mxu1 }
 0xb1b   : > { %2260 = vrot.lane.b32.xlu1 %v4347_v10, %s4658_s8 }
 0xb61   : > { %v1894_v60 = vpop.xlane.xlu1 %1893 }
 0xb62   : > { %v1895_v61 = vmul.f32 0.03125, %v1894_v60 }
 0xb64   : > { %v1896_v62 = vadd.f32 1e-05, %v1895_v61 }
 0xb66   : > { %3866 = vrsqrt.f32 %v1896_v62 }
 0xb70   : > { %v3867_v63 = vpop.eup %3866 }
 0xb71   : > { %v1898_v1 = vmul.f32 %v3867_v63, %v1890_v45 }
 0xb73   : > { %v1905_v4 = vmul.f32 %v3465_v0, %v1898_v1 }
 0xb75   : > { %v4338_v5 = vadd.f32 %v3466_v2, %v1905_v4 }
 0xb77   : > { %3658 = vmatmul.mubr.msk.f32.vlgmr.msra.gmra.mrb[14].mxu0 %vm834_vm1, %v4338_v5 }
 0xb78   : > { %3673 = vmatprep.mubr.msk.f32.mxu0 %vm3953_vm0, %v3954_v6  ;;  %3672 = vmatpush3.xpose.msk.msra.mxu0 %vm916_vm2, %v4347_v10 }
 0xb79   : > { %3681 = vmatprep.subr.mxu0 %v3954_v6 }
 0xb8d   : > { %v2261_v18 = vpop.permute.xlu1 %2260 }
 0xc4a   : > { %v1993_v14 = vpop.f32.mrb[14].mxu0 }
 0xc4b   : > { %v4357_v15 = vadd.f32 %v3467_v13, %v1993_v14  ;;  %v3659_v16 = vpop.f32.mrb[15].mxu0 }
 0xc4d   : > { %2258 = vrot.lane.b32.xlu0 %v4357_v15, %s4658_s8  ;;  %3674 = vmatmul.mubr.msk.f32.vlgmr.msra.gmra.mrb[16].mxu0 %vm916_vm2, %v4357_v15  ;;  %s3892_s8 = sshll.u32 %s3966_s9, 4  ;;  %s3893_s8 = int_to_ptr.vmem [resolvable:$false] %s3892_s8 }
 0xc4e   : > { %3682 = vmatpush3.xpose.msk.msra.mxu0 %vm916_vm2, %v2261_v18  ;;  %3683 = vmatprep.mubr.msk.f32.mxu0 %vm3953_vm0, %v3954_v6 }
 0xc4f   : > { %3691 = vmatprep.subr.mxu0 %v3954_v6 }
 0xcbf   : > { %v2259_v19 = vpop.permute.xlu0 %2258 }
 0xcc0   : > { %3684 = vmatmul.mubr.msk.f32.vlgmr.msra.gmra.mrb[18].mxu0 %vm916_vm2, %v2259_v19 }
 0xcc1   : > { %3693 = vmatprep.mubr.msk.f32.mxu0 %vm3953_vm0, %v3954_v6  ;;  %3692 = vmatpush3.msra.mxu0 %v2082_v49 }
 0xcc2   : > { %3701 = vmatprep.subr.mxu0 %v3954_v6 }
 0xd20   : > { %v2158_v20 = vpop.f32.mrb[16].mxu0 }
 0xd21   : > { %v2162_v22 = vmul.f32 0.35355338, %v2158_v20  ;;  %v3675_v23 = vpop.f32.mrb[17].mxu0  ;;  %v2083_v20 = vld [vmem:[%s4597_s14 + $0x10] sm:$0xff] }
 0xd23   : > { %v2169_v24 = vadd.f32 %v4374_v21, %v2162_v22 }
 0xd25   : > { %v2170_v25 = vsel %vm916_vm2, %v2169_v24, -inf }
 0xd26   : > { %2171 = vmax.xlane.f32.xlu0 %v2170_v25 }
 0xd93   : > { %v2332_v26 = vpop.f32.mrb[18].mxu0 }
 0xd94   : > { %v2336_v27 = vmul.f32 0.35355338, %v2332_v26  ;;  %v3685_v28 = vpop.f32.mrb[19].mxu0 }
 0xd96   : > { %v2337_v17 = vadd.f32 %v4374_v21, %v2336_v27 }
 0xd98   : > { %v2338_v11 = vsel %vm916_vm2, %v2337_v17, -inf }
 0xd99   : > { %2339 = vmax.xlane.f32.xlu1 %v2338_v11 }
 0xdaa   : > { %2349 = vrot.lane.b32.xlu1 %v4347_v10, %s4660_s30 }
 0xdae   : > { %2574 = vrot.lane.b32.xlu1 %v4347_v10, %s4661_s27 }
 0xdb3   : > { %v2172_v29 = vpop.xlane.xlu0 %2171 }
 0xdb4   : > { %v2173_v30 = vsub.f32 %v2169_v24, %v2172_v29 }
 0xdb6   : > { %v2174_v31 = vmul.f32 1.442695, %v2173_v30 }
 0xdb8   : > { %3868 = vpow2.f32 %v2174_v31 }
 0xdc2   : > { %v3869_v32 = vpop.eup %3868 }
 0xdc3   : > { %v2176_v33 = vsel %vm916_vm2, %v3869_v32, 0.0 }
 0xdc4   : > { %2177 = vadd.xlane.f32.xlu0 %v2176_v33 }
 0xe26   : > { %v2340_v34 = vpop.xlane.xlu1 %2339 }
 0xe27   : > { %v2341_v35 = vsub.f32 %v2337_v17, %v2340_v34 }
 0xe29   : > { %v2342_v36 = vmul.f32 1.442695, %v2341_v35 }
 0xe2a   : > { %v2350_v44 = vpop.permute.xlu1 %2349 }
 0xe2b   : > { %3870 = vpow2.f32 %v2342_v36 }
 0xe2e   : > { %v2575_v52 = vpop.permute.xlu1 %2574 }
 0xe35   : > { %v3871_v37 = vpop.eup %3870 }
 0xe36   : > { %v2344_v38 = vsel %vm916_vm2, %v3871_v37, 0.0 }
 0xe37   : > { %2345 = vadd.xlane.f32.xlu0 %v2344_v38 }
 0xe4d   : > { %2181 = vrot.lane.b32.xlu0 %v4347_v10, %s4662_s1 }
 0xe51   : > { %2572 = vrot.lane.b32.xlu0 %v4357_v15, %s4661_s27  ;;  %v2178_v39 = vpop.xlane.xlu0 %2177  ;;  %s797_s27 = sand.u32 1, %s3942_s2  }
 0xe52   : > { %3872 = vrcp.f32 %v2178_v39  ;;  %s4455_s1 = sshll.u32 %s797_s27, 3  ;;  %s3305_s30 = scalar_lea.sflag [#allocation3], %s797_s27 }
 0xe53   : > { %s799_s0 = scalar_lea.vmem [#allocation2], %s4455_s1 }
 0xe54   : > { %s3321_s26 = sshll.u32 %s799_s0, 4  ;;  %s3322_s26 = int_to_ptr.vmem [resolvable:$true] %s3321_s26 }
 0xe55   : > { %s3888_s5 = scalar_lea.vmem %s3322_s26, 128  ;;  %p3895_p0 = scmp.lt.s32.totalorder %s3322_s26, %s3893_s8 }
 0xe56   : > { %p3889_p11 = scmp.ne.s32.totalorder %s3322_s26, %s3888_s5 }
 0xe58   : > { %p3890_p12 = pnand %p3889_p11, %p4135_p5 }
 0xe5a   : > { %p3891_p13 = pneg %p3890_p12 }
 0xe5c   : > { %v3873_v41 = vpop.eup %3872 }
 0xe5d   : > { %v2180_v42 = vmul.f32 %v3873_v41, %v3869_v32 }
 0xec4   : > { %v2346_v40 = vpop.xlane.xlu0 %2345 }
 0xec5   : > { %3874 = vrcp.f32 %v2346_v40 }
 0xec8   : > { %v2182_v43 = vpop.permute.xlu0 %2181 }
 0xec9   : > { %3677 = vmatpush3.msra.mxu1 %v2182_v43 }
 0xeca   : > { %3679 = vmatmul.mubr.msk.f32.vlgmr.msra.gmra.mrb[14].mxu1 %vm916_vm2, %v2180_v42  ;;  %3686 = vmatprep.subr.mxu1 %v3954_v6 }
 0xecb   : > { %3687 = vmatpush3.msra.mxu1 %v2350_v44  ;;  %3688 = vmatprep.mubr.msk.f32.mxu1 %vm3953_vm0, %v3954_v6 }
 0xecc   : > { %3696 = vmatprep.subr.mxu1 %v3954_v6  ;;  %v2573_v54 = vpop.permute.xlu0 %2572 }
 0xecf   : > { %v3875_v45 = vpop.eup %3874 }
 0xed0   : > { %v2348_v46 = vmul.f32 %v3875_v45, %v3871_v37 }
 0xed2   : > { %3689 = vmatmul.mubr.msk.f32.vlgmr.msra.gmra.mrb[16].mxu1 %vm916_vm2, %v2348_v46  ;;  %v2571_v47 = vadd.f32 %v2348_v46, %v2180_v42  ;;  %v3488_v42 = vld [vmem:[%s4598_s15] ss:$0 sm:$0xff] }
 0xed3   : > { %3698 = vmatprep.mubr.msk.f32.mxu1 %vm3953_vm0, %v3954_v6  ;;  %3697 = vmatpush3.msra.mxu1 %v2081_v48 }
 0xed4   : > { %3706 = vmatprep.subr.mxu1 %v3954_v6 }
 0xf9d   : > { %v2253_v8 = vpop.f32.mrb[14].mxu1 }
 0xf9e   : > { %v3680_v50 = vpop.f32.mrb[15].mxu1  ;;  %3699 = vmatmul.mubr.msk.f32.vlgmr.msra.gmra.mrb[18].mxu1 %vm916_vm2, %v2253_v8 }
 0xf9f   : > { %3708 = vmatprep.mubr.msk.f32.mxu1 %vm3953_vm0, %v3954_v6 }
 0xfa5   : > { %v2421_v51 = vpop.f32.mrb[16].mxu1 }
 0xfa6   : > { %v3690_v53 = vpop.f32.mrb[17].mxu1  ;;  %3694 = vmatmul.mubr.msk.f32.vlgmr.msra.gmra.mrb[20].mxu0 %vm916_vm2, %v2421_v51 }
 0xfa7   : > { %3702 = vmatpush3.xpose.msk.msra.mxu0 %vm916_vm2, %v2575_v52  ;;  %3703 = vmatprep.mubr.msk.f32.mxu0 %vm3953_vm0, %v3954_v6  ;;  %v3095_v53 = vld [vmem:[%s4601_s18 + $0x8] sm:$0xff] }
 0xfa8   : > { %3711 = vmatprep.subr.mxu0 %v3954_v6 }
 0xfaa   : > { %3704 = vmatmul.mubr.msk.f32.vlgmr.msra.gmra.mrb[22].mxu0 %vm916_vm2, %v2573_v54 }
 0xfab   : > { %3713 = vmatprep.mubr.msk.f32.mxu0 %vm3953_vm0, %v3954_v6  ;;  %3712 = vmatpush3.msra.mxu0 %v2083_v20  ;;  %v3491_v20 = vld [vmem:[%s4602_s19] ss:$0 sm:$0xff] }
 0xfac   : > { %3721 = vmatprep.subr.mxu0 %v3954_v6 }
0x1071   : > { %v2567_v55 = vpop.f32.mrb[18].mxu1 }
0x1072   : > { %v3700_v56 = vpop.f32.mrb[19].mxu1 }
0x1079   : > { %v2494_v57 = vpop.f32.mrb[20].mxu0 }
0x107a   : > { %v2568_v58 = vadd.f32 %v2567_v55, %v2494_v57  ;;  %v3695_v59 = vpop.f32.mrb[21].mxu0  ;;  %v3097_v55 = vld [vmem:[%s4601_s18 + $0x18] sm:$0xff]  ;;  %v3099_v57 = vld [vmem:[%s4603_s20] sm:$0xff] }
0x107b   : > { %v3101_v59 = vld [vmem:[%s4603_s20 + $0x10] sm:$0xff] }
0x107d   : > { %v2646_v60 = vpop.f32.mrb[22].mxu0 }
0x107e   : > { %v2650_v61 = vmul.f32 0.35355338, %v2646_v60  ;;  %v3705_v62 = vpop.f32.mrb[23].mxu0 }
0x1080   : > { %v2651_v63 = vadd.f32 %v4374_v21, %v2650_v61  ;;  %v3102_v61 = vld [vmem:[%s4603_s20 + $0x18] sm:$0xff] }
0x1081   : > { %v3789_v62 = vpack.c.bf16 %v3102_v61, %v3101_v59 }
0x1082   : > { %v2652_v0 = vsel %vm916_vm2, %v2651_v63, -inf }
0x1083   : > { %2653 = vmax.xlane.f32.xlu1 %v2652_v0  ;;  %v3104_v0 = vld [vmem:[%s4603_s20 + $0x28] sm:$0xff] }
0x1094   : > { %2816 = vrot.lane.b32.xlu1 %v4347_v10, %s4663_s3 }
0x1098   : > { %2814 = vrot.lane.b32.xlu1 %v4357_v15, %s4663_s3  ;;  %s3894_s3 = scalar_lea.vmem %s3893_s8, 256 }
0x1099   : > { %p3896_p1 = scmp.lt.s32.totalorder %s3894_s3, %s3888_s5 }
0x109b   : > { %p3897_p2 = por %p3896_p1, %p3895_p0 }
0x109d   : > { %p3898_p3 = pnand %p3897_p2, %p3891_p13 }
0x1110   : > { %v2654_v1 = vpop.xlane.xlu1 %2653 }
0x1111   : > { %v2655_v2 = vsub.f32 %v2651_v63, %v2654_v1  ;;  %v3103_v63 = vld [vmem:[%s4603_s20 + $0x20] sm:$0xff] }
0x1112   : > { %v3792_v1 = vpack.c.bf16 %v3104_v0, %v3103_v63 }
0x1113   : > { %v2656_v4 = vmul.f32 1.442695, %v2655_v2 }
0x1114   : > { %v2817_v16 = vpop.permute.xlu1 %2816 }
0x1115   : > { %3876 = vpow2.f32 %v2656_v4 }
0x1118   : > { %v2815_v19 = vpop.permute.xlu1 %2814 }
0x111f   : > { %v3877_v7 = vpop.eup %3876 }
0x1120   : > { %v2658_v9 = vsel %vm916_vm2, %v3877_v7, 0.0 }
0x1121   : > { %2659 = vadd.xlane.f32.xlu0 %v2658_v9 }
0x1137   : > { %2663 = vrot.lane.b32.xlu0 %v4347_v10, %s4664_s28  ;;  %s3498_s28 = sshll.u32 %s4118_s7, 7 }
0x1138   : > { %s4534_s29 = scalar_lea.hbm %s4608_s25, %s3498_s28 }
0x11ae   : > { %v2660_v12 = vpop.xlane.xlu0 %2659 }
0x11af   : > { %3878 = vrcp.f32 %v2660_v12  ;;  %v3489_v12 = vld [vmem:[%s4599_s16] ss:$0 sm:$0xff] }
0x11b2   : > { %v2664_v13 = vpop.permute.xlu0 %2663 }
0x11b3   : > { %3707 = vmatpush3.msra.mxu1 %v2664_v13 }
0x11b4   : > { %3716 = vmatprep.subr.mxu1 %v3954_v6 }
0x11b9   : > { %v3879_v14 = vpop.eup %3878 }
0x11ba   : > { %v2662_v15 = vmul.f32 %v3879_v14, %v3877_v7  ;;  %v3490_v14 = vld [vmem:[%s4600_s17] ss:$0 sm:$0xff] }
0x11bc   : > { %3709 = vmatmul.mubr.msk.f32.vlgmr.msra.gmra.mrb[20].mxu1 %vm916_vm2, %v2662_v15  ;;  %v2813_v18 = vadd.f32 %v2662_v15, %v2571_v47 }
0x11bd   : > { %3717 = vmatpush3.xpose.msk.msra.mxu1 %vm916_vm2, %v2817_v16  ;;  %3718 = vmatprep.mubr.msk.f32.mxu1 %vm3953_vm0, %v3954_v6 }
0x11be   : > { %3726 = vmatprep.subr.mxu1 %v3954_v6 }
0x11c0   : > { %3719 = vmatmul.mubr.msk.f32.vlgmr.msra.gmra.mrb[22].mxu1 %vm916_vm2, %v2815_v19 }
0x11c1   : > { %3728 = vmatprep.mubr.msk.f32.mxu1 %vm3953_vm0, %v3954_v6 }
0x128f   : > { %v2735_v22 = vpop.f32.mrb[20].mxu1 }
0x1290   : > { %v3710_v23 = vpop.f32.mrb[21].mxu1  ;;  %3714 = vmatmul.mubr.msk.f32.vlgmr.msra.gmra.mrb[24].mxu0 %vm916_vm2, %v2735_v22 }
0x1291   : > { %3723 = vmatprep.mubr.msk.f32.mxu0 %vm3953_vm0, %v3954_v6 }
0x1293   : > { %v2888_v24 = vpop.f32.mrb[22].mxu1 }
0x1294   : > { %v2892_v25 = vmul.f32 0.35355338, %v2888_v24  ;;  %v3720_v26 = vpop.f32.mrb[23].mxu1 }
0x1295   : > { %v3493_v26 = vld [vmem:[%s4604_s21] ss:$0 sm:$0xff] }
0x1296   : > { %v2893_v27 = vadd.f32 %v4374_v21, %v2892_v25  ;;  %v2084_v21 = vld [vmem:[%s4597_s14 + $0x18] sm:$0xff] }
0x1297   : > { %3727 = vmatpush3.msra.mxu1 %v2084_v21 }
0x1298   : > { %v2894_v28 = vsel %vm916_vm2, %v2893_v27, -inf  ;;  %3785 = vmatprep.subr.bf16.mxu1 %v3952_v3 }
0x1299   : > { %2895 = vmax.xlane.f32.xlu0 %v2894_v28 }
0x12af   : > { %2905 = vrot.lane.b32.xlu0 %v4347_v10, %s4665_s24 }
0x1326   : > { %v2896_v17 = vpop.xlane.xlu0 %2895 }
0x1327   : > { %v2897_v11 = vsub.f32 %v2893_v27, %v2896_v17 }
0x1329   : > { %v2898_v29 = vmul.f32 1.442695, %v2897_v11 }
0x132a   : > { %v2906_v30 = vpop.permute.xlu0 %2905 }
0x132b   : > { %3880 = vpow2.f32 %v2898_v29  ;;  %3722 = vmatpush3.msra.mxu0 %v2906_v30 }
0x132c   : > { %3779 = vmatprep.subr.bf16.mxu0 %v3952_v3 }
0x1335   : > { %v3881_v31 = vpop.eup %3880 }
0x1336   : > { %v2900_v32 = vsel %vm916_vm2, %v3881_v31, 0.0 }
0x1337   : > { %2901 = vadd.xlane.f32.xlu1 %v2900_v32 }
0x1363   : > { %v2808_v10 = vpop.f32.mrb[24].mxu0 }
0x1364   : > { %v2812_v33 = vadd.f32 %v2808_v10, %v2568_v58  ;;  %v3715_v34 = vpop.f32.mrb[25].mxu0  ;;  %v3100_v58 = vld [vmem:[%s4603_s20 + $0x8] sm:$0xff] }
0x1365   : > { %v3786_v60 = vpack.c.bf16 %v3100_v58, %v3099_v57 }
0x13c4   : > { %v2902_v35 = vpop.xlane.xlu1 %2901 }
0x13c5   : > { %3882 = vrcp.f32 %v2902_v35 }
0x13cf   : > { %v3883_v36 = vpop.eup %3882 }
0x13d0   : > { %v2904_v37 = vmul.f32 %v3883_v36, %v3881_v31 }
0x13d2   : > { %3724 = vmatmul.mubr.msk.f32.vlgmr.msra.gmra.mrb[26].mxu0 %vm916_vm2, %v2904_v37  ;;  %v3055_v38 = vadd.f32 %v2904_v37, %v2813_v18  ;;  %v3106_v18 = vld [vmem:[%s4603_s20 + $0x38] sm:$0xff] }
0x13d3   : > { %3739 = vmatprep.mubr.msk.f32.mxu0 %vm3953_vm0, %v3954_v6 }
0x13d4   : > { %v3063_v39 = vmul.f32 0.25, %v3055_v38 }
0x13d6   : > { %3299 = vst.msk [vmem:[%s799_s0] sm:$0xff] %vm916_vm2, %v3063_v39 }
0x14a5   : > { %v2977_v40 = vpop.f32.mrb[26].mxu0 }
0x14a6   : > { %v3725_v41 = vpop.f32.mrb[27].mxu0  ;;  %3729 = vmatmul.mubr.msk.f32.vlgmr.msra.gmra.mrb[24].mxu1 %vm916_vm2, %v2977_v40 }
0x14a7   : > { %3758 = vmatprep.mubr.msk.f32.mxu1 %vm3953_vm0, %v3954_v6  ;;  %v3094_v6 = vld [vmem:[%s4601_s18] sm:$0xff]  ;;  %3787 = vmatpush3.bf16.msra.mxu1 %v3786_v60 }
0x14a8   : > { %v3780_v54 = vpack.c.bf16 %v3095_v53, %v3094_v6  ;;  %3788 = vmatprep.subr.bf16.mxu1 %v3952_v3 }
0x14aa   : > { %3781 = vmatpush3.bf16.msra.mxu0 %v3780_v54 }
0x14ab   : > { %3782 = vmatprep.subr.bf16.mxu0 %v3952_v3  ;;  %3790 = vmatpush3.bf16.msra.mxu1 %v3789_v62 }
0x14ac   : > { %3791 = vmatprep.subr.bf16.mxu1 %v3952_v3 }
0x14af   : > { %3793 = vmatpush3.bf16.msra.mxu1 %v3792_v1 }
0x14b0   : > { %3794 = vmatprep.subr.bf16.mxu1 %v3952_v3  ;;  %v3105_v3 = vld [vmem:[%s4603_s20 + $0x30] sm:$0xff] }
0x14b1   : > { %v3795_v19 = vpack.c.bf16 %v3106_v18, %v3105_v3 }
0x14b3   : > { %3796 = vmatpush3.bf16.msra.mxu1 %v3795_v19 }
0x1579   : > { %v3050_v43 = vpop.f32.mrb[24].mxu1 }
0x157a   : > { %v3054_v44 = vadd.f32 %v3050_v43, %v2812_v33  ;;  %v3730_v45 = vpop.f32.mrb[25].mxu1 }
0x157c   : > { %v3062_v46 = vadd.f32 %v3488_v42, %v3054_v44 }
0x157e   : > { %v3064_v47 = vadd.f32 %v3062_v46, %v4338_v5  ;;  %v3096_v5 = vld [vmem:[%s4601_s18 + $0x10] sm:$0xff] }
0x157f   : > { %v3783_v56 = vpack.c.bf16 %v3097_v55, %v3096_v5 }
0x1580   : > { %v3067_v48 = vsel %vm834_vm1, %v3064_v47, 0.0 }
0x1581   : > { %3068 = vadd.xlane.f32.xlu1 %v3067_v48  ;;  %3784 = vmatpush3.bf16.msra.mxu0 %v3783_v56 }
0x160e   : > { %v3069_v49 = vpop.xlane.xlu1 %3068 }
0x160f   : > { %v3070_v8 = vmul.f32 0.03125, %v3069_v49 }
0x1611   : > { %v3071_v50 = vsub.f32 %v3064_v47, %v3070_v8 }
0x1613   : > { %v3072_v51 = vmul.f32 %v3071_v50, %v3071_v50 }
0x1615   : > { %v3073_v52 = vsel %vm834_vm1, %v3072_v51, 0.0 }
0x1616   : > { %3074 = vadd.xlane.f32.xlu1 %v3073_v52 }
0x16a3   : > { %v3075_v2 = vpop.xlane.xlu1 %3074 }
0x16a4   : > { %v3076_v4 = vmul.f32 0.03125, %v3075_v2 }
0x16a6   : > { %v3077_v7 = vadd.f32 1e-05, %v3076_v4 }
0x16a8   : > { %3884 = vrsqrt.f32 %v3077_v7 }
0x16b2   : > { %v3885_v9 = vpop.eup %3884 }
0x16b3   : > { %v3079_v13 = vmul.f32 %v3885_v9, %v3071_v50 }
0x16b5   : > { %v3086_v16 = vmul.f32 %v3489_v12, %v3079_v13 }
0x16b7   : > { %v3093_v15 = vadd.f32 %v3490_v14, %v3086_v16 }
0x16b9   : > { %3740 = vmatmul.mubr.msk.f32.vlgmr.msra.gmra.mrb[28].mxu0 %vm834_vm1, %v3093_v15 }
0x178c   : > { %v3183_v22 = vpop.f32.mrb[28].mxu0 }
0x178d   : > { %v3184_v23 = vadd.f32 %v3491_v20, %v3183_v22  ;;  %v3741_v24 = vpop.f32.mrb[29].mxu0 }
0x178f   : > { %v3187_v25 = vmax.f32 %v3184_v23, 0.0 }
0x1791   : > { %3759 = vmatmul.mubr.msk.f32.vlgmr.msra.gmra.mrb[26].mxu1 %vm3194_vm3, %v3187_v25 }
0x1864   : > { %v3264_v27 = vpop.f32.mrb[26].mxu1 }
0x1865   : > { %v3265_v28 = vadd.f32 %v3493_v26, %v3264_v27  ;;  %v3760_v17 = vpop.f32.mrb[27].mxu1 }
0x1867   : > { %v3268_v11 = vadd.f32 %v3265_v28, %v3093_v15 }
0x1869   : > { %v3271_v29 = vsel %vm834_vm1, %v3268_v11, 0.0 }
0x186a   : > { %3272 = vadd.xlane.f32.xlu1 %v3271_v29 }
0x18f7   : > { %v3273_v30 = vpop.xlane.xlu1 %3272 }
0x18f8   : > { %v3274_v31 = vmul.f32 0.03125, %v3273_v30 }
0x18fa   : > { %v3275_v32 = vsub.f32 %v3268_v11, %v3274_v31 }
0x18fc   : > { %v3276_v21 = vmul.f32 %v3275_v32, %v3275_v32 }
0x18fe   : > { %v3277_v10 = vsel %vm834_vm1, %v3276_v21, 0.0 }
0x18ff   : > { %3278 = vadd.xlane.f32.xlu1 %v3277_v10 }
0x1900   : > { %3901 = shalt.err (!%p3898_p3)
}
0x1901   : > { %s3902_s7 = scalar_lea.hbm %s4534_s29, 128  ;;  %s3906_s0 = scalar_lea.hbm %s4608_s25, 256 }
0x1902   : > { %p3903_p4 = scmp.ne.s32.totalorder %s4534_s29, %s3902_s7  ;;  %p3907_p9 = scmp.lt.u32.totalorder %s4534_s29, %s4608_s25 }
0x1903   : > { %p3908_p10 = scmp.lt.u32.totalorder %s3906_s0, %s3902_s7  ;;  %p3910_p12 = scmp.lt.u32.totalorder %s3902_s7, %s4534_s29 }
0x1904   : > { %p3904_p7 = pnand %p3903_p4, %p4135_p5 }
0x1905   : > { %p3909_p11 = por %p3908_p10, %p3907_p9 }
0x1906   : > { %p3905_p8 = pneg %p3904_p7 }
0x1907   : > { %p3911_p13 = por %p3910_p12, %p3909_p11 }
0x1909   : > { %p3912_p0 = pnand %p3911_p13, %p3905_p8 }
0x190b   : > { %3915 = shalt.err (!%p3912_p0)
}
0x190c   : > { %3797 = dma.vmem_to_hbm [thread:$0]  (%p4135_p5), %s3322_s26, 128, %s4534_s29, %s3305_s30   ;;  %v3495_v37 = vld [vmem:[%s4605_s22] ss:$0 sm:$0xff] }
0x190d   : > { %s4666_s3 = sld [smem:[#allocation21_spill]]  ;;  %s4667_s27 = sld [smem:[#allocation22_spill]] }
0x1913   : > { %v3496_v39 = vld [vmem:[%s4666_s3] ss:$0 sm:$0xff]  ;;  %s818_s1 = scalar_lea.vmem %s4667_s27, %s4169_s6 }
0x198c   : > { %v3279_v33 = vpop.xlane.xlu1 %3278 }
0x198d   : > { %v3280_v34 = vmul.f32 0.03125, %v3279_v33 }
0x198f   : > { %v3281_v35 = vadd.f32 1e-05, %v3280_v34 }
0x1991   : > { %3886 = vrsqrt.f32 %v3281_v35 }
0x199b   : > { %v3887_v36 = vpop.eup %3886 }
0x199c   : > { %v3283_v38 = vmul.f32 %v3887_v36, %v3275_v32 }
0x199e   : > { %v3290_v40 = vmul.f32 %v3495_v37, %v3283_v38 }
0x19a0   : > { %v3297_v41 = vadd.f32 %v3496_v39, %v3290_v40 }
0x19a2   : > { %3298 = vst.msk [vmem:[%s818_s1] sm:$0xff] %vm834_vm1, %v3297_v41 }
0x19a3 PF: > { %s4668_s26 = sld [smem:[#allocation7_spill]]  ;;  %s4669_s29 = sld [smem:[#allocation5_spill]] }
0x19a9   : > { %p3803_p5 = scmp.ge.s32.totalorder %s4668_s26, 2  ;;  %s3340_s0 = sand.u32 1, %s4669_s29  }
0x19aa   : > { %s3341_s28 = scalar_lea.sflag [#allocation3], %s3340_s0 }
0x19ab   : > { %p3800_p1 = pnand %p3803_p5, %p4139_p6 }
0x19ad   : > { %3933 = dma.done.wait (!%p3800_p1), %s3341_s28, 128  }
0x19ae   : > { %3935 = vsyncadd (!%p3800_p1), %s3341_s28, 4294967168  ;;  %s4671_s30 = sld [smem:[#allocation8_spill]]  ;;  %s4672_s23 = sld [smem:[#allocation6_spill]] }
0x19af   : > { %s4673_s6 = sld [smem:[#allocation9_spill]]  ;;  %s4674_s29 = smov %s3942_s2 }
0x19b4   : > { %p36_p2 = scmp.ge.s32.totalorder %s4671_s30, 4   ;;  %s4675_s2 = smov %s4672_s23 }
0x19b6   :  { %38 = sbr.rel (!%p36_p2) target bundleno = 16 (0x10), region = 172 }
0x19bd   :  { %3346 = vsyncpa [#allocation3], 1 }
0x19be   :  { %3348 = vsyncpa [#allocation3 + $0x1], 1 }

// kernel: transformer_forward.25
= control target key start
LH: loop header
LB: loop body
LE: loop exit
PB: predicated region body
PF: predicated region fallthrough
CT: control target
= control target key end

     0   :  { %vm22_vm0 = vcmask 261120   ;;  %s361_s0 = inlined_call_operand.vmem [shape: f32[16,32], index: 0, kind: input, shape index: {}]   ;;  %s362_s1 = inlined_call_operand.vmem [shape: f32[64,32], index: 1, kind: input, shape index: {}]   ;;  %s363_s2 = inlined_call_operand.hbm [shape: f32[16,64], index: 2, kind: output, shape index: {}]  }
   0x1   :  { %v14_v0 = vld [vmem:[%s362_s1] sm:$0xff]  ;;  %v15_v1 = vld [vmem:[%s362_s1 + $0x8] sm:$0xff]  ;;  %v16_v2 = vld [vmem:[%s362_s1 + $0x10] sm:$0xff] }
   0x2   :  { %v212_v3 = vpack.c.bf16 %v15_v1, %v14_v0  ;;  %vm300_vm1 = vmpackc.low %vm22_vm0, %vm22_vm0  ;;  %v17_v5 = vld [vmem:[%s362_s1 + $0x18] sm:$0xff]  ;;  %v12_v7 = vld [vmem:[%s361_s0] sm:$0xff] }
   0x3   :  { %v218_v6 = vpack.c.bf16 %v17_v5, %v16_v2 }
   0x4   :  { %214 = vmatprep.subr.msk.bf16.mxu0 %vm300_vm1, %v212_v3 }
   0x5   :  { %7 = vsyncpa [#allocation3], 0  ;;  %217 = vmatpush3.bf16.xpose.msk.msra.mxu0 %vm300_vm1, %v212_v3  ;;  %209 = vmatprep.mubr.msk.f32.mxu0 %vm22_vm0, %v12_v7  ;;  %v18_v8 = vld [vmem:[%s362_s1 + $0x20] sm:$0xff]  ;;  %v19_v9 = vld [vmem:[%s362_s1 + $0x28] sm:$0xff]  ;;  %vm128_vm2 = vcmask 523264  }
   0x6   :  { %220 = vmatprep.subr.msk.bf16.mxu0 %vm300_vm1, %v218_v6  ;;  %v224_v10 = vpack.c.bf16 %v19_v9, %v18_v8  ;;  %v20_v11 = vld [vmem:[%s362_s1 + $0x30] sm:$0xff]  ;;  %v21_v12 = vld [vmem:[%s362_s1 + $0x38] sm:$0xff]  ;;  %v13_v14 = vld [vmem:[%s361_s0 + $0x8] sm:$0xff]  ;;  %s271_s0 = smov [#allocation2]  }
   0x7   :  { %v230_v13 = vpack.c.bf16 %v21_v12, %v20_v11  ;;  %s162_s1 = sshll.u32 %s271_s0, 4  ;;  %s163_s1 = int_to_ptr.vmem [resolvable:$true] %s162_s1 }
   0x8   :  { %s247_s29 = scalar_lea.vmem %s163_s1, 256  ;;  %p252_p1 = scmp.lt.s32.totalorder %s163_s1, %s163_s1 }
   0x9   :  { %p248_p0 = scmp.ne.s32.totalorder %s163_s1, %s247_s29  ;;  %p253_p2 = scmp.lt.s32.totalorder %s247_s29, %s247_s29 }
   0xb   :  { %p254_p3 = por %p253_p2, %p252_p1 }
   0xd   :  { %223 = vmatpush3.bf16.xpose.msk.msra.mxu0 %vm300_vm1, %v218_v6  ;;  %p255_p4 = pnand %p254_p3, %p248_p0 }
   0xe   :  { %226 = vmatprep.subr.msk.bf16.mxu0 %vm300_vm1, %v224_v10 }
  0x15   :  { %229 = vmatpush3.bf16.xpose.msk.msra.mxu0 %vm300_vm1, %v224_v10 }
  0x16   :  { %232 = vmatprep.subr.msk.bf16.mxu0 %vm300_vm1, %v230_v13 }
  0x1d   :  { %235 = vmatpush3.bf16.xpose.msk.msra.mxu0 %vm300_vm1, %v230_v13 }
  0x24   :  { %210 = vmatmul.mubr.msk.f32.vlgmr.msra.gmra.mrb[0].mxu0 %vm22_vm0, %v13_v14 }
  0xf7   :  { %v211_v15 = vpop.f32.mrb[0].mxu0 }
  0xf8   :  { %v119_v16 = vpop.f32.mrb[1].mxu0  ;;  %v132_v18 = vsel %vm128_vm2, %v211_v15, -inf }
  0xf9   :  { %v129_v17 = vsel %vm128_vm2, %v119_v16, -inf }
  0xfa   :  { %130 = vmax.xlane.f32.xlu0 %v129_v17 }
  0xfe   :  { %133 = vmax.xlane.f32.xlu0 %v132_v18 }
 0x187   :  { %v131_v19 = vpop.xlane.xlu0 %130 }
 0x188   :  { %v135_v20 = vsub.f32 %v119_v16, %v131_v19 }
 0x18a   :  { %v137_v21 = vmul.f32 1.442695, %v135_v20 }
 0x18b   :  { %v134_v22 = vpop.xlane.xlu0 %133 }
 0x18c   :  { %239 = vpow2.f32 %v137_v21  ;;  %v136_v23 = vsub.f32 %v211_v15, %v134_v22 }
 0x18e   :  { %v139_v24 = vmul.f32 1.442695, %v136_v23 }
 0x190   :  { %241 = vpow2.f32 %v139_v24 }
 0x196   :  { %v240_v25 = vpop.eup %239 }
 0x197   :  { %v141_v26 = vsel %vm128_vm2, %v240_v25, 0.0 }
 0x198   :  { %142 = vadd.xlane.f32.xlu1 %v141_v26 }
 0x19a   :  { %v242_v27 = vpop.eup %241 }
 0x19b   :  { %v144_v28 = vsel %vm128_vm2, %v242_v27, 0.0 }
 0x19c   :  { %145 = vadd.xlane.f32.xlu1 %v144_v28 }
 0x225   :  { %v143_v29 = vpop.xlane.xlu1 %142 }
 0x226   :  { %243 = vlog2.f32 %v143_v29 }
 0x229   :  { %v146_v30 = vpop.xlane.xlu1 %145 }
 0x22a   :  { %245 = vlog2.f32 %v146_v30 }
 0x230   :  { %v244_v31 = vpop.eup %243 }
 0x231   :  { %v148_v32 = vmul.f32 0.6931472, %v244_v31 }
 0x233   :  { %v151_v33 = vadd.f32 %v148_v32, %v131_v19 }
 0x234   :  { %v246_v34 = vpop.eup %245 }
 0x235   :  { %v153_v35 = vsub.f32 %v119_v16, %v151_v33  ;;  %v150_v36 = vmul.f32 0.6931472, %v246_v34 }
 0x237   :  { %155 = vst.msk [vmem:[#allocation2] sm:$0xff] %vm128_vm2, %v153_v35  ;;  %v152_v37 = vadd.f32 %v150_v36, %v134_v22 }
 0x239   :  { %v154_v38 = vsub.f32 %v211_v15, %v152_v37 }
 0x23b   :  { %156 = vst.msk [vmem:[#allocation2 + $0x8] sm:$0xff] %vm128_vm2, %v154_v38 }
 0x23c   :  { %258 = shalt.err (!%p255_p4)
}
 0x23d   :  { %s259_s4 = scalar_lea.hbm %s363_s2, 256 }
 0x23e   :  { %p260_p5 = scmp.ne.s32.totalorder %s363_s2, %s259_s4  ;;  %p263_p6 = scmp.lt.u32.totalorder %s259_s4, %s363_s2 }
 0x240   :  { %p265_p7 = pnand %p263_p6, %p260_p5 }
 0x242   :  { %268 = shalt.err (!%p265_p7)
}
 0x243   :  { %s272_s9 = smov 128   ;;  %s273_s10 = smov 8  }
 0x244   :  { %168 = dma.vmem_to_hbm [thread:$0]  %s163_s1, 256, %s363_s2, [#allocation3], %s272_s9, %s272_s9, %s273_s10  }
 0x245   :  { %269 = dma.done.wait [#allocation3], 256  }
 0x246   :  { %270 = vsyncadd [#allocation3], 4294967040 }
 0x247   :  { %172 = vsyncpa [#allocation3], 1 }

</bundles_post_ra>
